<compile_context>
chip_gen: v5e
topology: v5e:2x2
jax: 0.10.0
libtpu: 0.0.40
codegen_flags: <defaults>
</compile_context>

<pallas_src>
import functools

import jax
import jax.numpy as jnp
from jax import lax
from jax.experimental import pallas as pl
from jax.experimental.pallas import tpu as pltpu


# ---------------------------------------------------------------------------
# Kernel
# ---------------------------------------------------------------------------
def decoder_kernel(x_ref,
                   wih0_ref, bg0_ref, bn0_ref,
                   wstep_ref, bg1_ref, bn1_ref,
                   anorm_ref, wfc_ref, bfc_ref,
                   out_ref,
                   gi_scr, y_scr,
                   *, seq_len, batch, fused_hidden):
    """Wavefront-fused 2-layer GRU (all devices at once) + instance-norm + FC."""
    B, S, DH = batch, seq_len, fused_hidden
    f32 = jnp.float32
    bf16 = jnp.bfloat16

    # ---- hoisted layer-0 input projection (+ folded b_ih / b_hh r,z bias) ---
    x = x_ref[...]                                              # (S*B, D*Z)
    gi0 = jnp.dot(x.astype(bf16), wih0_ref[...],
                  preferred_element_type=f32) + bg0_ref[...]    # (S*B, 3*DH)
    # Stage per-timestep slabs so the serial recurrence reads clean
    # leading-index blocks instead of 2-of-8-sublane extracts.
    for t in range(S):
        gi_scr[t] = gi0[t * B:(t + 1) * B, :]

    # ---- loop-invariant values hoisted out of the recurrence ----------------
    wstep = wstep_ref[...]                                      # (2*DH, 9*DH) bf16
    bn0 = jnp.broadcast_to(bn0_ref[...], (B, DH))               # b_hh(n) layer 0
    bn1 = jnp.broadcast_to(bn1_ref[...], (B, DH))               # b_hh(n) layer 1
    bg1 = jnp.broadcast_to(bg1_ref[...], (B, 3 * DH))           # layer-1 gi bias

    h0 = jnp.zeros((B, DH), f32)
    h1 = jnp.zeros((B, DH), f32)

    # ---- wavefront step 0: layer-0 @ t=0 only (h0_{-1}=0 -> gh0 == 0) -------
    gi = gi_scr[0]
    rz = jax.nn.sigmoid(gi[:, :2 * DH])
    r0, z0 = rz[:, :DH], rz[:, DH:]
    n0 = jnp.tanh(gi[:, 2 * DH:] + r0 * bn0)
    h0 = (1.0 - z0) * n0

    # ---- wavefront steps 1..S: ONE fused per-step dot ----------------------
    #   [h0_{s-1} | h1_{s-2}] @ [[whh0, wih1, 0], [0, 0, whh1]]
    #     -> [ gh0 (layer-0 @ t=s) | gi1, gh1 (layer-1 @ t=s-1) ]
    for s in range(1, S + 1):
        hcat = jnp.concatenate([h0, h1], axis=1).astype(bf16)   # (B, 2*DH)
        g = jnp.dot(hcat, wstep, preferred_element_type=f32)    # (B, 9*DH)
        gh0 = g[:, :3 * DH]
        gi1 = g[:, 3 * DH:6 * DH] + bg1
        gh1 = g[:, 6 * DH:]

        if s < S:
            # Both cells this step: one fused sigmoid + one fused tanh.
            gi0_s = gi_scr[s]
            rz = jax.nn.sigmoid(jnp.concatenate(
                [gi0_s[:, :2 * DH] + gh0[:, :2 * DH],
                 gi1[:, :2 * DH] + gh1[:, :2 * DH]], axis=1))   # (B, 4*DH)
            r0, z0 = rz[:, :DH], rz[:, DH:2 * DH]
            r1, z1 = rz[:, 2 * DH:3 * DH], rz[:, 3 * DH:]
            n_cat = jnp.tanh(jnp.concatenate(
                [gi0_s[:, 2 * DH:] + r0 * (gh0[:, 2 * DH:] + bn0),
                 gi1[:, 2 * DH:] + r1 * (gh1[:, 2 * DH:] + bn1)], axis=1))
            n0, n1 = n_cat[:, :DH], n_cat[:, DH:]
            h0_new = (1.0 - z0) * n0 + z0 * h0
        else:
            # Last wavefront step: only layer-1 @ t = S-1 remains.
            rz = jax.nn.sigmoid(gi1[:, :2 * DH] + gh1[:, :2 * DH])
            r1, z1 = rz[:, :DH], rz[:, DH:]
            n1 = jnp.tanh(gi1[:, 2 * DH:] + r1 * (gh1[:, 2 * DH:] + bn1))
            h0_new = h0

        h1 = (1.0 - z1) * n1 + z1 * h1
        h0 = h0_new
        y_scr[(s - 1) * B:s * B, :] = h1        # direct scratch write, no concat

    # ---- InstanceNorm over each device's H block: one fused stats matmul ---
    y = y_scr[...]                                              # (S*B, DH) f32
    stats = jnp.dot(jnp.concatenate([y, y * y], axis=1), anorm_ref[...],
                    preferred_element_type=f32)                 # (S*B, 2*DH)
    mean = stats[:, :DH]
    var = stats[:, DH:] - mean * mean                           # biased variance
    yn = (y - mean) * lax.rsqrt(var + 1e-5)

    # ---- per-device Linear(H -> O) as one block-diagonal matmul ------------
    out_ref[...] = jnp.dot(yn, wfc_ref[...],
                           preferred_element_type=f32) + bfc_ref[...]


# ---------------------------------------------------------------------------
# Host-side packing of per-device parameters into fused, gate-major,
# block-diagonal arrays (done once, outside the kernel).
# ---------------------------------------------------------------------------
def pack_params(params, *, num_devices, z_dim, gru_dim, output_dim):
    D, Z, H, O = num_devices, z_dim, gru_dim, output_dim
    DH = D * H
    (wih0, whh0, bih0, bhh0, wih1, whh1, bih1, bhh1, wfc, bfc) = params
    eye = jnp.eye(D, dtype=jnp.float32)

    def bd_gates(w, in_dim):
        # w: (D, in_dim, 3H) per device, gate order (r, z, n) within device.
        # -> (D*in_dim, 3*D*H), columns gate-major: col = g*D*H + d*H + h.
        w = w.reshape(D, in_dim, 3, H)
        bd = jnp.einsum('digh,de->digeh', w, eye)
        return bd.reshape(D * in_dim, 3 * DH)

    def gm_bias(b):
        # b: (D, 1, 3H) -> (1, 3*D*H) gate-major.
        return b.reshape(D, 3, H).transpose(1, 0, 2).reshape(1, 3 * DH)

    wih0_bd = bd_gates(wih0, Z)
    whh0_bd = bd_gates(whh0, H)
    wih1_bd = bd_gates(wih1, H)
    whh1_bd = bd_gates(whh1, H)

    bih0_g, bhh0_g = gm_bias(bih0), gm_bias(bhh0)
    bih1_g, bhh1_g = gm_bias(bih1), gm_bias(bhh1)

    # Fold b_hh for the r/z gates into the hoisted gi bias; keep b_hh(n) apart.
    bg0 = jnp.concatenate(
        [bih0_g[:, :2 * DH] + bhh0_g[:, :2 * DH], bih0_g[:, 2 * DH:]], axis=1)
    bn0 = bhh0_g[:, 2 * DH:]
    bg1 = jnp.concatenate(
        [bih1_g[:, :2 * DH] + bhh1_g[:, :2 * DH], bih1_g[:, 2 * DH:]], axis=1)
    bn1 = bhh1_g[:, 2 * DH:]

    # Wavefront-fused per-step weight: rows [h0 | h1], cols [gh0 | gi1 | gh1].
    zeros = jnp.zeros((DH, 3 * DH), jnp.float32)
    w_top = jnp.concatenate([whh0_bd, wih1_bd, zeros], axis=1)
    w_bot = jnp.concatenate([zeros, zeros, whh1_bd], axis=1)
    wstep = jnp.concatenate([w_top, w_bot], axis=0)             # (2*DH, 9*DH)

    # Block-diagonal averaging matrix, duplicated for the fused [mean|E[y^2]]
    # statistics matmul.  (1/H = 1/32 is exactly representable.)
    a = jnp.kron(eye, jnp.ones((H, H), jnp.float32) / H)        # (DH, DH)
    a2 = jnp.kron(jnp.eye(2, dtype=jnp.float32), a)             # (2*DH, 2*DH)

    # Block-diagonal FC weights / stacked biases.
    wfc_bd = jnp.einsum('dho,de->dheo', wfc, eye).reshape(DH, D * O)
    bfc_bd = bfc.reshape(1, D * O)

    bf16 = jnp.bfloat16
    # bf16 only where it sits on / feeds the serial recurrence (MXU single-pass,
    # halved weight bytes); norm-stats and FC weights stay f32.
    return (wih0_bd.astype(bf16), bg0, bn0,
            wstep.astype(bf16), bg1, bn1,
            a2, wfc_bd, bfc_bd)


# ---------------------------------------------------------------------------
# Wrapper
# ---------------------------------------------------------------------------
def decoder_forward(x, packed, *, num_devices, gru_dim, output_dim):
    """x: (B, S, D, Z) float32 -> (B, S, D, output_dim) float32."""
    B, S, D, Z = x.shape
    assert D == num_devices
    H, O = gru_dim, output_dim
    DH = D * H

    # Time-major, device folded into the feature axis: row = t*B + b.
    x_tm = jnp.transpose(x, (1, 0, 2, 3)).reshape(S * B, D * Z)

    kern = functools.partial(decoder_kernel, seq_len=S, batch=B,
                             fused_hidden=DH)

    # Everything fits in VMEM; no grid -> whole arrays are VMEM-resident for
    # the single kernel invocation (default whole-array BlockSpecs).
    out = pl.pallas_call(
        kern,
        out_shape=jax.ShapeDtypeStruct((S * B, D * O), jnp.float32),
        scratch_shapes=[
            pltpu.VMEM((S, B, 3 * DH), jnp.float32),   # staged layer-0 gi
            pltpu.VMEM((S * B, DH), jnp.float32),      # stacked layer-1 states
        ],
    )(x_tm, *packed)

    # (S*B, D*O) -> (B, S, D, O); layout undo happens in plain XLA.
    return jnp.transpose(out.reshape(S, B, D, O), (1, 0, 2, 3))


# ---------------------------------------------------------------------------
# Per-device parameter init (PyTorch-style U(-1/sqrt(H), 1/sqrt(H)); weights
# stored pre-transposed (in, 3H)/(in, O), gate order (r, z, n)).
# ---------------------------------------------------------------------------
def init_params(key, *, num_devices, z_dim, gru_dim, output_dim):
    D, Z, H, O = num_devices, z_dim, gru_dim, output_dim
    keys = jax.random.split(key, 10)
    k = 1.0 / jnp.sqrt(jnp.float32(H))

    def u(kk, shape):
        return jax.random.uniform(kk, shape, jnp.float32, -k, k)

    wih0 = u(keys[0], (D, Z, 3 * H))
    whh0 = u(keys[1], (D, H, 3 * H))
    bih0 = u(keys[2], (D, 1, 3 * H))
    bhh0 = u(keys[3], (D, 1, 3 * H))
    wih1 = u(keys[4], (D, H, 3 * H))
    whh1 = u(keys[5], (D, H, 3 * H))
    bih1 = u(keys[6], (D, 1, 3 * H))
    bhh1 = u(keys[7], (D, 1, 3 * H))
    wfc = u(keys[8], (D, H, O))
    bfc = u(keys[9], (D, 1, O))
    return (wih0, whh0, bih0, bhh0, wih1, whh1, bih1, bhh1, wfc, bfc)


# ---------------------------------------------------------------------------
# Pure-JAX reference (per-device, un-fused).  bf16_matmul=True mirrors the
# kernel's precision policy (bf16 operands for the GRU dots, f32 accumulate,
# f32 norm/FC) so structural correctness can be asserted tightly; the f32
# variant documents the residual mixed-precision error.
# ---------------------------------------------------------------------------
def decoder_reference(x, params, *, gru_dim, bf16_matmul=False):
    B, S, D, Z = x.shape
    H = gru_dim
    (wih0, whh0, bih0, bhh0, wih1, whh1, bih1, bhh1, wfc, bfc) = params
    hp = lax.Precision.HIGHEST

    if bf16_matmul:
        def gdot(a, w):
            return jnp.dot(a.astype(jnp.bfloat16), w.astype(jnp.bfloat16),
                           preferred_element_type=jnp.float32)
    else:
        def gdot(a, w):
            return jnp.dot(a, w, precision=hp)

    def cell(xt, h, wih, whh, bih, bhh):
        gi = gdot(xt, wih) + bih
        gh = gdot(h, whh) + bhh
        r = jax.nn.sigmoid(gi[:, :H] + gh[:, :H])
        z = jax.nn.sigmoid(gi[:, H:2 * H] + gh[:, H:2 * H])
        n = jnp.tanh(gi[:, 2 * H:] + r * gh[:, 2 * H:])
        return (1.0 - z) * n + z * h

    outs = []
    for d in range(D):
        h0 = jnp.zeros((B, H), jnp.float32)
        h1 = jnp.zeros((B, H), jnp.float32)
        ys = []
        for t in range(S):
            h0 = cell(x[:, t, d, :], h0, wih0[d], whh0[d], bih0[d], bhh0[d])
            h1 = cell(h0, h1, wih1[d], whh1[d], bih1[d], bhh1[d])
            ys.append(h1)
        y = jnp.stack(ys, axis=1)                       # (B, S, H)
        mean = jnp.mean(y, axis=-1, keepdims=True)
        var = jnp.mean((y - mean) ** 2, axis=-1, keepdims=True)
        yn = (y - mean) * lax.rsqrt(var + 1e-5)
        outs.append(jnp.dot(yn, wfc[d], precision=hp) + bfc[d])
    return jnp.stack(outs, axis=2)                      # (B, S, D, O)


if __name__ == "__main__":
    B, S, D, Z = 2, 8, 4, 16     # batch, seq_len, num_devices, z_dim
    H, O = 32, 16                # gru_dim, output_dim

    key = jax.random.PRNGKey(0)
    kp, kx = jax.random.split(key)
    params = init_params(kp, num_devices=D, z_dim=Z, gru_dim=H, output_dim=O)
    packed = pack_params(params, num_devices=D, z_dim=Z, gru_dim=H,
                         output_dim=O)
    x = jax.random.normal(kx, (B, S, D, Z), jnp.float32)

    out = decoder_forward(x, packed, num_devices=D, gru_dim=H, output_dim=O)
    out = jax.block_until_ready(out)

    assert out.shape == (B, S, D, O), out.shape
    assert bool(jnp.all(jnp.isfinite(out)))

    # 1) Structural correctness: un-fused per-device reference with the SAME
    #    precision policy as the kernel -> must agree tightly.
    ref_mixed = jax.block_until_ready(
        decoder_reference(x, params, gru_dim=H, bf16_matmul=True))
    err_mixed = float(jnp.max(jnp.abs(out - ref_mixed)))
    assert err_mixed < 5e-3, f"mismatch vs mixed-precision reference: {err_mixed}"

    # 2) Precision sanity vs the pure-f32 reference: bf16 MXU operands in the
    #    8-step recurrence, amplified by InstanceNorm where channel variance
    #    is small, so a looser bound applies here by design.
    ref_f32 = jax.block_until_ready(
        decoder_reference(x, params, gru_dim=H, bf16_matmul=False))
    err_f32 = float(jnp.max(jnp.abs(out - ref_f32)))
    assert err_f32 < 7.5e-2, f"mismatch vs f32 reference: {err_f32}"

    print("KERNEL_OK")
</pallas_src>

<mosaic_0001>
module attributes {stable_mosaic.version = 11 : i64} {
  func.func @decoder_kernel(%arg0: memref<16x64xf32, #tpu.memory_space<vmem>>, %arg1: memref<64x384xbf16, #tpu.memory_space<vmem>>, %arg2: memref<1x384xf32, #tpu.memory_space<vmem>>, %arg3: memref<1x128xf32, #tpu.memory_space<vmem>>, %arg4: memref<256x1152xbf16, #tpu.memory_space<vmem>>, %arg5: memref<1x384xf32, #tpu.memory_space<vmem>>, %arg6: memref<1x128xf32, #tpu.memory_space<vmem>>, %arg7: memref<256x256xf32, #tpu.memory_space<vmem>>, %arg8: memref<128x64xf32, #tpu.memory_space<vmem>>, %arg9: memref<1x64xf32, #tpu.memory_space<vmem>>, %arg10: memref<16x64xf32, #tpu.memory_space<vmem>>, %arg11: memref<8x2x384xf32, #tpu.memory_space<vmem>>, %arg12: memref<16x128xf32, #tpu.memory_space<vmem>>) attributes {dimension_semantics = [], scalar_prefetch = 0 : i64, scratch_operands = 2 : i64, tpu.core_type = #tpu.core_type<tc>} {
    %c0 = arith.constant 0 : index
    %c0_0 = arith.constant 0 : index
    %0 = vector.load %arg0[%c0, %c0_0] : memref<16x64xf32, #tpu.memory_space<vmem>>, vector<16x64xf32>
    %1 = arith.truncf %0 : vector<16x64xf32> to vector<16x64xbf16>
    %c0_1 = arith.constant 0 : index
    %c0_2 = arith.constant 0 : index
    %2 = vector.load %arg1[%c0_1, %c0_2] : memref<64x384xbf16, #tpu.memory_space<vmem>>, vector<64x384xbf16>
    %cst = arith.constant dense<0.000000e+00> : vector<16x384xf32>
    %3 = tpu.matmul %1, %2, %cst {dimension_numbers = #tpu.dot_dimension_numbers<[1], [0], [0], [1], [0, 0, 1, 1], [], []>} : vector<16x64xbf16>, vector<64x384xbf16>, vector<16x384xf32> -> vector<16x384xf32>
    %c0_3 = arith.constant 0 : index
    %c0_4 = arith.constant 0 : index
    %4 = vector.load %arg2[%c0_3, %c0_4] : memref<1x384xf32, #tpu.memory_space<vmem>>, vector<1x384xf32>
    %5 = vector.broadcast %4 : vector<1x384xf32> to vector<16x384xf32>
    %6 = arith.addf %3, %5 : vector<16x384xf32>
    %7 = vector.extract_strided_slice %6 {offsets = [0, 0], sizes = [2, 384], strides = [1, 1]} : vector<16x384xf32> to vector<2x384xf32>
    %c0_5 = arith.constant 0 : index
    %c0_6 = arith.constant 0 : index
    %c0_7 = arith.constant 0 : index
    %8 = vector.load %arg11[%c0_5, %c0_6, %c0_7] : memref<8x2x384xf32, #tpu.memory_space<vmem>>, vector<1x2x384xf32>
    %9 = vector.shape_cast %8 : vector<1x2x384xf32> to vector<2x384xf32>
    %10 = vector.shape_cast %7 : vector<2x384xf32> to vector<1x2x384xf32>
    tpu.vector_store %arg11[%c0_5, %c0_6, %c0_7], %10 {strides = array<i32>} : memref<8x2x384xf32, #tpu.memory_space<vmem>>, vector<1x2x384xf32>,
    %11 = vector.extract_strided_slice %6 {offsets = [2, 0], sizes = [2, 384], strides = [1, 1]} : vector<16x384xf32> to vector<2x384xf32>
    %c1 = arith.constant 1 : index
    %c0_8 = arith.constant 0 : index
    %c0_9 = arith.constant 0 : index
    %12 = vector.load %arg11[%c1, %c0_8, %c0_9] : memref<8x2x384xf32, #tpu.memory_space<vmem>>, vector<1x2x384xf32>
    %13 = vector.shape_cast %12 : vector<1x2x384xf32> to vector<2x384xf32>
    %14 = vector.shape_cast %11 : vector<2x384xf32> to vector<1x2x384xf32>
    tpu.vector_store %arg11[%c1, %c0_8, %c0_9], %14 {strides = array<i32>} : memref<8x2x384xf32, #tpu.memory_space<vmem>>, vector<1x2x384xf32>,
    %15 = vector.extract_strided_slice %6 {offsets = [4, 0], sizes = [2, 384], strides = [1, 1]} : vector<16x384xf32> to vector<2x384xf32>
    %c2 = arith.constant 2 : index
    %c0_10 = arith.constant 0 : index
    %c0_11 = arith.constant 0 : index
    %16 = vector.load %arg11[%c2, %c0_10, %c0_11] : memref<8x2x384xf32, #tpu.memory_space<vmem>>, vector<1x2x384xf32>
    %17 = vector.shape_cast %16 : vector<1x2x384xf32> to vector<2x384xf32>
    %18 = vector.shape_cast %15 : vector<2x384xf32> to vector<1x2x384xf32>
    tpu.vector_store %arg11[%c2, %c0_10, %c0_11], %18 {strides = array<i32>} : memref<8x2x384xf32, #tpu.memory_space<vmem>>, vector<1x2x384xf32>,
    %19 = vector.extract_strided_slice %6 {offsets = [6, 0], sizes = [2, 384], strides = [1, 1]} : vector<16x384xf32> to vector<2x384xf32>
    %c3 = arith.constant 3 : index
    %c0_12 = arith.constant 0 : index
    %c0_13 = arith.constant 0 : index
    %20 = vector.load %arg11[%c3, %c0_12, %c0_13] : memref<8x2x384xf32, #tpu.memory_space<vmem>>, vector<1x2x384xf32>
    %21 = vector.shape_cast %20 : vector<1x2x384xf32> to vector<2x384xf32>
    %22 = vector.shape_cast %19 : vector<2x384xf32> to vector<1x2x384xf32>
    tpu.vector_store %arg11[%c3, %c0_12, %c0_13], %22 {strides = array<i32>} : memref<8x2x384xf32, #tpu.memory_space<vmem>>, vector<1x2x384xf32>,
    %23 = vector.extract_strided_slice %6 {offsets = [8, 0], sizes = [2, 384], strides = [1, 1]} : vector<16x384xf32> to vector<2x384xf32>
    %c4 = arith.constant 4 : index
    %c0_14 = arith.constant 0 : index
    %c0_15 = arith.constant 0 : index
    %24 = vector.load %arg11[%c4, %c0_14, %c0_15] : memref<8x2x384xf32, #tpu.memory_space<vmem>>, vector<1x2x384xf32>
    %25 = vector.shape_cast %24 : vector<1x2x384xf32> to vector<2x384xf32>
    %26 = vector.shape_cast %23 : vector<2x384xf32> to vector<1x2x384xf32>
    tpu.vector_store %arg11[%c4, %c0_14, %c0_15], %26 {strides = array<i32>} : memref<8x2x384xf32, #tpu.memory_space<vmem>>, vector<1x2x384xf32>,
    %27 = vector.extract_strided_slice %6 {offsets = [10, 0], sizes = [2, 384], strides = [1, 1]} : vector<16x384xf32> to vector<2x384xf32>
    %c5 = arith.constant 5 : index
    %c0_16 = arith.constant 0 : index
    %c0_17 = arith.constant 0 : index
    %28 = vector.load %arg11[%c5, %c0_16, %c0_17] : memref<8x2x384xf32, #tpu.memory_space<vmem>>, vector<1x2x384xf32>
    %29 = vector.shape_cast %28 : vector<1x2x384xf32> to vector<2x384xf32>
    %30 = vector.shape_cast %27 : vector<2x384xf32> to vector<1x2x384xf32>
    tpu.vector_store %arg11[%c5, %c0_16, %c0_17], %30 {strides = array<i32>} : memref<8x2x384xf32, #tpu.memory_space<vmem>>, vector<1x2x384xf32>,
    %31 = vector.extract_strided_slice %6 {offsets = [12, 0], sizes = [2, 384], strides = [1, 1]} : vector<16x384xf32> to vector<2x384xf32>
    %c6 = arith.constant 6 : index
    %c0_18 = arith.constant 0 : index
    %c0_19 = arith.constant 0 : index
    %32 = vector.load %arg11[%c6, %c0_18, %c0_19] : memref<8x2x384xf32, #tpu.memory_space<vmem>>, vector<1x2x384xf32>
    %33 = vector.shape_cast %32 : vector<1x2x384xf32> to vector<2x384xf32>
    %34 = vector.shape_cast %31 : vector<2x384xf32> to vector<1x2x384xf32>
    tpu.vector_store %arg11[%c6, %c0_18, %c0_19], %34 {strides = array<i32>} : memref<8x2x384xf32, #tpu.memory_space<vmem>>, vector<1x2x384xf32>,
    %35 = vector.extract_strided_slice %6 {offsets = [14, 0], sizes = [2, 384], strides = [1, 1]} : vector<16x384xf32> to vector<2x384xf32>
    %c7 = arith.constant 7 : index
    %c0_20 = arith.constant 0 : index
    %c0_21 = arith.constant 0 : index
    %36 = vector.load %arg11[%c7, %c0_20, %c0_21] : memref<8x2x384xf32, #tpu.memory_space<vmem>>, vector<1x2x384xf32>
    %37 = vector.shape_cast %36 : vector<1x2x384xf32> to vector<2x384xf32>
    %38 = vector.shape_cast %35 : vector<2x384xf32> to vector<1x2x384xf32>
    tpu.vector_store %arg11[%c7, %c0_20, %c0_21], %38 {strides = array<i32>} : memref<8x2x384xf32, #tpu.memory_space<vmem>>, vector<1x2x384xf32>,
    %c0_22 = arith.constant 0 : index
    %c0_23 = arith.constant 0 : index
    %39 = vector.load %arg4[%c0_22, %c0_23] : memref<256x1152xbf16, #tpu.memory_space<vmem>>, vector<256x1152xbf16>
    %c0_24 = arith.constant 0 : index
    %c0_25 = arith.constant 0 : index
    %40 = vector.load %arg3[%c0_24, %c0_25] : memref<1x128xf32, #tpu.memory_space<vmem>>, vector<1x128xf32>
    %41 = vector.shape_cast %40 : vector<1x128xf32> to vector<1x128xf32>
    %42 = vector.broadcast %41 : vector<1x128xf32> to vector<2x128xf32>
    %c0_26 = arith.constant 0 : index
    %c0_27 = arith.constant 0 : index
    %43 = vector.load %arg6[%c0_26, %c0_27] : memref<1x128xf32, #tpu.memory_space<vmem>>, vector<1x128xf32>
    %44 = vector.shape_cast %43 : vector<1x128xf32> to vector<1x128xf32>
    %45 = vector.broadcast %44 : vector<1x128xf32> to vector<2x128xf32>
    %c0_28 = arith.constant 0 : index
    %c0_29 = arith.constant 0 : index
    %46 = vector.load %arg5[%c0_28, %c0_29] : memref<1x384xf32, #tpu.memory_space<vmem>>, vector<1x384xf32>
    %47 = vector.shape_cast %46 : vector<1x384xf32> to vector<1x384xf32>
    %48 = vector.broadcast %47 : vector<1x384xf32> to vector<2x384xf32>
    %cst_30 = arith.constant 0.000000e+00 : f32
    %49 = vector.broadcast %cst_30 : f32 to vector<2x128xf32>
    %c0_31 = arith.constant 0 : index
    %c0_32 = arith.constant 0 : index
    %c0_33 = arith.constant 0 : index
    %50 = vector.load %arg11[%c0_31, %c0_32, %c0_33] : memref<8x2x384xf32, #tpu.memory_space<vmem>>, vector<1x2x384xf32>
    %51 = vector.shape_cast %50 : vector<1x2x384xf32> to vector<2x384xf32>
    %52 = vector.extract_strided_slice %51 {offsets = [0, 0], sizes = [2, 256], strides = [1, 1]} : vector<2x384xf32> to vector<2x256xf32>
    %53 = arith.negf %52 : vector<2x256xf32>
    %54 = math.exp %53 : vector<2x256xf32>
    %cst_34 = arith.constant 1.000000e+00 : f32
    %55 = vector.broadcast %cst_34 : f32 to vector<2x256xf32>
    %56 = arith.addf %55, %54 : vector<2x256xf32>
    %57 = arith.divf %55, %56 : vector<2x256xf32>
    %58 = vector.extract_strided_slice %57 {offsets = [0, 0], sizes = [2, 128], strides = [1, 1]} : vector<2x256xf32> to vector<2x128xf32>
    %59 = vector.extract_strided_slice %57 {offsets = [0, 128], sizes = [2, 128], strides = [1, 1]} : vector<2x256xf32> to vector<2x128xf32>
    %60 = vector.extract_strided_slice %51 {offsets = [0, 256], sizes = [2, 128], strides = [1, 1]} : vector<2x384xf32> to vector<2x128xf32>
    %61 = arith.mulf %58, %42 : vector<2x128xf32>
    %62 = arith.addf %60, %61 : vector<2x128xf32>
    %63 = math.tanh %62 : vector<2x128xf32>
    %cst_35 = arith.constant 1.000000e+00 : f32
    %64 = vector.broadcast %cst_35 : f32 to vector<2x128xf32>
    %65 = arith.subf %64, %59 : vector<2x128xf32>
    %66 = arith.mulf %65, %63 : vector<2x128xf32>
    %67 = tpu.concatenate %66, %49 in 1 : vector<2x128xf32>, vector<2x128xf32> -> vector<2x256xf32>
    %68 = arith.truncf %67 : vector<2x256xf32> to vector<2x256xbf16>
    %cst_36 = arith.constant dense<0.000000e+00> : vector<2x1152xf32>
    %69 = tpu.matmul %68, %39, %cst_36 {dimension_numbers = #tpu.dot_dimension_numbers<[1], [0], [0], [1], [0, 0, 1, 1], [], []>} : vector<2x256xbf16>, vector<256x1152xbf16>, vector<2x1152xf32> -> vector<2x1152xf32>
    %70 = vector.extract_strided_slice %69 {offsets = [0, 0], sizes = [2, 384], strides = [1, 1]} : vector<2x1152xf32> to vector<2x384xf32>
    %71 = vector.extract_strided_slice %69 {offsets = [0, 384], sizes = [2, 384], strides = [1, 1]} : vector<2x1152xf32> to vector<2x384xf32>
    %72 = arith.addf %71, %48 : vector<2x384xf32>
    %73 = vector.extract_strided_slice %69 {offsets = [0, 768], sizes = [2, 384], strides = [1, 1]} : vector<2x1152xf32> to vector<2x384xf32>
    %c1_37 = arith.constant 1 : index
    %c0_38 = arith.constant 0 : index
    %c0_39 = arith.constant 0 : index
    %74 = vector.load %arg11[%c1_37, %c0_38, %c0_39] : memref<8x2x384xf32, #tpu.memory_space<vmem>>, vector<1x2x384xf32>
    %75 = vector.shape_cast %74 : vector<1x2x384xf32> to vector<2x384xf32>
    %76 = vector.extract_strided_slice %75 {offsets = [0, 0], sizes = [2, 256], strides = [1, 1]} : vector<2x384xf32> to vector<2x256xf32>
    %77 = vector.extract_strided_slice %70 {offsets = [0, 0], sizes = [2, 256], strides = [1, 1]} : vector<2x384xf32> to vector<2x256xf32>
    %78 = arith.addf %76, %77 : vector<2x256xf32>
    %79 = vector.extract_strided_slice %72 {offsets = [0, 0], sizes = [2, 256], strides = [1, 1]} : vector<2x384xf32> to vector<2x256xf32>
    %80 = vector.extract_strided_slice %73 {offsets = [0, 0], sizes = [2, 256], strides = [1, 1]} : vector<2x384xf32> to vector<2x256xf32>
    %81 = arith.addf %79, %80 : vector<2x256xf32>
    %82 = tpu.concatenate %78, %81 in 1 : vector<2x256xf32>, vector<2x256xf32> -> vector<2x512xf32>
    %83 = arith.negf %82 : vector<2x512xf32>
    %84 = math.exp %83 : vector<2x512xf32>
    %cst_40 = arith.constant 1.000000e+00 : f32
    %85 = vector.broadcast %cst_40 : f32 to vector<2x512xf32>
    %86 = arith.addf %85, %84 : vector<2x512xf32>
    %87 = arith.divf %85, %86 : vector<2x512xf32>
    %88 = vector.extract_strided_slice %87 {offsets = [0, 0], sizes = [2, 128], strides = [1, 1]} : vector<2x512xf32> to vector<2x128xf32>
    %89 = vector.extract_strided_slice %87 {offsets = [0, 128], sizes = [2, 128], strides = [1, 1]} : vector<2x512xf32> to vector<2x128xf32>
    %90 = vector.extract_strided_slice %87 {offsets = [0, 256], sizes = [2, 128], strides = [1, 1]} : vector<2x512xf32> to vector<2x128xf32>
    %91 = vector.extract_strided_slice %87 {offsets = [0, 384], sizes = [2, 128], strides = [1, 1]} : vector<2x512xf32> to vector<2x128xf32>
    %92 = vector.extract_strided_slice %75 {offsets = [0, 256], sizes = [2, 128], strides = [1, 1]} : vector<2x384xf32> to vector<2x128xf32>
    %93 = vector.extract_strided_slice %70 {offsets = [0, 256], sizes = [2, 128], strides = [1, 1]} : vector<2x384xf32> to vector<2x128xf32>
    %94 = arith.addf %93, %42 : vector<2x128xf32>
    %95 = arith.mulf %88, %94 : vector<2x128xf32>
    %96 = arith.addf %92, %95 : vector<2x128xf32>
    %97 = vector.extract_strided_slice %72 {offsets = [0, 256], sizes = [2, 128], strides = [1, 1]} : vector<2x384xf32> to vector<2x128xf32>
    %98 = vector.extract_strided_slice %73 {offsets = [0, 256], sizes = [2, 128], strides = [1, 1]} : vector<2x384xf32> to vector<2x128xf32>
    %99 = arith.addf %98, %45 : vector<2x128xf32>
    %100 = arith.mulf %90, %99 : vector<2x128xf32>
    %101 = arith.addf %97, %100 : vector<2x128xf32>
    %102 = tpu.concatenate %96, %101 in 1 : vector<2x128xf32>, vector<2x128xf32> -> vector<2x256xf32>
    %103 = math.tanh %102 : vector<2x256xf32>
    %104 = vector.extract_strided_slice %103 {offsets = [0, 0], sizes = [2, 128], strides = [1, 1]} : vector<2x256xf32> to vector<2x128xf32>
    %105 = vector.extract_strided_slice %103 {offsets = [0, 128], sizes = [2, 128], strides = [1, 1]} : vector<2x256xf32> to vector<2x128xf32>
    %cst_41 = arith.constant 1.000000e+00 : f32
    %106 = vector.broadcast %cst_41 : f32 to vector<2x128xf32>
    %107 = arith.subf %106, %89 : vector<2x128xf32>
    %108 = arith.mulf %107, %104 : vector<2x128xf32>
    %109 = arith.mulf %89, %66 : vector<2x128xf32>
    %110 = arith.addf %108, %109 : vector<2x128xf32>
    %cst_42 = arith.constant 1.000000e+00 : f32
    %111 = vector.broadcast %cst_42 : f32 to vector<2x128xf32>
    %112 = arith.subf %111, %91 : vector<2x128xf32>
    %113 = arith.mulf %112, %105 : vector<2x128xf32>
    %114 = arith.mulf %91, %49 : vector<2x128xf32>
    %115 = arith.addf %113, %114 : vector<2x128xf32>
    %c0_43 = arith.constant 0 : index
    %c0_44 = arith.constant 0 : index
    %116 = vector.load %arg12[%c0_43, %c0_44] : memref<16x128xf32, #tpu.memory_space<vmem>>, vector<2x128xf32>
    tpu.vector_store %arg12[%c0_43, %c0_44], %115 {strides = array<i32>} : memref<16x128xf32, #tpu.memory_space<vmem>>, vector<2x128xf32>,
    %117 = tpu.concatenate %110, %115 in 1 : vector<2x128xf32>, vector<2x128xf32> -> vector<2x256xf32>
    %118 = arith.truncf %117 : vector<2x256xf32> to vector<2x256xbf16>
    %cst_45 = arith.constant dense<0.000000e+00> : vector<2x1152xf32>
    %119 = tpu.matmul %118, %39, %cst_45 {dimension_numbers = #tpu.dot_dimension_numbers<[1], [0], [0], [1], [0, 0, 1, 1], [], []>} : vector<2x256xbf16>, vector<256x1152xbf16>, vector<2x1152xf32> -> vector<2x1152xf32>
    %120 = vector.extract_strided_slice %119 {offsets = [0, 0], sizes = [2, 384], strides = [1, 1]} : vector<2x1152xf32> to vector<2x384xf32>
    %121 = vector.extract_strided_slice %119 {offsets = [0, 384], sizes = [2, 384], strides = [1, 1]} : vector<2x1152xf32> to vector<2x384xf32>
    %122 = arith.addf %121, %48 : vector<2x384xf32>
    %123 = vector.extract_strided_slice %119 {offsets = [0, 768], sizes = [2, 384], strides = [1, 1]} : vector<2x1152xf32> to vector<2x384xf32>
    %c2_46 = arith.constant 2 : index
    %c0_47 = arith.constant 0 : index
    %c0_48 = arith.constant 0 : index
    %124 = vector.load %arg11[%c2_46, %c0_47, %c0_48] : memref<8x2x384xf32, #tpu.memory_space<vmem>>, vector<1x2x384xf32>
    %125 = vector.shape_cast %124 : vector<1x2x384xf32> to vector<2x384xf32>
    %126 = vector.extract_strided_slice %125 {offsets = [0, 0], sizes = [2, 256], strides = [1, 1]} : vector<2x384xf32> to vector<2x256xf32>
    %127 = vector.extract_strided_slice %120 {offsets = [0, 0], sizes = [2, 256], strides = [1, 1]} : vector<2x384xf32> to vector<2x256xf32>
    %128 = arith.addf %126, %127 : vector<2x256xf32>
    %129 = vector.extract_strided_slice %122 {offsets = [0, 0], sizes = [2, 256], strides = [1, 1]} : vector<2x384xf32> to vector<2x256xf32>
    %130 = vector.extract_strided_slice %123 {offsets = [0, 0], sizes = [2, 256], strides = [1, 1]} : vector<2x384xf32> to vector<2x256xf32>
    %131 = arith.addf %129, %130 : vector<2x256xf32>
    %132 = tpu.concatenate %128, %131 in 1 : vector<2x256xf32>, vector<2x256xf32> -> vector<2x512xf32>
    %133 = arith.negf %132 : vector<2x512xf32>
    %134 = math.exp %133 : vector<2x512xf32>
    %cst_49 = arith.constant 1.000000e+00 : f32
    %135 = vector.broadcast %cst_49 : f32 to vector<2x512xf32>
    %136 = arith.addf %135, %134 : vector<2x512xf32>
    %137 = arith.divf %135, %136 : vector<2x512xf32>
    %138 = vector.extract_strided_slice %137 {offsets = [0, 0], sizes = [2, 128], strides = [1, 1]} : vector<2x512xf32> to vector<2x128xf32>
    %139 = vector.extract_strided_slice %137 {offsets = [0, 128], sizes = [2, 128], strides = [1, 1]} : vector<2x512xf32> to vector<2x128xf32>
    %140 = vector.extract_strided_slice %137 {offsets = [0, 256], sizes = [2, 128], strides = [1, 1]} : vector<2x512xf32> to vector<2x128xf32>
    %141 = vector.extract_strided_slice %137 {offsets = [0, 384], sizes = [2, 128], strides = [1, 1]} : vector<2x512xf32> to vector<2x128xf32>
    %142 = vector.extract_strided_slice %125 {offsets = [0, 256], sizes = [2, 128], strides = [1, 1]} : vector<2x384xf32> to vector<2x128xf32>
    %143 = vector.extract_strided_slice %120 {offsets = [0, 256], sizes = [2, 128], strides = [1, 1]} : vector<2x384xf32> to vector<2x128xf32>
    %144 = arith.addf %143, %42 : vector<2x128xf32>
    %145 = arith.mulf %138, %144 : vector<2x128xf32>
    %146 = arith.addf %142, %145 : vector<2x128xf32>
    %147 = vector.extract_strided_slice %122 {offsets = [0, 256], sizes = [2, 128], strides = [1, 1]} : vector<2x384xf32> to vector<2x128xf32>
    %148 = vector.extract_strided_slice %123 {offsets = [0, 256], sizes = [2, 128], strides = [1, 1]} : vector<2x384xf32> to vector<2x128xf32>
    %149 = arith.addf %148, %45 : vector<2x128xf32>
    %150 = arith.mulf %140, %149 : vector<2x128xf32>
    %151 = arith.addf %147, %150 : vector<2x128xf32>
    %152 = tpu.concatenate %146, %151 in 1 : vector<2x128xf32>, vector<2x128xf32> -> vector<2x256xf32>
    %153 = math.tanh %152 : vector<2x256xf32>
    %154 = vector.extract_strided_slice %153 {offsets = [0, 0], sizes = [2, 128], strides = [1, 1]} : vector<2x256xf32> to vector<2x128xf32>
    %155 = vector.extract_strided_slice %153 {offsets = [0, 128], sizes = [2, 128], strides = [1, 1]} : vector<2x256xf32> to vector<2x128xf32>
    %cst_50 = arith.constant 1.000000e+00 : f32
    %156 = vector.broadcast %cst_50 : f32 to vector<2x128xf32>
    %157 = arith.subf %156, %139 : vector<2x128xf32>
    %158 = arith.mulf %157, %154 : vector<2x128xf32>
    %159 = arith.mulf %139, %110 : vector<2x128xf32>
    %160 = arith.addf %158, %159 : vector<2x128xf32>
    %cst_51 = arith.constant 1.000000e+00 : f32
    %161 = vector.broadcast %cst_51 : f32 to vector<2x128xf32>
    %162 = arith.subf %161, %141 : vector<2x128xf32>
    %163 = arith.mulf %162, %155 : vector<2x128xf32>
    %164 = arith.mulf %141, %115 : vector<2x128xf32>
    %165 = arith.addf %163, %164 : vector<2x128xf32>
    %c2_52 = arith.constant 2 : index
    %c0_53 = arith.constant 0 : index
    %166 = vector.load %arg12[%c2_52, %c0_53] : memref<16x128xf32, #tpu.memory_space<vmem>>, vector<2x128xf32>
    tpu.vector_store %arg12[%c2_52, %c0_53], %165 {strides = array<i32>} : memref<16x128xf32, #tpu.memory_space<vmem>>, vector<2x128xf32>,
    %167 = tpu.concatenate %160, %165 in 1 : vector<2x128xf32>, vector<2x128xf32> -> vector<2x256xf32>
    %168 = arith.truncf %167 : vector<2x256xf32> to vector<2x256xbf16>
    %cst_54 = arith.constant dense<0.000000e+00> : vector<2x1152xf32>
    %169 = tpu.matmul %168, %39, %cst_54 {dimension_numbers = #tpu.dot_dimension_numbers<[1], [0], [0], [1], [0, 0, 1, 1], [], []>} : vector<2x256xbf16>, vector<256x1152xbf16>, vector<2x1152xf32> -> vector<2x1152xf32>
    %170 = vector.extract_strided_slice %169 {offsets = [0, 0], sizes = [2, 384], strides = [1, 1]} : vector<2x1152xf32> to vector<2x384xf32>
    %171 = vector.extract_strided_slice %169 {offsets = [0, 384], sizes = [2, 384], strides = [1, 1]} : vector<2x1152xf32> to vector<2x384xf32>
    %172 = arith.addf %171, %48 : vector<2x384xf32>
    %173 = vector.extract_strided_slice %169 {offsets = [0, 768], sizes = [2, 384], strides = [1, 1]} : vector<2x1152xf32> to vector<2x384xf32>
    %c3_55 = arith.constant 3 : index
    %c0_56 = arith.constant 0 : index
    %c0_57 = arith.constant 0 : index
    %174 = vector.load %arg11[%c3_55, %c0_56, %c0_57] : memref<8x2x384xf32, #tpu.memory_space<vmem>>, vector<1x2x384xf32>
    %175 = vector.shape_cast %174 : vector<1x2x384xf32> to vector<2x384xf32>
    %176 = vector.extract_strided_slice %175 {offsets = [0, 0], sizes = [2, 256], strides = [1, 1]} : vector<2x384xf32> to vector<2x256xf32>
    %177 = vector.extract_strided_slice %170 {offsets = [0, 0], sizes = [2, 256], strides = [1, 1]} : vector<2x384xf32> to vector<2x256xf32>
    %178 = arith.addf %176, %177 : vector<2x256xf32>
    %179 = vector.extract_strided_slice %172 {offsets = [0, 0], sizes = [2, 256], strides = [1, 1]} : vector<2x384xf32> to vector<2x256xf32>
    %180 = vector.extract_strided_slice %173 {offsets = [0, 0], sizes = [2, 256], strides = [1, 1]} : vector<2x384xf32> to vector<2x256xf32>
    %181 = arith.addf %179, %180 : vector<2x256xf32>
    %182 = tpu.concatenate %178, %181 in 1 : vector<2x256xf32>, vector<2x256xf32> -> vector<2x512xf32>
    %183 = arith.negf %182 : vector<2x512xf32>
    %184 = math.exp %183 : vector<2x512xf32>
    %cst_58 = arith.constant 1.000000e+00 : f32
    %185 = vector.broadcast %cst_58 : f32 to vector<2x512xf32>
    %186 = arith.addf %185, %184 : vector<2x512xf32>
    %187 = arith.divf %185, %186 : vector<2x512xf32>
    %188 = vector.extract_strided_slice %187 {offsets = [0, 0], sizes = [2, 128], strides = [1, 1]} : vector<2x512xf32> to vector<2x128xf32>
    %189 = vector.extract_strided_slice %187 {offsets = [0, 128], sizes = [2, 128], strides = [1, 1]} : vector<2x512xf32> to vector<2x128xf32>
    %190 = vector.extract_strided_slice %187 {offsets = [0, 256], sizes = [2, 128], strides = [1, 1]} : vector<2x512xf32> to vector<2x128xf32>
    %191 = vector.extract_strided_slice %187 {offsets = [0, 384], sizes = [2, 128], strides = [1, 1]} : vector<2x512xf32> to vector<2x128xf32>
    %192 = vector.extract_strided_slice %175 {offsets = [0, 256], sizes = [2, 128], strides = [1, 1]} : vector<2x384xf32> to vector<2x128xf32>
    %193 = vector.extract_strided_slice %170 {offsets = [0, 256], sizes = [2, 128], strides = [1, 1]} : vector<2x384xf32> to vector<2x128xf32>
    %194 = arith.addf %193, %42 : vector<2x128xf32>
    %195 = arith.mulf %188, %194 : vector<2x128xf32>
    %196 = arith.addf %192, %195 : vector<2x128xf32>
    %197 = vector.extract_strided_slice %172 {offsets = [0, 256], sizes = [2, 128], strides = [1, 1]} : vector<2x384xf32> to vector<2x128xf32>
    %198 = vector.extract_strided_slice %173 {offsets = [0, 256], sizes = [2, 128], strides = [1, 1]} : vector<2x384xf32> to vector<2x128xf32>
    %199 = arith.addf %198, %45 : vector<2x128xf32>
    %200 = arith.mulf %190, %199 : vector<2x128xf32>
    %201 = arith.addf %197, %200 : vector<2x128xf32>
    %202 = tpu.concatenate %196, %201 in 1 : vector<2x128xf32>, vector<2x128xf32> -> vector<2x256xf32>
    %203 = math.tanh %202 : vector<2x256xf32>
    %204 = vector.extract_strided_slice %203 {offsets = [0, 0], sizes = [2, 128], strides = [1, 1]} : vector<2x256xf32> to vector<2x128xf32>
    %205 = vector.extract_strided_slice %203 {offsets = [0, 128], sizes = [2, 128], strides = [1, 1]} : vector<2x256xf32> to vector<2x128xf32>
    %cst_59 = arith.constant 1.000000e+00 : f32
    %206 = vector.broadcast %cst_59 : f32 to vector<2x128xf32>
    %207 = arith.subf %206, %189 : vector<2x128xf32>
    %208 = arith.mulf %207, %204 : vector<2x128xf32>
    %209 = arith.mulf %189, %160 : vector<2x128xf32>
    %210 = arith.addf %208, %209 : vector<2x128xf32>
    %cst_60 = arith.constant 1.000000e+00 : f32
    %211 = vector.broadcast %cst_60 : f32 to vector<2x128xf32>
    %212 = arith.subf %211, %191 : vector<2x128xf32>
    %213 = arith.mulf %212, %205 : vector<2x128xf32>
    %214 = arith.mulf %191, %165 : vector<2x128xf32>
    %215 = arith.addf %213, %214 : vector<2x128xf32>
    %c4_61 = arith.constant 4 : index
    %c0_62 = arith.constant 0 : index
    %216 = vector.load %arg12[%c4_61, %c0_62] : memref<16x128xf32, #tpu.memory_space<vmem>>, vector<2x128xf32>
    tpu.vector_store %arg12[%c4_61, %c0_62], %215 {strides = array<i32>} : memref<16x128xf32, #tpu.memory_space<vmem>>, vector<2x128xf32>,
    %217 = tpu.concatenate %210, %215 in 1 : vector<2x128xf32>, vector<2x128xf32> -> vector<2x256xf32>
    %218 = arith.truncf %217 : vector<2x256xf32> to vector<2x256xbf16>
    %cst_63 = arith.constant dense<0.000000e+00> : vector<2x1152xf32>
    %219 = tpu.matmul %218, %39, %cst_63 {dimension_numbers = #tpu.dot_dimension_numbers<[1], [0], [0], [1], [0, 0, 1, 1], [], []>} : vector<2x256xbf16>, vector<256x1152xbf16>, vector<2x1152xf32> -> vector<2x1152xf32>
    %220 = vector.extract_strided_slice %219 {offsets = [0, 0], sizes = [2, 384], strides = [1, 1]} : vector<2x1152xf32> to vector<2x384xf32>
    %221 = vector.extract_strided_slice %219 {offsets = [0, 384], sizes = [2, 384], strides = [1, 1]} : vector<2x1152xf32> to vector<2x384xf32>
    %222 = arith.addf %221, %48 : vector<2x384xf32>
    %223 = vector.extract_strided_slice %219 {offsets = [0, 768], sizes = [2, 384], strides = [1, 1]} : vector<2x1152xf32> to vector<2x384xf32>
    %c4_64 = arith.constant 4 : index
    %c0_65 = arith.constant 0 : index
    %c0_66 = arith.constant 0 : index
    %224 = vector.load %arg11[%c4_64, %c0_65, %c0_66] : memref<8x2x384xf32, #tpu.memory_space<vmem>>, vector<1x2x384xf32>
    %225 = vector.shape_cast %224 : vector<1x2x384xf32> to vector<2x384xf32>
    %226 = vector.extract_strided_slice %225 {offsets = [0, 0], sizes = [2, 256], strides = [1, 1]} : vector<2x384xf32> to vector<2x256xf32>
    %227 = vector.extract_strided_slice %220 {offsets = [0, 0], sizes = [2, 256], strides = [1, 1]} : vector<2x384xf32> to vector<2x256xf32>
    %228 = arith.addf %226, %227 : vector<2x256xf32>
    %229 = vector.extract_strided_slice %222 {offsets = [0, 0], sizes = [2, 256], strides = [1, 1]} : vector<2x384xf32> to vector<2x256xf32>
    %230 = vector.extract_strided_slice %223 {offsets = [0, 0], sizes = [2, 256], strides = [1, 1]} : vector<2x384xf32> to vector<2x256xf32>
    %231 = arith.addf %229, %230 : vector<2x256xf32>
    %232 = tpu.concatenate %228, %231 in 1 : vector<2x256xf32>, vector<2x256xf32> -> vector<2x512xf32>
    %233 = arith.negf %232 : vector<2x512xf32>
    %234 = math.exp %233 : vector<2x512xf32>
    %cst_67 = arith.constant 1.000000e+00 : f32
    %235 = vector.broadcast %cst_67 : f32 to vector<2x512xf32>
    %236 = arith.addf %235, %234 : vector<2x512xf32>
    %237 = arith.divf %235, %236 : vector<2x512xf32>
    %238 = vector.extract_strided_slice %237 {offsets = [0, 0], sizes = [2, 128], strides = [1, 1]} : vector<2x512xf32> to vector<2x128xf32>
    %239 = vector.extract_strided_slice %237 {offsets = [0, 128], sizes = [2, 128], strides = [1, 1]} : vector<2x512xf32> to vector<2x128xf32>
    %240 = vector.extract_strided_slice %237 {offsets = [0, 256], sizes = [2, 128], strides = [1, 1]} : vector<2x512xf32> to vector<2x128xf32>
    %241 = vector.extract_strided_slice %237 {offsets = [0, 384], sizes = [2, 128], strides = [1, 1]} : vector<2x512xf32> to vector<2x128xf32>
    %242 = vector.extract_strided_slice %225 {offsets = [0, 256], sizes = [2, 128], strides = [1, 1]} : vector<2x384xf32> to vector<2x128xf32>
    %243 = vector.extract_strided_slice %220 {offsets = [0, 256], sizes = [2, 128], strides = [1, 1]} : vector<2x384xf32> to vector<2x128xf32>
    %244 = arith.addf %243, %42 : vector<2x128xf32>
    %245 = arith.mulf %238, %244 : vector<2x128xf32>
    %246 = arith.addf %242, %245 : vector<2x128xf32>
    %247 = vector.extract_strided_slice %222 {offsets = [0, 256], sizes = [2, 128], strides = [1, 1]} : vector<2x384xf32> to vector<2x128xf32>
    %248 = vector.extract_strided_slice %223 {offsets = [0, 256], sizes = [2, 128], strides = [1, 1]} : vector<2x384xf32> to vector<2x128xf32>
    %249 = arith.addf %248, %45 : vector<2x128xf32>
    %250 = arith.mulf %240, %249 : vector<2x128xf32>
    %251 = arith.addf %247, %250 : vector<2x128xf32>
    %252 = tpu.concatenate %246, %251 in 1 : vector<2x128xf32>, vector<2x128xf32> -> vector<2x256xf32>
    %253 = math.tanh %252 : vector<2x256xf32>
    %254 = vector.extract_strided_slice %253 {offsets = [0, 0], sizes = [2, 128], strides = [1, 1]} : vector<2x256xf32> to vector<2x128xf32>
    %255 = vector.extract_strided_slice %253 {offsets = [0, 128], sizes = [2, 128], strides = [1, 1]} : vector<2x256xf32> to vector<2x128xf32>
    %cst_68 = arith.constant 1.000000e+00 : f32
    %256 = vector.broadcast %cst_68 : f32 to vector<2x128xf32>
    %257 = arith.subf %256, %239 : vector<2x128xf32>
    %258 = arith.mulf %257, %254 : vector<2x128xf32>
    %259 = arith.mulf %239, %210 : vector<2x128xf32>
    %260 = arith.addf %258, %259 : vector<2x128xf32>
    %cst_69 = arith.constant 1.000000e+00 : f32
    %261 = vector.broadcast %cst_69 : f32 to vector<2x128xf32>
    %262 = arith.subf %261, %241 : vector<2x128xf32>
    %263 = arith.mulf %262, %255 : vector<2x128xf32>
    %264 = arith.mulf %241, %215 : vector<2x128xf32>
    %265 = arith.addf %263, %264 : vector<2x128xf32>
    %c6_70 = arith.constant 6 : index
    %c0_71 = arith.constant 0 : index
    %266 = vector.load %arg12[%c6_70, %c0_71] : memref<16x128xf32, #tpu.memory_space<vmem>>, vector<2x128xf32>
    tpu.vector_store %arg12[%c6_70, %c0_71], %265 {strides = array<i32>} : memref<16x128xf32, #tpu.memory_space<vmem>>, vector<2x128xf32>,
    %267 = tpu.concatenate %260, %265 in 1 : vector<2x128xf32>, vector<2x128xf32> -> vector<2x256xf32>
    %268 = arith.truncf %267 : vector<2x256xf32> to vector<2x256xbf16>
    %cst_72 = arith.constant dense<0.000000e+00> : vector<2x1152xf32>
    %269 = tpu.matmul %268, %39, %cst_72 {dimension_numbers = #tpu.dot_dimension_numbers<[1], [0], [0], [1], [0, 0, 1, 1], [], []>} : vector<2x256xbf16>, vector<256x1152xbf16>, vector<2x1152xf32> -> vector<2x1152xf32>
    %270 = vector.extract_strided_slice %269 {offsets = [0, 0], sizes = [2, 384], strides = [1, 1]} : vector<2x1152xf32> to vector<2x384xf32>
    %271 = vector.extract_strided_slice %269 {offsets = [0, 384], sizes = [2, 384], strides = [1, 1]} : vector<2x1152xf32> to vector<2x384xf32>
    %272 = arith.addf %271, %48 : vector<2x384xf32>
    %273 = vector.extract_strided_slice %269 {offsets = [0, 768], sizes = [2, 384], strides = [1, 1]} : vector<2x1152xf32> to vector<2x384xf32>
    %c5_73 = arith.constant 5 : index
    %c0_74 = arith.constant 0 : index
    %c0_75 = arith.constant 0 : index
    %274 = vector.load %arg11[%c5_73, %c0_74, %c0_75] : memref<8x2x384xf32, #tpu.memory_space<vmem>>, vector<1x2x384xf32>
    %275 = vector.shape_cast %274 : vector<1x2x384xf32> to vector<2x384xf32>
    %276 = vector.extract_strided_slice %275 {offsets = [0, 0], sizes = [2, 256], strides = [1, 1]} : vector<2x384xf32> to vector<2x256xf32>
    %277 = vector.extract_strided_slice %270 {offsets = [0, 0], sizes = [2, 256], strides = [1, 1]} : vector<2x384xf32> to vector<2x256xf32>
    %278 = arith.addf %276, %277 : vector<2x256xf32>
    %279 = vector.extract_strided_slice %272 {offsets = [0, 0], sizes = [2, 256], strides = [1, 1]} : vector<2x384xf32> to vector<2x256xf32>
    %280 = vector.extract_strided_slice %273 {offsets = [0, 0], sizes = [2, 256], strides = [1, 1]} : vector<2x384xf32> to vector<2x256xf32>
    %281 = arith.addf %279, %280 : vector<2x256xf32>
    %282 = tpu.concatenate %278, %281 in 1 : vector<2x256xf32>, vector<2x256xf32> -> vector<2x512xf32>
    %283 = arith.negf %282 : vector<2x512xf32>
    %284 = math.exp %283 : vector<2x512xf32>
    %cst_76 = arith.constant 1.000000e+00 : f32
    %285 = vector.broadcast %cst_76 : f32 to vector<2x512xf32>
    %286 = arith.addf %285, %284 : vector<2x512xf32>
    %287 = arith.divf %285, %286 : vector<2x512xf32>
    %288 = vector.extract_strided_slice %287 {offsets = [0, 0], sizes = [2, 128], strides = [1, 1]} : vector<2x512xf32> to vector<2x128xf32>
    %289 = vector.extract_strided_slice %287 {offsets = [0, 128], sizes = [2, 128], strides = [1, 1]} : vector<2x512xf32> to vector<2x128xf32>
    %290 = vector.extract_strided_slice %287 {offsets = [0, 256], sizes = [2, 128], strides = [1, 1]} : vector<2x512xf32> to vector<2x128xf32>
    %291 = vector.extract_strided_slice %287 {offsets = [0, 384], sizes = [2, 128], strides = [1, 1]} : vector<2x512xf32> to vector<2x128xf32>
    %292 = vector.extract_strided_slice %275 {offsets = [0, 256], sizes = [2, 128], strides = [1, 1]} : vector<2x384xf32> to vector<2x128xf32>
    %293 = vector.extract_strided_slice %270 {offsets = [0, 256], sizes = [2, 128], strides = [1, 1]} : vector<2x384xf32> to vector<2x128xf32>
    %294 = arith.addf %293, %42 : vector<2x128xf32>
    %295 = arith.mulf %288, %294 : vector<2x128xf32>
    %296 = arith.addf %292, %295 : vector<2x128xf32>
    %297 = vector.extract_strided_slice %272 {offsets = [0, 256], sizes = [2, 128], strides = [1, 1]} : vector<2x384xf32> to vector<2x128xf32>
    %298 = vector.extract_strided_slice %273 {offsets = [0, 256], sizes = [2, 128], strides = [1, 1]} : vector<2x384xf32> to vector<2x128xf32>
    %299 = arith.addf %298, %45 : vector<2x128xf32>
    %300 = arith.mulf %290, %299 : vector<2x128xf32>
    %301 = arith.addf %297, %300 : vector<2x128xf32>
    %302 = tpu.concatenate %296, %301 in 1 : vector<2x128xf32>, vector<2x128xf32> -> vector<2x256xf32>
    %303 = math.tanh %302 : vector<2x256xf32>
    %304 = vector.extract_strided_slice %303 {offsets = [0, 0], sizes = [2, 128], strides = [1, 1]} : vector<2x256xf32> to vector<2x128xf32>
    %305 = vector.extract_strided_slice %303 {offsets = [0, 128], sizes = [2, 128], strides = [1, 1]} : vector<2x256xf32> to vector<2x128xf32>
    %cst_77 = arith.constant 1.000000e+00 : f32
    %306 = vector.broadcast %cst_77 : f32 to vector<2x128xf32>
    %307 = arith.subf %306, %289 : vector<2x128xf32>
    %308 = arith.mulf %307, %304 : vector<2x128xf32>
    %309 = arith.mulf %289, %260 : vector<2x128xf32>
    %310 = arith.addf %308, %309 : vector<2x128xf32>
    %cst_78 = arith.constant 1.000000e+00 : f32
    %311 = vector.broadcast %cst_78 : f32 to vector<2x128xf32>
    %312 = arith.subf %311, %291 : vector<2x128xf32>
    %313 = arith.mulf %312, %305 : vector<2x128xf32>
    %314 = arith.mulf %291, %265 : vector<2x128xf32>
    %315 = arith.addf %313, %314 : vector<2x128xf32>
    %c8 = arith.constant 8 : index
    %c0_79 = arith.constant 0 : index
    %316 = vector.load %arg12[%c8, %c0_79] : memref<16x128xf32, #tpu.memory_space<vmem>>, vector<2x128xf32>
    tpu.vector_store %arg12[%c8, %c0_79], %315 {strides = array<i32>} : memref<16x128xf32, #tpu.memory_space<vmem>>, vector<2x128xf32>,
    %317 = tpu.concatenate %310, %315 in 1 : vector<2x128xf32>, vector<2x128xf32> -> vector<2x256xf32>
    %318 = arith.truncf %317 : vector<2x256xf32> to vector<2x256xbf16>
    %cst_80 = arith.constant dense<0.000000e+00> : vector<2x1152xf32>
    %319 = tpu.matmul %318, %39, %cst_80 {dimension_numbers = #tpu.dot_dimension_numbers<[1], [0], [0], [1], [0, 0, 1, 1], [], []>} : vector<2x256xbf16>, vector<256x1152xbf16>, vector<2x1152xf32> -> vector<2x1152xf32>
    %320 = vector.extract_strided_slice %319 {offsets = [0, 0], sizes = [2, 384], strides = [1, 1]} : vector<2x1152xf32> to vector<2x384xf32>
    %321 = vector.extract_strided_slice %319 {offsets = [0, 384], sizes = [2, 384], strides = [1, 1]} : vector<2x1152xf32> to vector<2x384xf32>
    %322 = arith.addf %321, %48 : vector<2x384xf32>
    %323 = vector.extract_strided_slice %319 {offsets = [0, 768], sizes = [2, 384], strides = [1, 1]} : vector<2x1152xf32> to vector<2x384xf32>
    %c6_81 = arith.constant 6 : index
    %c0_82 = arith.constant 0 : index
    %c0_83 = arith.constant 0 : index
    %324 = vector.load %arg11[%c6_81, %c0_82, %c0_83] : memref<8x2x384xf32, #tpu.memory_space<vmem>>, vector<1x2x384xf32>
    %325 = vector.shape_cast %324 : vector<1x2x384xf32> to vector<2x384xf32>
    %326 = vector.extract_strided_slice %325 {offsets = [0, 0], sizes = [2, 256], strides = [1, 1]} : vector<2x384xf32> to vector<2x256xf32>
    %327 = vector.extract_strided_slice %320 {offsets = [0, 0], sizes = [2, 256], strides = [1, 1]} : vector<2x384xf32> to vector<2x256xf32>
    %328 = arith.addf %326, %327 : vector<2x256xf32>
    %329 = vector.extract_strided_slice %322 {offsets = [0, 0], sizes = [2, 256], strides = [1, 1]} : vector<2x384xf32> to vector<2x256xf32>
    %330 = vector.extract_strided_slice %323 {offsets = [0, 0], sizes = [2, 256], strides = [1, 1]} : vector<2x384xf32> to vector<2x256xf32>
    %331 = arith.addf %329, %330 : vector<2x256xf32>
    %332 = tpu.concatenate %328, %331 in 1 : vector<2x256xf32>, vector<2x256xf32> -> vector<2x512xf32>
    %333 = arith.negf %332 : vector<2x512xf32>
    %334 = math.exp %333 : vector<2x512xf32>
    %cst_84 = arith.constant 1.000000e+00 : f32
    %335 = vector.broadcast %cst_84 : f32 to vector<2x512xf32>
    %336 = arith.addf %335, %334 : vector<2x512xf32>
    %337 = arith.divf %335, %336 : vector<2x512xf32>
    %338 = vector.extract_strided_slice %337 {offsets = [0, 0], sizes = [2, 128], strides = [1, 1]} : vector<2x512xf32> to vector<2x128xf32>
    %339 = vector.extract_strided_slice %337 {offsets = [0, 128], sizes = [2, 128], strides = [1, 1]} : vector<2x512xf32> to vector<2x128xf32>
    %340 = vector.extract_strided_slice %337 {offsets = [0, 256], sizes = [2, 128], strides = [1, 1]} : vector<2x512xf32> to vector<2x128xf32>
    %341 = vector.extract_strided_slice %337 {offsets = [0, 384], sizes = [2, 128], strides = [1, 1]} : vector<2x512xf32> to vector<2x128xf32>
    %342 = vector.extract_strided_slice %325 {offsets = [0, 256], sizes = [2, 128], strides = [1, 1]} : vector<2x384xf32> to vector<2x128xf32>
    %343 = vector.extract_strided_slice %320 {offsets = [0, 256], sizes = [2, 128], strides = [1, 1]} : vector<2x384xf32> to vector<2x128xf32>
    %344 = arith.addf %343, %42 : vector<2x128xf32>
    %345 = arith.mulf %338, %344 : vector<2x128xf32>
    %346 = arith.addf %342, %345 : vector<2x128xf32>
    %347 = vector.extract_strided_slice %322 {offsets = [0, 256], sizes = [2, 128], strides = [1, 1]} : vector<2x384xf32> to vector<2x128xf32>
    %348 = vector.extract_strided_slice %323 {offsets = [0, 256], sizes = [2, 128], strides = [1, 1]} : vector<2x384xf32> to vector<2x128xf32>
    %349 = arith.addf %348, %45 : vector<2x128xf32>
    %350 = arith.mulf %340, %349 : vector<2x128xf32>
    %351 = arith.addf %347, %350 : vector<2x128xf32>
    %352 = tpu.concatenate %346, %351 in 1 : vector<2x128xf32>, vector<2x128xf32> -> vector<2x256xf32>
    %353 = math.tanh %352 : vector<2x256xf32>
    %354 = vector.extract_strided_slice %353 {offsets = [0, 0], sizes = [2, 128], strides = [1, 1]} : vector<2x256xf32> to vector<2x128xf32>
    %355 = vector.extract_strided_slice %353 {offsets = [0, 128], sizes = [2, 128], strides = [1, 1]} : vector<2x256xf32> to vector<2x128xf32>
    %cst_85 = arith.constant 1.000000e+00 : f32
    %356 = vector.broadcast %cst_85 : f32 to vector<2x128xf32>
    %357 = arith.subf %356, %339 : vector<2x128xf32>
    %358 = arith.mulf %357, %354 : vector<2x128xf32>
    %359 = arith.mulf %339, %310 : vector<2x128xf32>
    %360 = arith.addf %358, %359 : vector<2x128xf32>
    %cst_86 = arith.constant 1.000000e+00 : f32
    %361 = vector.broadcast %cst_86 : f32 to vector<2x128xf32>
    %362 = arith.subf %361, %341 : vector<2x128xf32>
    %363 = arith.mulf %362, %355 : vector<2x128xf32>
    %364 = arith.mulf %341, %315 : vector<2x128xf32>
    %365 = arith.addf %363, %364 : vector<2x128xf32>
    %c10 = arith.constant 10 : index
    %c0_87 = arith.constant 0 : index
    %366 = vector.load %arg12[%c10, %c0_87] : memref<16x128xf32, #tpu.memory_space<vmem>>, vector<2x128xf32>
    tpu.vector_store %arg12[%c10, %c0_87], %365 {strides = array<i32>} : memref<16x128xf32, #tpu.memory_space<vmem>>, vector<2x128xf32>,
    %367 = tpu.concatenate %360, %365 in 1 : vector<2x128xf32>, vector<2x128xf32> -> vector<2x256xf32>
    %368 = arith.truncf %367 : vector<2x256xf32> to vector<2x256xbf16>
    %cst_88 = arith.constant dense<0.000000e+00> : vector<2x1152xf32>
    %369 = tpu.matmul %368, %39, %cst_88 {dimension_numbers = #tpu.dot_dimension_numbers<[1], [0], [0], [1], [0, 0, 1, 1], [], []>} : vector<2x256xbf16>, vector<256x1152xbf16>, vector<2x1152xf32> -> vector<2x1152xf32>
    %370 = vector.extract_strided_slice %369 {offsets = [0, 0], sizes = [2, 384], strides = [1, 1]} : vector<2x1152xf32> to vector<2x384xf32>
    %371 = vector.extract_strided_slice %369 {offsets = [0, 384], sizes = [2, 384], strides = [1, 1]} : vector<2x1152xf32> to vector<2x384xf32>
    %372 = arith.addf %371, %48 : vector<2x384xf32>
    %373 = vector.extract_strided_slice %369 {offsets = [0, 768], sizes = [2, 384], strides = [1, 1]} : vector<2x1152xf32> to vector<2x384xf32>
    %c7_89 = arith.constant 7 : index
    %c0_90 = arith.constant 0 : index
    %c0_91 = arith.constant 0 : index
    %374 = vector.load %arg11[%c7_89, %c0_90, %c0_91] : memref<8x2x384xf32, #tpu.memory_space<vmem>>, vector<1x2x384xf32>
    %375 = vector.shape_cast %374 : vector<1x2x384xf32> to vector<2x384xf32>
    %376 = vector.extract_strided_slice %375 {offsets = [0, 0], sizes = [2, 256], strides = [1, 1]} : vector<2x384xf32> to vector<2x256xf32>
    %377 = vector.extract_strided_slice %370 {offsets = [0, 0], sizes = [2, 256], strides = [1, 1]} : vector<2x384xf32> to vector<2x256xf32>
    %378 = arith.addf %376, %377 : vector<2x256xf32>
    %379 = vector.extract_strided_slice %372 {offsets = [0, 0], sizes = [2, 256], strides = [1, 1]} : vector<2x384xf32> to vector<2x256xf32>
    %380 = vector.extract_strided_slice %373 {offsets = [0, 0], sizes = [2, 256], strides = [1, 1]} : vector<2x384xf32> to vector<2x256xf32>
    %381 = arith.addf %379, %380 : vector<2x256xf32>
    %382 = tpu.concatenate %378, %381 in 1 : vector<2x256xf32>, vector<2x256xf32> -> vector<2x512xf32>
    %383 = arith.negf %382 : vector<2x512xf32>
    %384 = math.exp %383 : vector<2x512xf32>
    %cst_92 = arith.constant 1.000000e+00 : f32
    %385 = vector.broadcast %cst_92 : f32 to vector<2x512xf32>
    %386 = arith.addf %385, %384 : vector<2x512xf32>
    %387 = arith.divf %385, %386 : vector<2x512xf32>
    %388 = vector.extract_strided_slice %387 {offsets = [0, 0], sizes = [2, 128], strides = [1, 1]} : vector<2x512xf32> to vector<2x128xf32>
    %389 = vector.extract_strided_slice %387 {offsets = [0, 128], sizes = [2, 128], strides = [1, 1]} : vector<2x512xf32> to vector<2x128xf32>
    %390 = vector.extract_strided_slice %387 {offsets = [0, 256], sizes = [2, 128], strides = [1, 1]} : vector<2x512xf32> to vector<2x128xf32>
    %391 = vector.extract_strided_slice %387 {offsets = [0, 384], sizes = [2, 128], strides = [1, 1]} : vector<2x512xf32> to vector<2x128xf32>
    %392 = vector.extract_strided_slice %375 {offsets = [0, 256], sizes = [2, 128], strides = [1, 1]} : vector<2x384xf32> to vector<2x128xf32>
    %393 = vector.extract_strided_slice %370 {offsets = [0, 256], sizes = [2, 128], strides = [1, 1]} : vector<2x384xf32> to vector<2x128xf32>
    %394 = arith.addf %393, %42 : vector<2x128xf32>
    %395 = arith.mulf %388, %394 : vector<2x128xf32>
    %396 = arith.addf %392, %395 : vector<2x128xf32>
    %397 = vector.extract_strided_slice %372 {offsets = [0, 256], sizes = [2, 128], strides = [1, 1]} : vector<2x384xf32> to vector<2x128xf32>
    %398 = vector.extract_strided_slice %373 {offsets = [0, 256], sizes = [2, 128], strides = [1, 1]} : vector<2x384xf32> to vector<2x128xf32>
    %399 = arith.addf %398, %45 : vector<2x128xf32>
    %400 = arith.mulf %390, %399 : vector<2x128xf32>
    %401 = arith.addf %397, %400 : vector<2x128xf32>
    %402 = tpu.concatenate %396, %401 in 1 : vector<2x128xf32>, vector<2x128xf32> -> vector<2x256xf32>
    %403 = math.tanh %402 : vector<2x256xf32>
    %404 = vector.extract_strided_slice %403 {offsets = [0, 0], sizes = [2, 128], strides = [1, 1]} : vector<2x256xf32> to vector<2x128xf32>
    %405 = vector.extract_strided_slice %403 {offsets = [0, 128], sizes = [2, 128], strides = [1, 1]} : vector<2x256xf32> to vector<2x128xf32>
    %cst_93 = arith.constant 1.000000e+00 : f32
    %406 = vector.broadcast %cst_93 : f32 to vector<2x128xf32>
    %407 = arith.subf %406, %389 : vector<2x128xf32>
    %408 = arith.mulf %407, %404 : vector<2x128xf32>
    %409 = arith.mulf %389, %360 : vector<2x128xf32>
    %410 = arith.addf %408, %409 : vector<2x128xf32>
    %cst_94 = arith.constant 1.000000e+00 : f32
    %411 = vector.broadcast %cst_94 : f32 to vector<2x128xf32>
    %412 = arith.subf %411, %391 : vector<2x128xf32>
    %413 = arith.mulf %412, %405 : vector<2x128xf32>
    %414 = arith.mulf %391, %365 : vector<2x128xf32>
    %415 = arith.addf %413, %414 : vector<2x128xf32>
    %c12 = arith.constant 12 : index
    %c0_95 = arith.constant 0 : index
    %416 = vector.load %arg12[%c12, %c0_95] : memref<16x128xf32, #tpu.memory_space<vmem>>, vector<2x128xf32>
    tpu.vector_store %arg12[%c12, %c0_95], %415 {strides = array<i32>} : memref<16x128xf32, #tpu.memory_space<vmem>>, vector<2x128xf32>,
    %417 = tpu.concatenate %410, %415 in 1 : vector<2x128xf32>, vector<2x128xf32> -> vector<2x256xf32>
    %418 = arith.truncf %417 : vector<2x256xf32> to vector<2x256xbf16>
    %cst_96 = arith.constant dense<0.000000e+00> : vector<2x1152xf32>
    %419 = tpu.matmul %418, %39, %cst_96 {dimension_numbers = #tpu.dot_dimension_numbers<[1], [0], [0], [1], [0, 0, 1, 1], [], []>} : vector<2x256xbf16>, vector<256x1152xbf16>, vector<2x1152xf32> -> vector<2x1152xf32>
    %420 = vector.extract_strided_slice %419 {offsets = [0, 384], sizes = [2, 384], strides = [1, 1]} : vector<2x1152xf32> to vector<2x384xf32>
    %421 = arith.addf %420, %48 : vector<2x384xf32>
    %422 = vector.extract_strided_slice %419 {offsets = [0, 768], sizes = [2, 384], strides = [1, 1]} : vector<2x1152xf32> to vector<2x384xf32>
    %423 = vector.extract_strided_slice %421 {offsets = [0, 0], sizes = [2, 256], strides = [1, 1]} : vector<2x384xf32> to vector<2x256xf32>
    %424 = vector.extract_strided_slice %422 {offsets = [0, 0], sizes = [2, 256], strides = [1, 1]} : vector<2x384xf32> to vector<2x256xf32>
    %425 = arith.addf %423, %424 : vector<2x256xf32>
    %426 = arith.negf %425 : vector<2x256xf32>
    %427 = math.exp %426 : vector<2x256xf32>
    %cst_97 = arith.constant 1.000000e+00 : f32
    %428 = vector.broadcast %cst_97 : f32 to vector<2x256xf32>
    %429 = arith.addf %428, %427 : vector<2x256xf32>
    %430 = arith.divf %428, %429 : vector<2x256xf32>
    %431 = vector.extract_strided_slice %430 {offsets = [0, 0], sizes = [2, 128], strides = [1, 1]} : vector<2x256xf32> to vector<2x128xf32>
    %432 = vector.extract_strided_slice %430 {offsets = [0, 128], sizes = [2, 128], strides = [1, 1]} : vector<2x256xf32> to vector<2x128xf32>
    %433 = vector.extract_strided_slice %421 {offsets = [0, 256], sizes = [2, 128], strides = [1, 1]} : vector<2x384xf32> to vector<2x128xf32>
    %434 = vector.extract_strided_slice %422 {offsets = [0, 256], sizes = [2, 128], strides = [1, 1]} : vector<2x384xf32> to vector<2x128xf32>
    %435 = arith.addf %434, %45 : vector<2x128xf32>
    %436 = arith.mulf %431, %435 : vector<2x128xf32>
    %437 = arith.addf %433, %436 : vector<2x128xf32>
    %438 = math.tanh %437 : vector<2x128xf32>
    %cst_98 = arith.constant 1.000000e+00 : f32
    %439 = vector.broadcast %cst_98 : f32 to vector<2x128xf32>
    %440 = arith.subf %439, %432 : vector<2x128xf32>
    %441 = arith.mulf %440, %438 : vector<2x128xf32>
    %442 = arith.mulf %432, %415 : vector<2x128xf32>
    %443 = arith.addf %441, %442 : vector<2x128xf32>
    %c14 = arith.constant 14 : index
    %c0_99 = arith.constant 0 : index
    %444 = vector.load %arg12[%c14, %c0_99] : memref<16x128xf32, #tpu.memory_space<vmem>>, vector<2x128xf32>
    tpu.vector_store %arg12[%c14, %c0_99], %443 {strides = array<i32>} : memref<16x128xf32, #tpu.memory_space<vmem>>, vector<2x128xf32>,
    %c0_100 = arith.constant 0 : index
    %c0_101 = arith.constant 0 : index
    %445 = vector.load %arg12[%c0_100, %c0_101] : memref<16x128xf32, #tpu.memory_space<vmem>>, vector<16x128xf32>
    %446 = arith.mulf %445, %445 : vector<16x128xf32>
    %447 = tpu.concatenate %445, %446 in 1 : vector<16x128xf32>, vector<16x128xf32> -> vector<16x256xf32>
    %c0_102 = arith.constant 0 : index
    %c0_103 = arith.constant 0 : index
    %448 = vector.load %arg7[%c0_102, %c0_103] : memref<256x256xf32, #tpu.memory_space<vmem>>, vector<256x256xf32>
    %cst_104 = arith.constant dense<0.000000e+00> : vector<16x256xf32>
    %449 = tpu.matmul %447, %448, %cst_104 {dimension_numbers = #tpu.dot_dimension_numbers<[1], [0], [0], [1], [0, 0, 1, 1], [], []>} : vector<16x256xf32>, vector<256x256xf32>, vector<16x256xf32> -> vector<16x256xf32>
    %450 = vector.extract_strided_slice %449 {offsets = [0, 0], sizes = [16, 128], strides = [1, 1]} : vector<16x256xf32> to vector<16x128xf32>
    %451 = vector.extract_strided_slice %449 {offsets = [0, 128], sizes = [16, 128], strides = [1, 1]} : vector<16x256xf32> to vector<16x128xf32>
    %452 = arith.mulf %450, %450 : vector<16x128xf32>
    %453 = arith.subf %451, %452 : vector<16x128xf32>
    %454 = arith.subf %445, %450 : vector<16x128xf32>
    %cst_105 = arith.constant 9.99999974E-6 : f32
    %455 = vector.broadcast %cst_105 : f32 to vector<16x128xf32>
    %456 = arith.addf %453, %455 : vector<16x128xf32>
    %457 = math.rsqrt %456 : vector<16x128xf32>
    %458 = arith.mulf %454, %457 : vector<16x128xf32>
    %c0_106 = arith.constant 0 : index
    %c0_107 = arith.constant 0 : index
    %459 = vector.load %arg8[%c0_106, %c0_107] : memref<128x64xf32, #tpu.memory_space<vmem>>, vector<128x64xf32>
    %cst_108 = arith.constant dense<0.000000e+00> : vector<16x64xf32>
    %460 = tpu.matmul %458, %459, %cst_108 {dimension_numbers = #tpu.dot_dimension_numbers<[1], [0], [0], [1], [0, 0, 1, 1], [], []>} : vector<16x128xf32>, vector<128x64xf32>, vector<16x64xf32> -> vector<16x64xf32>
    %c0_109 = arith.constant 0 : index
    %c0_110 = arith.constant 0 : index
    %461 = vector.load %arg9[%c0_109, %c0_110] : memref<1x64xf32, #tpu.memory_space<vmem>>, vector<1x64xf32>
    %462 = vector.broadcast %461 : vector<1x64xf32> to vector<16x64xf32>
    %463 = arith.addf %460, %462 : vector<16x64xf32>
    %c0_111 = arith.constant 0 : index
    %c0_112 = arith.constant 0 : index
    %464 = vector.load %arg10[%c0_111, %c0_112] : memref<16x64xf32, #tpu.memory_space<vmem>>, vector<16x64xf32>
    tpu.vector_store %arg10[%c0_111, %c0_112], %463 {strides = array<i32>} : memref<16x64xf32, #tpu.memory_space<vmem>>, vector<16x64xf32>,
    return
  }
}

</mosaic_0001>

<bundles_post_ra>
// kernel: tpu_custom_call.1
= control target key start
LH: loop header
LB: loop body
LE: loop exit
PB: predicated region body
PF: predicated region fallthrough
CT: control target
= control target key end

     0   :  { %15 = vsyncpa [#allocation5], 0  ;;  %s7407_s0 = inlined_call_operand.vmem [shape: f32[16,64], index: 0, kind: input, shape index: {}]   ;;  %s7408_s1 = inlined_call_operand.vmem [shape: bf16[64,384], index: 1, kind: input, shape index: {}]   ;;  %s7409_s2 = inlined_call_operand.vmem [shape: f32[1,384], index: 2, kind: input, shape index: {}]   ;;  %s7410_s3 = inlined_call_operand.vmem [shape: f32[1,128], index: 3, kind: input, shape index: {}]   ;;  %s7411_s4 = inlined_call_operand.hbm [shape: bf16[256,1152], index: 4, kind: input, shape index: {}]   ;;  %s7412_s5 = inlined_call_operand.vmem [shape: f32[1,384], index: 5, kind: input, shape index: {}]   ;;  %s7413_s6 = inlined_call_operand.vmem [shape: f32[1,128], index: 6, kind: input, shape index: {}]   ;;  %s7414_s7 = inlined_call_operand.hbm [shape: f32[256,256], index: 7, kind: input, shape index: {}]   ;;  %s7415_s8 = inlined_call_operand.vmem [shape: f32[128,64], index: 8, kind: input, shape index: {}]   ;;  %s7416_s9 = inlined_call_operand.vmem [shape: f32[1,64], index: 9, kind: input, shape index: {}]   ;;  %s7417_s10 = inlined_call_operand.hbm [shape: f32[16,64], index: 10, kind: output, shape index: {}]  }
   0x1   :  { %16 = vsyncpa [#allocation8], 0 }
   0x2   :  { %17 = vsyncpa [#allocation6], 0  ;;  %s30_s15 = sshll.u32 %s7411_s4, 4  ;;  %s5204_s16 = smov [#allocation4]   ;;  %s31_s15 = int_to_ptr.hbm [resolvable:$true] %s30_s15 }
   0x3   :  { %s32_s17 = sshll.u32 %s5204_s16, 4  ;;  %s47_s20 = sshll.u32 %s7414_s7, 4  ;;  %s33_s17 = int_to_ptr.vmem [resolvable:$true] %s32_s17  ;;  %s48_s20 = int_to_ptr.hbm [resolvable:$true] %s47_s20 }
   0x4   :  { %s5205_s21 = smov 576   ;;  %s5206_s22 = smov 36  }
   0x5   :  { %38 = dma.hbm_to_vmem [thread:$0]  %s31_s15, 18432, %s33_s17, [#allocation5], %s5205_s21, %s5205_s21, %s5206_s22  }
   0x6   :  { %s5207_s23 = smov [#allocation7]   ;;  %s5208_s25 = smov 256  }
   0x7   :  { %s49_s24 = sshll.u32 %s5207_s23, 4  ;;  %s5209_s26 = smov 16   ;;  %s50_s24 = int_to_ptr.vmem [resolvable:$true] %s49_s24 }
   0x8   :  { %55 = dma.hbm_to_vmem [thread:$0]  %s48_s20, 8192, %s50_s24, [#allocation8], %s5208_s25, %s5208_s25, %s5209_s26  }
   0x9   :  { %5198 = dma.done.wait [#allocation5], 18432  }
   0xa   :  { %5199 = vsyncadd [#allocation5], 4294948864 }
   0xb   :  { %5200 = dma.done.wait [#allocation8], 8192  }
   0xc   :  { %5201 = vsyncadd [#allocation8], 4294959104  ;;  %v4171_v0 = vld [vmem:[%s7408_s1 + $0x48] sm:$0xf]  ;;  %v4801_v1 = vld [vmem:[%s7408_s1 + $0x50] sm:$0xf0] }
   0xd   :  { %v4159_v2 = vld [vmem:[%s7408_s1 + $0x30] sm:$0xf]  ;;  %v4172_v3 = vor.u32 %v4801_v1, %v4171_v0  ;;  %v4798_v4 = vld [vmem:[%s7408_s1 + $0x38] sm:$0xf0]  ;;  %v4800_v5 = vld [vmem:[%s7408_s1 + $0x4c] sm:$0xf] }
   0xe   :  { %v4173_v6 = vld [vmem:[%s7408_s1 + $0x54] sm:$0xf0]  ;;  %v4797_v8 = vld [vmem:[%s7408_s1 + $0x34] sm:$0xf]  ;;  %v4160_v9 = vor.u32 %v4798_v4, %v4159_v2  ;;  %v4161_v10 = vld [vmem:[%s7408_s1 + $0x3c] sm:$0xf0] }
   0xf   :  { %v4176_v7 = vor.u32 %v4800_v5, %v4173_v6  ;;  %168 = vmatpush.bf16.msra.mxu2 %v4172_v3  ;;  %v4147_v11 = vld [vmem:[%s7408_s1 + $0x18] sm:$0xf]  ;;  %v4795_v12 = vld [vmem:[%s7408_s1 + $0x20] sm:$0xf0]  ;;  %v4164_v13 = vor.u32 %v4797_v8, %v4161_v10  ;;  %v4794_v14 = vld [vmem:[%s7408_s1 + $0x1c] sm:$0xf] }
  0x10   :  { %v4149_v15 = vld [vmem:[%s7408_s1 + $0x24] sm:$0xf0]  ;;  %v4148_v16 = vor.u32 %v4795_v12, %v4147_v11  ;;  %v4135_v17 = vld [vmem:[%s7408_s1] sm:$0xf]  ;;  %v4792_v18 = vld [vmem:[%s7408_s1 + $0x8] sm:$0xf0] }
  0x11   :  { %182 = vmatpush.bf16.msra.mxu1 %v4176_v7  ;;  %v4152_v19 = vor.u32 %v4794_v14, %v4149_v15  ;;  %v4791_v20 = vld [vmem:[%s7408_s1 + $0x4] sm:$0xf]  ;;  %v4137_v21 = vld [vmem:[%s7408_s1 + $0xc] sm:$0xf0]  ;;  %v4802_v23 = vld [vmem:[%s7408_s1 + $0x58] sm:$0xf0]  ;;  %v4136_v24 = vor.u32 %v4792_v18, %v4135_v17 }
  0x12   :  { %v4179_v22 = vld [vmem:[%s7408_s1 + $0x50] sm:$0xf]  ;;  %v69_v25 = vld [vmem:[%s7407_s0] sm:$0xff]  ;;  %v70_v26 = vld [vmem:[%s7407_s0 + $0x8] sm:$0xff]  ;;  %v4140_v27 = vor.u32 %v4791_v20, %v4137_v21  ;;  %vm160_vm0 = vcmask 523264   ;;  %vm211_vm1 = vcmask 1041408  }
  0x13   :  { %169 = vmatpush.bf16.msra.mxu2 %v4160_v9  ;;  %v4180_v28 = vor.u32 %v4802_v23, %v4179_v22  ;;  %v4167_v29 = vld [vmem:[%s7408_s1 + $0x38] sm:$0xf]  ;;  %v4799_v30 = vld [vmem:[%s7408_s1 + $0x40] sm:$0xf0]  ;;  %v71_v31 = vpack.c.bf16 %v70_v26, %v69_v25  ;;  %v4155_v33 = vld [vmem:[%s7408_s1 + $0x20] sm:$0xf] }
  0x14   :  { %v4168_v32 = vor.u32 %v4799_v30, %v4167_v29  ;;  %v4796_v34 = vld [vmem:[%s7408_s1 + $0x28] sm:$0xf0]  ;;  %v4143_v36 = vld [vmem:[%s7408_s1 + $0x8] sm:$0xf]  ;;  %v4793_v37 = vld [vmem:[%s7408_s1 + $0x10] sm:$0xf0] }
  0x15   :  { %183 = vmatpush.bf16.msra.mxu1 %v4164_v13  ;;  %v4156_v35 = vor.u32 %v4796_v34, %v4155_v33  ;;  %v4144_v38 = vor.u32 %v4793_v37, %v4143_v36  ;;  %v4938_v39 = vld [vmem:[#allocation4 + $0x43c] sm:$0xf]  ;;  %v4729_v40 = vld [vmem:[#allocation4 + $0x45c] sm:$0xf0]  ;;  %v4727_v42 = vld [vmem:[#allocation4 + $0x438] sm:$0xf] }
  0x16   :  { %v5356_v41 = vor.u32 %v4938_v39, %v4729_v40  ;;  %v4942_v43 = vld [vmem:[#allocation4 + $0x458] sm:$0xf0]  ;;  %v4929_v44 = vld [vmem:[#allocation4 + $0x3f4] sm:$0xf]  ;;  %v4693_v46 = vld [vmem:[#allocation4 + $0x414] sm:$0xf0] }
  0x17   :  { %170 = vmatpush.bf16.msra.mxu2 %v4148_v16  ;;  %v5359_v45 = vor.u32 %v4942_v43, %v4727_v42  ;;  %v4439_v47 = vld [vmem:[#allocation4 + $0x1f8] sm:$0xf]  ;;  %v4870_v48 = vld [vmem:[#allocation4 + $0x218] sm:$0xf0]  ;;  %v5361_v49 = vor.u32 %v4929_v44, %v4693_v46  ;;  %v4441_v52 = vld [vmem:[#allocation4 + $0x21c] sm:$0xf0] }
  0x18   :  { %7707 = vst [vmem:[#allocation13_spill] sm:$0xff] %v5356_v41  ;;  %v5363_v50 = vor.u32 %v4870_v48, %v4439_v47  ;;  %v4866_v51 = vld [vmem:[#allocation4 + $0x1fc] sm:$0xf]  ;;  %v4691_v54 = vld [vmem:[#allocation4 + $0x3f0] sm:$0xf]  ;;  %vm213_vm2 = vcmask 1043456  }
  0x19   :  { %184 = vmatpush.bf16.msra.mxu1 %v4152_v19  ;;  %7708 = vst [vmem:[#allocation14_spill] sm:$0xff] %v5359_v45  ;;  %1233 = vmatpush.bf16.msra.mxu0 %v5359_v45  ;;  %v5366_v53 = vor.u32 %v4866_v51, %v4441_v52  ;;  %v4933_v55 = vld [vmem:[#allocation4 + $0x410] sm:$0xf0]  ;;  %v5374_v56 = vld [vmem:[%s7409_s2] sm:$0x7]  ;;  %s4119_s1 = sshll.u32 %s7417_s10, 4  ;;  %s4120_s1 = int_to_ptr.hbm [resolvable:$true] %s4119_s1 }
  0x1a   :  { %7709 = vst [vmem:[#allocation15_spill] sm:$0xff] %v5361_v49  ;;  %1220 = vmatpush.bf16.msra.mxu3 %v5363_v50  ;;  %v5376_v57 = vor.u32 %v4933_v55, %v4691_v54  ;;  %v4920_v58 = vld [vmem:[#allocation4 + $0x3ac] sm:$0xf]  ;;  %v4657_v59 = vld [vmem:[#allocation4 + $0x3cc] sm:$0xf0]  ;;  %v91_v6 = vperm.slane %v5374_v56, 1 }
  0x1b   :  { %171 = vmatpush.bf16.msra.mxu2 %v4136_v24  ;;  %7710 = vst [vmem:[#allocation16_spill] sm:$0xff] %v5363_v50  ;;  %v5378_v60 = vor.u32 %v4920_v58, %v4657_v59  ;;  %v4403_v61 = vld [vmem:[#allocation4 + $0x1b0] sm:$0xf]  ;;  %v4861_v62 = vld [vmem:[#allocation4 + $0x1d0] sm:$0xf0]  ;;  %v90_v18 = vperm.slane %v5374_v56, 0 }
  0x1c   :  { %7711 = vst [vmem:[#allocation17_spill] sm:$0xff] %v5366_v53  ;;  %v4857_v63 = vld [vmem:[#allocation4 + $0x1b4] sm:$0xf]  ;;  %v5381_v0 = vor.u32 %v4861_v62, %v4403_v61  ;;  %v4405_v1 = vld [vmem:[#allocation4 + $0x1d4] sm:$0xf0]  ;;  %s5212_s12 = smov 128  }
  0x1d   :  { %185 = vmatpush.bf16.msra.mxu1 %v4140_v27  ;;  %7712 = vst [vmem:[#allocation18_spill] sm:$0xff] %v5376_v57  ;;  %1234 = vmatpush.bf16.msra.mxu0 %v5376_v57  ;;  %v5384_v2 = vor.u32 %v4857_v63, %v4405_v1  ;;  %v4655_v3 = vld [vmem:[#allocation4 + $0x3a8] sm:$0xf]  ;;  %v4924_v4 = vld [vmem:[#allocation4 + $0x3c8] sm:$0xf0]  ;;  %v92_v63 = vperm.slane %v5374_v56, 2 }
  0x1e   :  { %4181 = vmatmul.msk.bf16.vlgmr.msra.gmra.mxu2 %vm160_vm0, %v71_v31  ;;  %7713 = vst [vmem:[#allocation19_spill] sm:$0xff] %v5378_v60  ;;  %v4911_v5 = vld [vmem:[#allocation4 + $0x364] sm:$0xf]  ;;  %1221 = vmatpush.bf16.msra.mxu3 %v5381_v0  ;;  %v5388_v7 = vor.u32 %v4924_v4, %v4655_v3  ;;  %v4621_v8 = vld [vmem:[#allocation4 + $0x384] sm:$0xf0]  ;;  %s5213_s2 = smov 8  }
  0x1f   :  { %196 = vmatpush.bf16.msrb.mxu2 %v4180_v28  ;;  %7714 = vst [vmem:[#allocation20_spill] sm:$0xff] %v5381_v0  ;;  %v5391_v9 = vor.u32 %v4911_v5, %v4621_v8  ;;  %v4367_v10 = vld [vmem:[#allocation4 + $0x168] sm:$0xf]  ;;  %v4852_v11 = vld [vmem:[#allocation4 + $0x188] sm:$0xf0] }
  0x20   :  { %4182 = vmatmul.msk.bf16.vlgmr.msra.gmra.mxu1 %vm160_vm0, %v71_v31  ;;  %7715 = vst [vmem:[#allocation21_spill] sm:$0xff] %v5384_v2  ;;  %v4848_v12 = vld [vmem:[#allocation4 + $0x16c] sm:$0xf]  ;;  %v5394_v13 = vor.u32 %v4852_v11, %v4367_v10  ;;  %v4369_v14 = vld [vmem:[#allocation4 + $0x18c] sm:$0xf0] }
  0x21   :  { %1246 = vmatpush.bf16.msrb.mxu1 %v5366_v53  ;;  %7716 = vst [vmem:[#allocation22_spill] sm:$0xff] %v5388_v7  ;;  %1235 = vmatpush.bf16.msra.mxu0 %v5388_v7  ;;  %v5397_v16 = vor.u32 %v4848_v12, %v4369_v14  ;;  %v4619_v20 = vld [vmem:[#allocation4 + $0x360] sm:$0xf]  ;;  %v4915_v21 = vld [vmem:[#allocation4 + $0x380] sm:$0xf0] }
  0x22   :  { %7717 = vst [vmem:[#allocation23_spill] sm:$0xff] %v5391_v9  ;;  %1222 = vmatpush.bf16.msra.mxu3 %v5394_v13  ;;  %v4902_v22 = vld [vmem:[#allocation4 + $0x31c] sm:$0xf]  ;;  %v5411_v24 = vor.u32 %v4915_v21, %v4619_v20  ;;  %v4585_v25 = vld [vmem:[#allocation4 + $0x33c] sm:$0xf0] }
  0x23   :  { %197 = vmatpush.bf16.msrb.mxu2 %v4168_v32  ;;  %7718 = vst [vmem:[#allocation24_spill] sm:$0xff] %v5394_v13  ;;  %v5413_v26 = vor.u32 %v4902_v22, %v4585_v25  ;;  %v4331_v27 = vld [vmem:[#allocation4 + $0x120] sm:$0xf]  ;;  %v4843_v28 = vld [vmem:[#allocation4 + $0x140] sm:$0xf0] }
  0x24   :  { %7719 = vst [vmem:[#allocation25_spill] sm:$0xff] %v5397_v16  ;;  %v4839_v29 = vld [vmem:[#allocation4 + $0x124] sm:$0xf]  ;;  %v5417_v30 = vor.u32 %v4843_v28, %v4331_v27  ;;  %v4583_v33 = vld [vmem:[#allocation4 + $0x318] sm:$0xf] }
  0x25   :  { %1247 = vmatpush.bf16.msrb.mxu1 %v5384_v2  ;;  %7720 = vst [vmem:[#allocation26_spill] sm:$0xff] %v5411_v24  ;;  %1236 = vmatpush.bf16.msra.mxu0 %v5411_v24  ;;  %v4906_v34 = vld [vmem:[#allocation4 + $0x338] sm:$0xf0]  ;;  %v4549_v37 = vld [vmem:[#allocation4 + $0x2f4] sm:$0xf0] }
  0x26   :  { %7721 = vst [vmem:[#allocation27_spill] sm:$0xff] %v5413_v26  ;;  %1223 = vmatpush.bf16.msra.mxu3 %v5417_v30  ;;  %v5423_v36 = vor.u32 %v4906_v34, %v4583_v33  ;;  %v4295_v39 = vld [vmem:[#allocation4 + $0xd8] sm:$0xf]  ;;  %v4834_v40 = vld [vmem:[#allocation4 + $0xf8] sm:$0xf0] }
  0x27   :  { %198 = vmatpush.bf16.msrb.mxu2 %v4156_v35  ;;  %7722 = vst [vmem:[#allocation28_spill] sm:$0xff] %v5417_v30  ;;  %v4893_v35 = vld [vmem:[#allocation4 + $0x2d4] sm:$0xf]  ;;  %v5429_v42 = vor.u32 %v4834_v40, %v4295_v39  ;;  %v4830_v43 = vld [vmem:[#allocation4 + $0xdc] sm:$0xf] }
  0x28   :  { %7724 = vst [vmem:[#allocation30_spill] sm:$0xff] %v5423_v36  ;;  %v4297_v44 = vld [vmem:[#allocation4 + $0xfc] sm:$0xf0]  ;;  %v4547_v48 = vld [vmem:[#allocation4 + $0x2d0] sm:$0xf] }
  0x29   :  { %1248 = vmatpush.bf16.msrb.mxu1 %v5397_v16  ;;  %1237 = vmatpush.bf16.msra.mxu0 %v5423_v36  ;;  %7726 = vst [vmem:[#allocation32_spill] sm:$0xff] %v5429_v42  ;;  %v5434_v47 = vor.u32 %v4830_v43, %v4297_v44  ;;  %v4897_v51 = vld [vmem:[#allocation4 + $0x2f0] sm:$0xf0]  ;;  %v4884_v52 = vld [vmem:[#allocation4 + $0x28c] sm:$0xf] }
  0x2a   :  { %1224 = vmatpush.bf16.msra.mxu3 %v5429_v42  ;;  %v5437_v54 = vor.u32 %v4897_v51, %v4547_v48  ;;  %v4513_v55 = vld [vmem:[#allocation4 + $0x2ac] sm:$0xf0]  ;;  %v4825_v61 = vld [vmem:[#allocation4 + $0xb0] sm:$0xf0]  ;;  %v4261_v3 = vld [vmem:[#allocation4 + $0xb4] sm:$0xf0] }
  0x2b   :  { %199 = vmatpush.bf16.msrb.mxu2 %v4144_v38  ;;  %v5426_v38 = vor.u32 %v4893_v35, %v4549_v37  ;;  %7727 = vst [vmem:[#allocation33_spill] sm:$0xff] %v5434_v47  ;;  %v5440_v58 = vor.u32 %v4884_v52, %v4513_v55  ;;  %v4259_v59 = vld [vmem:[#allocation4 + $0x90] sm:$0xf]  ;;  %v4821_v62 = vld [vmem:[#allocation4 + $0x94] sm:$0xf] }
  0x2c   :  { %7728 = vst [vmem:[#allocation34_spill] sm:$0xff] %v5437_v54  ;;  %v5444_v1 = vor.u32 %v4825_v61, %v4259_v59  ;;  %v5447_v4 = vor.u32 %v4821_v62, %v4261_v3  ;;  %v4511_v5 = vld [vmem:[#allocation4 + $0x288] sm:$0xf]  ;;  %v4888_v8 = vld [vmem:[#allocation4 + $0x2a8] sm:$0xf0] }
  0x2d   :  { %7725 = vst [vmem:[#allocation31_spill] sm:$0xff] %v5426_v38  ;;  %1238 = vmatpush.bf16.msra.mxu0 %v5437_v54  ;;  %v4875_v10 = vld [vmem:[#allocation4 + $0x244] sm:$0xf]  ;;  %v5450_v11 = vor.u32 %v4888_v8, %v4511_v5  ;;  %v4477_v12 = vld [vmem:[#allocation4 + $0x264] sm:$0xf0] }
  0x2e   :  { %4183 = vmatmul.msk.bf16.vlgmr.msrb.gmra.mxu2 %vm160_vm0, %v71_v31  ;;  %v4333_v31 = vld [vmem:[#allocation4 + $0x144] sm:$0xf0]  ;;  %7729 = vst [vmem:[#allocation35_spill] sm:$0xff] %v5440_v58  ;;  %1225 = vmatpush.bf16.msra.mxu3 %v5444_v1  ;;  %v4939_v14 = vld [vmem:[#allocation4 + $0x444] sm:$0xf] }
  0x2f   :  { %1259 = vmatpush.bf16.msra.mxu2 %v5356_v41  ;;  %v5420_v32 = vor.u32 %v4839_v29, %v4333_v31  ;;  %7730 = vst [vmem:[#allocation36_spill] sm:$0xff] %v5444_v1  ;;  %v4223_v21 = vld [vmem:[#allocation4 + $0x48] sm:$0xf]  ;;  %v4816_v22 = vld [vmem:[#allocation4 + $0x68] sm:$0xf0] }
  0x30   :  { %7731 = vst [vmem:[#allocation37_spill] sm:$0xff] %v5447_v4  ;;  %v4812_v25 = vld [vmem:[#allocation4 + $0x4c] sm:$0xf]  ;;  %v5458_v27 = vor.u32 %v4816_v22, %v4223_v21  ;;  %v4225_v28 = vld [vmem:[#allocation4 + $0x6c] sm:$0xf0] }
  0x31   :  { %7723 = vst [vmem:[#allocation29_spill] sm:$0xff] %v5420_v32  ;;  %1249 = vmatpush.bf16.msrb.mxu1 %v5420_v32  ;;  %1239 = vmatpush.bf16.msra.mxu0 %v5450_v11  ;;  %v5462_v33 = vor.u32 %v4812_v25, %v4225_v28  ;;  %v4475_v34 = vld [vmem:[#allocation4 + $0x240] sm:$0xf]  ;;  %v4879_v35 = vld [vmem:[#allocation4 + $0x260] sm:$0xf0] }
  0x32   :  { %7732 = vst [vmem:[#allocation38_spill] sm:$0xff] %v5450_v11  ;;  %1226 = vmatpush.bf16.msra.mxu3 %v5458_v27  ;;  %v5470_v40 = vor.u32 %v4879_v35, %v4475_v34  ;;  %v4735_v43 = vld [vmem:[#allocation4 + $0x440] sm:$0xf]  ;;  %v4943_v44 = vld [vmem:[#allocation4 + $0x460] sm:$0xf0] }
  0x33   :  { %1260 = vmatpush.bf16.msra.mxu2 %v5361_v49  ;;  %7735 = vst [vmem:[#allocation41_spill] sm:$0xff] %v5458_v27  ;;  %v4930_v48 = vld [vmem:[#allocation4 + $0x3fc] sm:$0xf]  ;;  %v5473_v51 = vor.u32 %v4943_v44, %v4735_v43  ;;  %v4701_v52 = vld [vmem:[#allocation4 + $0x41c] sm:$0xf0] }
  0x34   :  { %7736 = vst [vmem:[#allocation42_spill] sm:$0xff] %v5462_v33  ;;  %v4187_v55 = vld [vmem:[#allocation4] sm:$0xf]  ;;  %v4807_v59 = vld [vmem:[#allocation4 + $0x20] sm:$0xf0]  ;;  %v5478_v62 = vor.u32 %v4930_v48, %v4701_v52 }
  0x35   :  { %1250 = vmatpush.bf16.msrb.mxu1 %v5434_v47  ;;  %7737 = vst [vmem:[#allocation43_spill] sm:$0xff] %v5470_v40  ;;  %1240 = vmatpush.bf16.msra.mxu0 %v5470_v40  ;;  %v5480_v3 = vor.u32 %v4807_v59, %v4187_v55  ;;  %v4803_v5 = vld [vmem:[#allocation4 + $0x4] sm:$0xf]  ;;  %v4934_v34 = vld [vmem:[#allocation4 + $0x418] sm:$0xf0] }
  0x36   :  { %7738 = vst [vmem:[#allocation44_spill] sm:$0xff] %v5473_v51  ;;  %v4867_v28 = vld [vmem:[#allocation4 + $0x204] sm:$0xf]  ;;  %v4921_v35 = vld [vmem:[#allocation4 + $0x3b4] sm:$0xf] }
  0x37   :  { %1261 = vmatpush.bf16.msra.mxu2 %v5378_v60  ;;  %7739 = vst [vmem:[#allocation45_spill] sm:$0xff] %v5478_v62  ;;  %1227 = vmatpush.bf16.msra.mxu3 %v5480_v3  ;;  %v4665_v43 = vld [vmem:[#allocation4 + $0x3d4] sm:$0xf0]  ;;  %v4862_v48 = vld [vmem:[#allocation4 + $0x1d8] sm:$0xf0] }
  0x38   :  { %7740 = vst [vmem:[#allocation46_spill] sm:$0xff] %v5480_v3  ;;  %v4411_v44 = vld [vmem:[#allocation4 + $0x1b8] sm:$0xf] }
  0x39   :  { %1251 = vmatpush.bf16.msrb.mxu1 %v5447_v4  ;;  %1285 = vmatpush.bf16.msrb.mxu0 %v5473_v51  ;;  %v4817_v4 = vld [vmem:[#allocation4 + $0x70] sm:$0xf0] }
  0x3b   :  { %1262 = vmatpush.bf16.msra.mxu2 %v5391_v9 }
  0x3d   :  { %1252 = vmatpush.bf16.msrb.mxu1 %v5462_v33  ;;  %v4305_v33 = vld [vmem:[#allocation4 + $0x104] sm:$0xf0] }
  0x3f   :  { %1263 = vmatpush.bf16.msra.mxu2 %v5413_v26 }
  0x43   :  { %1264 = vmatpush.bf16.msra.mxu2 %v5426_v38 }
  0x47   :  { %1265 = vmatpush.bf16.msra.mxu2 %v5440_v58  ;;  %v4427_v58 = vld [vmem:[#allocation4 + $0x1c8] sm:$0xf] }
  0x9d   :  { %v187_v15 = vpop.f32.mrf.mxu1 }
  0x9e   :  { %v5401_v17 = vadd.f32 %v187_v15, %v91_v6  ;;  %v4737_v15 = vld [vmem:[#allocation4 + $0x464] sm:$0xf0] }
  0x9f   :  { %v5455_v20 = vor.u32 %v4939_v14, %v4737_v15  ;;  %v4447_v14 = vld [vmem:[#allocation4 + $0x200] sm:$0xf]  ;;  %v4871_v15 = vld [vmem:[#allocation4 + $0x220] sm:$0xf0] }
  0xa0   :  { %218 = vst.sshfl [vmem:[#allocation1 + $0x8] sm:$0xff pattern:$0x73625140] %v5401_v17  ;;  %v209_v29 = vrot.slane %v5401_v17, 6  ;;  %v5494_v25 = vor.u32 %v4871_v15, %v4447_v14 }
  0xa1   :  { %v173_v19 = vpop.f32.mrf.mxu2  ;;  %7734 = vst [vmem:[#allocation40_spill] sm:$0xff] %v5455_v20 }
  0xa2   :  { %v5409_v23 = vadd.f32 %v173_v19, %v90_v18  ;;  %v5453_v19 = vor.u32 %v4875_v10, %v4477_v12  ;;  %v4189_v12 = vld [vmem:[#allocation4 + $0x24] sm:$0xf0]  ;;  %7742 = vst [vmem:[#allocation48_spill] sm:$0xff] %v5494_v25  ;;  %1272 = vmatpush.bf16.msrb.mxu3 %v5494_v25 }
  0xa3   :  { %v5492_v22 = vor.u32 %v4803_v5, %v4189_v12  ;;  %v5511_v5 = vor.u32 %v4862_v48, %v4411_v44  ;;  %v4413_v12 = vld [vmem:[#allocation4 + $0x1dc] sm:$0xf0] }
  0xa4   :  { %217 = vst.sshfl [vmem:[#allocation1] sm:$0xff pattern:$0x73625140] %v5409_v23  ;;  %1266 = vmatpush.bf16.msra.mxu2 %v5453_v19  ;;  %v212_v8 = vsel %vm211_vm1, %v5409_v23, %v209_v29  ;;  %v4449_v29 = vld [vmem:[#allocation4 + $0x224] sm:$0xf0] }
  0xa5   :  { %7733 = vst [vmem:[#allocation39_spill] sm:$0xff] %v5453_v19  ;;  %v189_v37 = vpop.f32.mrf.mxu1  ;;  %1253 = vmatpush.bf16.msrb.mxu1 %v5492_v22 }
  0xa6   :  { %v5486_v10 = vadd.f32 %v189_v37, %v91_v6  ;;  %7741 = vst [vmem:[#allocation47_spill] sm:$0xff] %v5492_v22  ;;  %v5496_v6 = vor.u32 %v4867_v28, %v4449_v29  ;;  %1273 = vmatpush.bf16.msrb.mxu3 %v5511_v5  ;;  %v4341_v22 = vld [vmem:[#allocation4 + $0x14c] sm:$0xf0] }
  0xa7   :  { %7746 = vst [vmem:[#allocation52_spill] sm:$0xff] %v5511_v5  ;;  %v4860_v5 = vld [vmem:[#allocation4 + $0x1cc] sm:$0xf] }
  0xa8   :  { %1311 = vmatpush.bf16.msrb.mxu2 %v5455_v20  ;;  %7743 = vst [vmem:[#allocation49_spill] sm:$0xff] %v5496_v6  ;;  %v244_v52 = vrot.slane %v5486_v10, 6 }
  0xa9   :  { %v5431_v46 = vpop.f32.mrf.mxu2  ;;  %1298 = vmatpush.bf16.msra.mxu1 %v5496_v6  ;;  %v4840_v6 = vld [vmem:[#allocation4 + $0x12c] sm:$0xf] }
  0xaa   :  { %v5506_v55 = vadd.f32 %v5431_v46, %v90_v18  ;;  %v4925_v18 = vld [vmem:[#allocation4 + $0x3d0] sm:$0xf0]  ;;  %v4912_v46 = vld [vmem:[#allocation4 + $0x36c] sm:$0xf] }
  0xac   :  { %1312 = vmatpush.bf16.msrb.mxu2 %v5478_v62 }
  0xb1   :  { %v201_v31 = vpop.f32.mrf.mxu2 }
  0xb2   :  { %v5466_v39 = vadd.f32 %v201_v31, %v92_v63  ;;  %v4699_v31 = vld [vmem:[#allocation4 + $0x3f8] sm:$0xf] }
  0xb3   :  { %v5500_v37 = vor.u32 %v4934_v34, %v4699_v31  ;;  %v4629_v31 = vld [vmem:[#allocation4 + $0x38c] sm:$0xf0] }
  0xb4   :  { %v210_v61 = vrot.slane %v5466_v39, 4  ;;  %219 = vst.sshfl [vmem:[#allocation1 + $0x10] sm:$0xff pattern:$0x73625140] %v5466_v39  ;;  %v5526_v56 = vor.u32 %v4912_v46, %v4629_v31  ;;  %v4627_v46 = vld [vmem:[#allocation4 + $0x368] sm:$0xf] }
  0xb5   :  { %7744 = vst [vmem:[#allocation50_spill] sm:$0xff] %v5500_v37  ;;  %1286 = vmatpush.bf16.msrb.mxu0 %v5500_v37  ;;  %v4916_v31 = vld [vmem:[#allocation4 + $0x388] sm:$0xf0] }
  0xb6   :  { %v214_v21 = vsel %vm213_vm2, %v212_v8, %v210_v61  ;;  %v5509_v61 = vor.u32 %v4921_v35, %v4665_v43  ;;  %v4858_v8 = vld [vmem:[#allocation4 + $0x1bc] sm:$0xf]  ;;  %7749 = vst [vmem:[#allocation55_spill] sm:$0xff] %v5526_v56  ;;  %v246_v35 = vsel %vm211_vm1, %v5506_v55, %v244_v52  ;;  %v4853_v43 = vld [vmem:[#allocation4 + $0x190] sm:$0xf0]  ;;  %v7424_v52 = vmov 0.0|0.0  }
  0xb7   :  { %216 = vst [vmem:[#allocation2] sm:$0x3f] %v214_v21  ;;  %v5518_v15 = vor.u32 %v4858_v8, %v4413_v12  ;;  %v4663_v21 = vld [vmem:[#allocation4 + $0x3b0] sm:$0xf]  ;;  %1241 = vmatmul.bf16.vlgmr.msra.gmra.mxu0 %v7424_v52  ;;  %v4849_v12 = vld [vmem:[#allocation4 + $0x174] sm:$0xf]  ;;  %1267 = vmatmul.bf16.vlgmr.msra.gmra.mxu2 %v7424_v52 }
  0xb8   :  { %7745 = vst [vmem:[#allocation51_spill] sm:$0xff] %v5509_v61  ;;  %1313 = vmatpush.bf16.msrb.mxu2 %v5509_v61  ;;  %v5521_v29 = vor.u32 %v4925_v18, %v4663_v21  ;;  %v4377_v21 = vld [vmem:[#allocation4 + $0x194] sm:$0xf0]  ;;  %v4591_v52 = vld [vmem:[#allocation4 + $0x320] sm:$0xf] }
  0xb9   :  { %v203_v59 = vpop.f32.mrf.mxu2  ;;  %7747 = vst [vmem:[#allocation53_spill] sm:$0xff] %v5518_v15  ;;  %1299 = vmatpush.bf16.msra.mxu1 %v5518_v15  ;;  %v5544_v18 = vor.u32 %v4849_v12, %v4377_v21  ;;  %v4907_v12 = vld [vmem:[#allocation4 + $0x340] sm:$0xf0]  ;;  %v4894_v21 = vld [vmem:[#allocation4 + $0x2dc] sm:$0xf] }
  0xba   :  { %v5515_v14 = vadd.f32 %v203_v59, %v92_v63  ;;  %7748 = vst [vmem:[#allocation54_spill] sm:$0xff] %v5521_v29  ;;  %v4375_v63 = vld [vmem:[#allocation4 + $0x170] sm:$0xf]  ;;  %1287 = vmatpush.bf16.msrb.mxu0 %v5521_v29  ;;  %v4813_v61 = vld [vmem:[#allocation4 + $0x54] sm:$0xf] }
  0xbb   :  { %v221_v28 = vld [vmem:[#allocation1 + $0x1] ss:$4 sm:$0xff]  ;;  %v5537_v59 = vor.u32 %v4853_v43, %v4375_v63  ;;  %7751 = vst [vmem:[#allocation57_spill] sm:$0xff] %v5544_v18  ;;  %v5546_v63 = vor.u32 %v4916_v31, %v4627_v46 }
  0xbc   :  { %225 = vst.sshfl [vmem:[#allocation1] sm:$0xff pattern:$0x73625140] %v5409_v23  ;;  %v245_v34 = vrot.slane %v5515_v14, 4  ;;  %1314 = vmatpush.bf16.msrb.mxu2 %v5526_v56  ;;  %v4844_v43 = vld [vmem:[#allocation4 + $0x148] sm:$0xf0] }
  0xbd   :  { %226 = vst.sshfl [vmem:[#allocation1 + $0x8] sm:$0xff pattern:$0x73625140] %v5401_v17  ;;  %1274 = vmatpush.bf16.msrb.mxu3 %v5537_v59  ;;  %1300 = vmatpush.bf16.msra.mxu1 %v5544_v18  ;;  %v4557_v46 = vld [vmem:[#allocation4 + $0x2fc] sm:$0xf0]  ;;  %v5558_v18 = vor.u32 %v4907_v12, %v4591_v52 }
  0xbe   :  { %227 = vst.sshfl [vmem:[#allocation1 + $0x10] sm:$0xff pattern:$0x73625140] %v5466_v39  ;;  %v5533_v44 = vld [vmem:[#allocation2] sm:$0x3f]  ;;  %v247_v48 = vsel %vm213_vm2, %v246_v35, %v245_v34  ;;  %1288 = vmatpush.bf16.msrb.mxu0 %v5546_v63 }
  0xbf   :  { %7750 = vst [vmem:[#allocation56_spill] sm:$0xff] %v5537_v59  ;;  %v4184_v8 = vmul.f32 -1.442695, %v5533_v44  ;;  %v4903_v34 = vld [vmem:[#allocation4 + $0x324] sm:$0xf]  ;;  %v473_v62 = vrot.slane %v5533_v44, 4 }
  0xc0   :  { %224 = vst [vmem:[#allocation2 + $0x6] sm:$0x3f] %v221_v28  ;;  %v4593_v28 = vld [vmem:[#allocation4 + $0x344] sm:$0xf0]  ;;  %v4555_v56 = vld [vmem:[#allocation4 + $0x2d8] sm:$0xf] }
  0xc1   :  { %250 = vst [vmem:[#allocation2 + $0x18] sm:$0x3f] %v247_v48  ;;  %4960 = vpow2.f32 %v4184_v8  ;;  %v4339_v35 = vld [vmem:[#allocation4 + $0x128] sm:$0xf]  ;;  %v5549_v48 = vor.u32 %v4903_v34, %v4593_v28  ;;  %v5554_v8 = vor.u32 %v4840_v6, %v4341_v22  ;;  %v5560_v34 = vor.u32 %v4894_v21, %v4557_v46  ;;  %v4303_v28 = vld [vmem:[#allocation4 + $0xe0] sm:$0xf] }
  0xc2   :  { %7752 = vst [vmem:[#allocation58_spill] sm:$0xff] %v5546_v63  ;;  %v5551_v15 = vor.u32 %v4844_v43, %v4339_v35  ;;  %v4835_v35 = vld [vmem:[#allocation4 + $0x100] sm:$0xf0]  ;;  %1289 = vmatpush.bf16.msrb.mxu0 %v5558_v18  ;;  %v4898_v12 = vld [vmem:[#allocation4 + $0x2f8] sm:$0xf0] }
  0xc3   :  { %7753 = vst [vmem:[#allocation59_spill] sm:$0xff] %v5549_v48  ;;  %1315 = vmatpush.bf16.msrb.mxu2 %v5549_v48  ;;  %v5563_v43 = vor.u32 %v4835_v35, %v4303_v28  ;;  %v4831_v22 = vld [vmem:[#allocation4 + $0xe4] sm:$0xf]  ;;  %1301 = vmatpush.bf16.msra.mxu1 %v5554_v8  ;;  %v4885_v21 = vld [vmem:[#allocation4 + $0x294] sm:$0xf] }
  0xc4   :  { %7754 = vst [vmem:[#allocation60_spill] sm:$0xff] %v5551_v15  ;;  %1275 = vmatpush.bf16.msrb.mxu3 %v5551_v15  ;;  %v5570_v52 = vor.u32 %v4831_v22, %v4305_v33  ;;  %v4521_v46 = vld [vmem:[#allocation4 + $0x2b4] sm:$0xf0]  ;;  %v4826_v28 = vld [vmem:[#allocation4 + $0xb8] sm:$0xf0] }
  0xc5   :  { %7755 = vst [vmem:[#allocation61_spill] sm:$0xff] %v5554_v8  ;;  %v229_v31 = vld [vmem:[#allocation1 + $0x2] ss:$4 sm:$0xff] }
  0xc6   :  { %7756 = vst [vmem:[#allocation62_spill] sm:$0xff] %v5558_v18  ;;  %v4822_v35 = vld [vmem:[#allocation4 + $0x9c] sm:$0xf]  ;;  %v4519_v22 = vld [vmem:[#allocation4 + $0x290] sm:$0xf] }
  0xc7   :  { %7757 = vst [vmem:[#allocation63_spill] sm:$0xff] %v5560_v34  ;;  %v4961_v6 = vpop.eup %4960  ;;  %1316 = vmatpush.bf16.msrb.mxu2 %v5560_v34  ;;  %1302 = vmatpush.bf16.msra.mxu1 %v5570_v52  ;;  %v4485_v8 = vld [vmem:[#allocation4 + $0x26c] sm:$0xf0]  ;;  %v4529_v15 = vld [vmem:[#allocation4 + $0x2bc] sm:$0xf0] }
  0xc8   :  { %235 = vst.sshfl [vmem:[#allocation1 + $0x10] sm:$0xff pattern:$0x73625140] %v5466_v39  ;;  %v5566_v48 = vadd.f32 1.0, %v4961_v6  ;;  %1276 = vmatpush.bf16.msrb.mxu3 %v5563_v43  ;;  %v5575_v39 = vor.u32 %v4898_v12, %v4555_v56  ;;  %v4889_v56 = vld [vmem:[#allocation4 + $0x2b0] sm:$0xf0] }
  0xc9   :  { %7758 = vst [vmem:[#allocation64_spill] sm:$0xff] %v5563_v43  ;;  %v4876_v12 = vld [vmem:[#allocation4 + $0x24c] sm:$0xf]  ;;  %v5588_v34 = vor.u32 %v4889_v56, %v4519_v22  ;;  %v4743_v22 = vld [vmem:[#allocation4 + $0x448] sm:$0xf] }
  0xca   :  { %232 = vst [vmem:[#allocation2 + $0xc] sm:$0x3f] %v229_v31  ;;  %4962 = vrcp.f32 %v5566_v48  ;;  %v4267_v31 = vld [vmem:[#allocation4 + $0x98] sm:$0xf]  ;;  %1290 = vmatpush.bf16.msrb.mxu0 %v5575_v39  ;;  %v465_v47 = vand.u32 2147483647, %v5566_v48  ;;  %vm461_vm4 = vweird.f32 %v5566_v48 }
  0xcb   :  { %233 = vst.sshfl [vmem:[#allocation1] sm:$0xff pattern:$0x73625140] %v5409_v23  ;;  %v5579_v23 = vor.u32 %v4885_v21, %v4521_v46  ;;  %v5581_v33 = vor.u32 %v4826_v28, %v4267_v31  ;;  %v5590_v21 = vor.u32 %v4876_v12, %v4485_v8  ;;  %v4940_v46 = vld [vmem:[#allocation4 + $0x44c] sm:$0xf] }
  0xcc   :  { %7759 = vst [vmem:[#allocation65_spill] sm:$0xff] %v5570_v52  ;;  %v4745_v31 = vld [vmem:[#allocation4 + $0x46c] sm:$0xf0]  ;;  %vm466_vm6 = vcmp.eq.f32.partialorder %v465_v47, 8.507059e+37 }
  0xcd   :  { %234 = vst.sshfl [vmem:[#allocation1 + $0x8] sm:$0xff pattern:$0x73625140] %v5401_v17  ;;  %v4269_v17 = vld [vmem:[#allocation4 + $0xbc] sm:$0xf0]  ;;  %1317 = vmatpush.bf16.msrb.mxu2 %v5579_v23  ;;  %1277 = vmatpush.bf16.msrb.mxu3 %v5581_v33  ;;  %v5592_v52 = vor.u32 %v4940_v46, %v4745_v31 }
  0xce   :  { %7760 = vst [vmem:[#allocation66_spill] sm:$0xff] %v5575_v39  ;;  %v5584_v6 = vor.u32 %v4822_v35, %v4269_v17  ;;  %v4231_v28 = vld [vmem:[#allocation4 + $0x50] sm:$0xf]  ;;  %v4233_v35 = vld [vmem:[#allocation4 + $0x74] sm:$0xf0]  ;;  %1291 = vmatpush.bf16.msrb.mxu0 %v5588_v34 }
  0xcf   :  { %7761 = vst [vmem:[#allocation67_spill] sm:$0xff] %v5579_v23  ;;  %v5595_v17 = vor.u32 %v4817_v4, %v4231_v28  ;;  %v5597_v43 = vor.u32 %v4813_v61, %v4233_v35  ;;  %v4483_v23 = vld [vmem:[#allocation4 + $0x248] sm:$0xf]  ;;  %v4944_v46 = vld [vmem:[#allocation4 + $0x468] sm:$0xf0] }
  0xd0   :  { %7762 = vst [vmem:[#allocation68_spill] sm:$0xff] %v5581_v33  ;;  %1303 = vmatpush.bf16.msra.mxu1 %v5584_v6  ;;  %v4880_v33 = vld [vmem:[#allocation4 + $0x268] sm:$0xf0]  ;;  %v4963_v56 = vpop.eup %4962  ;;  %v4931_v31 = vld [vmem:[#allocation4 + $0x404] sm:$0xf]  ;;  %v5605_v4 = vor.u32 %v4944_v46, %v4743_v22 }
  0xd1   :  { %7763 = vst [vmem:[#allocation69_spill] sm:$0xff] %v5584_v6  ;;  %v5600_v12 = vor.u32 %v4880_v33, %v4483_v23  ;;  %1318 = vmatpush.bf16.msrb.mxu2 %v5590_v21  ;;  %1278 = vmatpush.bf16.msrb.mxu3 %v5595_v17  ;;  %v4709_v61 = vld [vmem:[#allocation4 + $0x424] sm:$0xf0]  ;;  %v457_v28 = vmul.f32 %v4963_v56, %v5566_v48  ;;  %v467_v33 = vand.u32 2147483648, %v5566_v48  ;;  %v4808_v6 = vld [vmem:[#allocation4 + $0x28] sm:$0xf0]  ;;  %vm462_vm3 = vweird.f32 %v4963_v56 }
  0xd2   :  { %7764 = vst [vmem:[#allocation70_spill] sm:$0xff] %v5588_v34  ;;  %v5610_v35 = vor.u32 %v4931_v31, %v4709_v61  ;;  %v4195_v23 = vld [vmem:[#allocation4 + $0x8] sm:$0xf]  ;;  %v4804_v46 = vld [vmem:[#allocation4 + $0xc] sm:$0xf]  ;;  %vm463_vm5 = vmor %vm461_vm4, %vm462_vm3 }
  0xd3   :  { %7765 = vst [vmem:[#allocation71_spill] sm:$0xff] %v5590_v21  ;;  %v458_v21 = vsub.f32 1.0, %v457_v28  ;;  %1292 = vmatpush.bf16.msrb.mxu0 %v5600_v12  ;;  %v5616_v22 = vor.u32 %v4808_v6, %v4195_v23  ;;  %v5630_v6 = vld [vmem:[%s7410_s3] ss:$0 sm:$0xff]  ;;  %v4707_v28 = vld [vmem:[#allocation4 + $0x400] sm:$0xf] }
  0xd4   :  { %7766 = vst [vmem:[#allocation72_spill] sm:$0xff] %v5592_v52  ;;  %v237_v8 = vld [vmem:[#allocation1 + $0x3] ss:$4 sm:$0xff]  ;;  %1304 = vmatpush.bf16.msra.mxu1 %v5597_v43 }
  0xd5   :  { %7767 = vst [vmem:[#allocation73_spill] sm:$0xff] %v5595_v17  ;;  %1363 = vmatpush.bf16.msra.mxu2 %v5592_v52  ;;  %v4197_v17 = vld [vmem:[#allocation4 + $0x2c] sm:$0xf0]  ;;  %v7773_v52 = vmov 0.0|0.0   ;;  %v459_v61 = vmul.f32 %v4963_v56, %v458_v21  ;;  %1279 = vmatpush.bf16.msrb.mxu3 %v5616_v22  ;;  %v4935_v21 = vld [vmem:[#allocation4 + $0x420] sm:$0xf0] }
  0xd6   :  { %7768 = vst [vmem:[#allocation74_spill] sm:$0xff] %v5597_v43  ;;  %1319 = vmatmul.bf16.vlgmr.msrb.gmra.mxu2 %v7773_v52  ;;  %v5620_v31 = vor.u32 %v4804_v46, %v4197_v17  ;;  %v468_v17 = vor.u32 1.1754944e-38, %v467_v33  ;;  %1293 = vmatmul.bf16.vlgmr.msrb.gmra.mxu0 %v7773_v52  ;;  %v4922_v23 = vld [vmem:[#allocation4 + $0x3bc] sm:$0xf]  ;;  %v4673_v46 = vld [vmem:[#allocation4 + $0x3dc] sm:$0xf0] }
  0xd7   :  { %7769 = vst [vmem:[#allocation75_spill] sm:$0xff] %v5600_v12  ;;  %1337 = vmatpush.bf16.msra.mxu0 %v5605_v4  ;;  %v5635_v48 = vor.u32 %v4922_v23, %v4673_v46  ;;  %v4904_v23 = vld [vmem:[#allocation4 + $0x32c] sm:$0xf]  ;;  %v4601_v46 = vld [vmem:[#allocation4 + $0x34c] sm:$0xf0] }
  0xd8   :  { %251 = vst.sshfl [vmem:[#allocation1] sm:$0xff pattern:$0x73625140] %v5506_v55  ;;  %1305 = vmatpush.bf16.msra.mxu1 %v5620_v31 }
  0xd9   :  { %7770 = vst [vmem:[#allocation76_spill] sm:$0xff] %v5605_v4  ;;  %1364 = vmatpush.bf16.msra.mxu2 %v5610_v35  ;;  %v5633_v4 = vor.u32 %v4935_v21, %v4707_v28  ;;  %v4635_v28 = vld [vmem:[#allocation4 + $0x370] sm:$0xf]  ;;  %v4917_v21 = vld [vmem:[#allocation4 + $0x390] sm:$0xf0] }
  0xda   :  { %252 = vst.sshfl [vmem:[#allocation1 + $0x8] sm:$0xff pattern:$0x73625140] %v5486_v10 }
  0xdb   :  { %7771 = vst [vmem:[#allocation77_spill] sm:$0xff] %v5610_v35  ;;  %1338 = vmatpush.bf16.msra.mxu0 %v5633_v4 }
  0xdc   :  { %253 = vst.sshfl [vmem:[#allocation1 + $0x10] sm:$0xff pattern:$0x73625140] %v5515_v14 }
  0xdd   :  { %240 = vst [vmem:[#allocation2 + $0x12] sm:$0x3f] %v237_v8  ;;  %v460_v8 = vadd.f32 %v4963_v56, %v459_v61  ;;  %1365 = vmatpush.bf16.msra.mxu2 %v5635_v48  ;;  %v4926_v61 = vld [vmem:[#allocation4 + $0x3d8] sm:$0xf0] }
  0xde   :  { %7772 = vst [vmem:[#allocation78_spill] sm:$0xff] %v5616_v22  ;;  %v4671_v22 = vld [vmem:[#allocation4 + $0x3b8] sm:$0xf] }
  0xdf   :  { %7774 = vst [vmem:[#allocation79_spill] sm:$0xff] %v5620_v31  ;;  %v464_v35 = vsel %vm463_vm5, %v4963_v56, %v460_v8  ;;  %v5643_v47 = vor.u32 %v4926_v61, %v4671_v22  ;;  %v4913_v56 = vld [vmem:[#allocation4 + $0x374] sm:$0xf]  ;;  %v4637_v8 = vld [vmem:[#allocation4 + $0x394] sm:$0xf0]  ;;  %v5650_v22 = vor.u32 %v4917_v21, %v4635_v28  ;;  %v5652_v61 = vor.u32 %v4904_v23, %v4601_v46 }
  0xe0   :  { %7775 = vst [vmem:[#allocation80_spill] sm:$0xff] %v5630_v6  ;;  %v469_v43 = vsel %vm466_vm6, %v468_v17, %v464_v35  ;;  %v5646_v44 = vor.u32 %v4913_v56, %v4637_v8  ;;  %v4563_v21 = vld [vmem:[#allocation4 + $0x2e0] sm:$0xf]  ;;  %v4899_v23 = vld [vmem:[#allocation4 + $0x300] sm:$0xf0] }
  0xe1   :  { %7776 = vst [vmem:[#allocation81_spill] sm:$0xff] %v5633_v4  ;;  %v471_v33 = vmul.f32 %v5630_v6, %v469_v43  ;;  %v478_v17 = vrot.slane %v469_v43, 2  ;;  %1339 = vmatpush.bf16.msra.mxu0 %v5643_v47  ;;  %v4895_v43 = vld [vmem:[#allocation4 + $0x2e4] sm:$0xf]  ;;  %v4886_v46 = vld [vmem:[#allocation4 + $0x29c] sm:$0xf] }
  0xe2   :  { %7777 = vst [vmem:[#allocation82_spill] sm:$0xff] %v5635_v48  ;;  %1366 = vmatpush.bf16.msra.mxu2 %v5646_v44  ;;  %v4455_v48 = vld [vmem:[#allocation4 + $0x208] sm:$0xf] }
  0xe3   :  { %v255_v31 = vld [vmem:[#allocation1 + $0x1] ss:$4 sm:$0xff]  ;;  %7778 = vst [vmem:[#allocation83_spill] sm:$0xff] %v5643_v47  ;;  %v475_v35 = vadd.f32 %v473_v62, %v471_v33  ;;  %v480_v8 = vsub.f32 1.0, %v478_v17 }
  0xe4   :  { %259 = vst.sshfl [vmem:[#allocation1] sm:$0xff pattern:$0x73625140] %v5506_v55  ;;  %v4599_v62 = vld [vmem:[#allocation4 + $0x328] sm:$0xf] }
  0xe5   :  { %260 = vst.sshfl [vmem:[#allocation1 + $0x8] sm:$0xff pattern:$0x73625140] %v5486_v10  ;;  %4964 = vtanh.f32 %v475_v35  ;;  %v4908_v33 = vld [vmem:[#allocation4 + $0x348] sm:$0xf0]  ;;  %1340 = vmatpush.bf16.msra.mxu0 %v5650_v22 }
  0xe6   :  { %261 = vst.sshfl [vmem:[#allocation1 + $0x10] sm:$0xff pattern:$0x73625140] %v5515_v14  ;;  %v5655_v56 = vor.u32 %v4908_v33, %v4599_v62  ;;  %v4565_v35 = vld [vmem:[#allocation4 + $0x304] sm:$0xf0]  ;;  %1367 = vmatpush.bf16.msra.mxu2 %v5652_v61 }
  0xe7   :  { %258 = vst [vmem:[#allocation2 + $0x1e] sm:$0x3f] %v255_v31  ;;  %v4872_v31 = vld [vmem:[#allocation4 + $0x228] sm:$0xf0]  ;;  %v5658_v4 = vor.u32 %v4895_v43, %v4565_v35  ;;  %v4419_v33 = vld [vmem:[#allocation4 + $0x1c0] sm:$0xf] }
  0xe8   :  { %7779 = vst [vmem:[#allocation84_spill] sm:$0xff] %v5646_v44  ;;  %v4868_v47 = vld [vmem:[#allocation4 + $0x20c] sm:$0xf]  ;;  %v4457_v44 = vld [vmem:[#allocation4 + $0x22c] sm:$0xf0]  ;;  %v5662_v32 = vor.u32 %v4872_v31, %v4455_v48 }
  0xe9   :  { %7780 = vst [vmem:[#allocation85_spill] sm:$0xff] %v5650_v22  ;;  %v5664_v62 = vor.u32 %v4868_v47, %v4457_v44  ;;  %v4863_v22 = vld [vmem:[#allocation4 + $0x1e0] sm:$0xf0]  ;;  %1341 = vmatpush.bf16.msra.mxu0 %v5655_v56  ;;  %v4421_v35 = vld [vmem:[#allocation4 + $0x1e4] sm:$0xf0] }
  0xea   :  { %7781 = vst [vmem:[#allocation86_spill] sm:$0xff] %v5652_v61  ;;  %v4859_v43 = vld [vmem:[#allocation4 + $0x1c4] sm:$0xf]  ;;  %1368 = vmatpush.bf16.msra.mxu2 %v5658_v4  ;;  %v5672_v61 = vor.u32 %v4899_v23, %v4563_v21  ;;  %v4527_v48 = vld [vmem:[#allocation4 + $0x298] sm:$0xf] }
  0xeb   :  { %7782 = vst [vmem:[#allocation87_spill] sm:$0xff] %v5655_v56  ;;  %v4965_v28 = vpop.eup %4964  ;;  %v4890_v31 = vld [vmem:[#allocation4 + $0x2b8] sm:$0xf0]  ;;  %v4877_v47 = vld [vmem:[#allocation4 + $0x254] sm:$0xf]  ;;  %v5682_v21 = vor.u32 %v4859_v43, %v4421_v35 }
  0xec   :  { %7783 = vst [vmem:[#allocation88_spill] sm:$0xff] %v5658_v4  ;;  %v5660_v6 = vmul.f32 %v4965_v28, %v480_v8  ;;  %v5674_v8 = vor.u32 %v4886_v46, %v4529_v15  ;;  %v4493_v44 = vld [vmem:[#allocation4 + $0x274] sm:$0xf0]  ;;  %v4941_v28 = vld [vmem:[#allocation4 + $0x454] sm:$0xf]  ;;  %v5686_v20 = vor.u32 %v4890_v31, %v4527_v48 }
  0xed   :  { %7785 = vst [vmem:[#allocation90_spill] sm:$0xff] %v5662_v32  ;;  %v4753_v56 = vld [vmem:[#allocation4 + $0x474] sm:$0xf0]  ;;  %v4854_v23 = vld [vmem:[#allocation4 + $0x198] sm:$0xf0]  ;;  %1342 = vmatpush.bf16.msra.mxu0 %v5672_v61  ;;  %v5688_v19 = vor.u32 %v4877_v47, %v4493_v44 }
  0xee   :  { %7784 = vst [vmem:[#allocation89_spill] sm:$0xff] %v5660_v6  ;;  %v5669_v17 = vpack.c.bf16 %v5660_v6, %v5660_v6  ;;  %v5680_v6 = vor.u32 %v4863_v22, %v4419_v33  ;;  %v4383_v15 = vld [vmem:[#allocation4 + $0x178] sm:$0xf]  ;;  %v4850_v46 = vld [vmem:[#allocation4 + $0x17c] sm:$0xf]  ;;  %1369 = vmatpush.bf16.msra.mxu2 %v5674_v8  ;;  %v5690_v59 = vor.u32 %v4941_v28, %v4753_v56 }
  0xef   :  { %7786 = vst [vmem:[#allocation91_spill] sm:$0xff] %v5664_v62  ;;  %v4385_v4 = vld [vmem:[#allocation4 + $0x19c] sm:$0xf0]  ;;  %v4751_v22 = vld [vmem:[#allocation4 + $0x450] sm:$0xf]  ;;  %v5694_v16 = vor.u32 %v4854_v23, %v4383_v15 }
  0xf0   :  { %7787 = vst [vmem:[#allocation92_spill] sm:$0xff] %v5672_v61  ;;  %1228 = vmatmul.bf16.vlgmr.msra.gmra.mxu3 %v5669_v17  ;;  %1254 = vmatmul.bf16.vlgmr.msrb.gmra.mxu1 %v5669_v17  ;;  %v4945_v33 = vld [vmem:[#allocation4 + $0x470] sm:$0xf0]  ;;  %v4932_v43 = vld [vmem:[#allocation4 + $0x40c] sm:$0xf]  ;;  %v5696_v61 = vor.u32 %v4850_v46, %v4385_v4 }
  0xf1   :  { %7788 = vst [vmem:[#allocation93_spill] sm:$0xff] %v5674_v8  ;;  %1324 = vmatpush.bf16.msra.mxu3 %v5662_v32  ;;  %1350 = vmatpush.bf16.msrb.mxu1 %v5664_v62  ;;  %v4491_v32 = vld [vmem:[#allocation4 + $0x250] sm:$0xf]  ;;  %v4881_v62 = vld [vmem:[#allocation4 + $0x270] sm:$0xf0]  ;;  %v5703_v28 = vor.u32 %v4945_v33, %v4751_v22 }
  0xf2   :  { %7789 = vst [vmem:[#allocation94_spill] sm:$0xff] %v5680_v6  ;;  %v4717_v35 = vld [vmem:[#allocation4 + $0x42c] sm:$0xf0]  ;;  %v4845_v31 = vld [vmem:[#allocation4 + $0x150] sm:$0xf0]  ;;  %1343 = vmatpush.bf16.msra.mxu0 %v5686_v20  ;;  %1370 = vmatpush.bf16.msra.mxu2 %v5688_v19  ;;  %v5700_v56 = vor.u32 %v4881_v62, %v4491_v32 }
  0xf3   :  { %7790 = vst [vmem:[#allocation95_spill] sm:$0xff] %v5682_v21  ;;  %v4347_v48 = vld [vmem:[#allocation4 + $0x130] sm:$0xf]  ;;  %v4841_v47 = vld [vmem:[#allocation4 + $0x134] sm:$0xf]  ;;  %v5705_v8 = vor.u32 %v4932_v43, %v4717_v35 }
  0xf4   :  { %7791 = vst [vmem:[#allocation96_spill] sm:$0xff] %v5686_v20  ;;  %v4349_v44 = vld [vmem:[#allocation4 + $0x154] sm:$0xf0]  ;;  %v4715_v15 = vld [vmem:[#allocation4 + $0x408] sm:$0xf] }
  0xf5   :  { %7792 = vst [vmem:[#allocation97_spill] sm:$0xff] %v5688_v19  ;;  %1325 = vmatpush.bf16.msra.mxu3 %v5680_v6  ;;  %1351 = vmatpush.bf16.msrb.mxu1 %v5682_v21  ;;  %v4936_v23 = vld [vmem:[#allocation4 + $0x428] sm:$0xf0]  ;;  %v4923_v4 = vld [vmem:[#allocation4 + $0x3c4] sm:$0xf]  ;;  %v5709_v21 = vor.u32 %v4845_v31, %v4347_v48  ;;  %v5711_v20 = vor.u32 %v4841_v47, %v4349_v44 }
  0xf6   :  { %7793 = vst [vmem:[#allocation98_spill] sm:$0xff] %v5690_v59  ;;  %1415 = vmatpush.bf16.msrb.mxu2 %v5690_v59  ;;  %v4681_v46 = vld [vmem:[#allocation4 + $0x3e4] sm:$0xf0]  ;;  %v4836_v62 = vld [vmem:[#allocation4 + $0x108] sm:$0xf0]  ;;  %1344 = vmatpush.bf16.msra.mxu0 %v5700_v56  ;;  %v5717_v22 = vor.u32 %v4936_v23, %v4715_v15 }
  0xf7   :  { %7794 = vst [vmem:[#allocation99_spill] sm:$0xff] %v5694_v16  ;;  %v4311_v32 = vld [vmem:[#allocation4 + $0xe8] sm:$0xf]  ;;  %v4832_v19 = vld [vmem:[#allocation4 + $0xec] sm:$0xf]  ;;  %1371 = vmatmul.bf16.vlgmr.msra.gmra.mxu2 %v7773_v52  ;;  %v5719_v33 = vor.u32 %v4923_v4, %v4681_v46 }
  0xf8   :  { %7795 = vst [vmem:[#allocation100_spill] sm:$0xff] %v5696_v61  ;;  %v4313_v59 = vld [vmem:[#allocation4 + $0x10c] sm:$0xf0]  ;;  %v4679_v43 = vld [vmem:[#allocation4 + $0x3c0] sm:$0xf]  ;;  %v5723_v47 = vor.u32 %v4836_v62, %v4311_v32 }
  0xf9   :  { %7796 = vst [vmem:[#allocation101_spill] sm:$0xff] %v5700_v56  ;;  %1326 = vmatpush.bf16.msra.mxu3 %v5694_v16  ;;  %1352 = vmatpush.bf16.msrb.mxu1 %v5696_v61  ;;  %v4927_v35 = vld [vmem:[#allocation4 + $0x3e0] sm:$0xf0]  ;;  %v4914_v48 = vld [vmem:[#allocation4 + $0x37c] sm:$0xf]  ;;  %v5725_v44 = vor.u32 %v4832_v19, %v4313_v59 }
  0xfa   :  { %7797 = vst [vmem:[#allocation102_spill] sm:$0xff] %v5703_v28  ;;  %1389 = vmatpush.bf16.msrb.mxu0 %v5703_v28  ;;  %1416 = vmatpush.bf16.msrb.mxu2 %v5705_v8  ;;  %v4645_v31 = vld [vmem:[#allocation4 + $0x39c] sm:$0xf0]  ;;  %v4827_v28 = vld [vmem:[#allocation4 + $0xc0] sm:$0xf0]  ;;  %v5730_v15 = vor.u32 %v4927_v35, %v4679_v43 }
  0xfb   :  { %7798 = vst [vmem:[#allocation103_spill] sm:$0xff] %v5705_v8  ;;  %v4275_v56 = vld [vmem:[#allocation4 + $0xa0] sm:$0xf]  ;;  %v4823_v61 = vld [vmem:[#allocation4 + $0xa4] sm:$0xf]  ;;  %1345 = vmatmul.bf16.vlgmr.msra.gmra.mxu0 %v7773_v52  ;;  %v5732_v23 = vor.u32 %v4914_v48, %v4645_v31 }
  0xfc   :  { %7799 = vst [vmem:[#allocation104_spill] sm:$0xff] %v5709_v21  ;;  %v4277_v8 = vld [vmem:[#allocation4 + $0xc4] sm:$0xf0]  ;;  %v4643_v4 = vld [vmem:[#allocation4 + $0x378] sm:$0xf]  ;;  %v5738_v32 = vor.u32 %v4827_v28, %v4275_v56 }
  0xfd   :  { %7800 = vst [vmem:[#allocation105_spill] sm:$0xff] %v5711_v20  ;;  %1327 = vmatpush.bf16.msra.mxu3 %v5709_v21  ;;  %1353 = vmatpush.bf16.msrb.mxu1 %v5711_v20  ;;  %v4918_v19 = vld [vmem:[#allocation4 + $0x398] sm:$0xf0]  ;;  %v4905_v59 = vld [vmem:[#allocation4 + $0x334] sm:$0xf]  ;;  %v5740_v62 = vor.u32 %v4823_v61, %v4277_v8 }
  0xfe   :  { %7801 = vst [vmem:[#allocation106_spill] sm:$0xff] %v5717_v22  ;;  %1390 = vmatpush.bf16.msrb.mxu0 %v5717_v22  ;;  %1417 = vmatpush.bf16.msrb.mxu2 %v5719_v33  ;;  %v4609_v46 = vld [vmem:[#allocation4 + $0x354] sm:$0xf0]  ;;  %v4818_v35 = vld [vmem:[#allocation4 + $0x78] sm:$0xf0] }
  0xff   :  { %7802 = vst [vmem:[#allocation107_spill] sm:$0xff] %v5719_v33  ;;  %v4239_v43 = vld [vmem:[#allocation4 + $0x58] sm:$0xf]  ;;  %v4814_v48 = vld [vmem:[#allocation4 + $0x5c] sm:$0xf]  ;;  %v5744_v33 = vor.u32 %v4918_v19, %v4643_v4  ;;  %v5746_v22 = vor.u32 %v4905_v59, %v4609_v46 }
 0x100   :  { %7803 = vst [vmem:[#allocation108_spill] sm:$0xff] %v5723_v47  ;;  %1280 = vmatmul.bf16.vlgmr.msrb.gmra.mxu3 %v5669_v17  ;;  %1306 = vmatmul.bf16.vlgmr.msra.gmra.mxu1 %v5669_v17  ;;  %v4241_v31 = vld [vmem:[#allocation4 + $0x7c] sm:$0xf0]  ;;  %v4607_v20 = vld [vmem:[#allocation4 + $0x330] sm:$0xf]  ;;  %v5750_v61 = vor.u32 %v4818_v35, %v4239_v43 }
 0x101   :  { %7804 = vst [vmem:[#allocation109_spill] sm:$0xff] %v5725_v44  ;;  %1328 = vmatpush.bf16.msra.mxu3 %v5723_v47  ;;  %1354 = vmatpush.bf16.msrb.mxu1 %v5725_v44  ;;  %v4203_v47 = vld [vmem:[#allocation4 + $0x10] sm:$0xf]  ;;  %v4909_v21 = vld [vmem:[#allocation4 + $0x350] sm:$0xf0]  ;;  %v5752_v8 = vor.u32 %v4814_v48, %v4241_v31 }
 0x102   :  { %7805 = vst [vmem:[#allocation110_spill] sm:$0xff] %v5730_v15  ;;  %1391 = vmatpush.bf16.msrb.mxu0 %v5730_v15  ;;  %1418 = vmatpush.bf16.msrb.mxu2 %v5732_v23  ;;  %v4896_v44 = vld [vmem:[#allocation4 + $0x2ec] sm:$0xf]  ;;  %v4573_v56 = vld [vmem:[#allocation4 + $0x30c] sm:$0xf0]  ;;  %v5756_v6 = vor.u32 %v4909_v21, %v4607_v20 }
 0x103   :  { %7806 = vst [vmem:[#allocation111_spill] sm:$0xff] %v5732_v23  ;;  %v4809_v28 = vld [vmem:[#allocation4 + $0x30] sm:$0xf0]  ;;  %v4205_v23 = vld [vmem:[#allocation4 + $0x34] sm:$0xf0] }
 0x104   :  { %7807 = vst [vmem:[#allocation112_spill] sm:$0xff] %v5738_v32  ;;  %v4805_v15 = vld [vmem:[#allocation4 + $0x14] sm:$0xf]  ;;  %v4463_v4 = vld [vmem:[#allocation4 + $0x210] sm:$0xf] }
 0x105   :  { %7808 = vst [vmem:[#allocation113_spill] sm:$0xff] %v5740_v62  ;;  %1329 = vmatpush.bf16.msra.mxu3 %v5738_v32  ;;  %1355 = vmatpush.bf16.msrb.mxu1 %v5740_v62  ;;  %v4873_v19 = vld [vmem:[#allocation4 + $0x230] sm:$0xf0]  ;;  %v4465_v16 = vld [vmem:[#allocation4 + $0x234] sm:$0xf0]  ;;  %v5758_v32 = vor.u32 %v4896_v44, %v4573_v56  ;;  %v5762_v62 = vor.u32 %v4809_v28, %v4203_v47 }
 0x106   :  { %7809 = vst [vmem:[#allocation114_spill] sm:$0xff] %v5744_v33  ;;  %v263_v59 = vld [vmem:[#allocation1 + $0x2] ss:$4 sm:$0xff]  ;;  %1392 = vmatpush.bf16.msrb.mxu0 %v5744_v33  ;;  %1419 = vmatpush.bf16.msrb.mxu2 %v5746_v22  ;;  %v5764_v12 = vor.u32 %v4805_v15, %v4205_v23  ;;  %v5767_v20 = vor.u32 %v4873_v19, %v4463_v4 }
 0x107   :  { %7810 = vst [vmem:[#allocation115_spill] sm:$0xff] %v5746_v22  ;;  %v4869_v46 = vld [vmem:[#allocation4 + $0x214] sm:$0xf]  ;;  %v4571_v43 = vld [vmem:[#allocation4 + $0x2e8] sm:$0xf] }
 0x108   :  { %7811 = vst [vmem:[#allocation116_spill] sm:$0xff] %v5750_v61  ;;  %v4900_v35 = vld [vmem:[#allocation4 + $0x308] sm:$0xf0]  ;;  %v4887_v48 = vld [vmem:[#allocation4 + $0x2a4] sm:$0xf]  ;;  %v5769_v21 = vor.u32 %v4869_v46, %v4465_v16 }
 0x109   :  { %7812 = vst [vmem:[#allocation117_spill] sm:$0xff] %v5752_v8  ;;  %v4537_v31 = vld [vmem:[#allocation4 + $0x2c4] sm:$0xf0]  ;;  %1330 = vmatpush.bf16.msra.mxu3 %v5750_v61  ;;  %1356 = vmatpush.bf16.msrb.mxu1 %v5752_v8  ;;  %v4864_v33 = vld [vmem:[#allocation4 + $0x1e8] sm:$0xf0]  ;;  %v5773_v47 = vor.u32 %v4900_v35, %v4571_v43 }
 0x10a   :  { %7813 = vst [vmem:[#allocation118_spill] sm:$0xff] %v5756_v6  ;;  %v4429_v44 = vld [vmem:[#allocation4 + $0x1ec] sm:$0xf0]  ;;  %v4535_v56 = vld [vmem:[#allocation4 + $0x2a0] sm:$0xf]  ;;  %1393 = vmatpush.bf16.msrb.mxu0 %v5756_v6  ;;  %1420 = vmatpush.bf16.msrb.mxu2 %v5758_v32  ;;  %v5775_v15 = vor.u32 %v4887_v48, %v4537_v31  ;;  %v5783_v16 = vor.u32 %v4864_v33, %v4427_v58 }
 0x10b   :  { %7814 = vst [vmem:[#allocation119_spill] sm:$0xff] %v5758_v32  ;;  %v4891_v22 = vld [vmem:[#allocation4 + $0x2c0] sm:$0xf0]  ;;  %v4878_v23 = vld [vmem:[#allocation4 + $0x25c] sm:$0xf] }
 0x10c   :  { %7815 = vst [vmem:[#allocation120_spill] sm:$0xff] %v5762_v62  ;;  %v4501_v28 = vld [vmem:[#allocation4 + $0x27c] sm:$0xf0]  ;;  %v4855_v19 = vld [vmem:[#allocation4 + $0x1a0] sm:$0xf0] }
 0x10d   :  { %7816 = vst [vmem:[#allocation121_spill] sm:$0xff] %v5764_v12  ;;  %1331 = vmatpush.bf16.msra.mxu3 %v5762_v62  ;;  %1357 = vmatpush.bf16.msrb.mxu1 %v5764_v12  ;;  %v4391_v4 = vld [vmem:[#allocation4 + $0x180] sm:$0xf]  ;;  %v4851_v46 = vld [vmem:[#allocation4 + $0x184] sm:$0xf]  ;;  %v5791_v43 = vor.u32 %v4878_v23, %v4501_v28 }
 0x10e   :  { %267 = vst.sshfl [vmem:[#allocation1] sm:$0xff pattern:$0x73625140] %v5506_v55  ;;  %v5785_v55 = vor.u32 %v4860_v5, %v4429_v44  ;;  %1394 = vmatpush.bf16.msrb.mxu0 %v5773_v47  ;;  %1421 = vmatpush.bf16.msrb.mxu2 %v5775_v15  ;;  %v4499_v58 = vld [vmem:[#allocation4 + $0x258] sm:$0xf] }
 0x10f   :  { %7817 = vst [vmem:[#allocation122_spill] sm:$0xff] %v5767_v20  ;;  %v4882_v5 = vld [vmem:[#allocation4 + $0x278] sm:$0xf0]  ;;  %v4759_v33 = vld [vmem:[#allocation4 + $0x458] sm:$0xf] }
 0x110   :  { %7818 = vst [vmem:[#allocation123_spill] sm:$0xff] %v5769_v21  ;;  %1332 = vmatmul.bf16.vlgmr.msra.gmra.mxu3 %v5669_v17  ;;  %1358 = vmatmul.bf16.vlgmr.msrb.gmra.mxu1 %v5669_v17  ;;  %v4946_v35 = vld [vmem:[#allocation4 + $0x478] sm:$0xf0]  ;;  %v5803_v23 = vor.u32 %v4882_v5, %v4499_v58  ;;  %v4723_v32 = vld [vmem:[#allocation4 + $0x410] sm:$0xf] }
 0x111   :  { %7819 = vst [vmem:[#allocation124_spill] sm:$0xff] %v5773_v47  ;;  %1376 = vmatpush.bf16.msrb.mxu3 %v5767_v20  ;;  %1402 = vmatpush.bf16.msra.mxu1 %v5769_v21  ;;  %v4846_v31 = vld [vmem:[#allocation4 + $0x158] sm:$0xf0]  ;;  %v5805_v28 = vor.u32 %v4946_v35, %v4759_v33  ;;  %v4833_v58 = vld [vmem:[#allocation4 + $0xf4] sm:$0xf] }
 0x112   :  { %7820 = vst [vmem:[#allocation125_spill] sm:$0xff] %v5775_v15  ;;  %v4842_v44 = vld [vmem:[#allocation4 + $0x13c] sm:$0xf]  ;;  %1422 = vmatpush.bf16.msrb.mxu2 %v5791_v43  ;;  %v4321_v5 = vld [vmem:[#allocation4 + $0x114] sm:$0xf0] }
 0x113   :  { %268 = vst.sshfl [vmem:[#allocation1 + $0x8] sm:$0xff pattern:$0x73625140] %v5486_v10  ;;  %v4393_v10 = vld [vmem:[#allocation4 + $0x1a4] sm:$0xf0] }
 0x114   :  { %269 = vst.sshfl [vmem:[#allocation1 + $0x10] sm:$0xff pattern:$0x73625140] %v5515_v14  ;;  %v5789_v14 = vor.u32 %v4891_v22, %v4535_v56  ;;  %v5799_v48 = vor.u32 %v4851_v46, %v4393_v10  ;;  %v4355_v22 = vld [vmem:[#allocation4 + $0x138] sm:$0xf] }
 0x115   :  { %266 = vst [vmem:[#allocation2 + $0x24] sm:$0x3f] %v263_v59  ;;  %1377 = vmatpush.bf16.msrb.mxu3 %v5783_v16  ;;  %1403 = vmatpush.bf16.msra.mxu1 %v5785_v55  ;;  %v5797_v59 = vor.u32 %v4855_v19, %v4391_v4  ;;  %v4357_v56 = vld [vmem:[#allocation4 + $0x15c] sm:$0xf0]  ;;  %v4937_v4 = vld [vmem:[#allocation4 + $0x430] sm:$0xf0]  ;;  %v5810_v19 = vor.u32 %v4846_v31, %v4355_v22 }
 0x116   :  { %7821 = vst [vmem:[#allocation126_spill] sm:$0xff] %v5789_v14  ;;  %1395 = vmatpush.bf16.msrb.mxu0 %v5789_v14  ;;  %1583 = vmatpush.bf16.msra.mxu2 %v5359_v45  ;;  %v5812_v46 = vor.u32 %v4842_v44, %v4357_v56  ;;  %v4319_v10 = vld [vmem:[#allocation4 + $0xf0] sm:$0xf]  ;;  %v5817_v33 = vor.u32 %v4937_v4, %v4723_v32  ;;  %v4928_v35 = vld [vmem:[#allocation4 + $0x3e8] sm:$0xf0] }
 0x117   :  { %7822 = vst [vmem:[#allocation127_spill] sm:$0xff] %v5791_v43  ;;  %v4837_v43 = vld [vmem:[#allocation4 + $0x110] sm:$0xf0]  ;;  %1423 = vmatmul.bf16.vlgmr.msrb.gmra.mxu2 %v7773_v52  ;;  %v5824_v31 = vor.u32 %v4833_v58, %v4321_v5  ;;  %v4283_v44 = vld [vmem:[#allocation4 + $0xa8] sm:$0xf] }
 0x118   :  { %7823 = vst [vmem:[#allocation128_spill] sm:$0xff] %v5803_v23  ;;  %v5822_v22 = vor.u32 %v4837_v43, %v4319_v10  ;;  %v4828_v56 = vld [vmem:[#allocation4 + $0xc8] sm:$0xf0]  ;;  %v4651_v4 = vld [vmem:[#allocation4 + $0x380] sm:$0xf] }
 0x119   :  { %7824 = vst [vmem:[#allocation129_spill] sm:$0xff] %v5805_v28  ;;  %1378 = vmatpush.bf16.msrb.mxu3 %v5797_v59  ;;  %1404 = vmatpush.bf16.msra.mxu1 %v5799_v48  ;;  %v4824_v45 = vld [vmem:[#allocation4 + $0xac] sm:$0xf]  ;;  %v5833_v43 = vor.u32 %v4828_v56, %v4283_v44  ;;  %v4247_v58 = vld [vmem:[#allocation4 + $0x60] sm:$0xf] }
 0x11a   :  { %1396 = vmatpush.bf16.msrb.mxu0 %v5803_v23  ;;  %7825 = vst [vmem:[#allocation130_spill] sm:$0xff] %v5817_v33  ;;  %1584 = vmatpush.bf16.msra.mxu2 %v5376_v57  ;;  %v4285_v23 = vld [vmem:[#allocation4 + $0xcc] sm:$0xf0]  ;;  %v4919_v57 = vld [vmem:[#allocation4 + $0x3a0] sm:$0xf0] }
 0x11b   :  { %v271_v15 = vld [vmem:[#allocation1 + $0x3] ss:$4 sm:$0xff]  ;;  %7826 = vst [vmem:[#allocation131_spill] sm:$0xff] %v5824_v31  ;;  %v5835_v10 = vor.u32 %v4824_v45, %v4285_v23 }
 0x11c   :  { %274 = vst [vmem:[#allocation2 + $0x2a] sm:$0x3f] %v271_v15  ;;  %v4687_v15 = vld [vmem:[#allocation4 + $0x3c8] sm:$0xf]  ;;  %v4819_v5 = vld [vmem:[#allocation4 + $0x80] sm:$0xf0] }
 0x11d   :  { %1379 = vmatpush.bf16.msrb.mxu3 %v5810_v19  ;;  %1405 = vmatpush.bf16.msra.mxu1 %v5812_v46  ;;  %v5828_v32 = vor.u32 %v4928_v35, %v4687_v15  ;;  %7828 = vst [vmem:[#allocation133_spill] sm:$0xff] %v5833_v43  ;;  %v4249_v14 = vld [vmem:[#allocation4 + $0x84] sm:$0xf0]  ;;  %v5838_v15 = vor.u32 %v4919_v57, %v4651_v4  ;;  %v4615_v35 = vld [vmem:[#allocation4 + $0x338] sm:$0xf] }
 0x11e   :  { %1441 = vmatpush.bf16.msra.mxu0 %v5805_v28  ;;  %1585 = vmatpush.bf16.msra.mxu2 %v5388_v7  ;;  %7829 = vst [vmem:[#allocation134_spill] sm:$0xff] %v5835_v10  ;;  %v4815_v28 = vld [vmem:[#allocation4 + $0x64] sm:$0xf]  ;;  %v4910_v7 = vld [vmem:[#allocation4 + $0x358] sm:$0xf0]  ;;  %v5843_v44 = vor.u32 %v4819_v5, %v4247_v58 }
 0x11f   :  { %1397 = vmatmul.bf16.vlgmr.msrb.gmra.mxu0 %v7773_v52  ;;  %7827 = vst [vmem:[#allocation132_spill] sm:$0xff] %v5828_v32  ;;  %v5845_v45 = vor.u32 %v4815_v28, %v4249_v14  ;;  %v4211_v23 = vld [vmem:[#allocation4 + $0x18] sm:$0xf]  ;;  %v4810_v56 = vld [vmem:[#allocation4 + $0x38] sm:$0xf0]  ;;  %v5848_v57 = vor.u32 %v4910_v7, %v4615_v35 }
 0x120   :  { %7830 = vst [vmem:[#allocation135_spill] sm:$0xff] %v5838_v15  ;;  %v4213_v47 = vld [vmem:[#allocation4 + $0x3c] sm:$0xf0]  ;;  %v4471_v6 = vld [vmem:[#allocation4 + $0x218] sm:$0xf]  ;;  %v5853_v14 = vor.u32 %v4810_v56, %v4211_v23 }
 0x121   :  { %1380 = vmatpush.bf16.msrb.mxu3 %v5822_v22  ;;  %1406 = vmatpush.bf16.msra.mxu1 %v5824_v31  ;;  %7831 = vst [vmem:[#allocation136_spill] sm:$0xff] %v5843_v44  ;;  %v4579_v4 = vld [vmem:[#allocation4 + $0x2f0] sm:$0xf]  ;;  %v4543_v35 = vld [vmem:[#allocation4 + $0x2a8] sm:$0xf] }
 0x122   :  { %1442 = vmatpush.bf16.msra.mxu0 %v5817_v33  ;;  %1586 = vmatpush.bf16.msra.mxu2 %v5411_v24  ;;  %7832 = vst [vmem:[#allocation137_spill] sm:$0xff] %v5845_v45  ;;  %v4806_v33 = vld [vmem:[#allocation4 + $0x1c] sm:$0xf]  ;;  %v4901_v24 = vld [vmem:[#allocation4 + $0x310] sm:$0xf0] }
 0x123   :  { %7833 = vst [vmem:[#allocation138_spill] sm:$0xff] %v5848_v57  ;;  %v5855_v28 = vor.u32 %v4806_v33, %v4213_v47  ;;  %v4435_v5 = vld [vmem:[#allocation4 + $0x1d0] sm:$0xf]  ;;  %v5860_v7 = vor.u32 %v4901_v24, %v4579_v4  ;;  %v4856_v33 = vld [vmem:[#allocation4 + $0x1a8] sm:$0xf0] }
 0x124   :  { %7834 = vst [vmem:[#allocation139_spill] sm:$0xff] %v5853_v14  ;;  %v4883_v23 = vld [vmem:[#allocation4 + $0x280] sm:$0xf0]  ;;  %v4363_v56 = vld [vmem:[#allocation4 + $0x140] sm:$0xf] }
 0x125   :  { %1381 = vmatpush.bf16.msrb.mxu3 %v5833_v43  ;;  %1407 = vmatpush.bf16.msra.mxu1 %v5835_v10  ;;  %7835 = vst [vmem:[#allocation140_spill] sm:$0xff] %v5855_v28  ;;  %v4865_v10 = vld [vmem:[#allocation4 + $0x1f0] sm:$0xf0]  ;;  %v4847_v4 = vld [vmem:[#allocation4 + $0x160] sm:$0xf0] }
 0x126   :  { %1443 = vmatpush.bf16.msra.mxu0 %v5828_v32  ;;  %v4874_v32 = vld [vmem:[#allocation4 + $0x238] sm:$0xf0]  ;;  %1587 = vmatpush.bf16.msra.mxu2 %v5423_v36  ;;  %7837 = vst [vmem:[#allocation142_spill] sm:$0xff] %v5860_v7  ;;  %v4892_v36 = vld [vmem:[#allocation4 + $0x2c8] sm:$0xf0]  ;;  %v5866_v47 = vor.u32 %v4865_v10, %v4435_v5  ;;  %v5885_v5 = vor.u32 %v4847_v4, %v4363_v56 }
 0x127   :  { %v5857_v58 = vor.u32 %v4874_v32, %v4471_v6  ;;  %v4399_v6 = vld [vmem:[#allocation4 + $0x188] sm:$0xf]  ;;  %v5870_v24 = vor.u32 %v4892_v36, %v4543_v35  ;;  %v4507_v32 = vld [vmem:[#allocation4 + $0x260] sm:$0xf]  ;;  %v4327_v35 = vld [vmem:[#allocation4 + $0xf8] sm:$0xf] }
 0x128   :  { %7838 = vst [vmem:[#allocation143_spill] sm:$0xff] %v5866_v47  ;;  %v5876_v10 = vor.u32 %v4856_v33, %v4399_v6  ;;  %v5880_v36 = vor.u32 %v4883_v23, %v4507_v32  ;;  %v4838_v6 = vld [vmem:[#allocation4 + $0x118] sm:$0xf0]  ;;  %v4291_v32 = vld [vmem:[#allocation4 + $0xb0] sm:$0xf] }
 0x129   :  { %1382 = vmatpush.bf16.msrb.mxu3 %v5843_v44  ;;  %1408 = vmatpush.bf16.msra.mxu1 %v5845_v45  ;;  %7836 = vst [vmem:[#allocation141_spill] sm:$0xff] %v5857_v58  ;;  %v5892_v33 = vor.u32 %v4838_v6, %v4327_v35  ;;  %v4829_v23 = vld [vmem:[#allocation4 + $0xd0] sm:$0xf0]  ;;  %v4255_v4 = vld [vmem:[#allocation4 + $0x68] sm:$0xf] }
 0x12a   :  { %1444 = vmatpush.bf16.msra.mxu0 %v5838_v15  ;;  %1588 = vmatpush.bf16.msra.mxu2 %v5437_v54  ;;  %7839 = vst [vmem:[#allocation144_spill] sm:$0xff] %v5870_v24  ;;  %v5899_v56 = vor.u32 %v4829_v23, %v4291_v32  ;;  %v4219_v35 = vld [vmem:[#allocation4 + $0x20] sm:$0xf]  ;;  %v4811_v6 = vld [vmem:[#allocation4 + $0x40] sm:$0xf0]  ;;  %v7870_v54 = vld [vmem:[#allocation53_spill] sm:$0xff] }
 0x12b   :  { %7840 = vst [vmem:[#allocation145_spill] sm:$0xff] %v5876_v10  ;;  %v5911_v23 = vor.u32 %v4811_v6, %v4219_v35  ;;  %v7847_v35 = vld [vmem:[#allocation52_spill] sm:$0xff]  ;;  %v7848_v6 = vld [vmem:[#allocation35_spill] sm:$0xff]  ;;  %v7872_v15 = vld [vmem:[#allocation57_spill] sm:$0xff] }
 0x12c   :  { %7841 = vst [vmem:[#allocation146_spill] sm:$0xff] %v5880_v36 }
 0x12d   :  { %1383 = vmatpush.bf16.msrb.mxu3 %v5853_v14  ;;  %1409 = vmatpush.bf16.msra.mxu1 %v5855_v28  ;;  %7842 = vst [vmem:[#allocation147_spill] sm:$0xff] %v5885_v5 }
 0x12e   :  { %1445 = vmatpush.bf16.msra.mxu0 %v5848_v57  ;;  %1589 = vmatpush.bf16.msra.mxu2 %v5450_v11  ;;  %7843 = vst [vmem:[#allocation148_spill] sm:$0xff] %v5892_v33  ;;  %v7867_v11 = vld [vmem:[#allocation49_spill] sm:$0xff] }
 0x12f   :  { %7844 = vst [vmem:[#allocation149_spill] sm:$0xff] %v5899_v56 }
 0x130   :  { %1384 = vmatmul.bf16.vlgmr.msrb.gmra.mxu3 %v5669_v17  ;;  %1410 = vmatmul.bf16.vlgmr.msra.gmra.mxu1 %v5669_v17  ;;  %7846 = vst [vmem:[#allocation151_spill] sm:$0xff] %v5911_v23 }
 0x131   :  { %1428 = vmatpush.bf16.msra.mxu3 %v5857_v58  ;;  %1570 = vmatpush.bf16.msrb.mxu1 %v5363_v50 }
 0x132   :  { %1446 = vmatpush.bf16.msra.mxu0 %v5860_v7  ;;  %1590 = vmatpush.bf16.msra.mxu2 %v5470_v40  ;;  %v7866_v40 = vld [vmem:[#allocation47_spill] sm:$0xff] }
 0x133   :  { %v7871_v7 = vld [vmem:[#allocation67_spill] sm:$0xff] }
 0x134   :  { %v1242_v32 = vpop.f32.mrf.mxu0 }
 0x135   :  { %1429 = vmatpush.bf16.msra.mxu3 %v5866_v47  ;;  %1571 = vmatpush.bf16.msrb.mxu1 %v5381_v0 }
 0x136   :  { %1447 = vmatpush.bf16.msra.mxu0 %v5870_v24  ;;  %1635 = vmatpush.bf16.msrb.mxu2 %v5473_v51  ;;  %v7863_v51 = vld [vmem:[#allocation42_spill] sm:$0xff]  ;;  %v7869_v24 = vld [vmem:[#allocation63_spill] sm:$0xff] }
 0x139   :  { %1430 = vmatpush.bf16.msra.mxu3 %v5876_v10  ;;  %1572 = vmatpush.bf16.msrb.mxu1 %v5394_v13 }
 0x13a   :  { %1448 = vmatpush.bf16.msra.mxu0 %v5880_v36  ;;  %1636 = vmatpush.bf16.msrb.mxu2 %v5500_v37  ;;  %v4820_v37 = vld [vmem:[#allocation4 + $0x88] sm:$0xf0] }
 0x13d   :  { %1431 = vmatpush.bf16.msra.mxu3 %v5885_v5  ;;  %1449 = vmatmul.bf16.vlgmr.msra.gmra.mxu0 %v7773_v52  ;;  %v5905_v52 = vor.u32 %v4820_v37, %v4255_v4  ;;  %v1244_v37 = vpop.f32.mrf.mxu0  ;;  %v1268_v4 = vpop.f32.mrf.mxu2 }
 0x13e   :  { %1609 = vmatpush.bf16.msrb.mxu0 %v5356_v41  ;;  %1573 = vmatpush.bf16.msrb.mxu1 %v5417_v30  ;;  %v7865_v41 = vld [vmem:[#allocation59_spill] sm:$0xff] }
 0x13f   :  { %1637 = vmatpush.bf16.msrb.mxu2 %v5521_v29  ;;  %7845 = vst [vmem:[#allocation150_spill] sm:$0xff] %v5905_v52  ;;  %v7857_v29 = vld [vmem:[#allocation33_spill] sm:$0xff] }
 0x141   :  { %1432 = vmatpush.bf16.msra.mxu3 %v5892_v33 }
 0x142   :  { %1610 = vmatpush.bf16.msrb.mxu0 %v5361_v49  ;;  %1574 = vmatpush.bf16.msrb.mxu1 %v5429_v42 }
 0x143   :  { %1638 = vmatpush.bf16.msrb.mxu2 %v5546_v63  ;;  %v7852_v63 = vld [vmem:[#allocation39_spill] sm:$0xff] }
 0x145   :  { %1433 = vmatpush.bf16.msra.mxu3 %v5899_v56  ;;  %v1270_v37 = vpop.f32.mrf.mxu2 }
 0x146   :  { %1611 = vmatpush.bf16.msrb.mxu0 %v5378_v60  ;;  %1575 = vmatpush.bf16.msrb.mxu1 %v5444_v1  ;;  %v7860_v60 = vld [vmem:[#allocation37_spill] sm:$0xff] }
 0x147   :  { %1639 = vmatpush.bf16.msrb.mxu2 %v5558_v18  ;;  %v7850_v18 = vld [vmem:[#allocation25_spill] sm:$0xff] }
 0x148   :  { %v7864_v37 = vld [vmem:[#allocation73_spill] sm:$0xff] }
 0x149   :  { %1434 = vmatpush.bf16.msra.mxu3 %v5905_v52 }
 0x14a   :  { %1612 = vmatpush.bf16.msrb.mxu0 %v5391_v9  ;;  %1576 = vmatpush.bf16.msrb.mxu1 %v5458_v27  ;;  %v7856_v9 = vld [vmem:[#allocation45_spill] sm:$0xff] }
 0x14b   :  { %1640 = vmatpush.bf16.msrb.mxu2 %v5575_v39  ;;  %v7849_v39 = vld [vmem:[#allocation75_spill] sm:$0xff] }
 0x14d   :  { %1435 = vmatpush.bf16.msra.mxu3 %v5911_v23 }
 0x14e   :  { %1613 = vmatpush.bf16.msrb.mxu0 %v5413_v26  ;;  %1577 = vmatpush.bf16.msrb.mxu1 %v5480_v3  ;;  %v7851_v26 = vld [vmem:[#allocation56_spill] sm:$0xff] }
 0x14f   :  { %1641 = vmatpush.bf16.msrb.mxu2 %v5588_v34  ;;  %v7855_v34 = vld [vmem:[#allocation60_spill] sm:$0xff] }
 0x150   :  { %1436 = vmatmul.bf16.vlgmr.msra.gmra.mxu3 %v5669_v17  ;;  %v7854_v17 = vld [vmem:[#allocation29_spill] sm:$0xff] }
 0x151   :  { %1596 = vmatpush.bf16.msrb.mxu3 %v5366_v53 }
 0x152   :  { %1622 = vmatpush.bf16.msra.mxu1 %v5494_v25  ;;  %1614 = vmatpush.bf16.msrb.mxu0 %v5426_v38  ;;  %v7853_v38 = vld [vmem:[#allocation40_spill] sm:$0xff] }
 0x153   :  { %1642 = vmatpush.bf16.msrb.mxu2 %v7849_v39  ;;  %v7859_v39 = vld [vmem:[#allocation51_spill] sm:$0xff]  ;;  %v7879_v25 = vld [vmem:[#allocation80_spill] sm:$0xff] }
 0x155   :  { %1597 = vmatpush.bf16.msrb.mxu3 %v5384_v2 }
 0x156   :  { %1623 = vmatpush.bf16.msra.mxu1 %v7847_v35  ;;  %1615 = vmatpush.bf16.msrb.mxu0 %v7848_v6  ;;  %v7858_v6 = vld [vmem:[#allocation64_spill] sm:$0xff] }
 0x159   :  { %1598 = vmatpush.bf16.msrb.mxu3 %v7850_v18  ;;  %v5938_v49 = vpop.f32.mrf.mxu2 }
 0x15a   :  { %1624 = vmatpush.bf16.msra.mxu1 %v7851_v26  ;;  %1616 = vmatpush.bf16.msrb.mxu0 %v7852_v63  ;;  %v7861_v63 = vld [vmem:[#allocation68_spill] sm:$0xff] }
 0x15d   :  { %1599 = vmatpush.bf16.msrb.mxu3 %v7854_v17 }
 0x15e   :  { %1661 = vmatpush.bf16.msra.mxu0 %v7853_v38  ;;  %1625 = vmatpush.bf16.msra.mxu1 %v7855_v34  ;;  %v7862_v38 = vld [vmem:[#allocation55_spill] sm:$0xff] }
 0x161   :  { %1600 = vmatpush.bf16.msrb.mxu3 %v7857_v29  ;;  %v1322_v36 = vpop.f32.mrf.mxu2 }
 0x162   :  { %1662 = vmatpush.bf16.msra.mxu0 %v7856_v9  ;;  %1626 = vmatpush.bf16.msra.mxu1 %v7858_v6  ;;  %v1294_v9 = vpop.f32.mrf.mxu0 }
 0x165   :  { %1601 = vmatpush.bf16.msrb.mxu3 %v7860_v60 }
 0x166   :  { %1663 = vmatpush.bf16.msra.mxu0 %v7859_v39  ;;  %1627 = vmatpush.bf16.msra.mxu1 %v7861_v63  ;;  %v7868_v39 = vld [vmem:[#allocation78_spill] sm:$0xff] }
 0x169   :  { %1602 = vmatpush.bf16.msrb.mxu3 %v7863_v51  ;;  %v7874_v51 = vld [vmem:[#allocation61_spill] sm:$0xff] }
 0x16a   :  { %1664 = vmatpush.bf16.msra.mxu0 %v7862_v38  ;;  %1628 = vmatpush.bf16.msra.mxu1 %v7864_v37  ;;  %v1296_v38 = vpop.f32.mrf.mxu0  ;;  %v7873_v37 = vld [vmem:[#allocation71_spill] sm:$0xff] }
 0x16d   :  { %1603 = vmatpush.bf16.msrb.mxu3 %v7866_v40  ;;  %v1255_v57 = vpop.f32.mrf.mxu1 }
 0x16e   :  { %1665 = vmatpush.bf16.msra.mxu0 %v7865_v41  ;;  %1629 = vmatpush.bf16.msra.mxu1 %v7868_v39  ;;  %v1269_v41 = vadd.f32 %v1268_v4, %v1255_v57  ;;  %v7875_v39 = vld [vmem:[#allocation65_spill] sm:$0xff]  ;;  %v7877_v57 = vld [vmem:[#allocation74_spill] sm:$0xff] }
 0x170   :  { %v1460_v40 = vrot.slane %v1269_v41, 6 }
 0x171   :  { %1648 = vmatpush.bf16.msra.mxu3 %v7867_v11 }
 0x172   :  { %1666 = vmatpush.bf16.msra.mxu0 %v7869_v24  ;;  %v5955_v24 = vld [vmem:[#allocation2 + $0x6] sm:$0x3f] }
 0x173   :  { %v1229_v36 = vpop.f32.mrf.mxu3 }
 0x174   :  { %v1243_v11 = vadd.f32 %v1242_v32, %v1229_v36  ;;  %v7878_v36 = vld [vmem:[#allocation79_spill] sm:$0xff] }
 0x175   :  { %1649 = vmatpush.bf16.msra.mxu3 %v7870_v54  ;;  %v1257_v63 = vpop.f32.mrf.mxu1 }
 0x176   :  { %1667 = vmatpush.bf16.msra.mxu0 %v7871_v7  ;;  %v1461_v54 = vsel %vm211_vm1, %v1243_v11, %v1460_v40  ;;  %v7876_v7 = vld [vmem:[#allocation69_spill] sm:$0xff] }
 0x177   :  { %v1463_v38 = vadd.f32 %v1461_v54, %v5955_v24 }
 0x178   :  { %v1346_v60 = vpop.f32.mrf.mxu0 }
 0x179   :  { %1650 = vmatpush.bf16.msra.mxu3 %v7872_v15  ;;  %1467 = vst [vmem:[#allocation1] ss:$4 sm:$0xff] %v1463_v38 }
 0x17a   :  { %1668 = vmatpush.bf16.msra.mxu0 %v7873_v37 }
 0x17b   :  { %v1231_v15 = vpop.f32.mrf.mxu3 }
 0x17c   :  { %v1372_v15 = vpop.f32.mrf.mxu2 }
 0x17d   :  { %1651 = vmatpush.bf16.msra.mxu3 %v7874_v51  ;;  %v5960_v37 = vpop.f32.mrf.mxu1 }
 0x180   :  { %v1468_v4 = vld.sshfl [vmem:[#allocation1] sm:$0xff pattern:$0x73625140]  ;;  %v1469_v41 = vld.sshfl [vmem:[#allocation1 + $0x8] sm:$0xff pattern:$0x73625140] }
 0x181   :  { %1652 = vmatpush.bf16.msra.mxu3 %v7875_v39  ;;  %v4761_v32 = vmul.f32 -1.442695, %v1468_v4  ;;  %v4762_v63 = vmul.f32 -1.442695, %v1469_v41 }
 0x183   :  { %v1281_v39 = vpop.f32.mrf.mxu3  ;;  %4966 = vpow2.f32 %v4761_v32  ;;  %v1348_v32 = vpop.f32.mrf.mxu0 }
 0x184   :  { %4968 = vpow2.f32 %v4762_v63  ;;  %v1374_v63 = vpop.f32.mrf.mxu2 }
 0x185   :  { %1653 = vmatpush.bf16.msra.mxu3 %v7876_v7  ;;  %v1309_v11 = vpop.f32.mrf.mxu1 }
 0x189   :  { %1654 = vmatpush.bf16.msra.mxu3 %v7877_v57  ;;  %v4967_v40 = vpop.eup %4966 }
 0x18a   :  { %v4969_v54 = vpop.eup %4968  ;;  %v1484_v38 = vadd.f32 1.0, %v4967_v40 }
 0x18b   :  { %v1485_v51 = vadd.f32 1.0, %v4969_v54  ;;  %v1283_v7 = vpop.f32.mrf.mxu3  ;;  %v1295_v54 = vadd.f32 %v1294_v9, %v1281_v39  ;;  %v1551_v9 = vrot.slane %v5955_v24, 4 }
 0x18c   :  { %4970 = vrcp.f32 %v1484_v38  ;;  %v1499_v26 = vand.u32 2147483648, %v1484_v38  ;;  %v1497_v18 = vand.u32 2147483647, %v1484_v38  ;;  %vm1493_vm8 = vweird.f32 %v1484_v38 }
 0x18d   :  { %1655 = vmatpush.bf16.msra.mxu3 %v7878_v36  ;;  %4972 = vrcp.f32 %v1485_v51  ;;  %v1359_v57 = vpop.f32.mrf.mxu1  ;;  %v1548_v53 = vadd.f32 %v7879_v25, %v1295_v54  ;;  %vm1508_vm12 = vweird.f32 %v1485_v51  ;;  %v7880_v54 = vld [vmem:[#allocation89_spill] sm:$0xff] }
 0x18e   :  { %v5964_v6 = vadd.f32 %v1372_v15, %v1359_v57  ;;  %v1500_v57 = vor.u32 1.1754944e-38, %v1499_v26  ;;  %vm1498_vm10 = vcmp.eq.f32.partialorder %v1497_v18, 8.507059e+37  ;;  %v5971_v18 = vld [vmem:[%s7412_s5] sm:$0x7] }
 0x192   :  { %v4971_v4 = vpop.eup %4970 }
 0x193   :  { %v4973_v41 = vpop.eup %4972  ;;  %v1489_v29 = vmul.f32 %v4971_v4, %v1484_v38  ;;  %v1333_v36 = vpop.f32.mrf.mxu3  ;;  %vm1494_vm7 = vweird.f32 %v4971_v4 }
 0x194   :  { %v1504_v34 = vmul.f32 %v4973_v41, %v1485_v51  ;;  %vm1495_vm9 = vmor %vm1493_vm8, %vm1494_vm7  ;;  %vm1509_vm11 = vweird.f32 %v4973_v41 }
 0x195   :  { %v1490_v11 = vsub.f32 1.0, %v1489_v29  ;;  %v1361_v17 = vpop.f32.mrf.mxu1  ;;  %vm1510_vm13 = vmor %vm1508_vm12, %vm1509_vm11 }
 0x196   :  { %v1505_v40 = vsub.f32 1.0, %v1504_v34  ;;  %v1514_v34 = vand.u32 2147483648, %v1485_v51 }
 0x197   :  { %v1491_v7 = vmul.f32 %v4971_v4, %v1490_v11  ;;  %v1512_v11 = vand.u32 2147483647, %v1485_v51  ;;  %v1347_v51 = vadd.f32 %v1346_v60, %v1333_v36 }
 0x198   :  { %v1506_v35 = vmul.f32 %v4973_v41, %v1505_v40  ;;  %v1515_v26 = vor.u32 1.1754944e-38, %v1514_v34  ;;  %v1321_v34 = vadd.f32 %v5938_v49, %v5960_v37  ;;  %v7884_v49 = vld [vmem:[#allocation95_spill] sm:$0xff] }
 0x199   :  { %v1492_v2 = vadd.f32 %v4971_v4, %v1491_v7  ;;  %vm1513_vm14 = vcmp.eq.f32.partialorder %v1512_v11, 8.507059e+37  ;;  %v7882_v11 = vld [vmem:[#allocation91_spill] sm:$0xff] }
 0x19a   :  { %v1507_v63 = vadd.f32 %v4973_v41, %v1506_v35  ;;  %v1424_v17 = vpop.f32.mrf.mxu2 }
 0x19b   :  { %v1496_v15 = vsel %vm1495_vm9, %v4971_v4, %v1492_v2  ;;  %v1335_v3 = vpop.f32.mrf.mxu3 }
 0x19c   :  { %v1501_v32 = vsel %vm1498_vm10, %v1500_v57, %v1496_v15  ;;  %v1398_v29 = vpop.f32.mrf.mxu0  ;;  %v1511_v40 = vsel %vm1510_vm13, %v4973_v41, %v1507_v63 }
 0x19d   :  { %v1549_v39 = vmul.f32 %v1548_v53, %v1501_v32  ;;  %v1516_v2 = vsel %vm1513_vm14, %v1515_v26, %v1511_v40  ;;  %v5974_v53 = vperm.slane %v5971_v18, 1 }
 0x19e   :  { %v1559_v35 = vsub.f32 1.0, %v1516_v2  ;;  %v1561_v41 = vmul.f32 %v1516_v2, %v7880_v54 }
 0x19f   :  { %v1553_v38 = vadd.f32 %v1551_v9, %v1549_v39  ;;  %v1455_v15 = vadd.f32 %v1347_v51, %v5974_v53  ;;  %v5985_v9 = vperm.slane %v5971_v18, 0  ;;  %v7881_v39 = vld [vmem:[#allocation90_spill] sm:$0xff]  ;;  %v7886_v51 = vld [vmem:[#allocation100_spill] sm:$0xff] }
 0x1a1   :  { %4974 = vtanh.f32 %v1553_v38  ;;  %v1454_v38 = vadd.f32 %v1321_v34, %v5985_v9  ;;  %v7889_v34 = vld [vmem:[#allocation108_spill] sm:$0xff] }
 0x1a2   :  { %v1426_v3 = vpop.f32.mrf.mxu2 }
 0x1a4   :  { %v1400_v25 = vpop.f32.mrf.mxu0 }
 0x1a5   :  { %v7883_v25 = vld [vmem:[#allocation94_spill] sm:$0xff] }
 0x1a7   :  { %v4975_v24 = vpop.eup %4974 }
 0x1a8   :  { %v1560_v4 = vmul.f32 %v4975_v24, %v1559_v35  ;;  %v7885_v24 = vld [vmem:[#allocation99_spill] sm:$0xff] }
 0x1aa   :  { %v5977_v7 = vadd.f32 %v1561_v41, %v1560_v4  ;;  %v7887_v41 = vld [vmem:[#allocation104_spill] sm:$0xff] }
 0x1ac   :  { %v5982_v63 = vpack.c.bf16 %v5977_v7, %v5977_v7 }
 0x1ad   :  { %v1411_v57 = vpop.f32.mrf.mxu1 }
 0x1ae   :  { %v1425_v32 = vadd.f32 %v1424_v17, %v1411_v57  ;;  %1578 = vmatmul.bf16.vlgmr.msrb.gmra.mxu1 %v5982_v63  ;;  %1604 = vmatmul.bf16.vlgmr.msrb.gmra.mxu3 %v5982_v63 }
 0x1af   :  { %1674 = vmatpush.bf16.msrb.mxu1 %v7881_v39  ;;  %1700 = vmatpush.bf16.msrb.mxu3 %v7882_v11 }
 0x1b0   :  { %v1465_v60 = vadd.f32 %v1455_v15, %v1425_v32 }
 0x1b2   :  { %v4764_v36 = vmul.f32 -1.442695, %v1465_v60  ;;  %v7890_v60 = vld [vmem:[#allocation109_spill] sm:$0xff] }
 0x1b3   :  { %v1385_v17 = vpop.f32.mrf.mxu3  ;;  %1675 = vmatpush.bf16.msrb.mxu1 %v7883_v25  ;;  %1701 = vmatpush.bf16.msrb.mxu3 %v7884_v49 }
 0x1b4   :  { %4976 = vpow2.f32 %v4764_v36  ;;  %v1399_v40 = vadd.f32 %v1398_v29, %v1385_v17  ;;  %v7888_v29 = vld [vmem:[#allocation105_spill] sm:$0xff]  ;;  %v7891_v17 = vld [vmem:[#allocation112_spill] sm:$0xff] }
 0x1b5   :  { %v1413_v26 = vpop.f32.mrf.mxu1 }
 0x1b6   :  { %v1464_v2 = vadd.f32 %v1454_v38, %v1399_v40  ;;  %v7892_v38 = vld [vmem:[#allocation113_spill] sm:$0xff] }
 0x1b7   :  { %1676 = vmatpush.bf16.msrb.mxu1 %v7885_v24  ;;  %1702 = vmatpush.bf16.msrb.mxu3 %v7886_v51 }
 0x1b8   :  { %v4763_v3 = vmul.f32 -1.442695, %v1464_v2 }
 0x1ba   :  { %v1450_v37 = vpop.f32.mrf.mxu0  ;;  %v4977_v35 = vpop.eup %4976  ;;  %4978 = vpow2.f32 %v4763_v3 }
 0x1bb   :  { %v5998_v4 = vadd.f32 1.0, %v4977_v35  ;;  %v1387_v54 = vpop.f32.mrf.mxu3  ;;  %1677 = vmatpush.bf16.msrb.mxu1 %v7887_v41  ;;  %1703 = vmatpush.bf16.msrb.mxu3 %v7888_v29 }
 0x1bd   :  { %4980 = vrcp.f32 %v5998_v4  ;;  %vm1538_vm6 = vweird.f32 %v5998_v4 }
 0x1be   :  { %1630 = vmatmul.bf16.vlgmr.msra.gmra.mxu1 %v5982_v63  ;;  %1656 = vmatmul.bf16.vlgmr.msra.gmra.mxu3 %v5982_v63 }
 0x1bf   :  { %1678 = vmatpush.bf16.msrb.mxu1 %v7889_v34  ;;  %1704 = vmatpush.bf16.msrb.mxu3 %v7890_v60 }
 0x1c0   :  { %v4979_v15 = vpop.eup %4978 }
 0x1c1   :  { %v1486_v32 = vadd.f32 1.0, %v4979_v15 }
 0x1c2   :  { %v1452_v57 = vpop.f32.mrf.mxu0 }
 0x1c3   :  { %4982 = vrcp.f32 %v1486_v32  ;;  %v4981_v36 = vpop.eup %4980  ;;  %1679 = vmatpush.bf16.msrb.mxu1 %v7891_v17  ;;  %1705 = vmatpush.bf16.msrb.mxu3 %v7892_v38  ;;  %v1529_v54 = vand.u32 2147483648, %v1486_v32  ;;  %v1527_v15 = vand.u32 2147483647, %v1486_v32  ;;  %vm1523_vm2 = vweird.f32 %v1486_v32 }
 0x1c4   :  { %v1534_v40 = vmul.f32 %v4981_v36, %v5998_v4  ;;  %vm1539_vm5 = vweird.f32 %v4981_v36 }
 0x1c5   :  { %vm1528_vm4 = vcmp.eq.f32.partialorder %v1527_v15, 8.507059e+37  ;;  %vm1540_vm7 = vmor %vm1538_vm6, %vm1539_vm5 }
 0x1c6   :  { %v1535_v3 = vsub.f32 1.0, %v1534_v40 }
 0x1c7   :  { %1680 = vmatpush.bf16.msrb.mxu1 %v5750_v61  ;;  %1706 = vmatpush.bf16.msrb.mxu3 %v5752_v8  ;;  %v6019_v61 = vld [vmem:[%s7413_s6] ss:$0 sm:$0xff] }
 0x1c8   :  { %v1536_v8 = vmul.f32 %v4981_v36, %v1535_v3 }
 0x1c9   :  { %v4983_v26 = vpop.eup %4982 }
 0x1ca   :  { %v1519_v2 = vmul.f32 %v4983_v26, %v1486_v32  ;;  %vm1524_vm15 = vweird.f32 %v4983_v26  ;;  %v1537_v32 = vadd.f32 %v4981_v36, %v1536_v8 }
 0x1cb   :  { %1681 = vmatpush.bf16.msrb.mxu1 %v5762_v62  ;;  %1707 = vmatpush.bf16.msrb.mxu3 %v5764_v12  ;;  %v6022_v62 = vperm.slane %v5971_v18, 2  ;;  %vm1525_vm3 = vmor %vm1523_vm2, %vm1524_vm15 }
 0x1cc   :  { %v1520_v35 = vsub.f32 1.0, %v1519_v2 }
 0x1cd   :  { %7893 = vst [vmem:[#allocation80_spill] sm:$0xff] %v6022_v62  ;;  %v1456_v18 = vadd.f32 %v5964_v6, %v6022_v62 }
 0x1ce   :  { %v1521_v57 = vmul.f32 %v4983_v26, %v1520_v35  ;;  %v1530_v35 = vor.u32 1.1754944e-38, %v1529_v54  ;;  %1682 = vmatmul.bf16.vlgmr.msrb.gmra.mxu1 %v5982_v63  ;;  %1708 = vmatmul.bf16.vlgmr.msrb.gmra.mxu3 %v5982_v63 }
 0x1cf   :  { %1726 = vmatpush.bf16.msra.mxu1 %v5767_v20  ;;  %1752 = vmatpush.bf16.msra.mxu3 %v5769_v21 }
 0x1d0   :  { %v1522_v2 = vadd.f32 %v4983_v26, %v1521_v57 }
 0x1d2   :  { %v1526_v21 = vsel %vm1525_vm3, %v4983_v26, %v1522_v2  ;;  %v1542_v26 = vand.u32 2147483647, %v5998_v4  ;;  %v7895_v2 = vld [vmem:[#allocation76_spill] sm:$0xff] }
 0x1d3   :  { %v1437_v40 = vpop.f32.mrf.mxu3  ;;  %v1531_v20 = vsel %vm1528_vm4, %v1530_v35, %v1526_v21  ;;  %1727 = vmatpush.bf16.msra.mxu1 %v5783_v16  ;;  %1753 = vmatpush.bf16.msra.mxu3 %v5785_v55  ;;  %v7896_v35 = vld [vmem:[#allocation72_spill] sm:$0xff] }
 0x1d4   :  { %v1451_v12 = vadd.f32 %v1450_v37, %v1437_v40  ;;  %v1544_v37 = vand.u32 2147483648, %v5998_v4  ;;  %vm1543_vm8 = vcmp.eq.f32.partialorder %v1542_v26, 8.507059e+37  ;;  %v7901_v26 = vld [vmem:[#allocation85_spill] sm:$0xff] }
 0x1d6   :  { %v1554_v38 = vadd.f32 %v6019_v61, %v1451_v12  ;;  %v1541_v12 = vsel %vm1540_vm7, %v4981_v36, %v1537_v32  ;;  %v1545_v8 = vor.u32 1.1754944e-38, %v1544_v37  ;;  %v7894_v36 = vld [vmem:[#allocation134_spill] sm:$0xff]  ;;  %v7897_v32 = vld [vmem:[#allocation81_spill] sm:$0xff]  ;;  %v7899_v37 = vld [vmem:[#allocation83_spill] sm:$0xff] }
 0x1d7   :  { %1728 = vmatpush.bf16.msra.mxu1 %v5797_v59  ;;  %1754 = vmatpush.bf16.msra.mxu3 %v5799_v48 }
 0x1d8   :  { %v1555_v3 = vmul.f32 %v1554_v38, %v1531_v20  ;;  %v1546_v57 = vsel %vm1543_vm8, %v1545_v8, %v1541_v12  ;;  %v7903_v12 = vld [vmem:[#allocation87_spill] sm:$0xff]  ;;  %v7905_v8 = vld [vmem:[#allocation92_spill] sm:$0xff] }
 0x1d9   :  { %v1563_v20 = vsub.f32 1.0, %v1546_v57  ;;  %v1565_v38 = vmul.f32 0.0, %v1546_v57  ;;  %v7906_v57 = vld [vmem:[#allocation88_spill] sm:$0xff] }
 0x1da   :  { %v1556_v21 = vadd.f32 %v1555_v3, %v1456_v18  ;;  %v7898_v18 = vld [vmem:[#allocation77_spill] sm:$0xff]  ;;  %v7900_v3 = vld [vmem:[#allocation82_spill] sm:$0xff] }
 0x1db   :  { %v1439_v54 = vpop.f32.mrf.mxu3  ;;  %1729 = vmatpush.bf16.msra.mxu1 %v5810_v19  ;;  %1755 = vmatpush.bf16.msra.mxu3 %v5812_v46 }
 0x1dc   :  { %4984 = vtanh.f32 %v1556_v21  ;;  %v7902_v21 = vld [vmem:[#allocation84_spill] sm:$0xff]  ;;  %v7904_v54 = vld [vmem:[#allocation86_spill] sm:$0xff] }
 0x1df   :  { %1730 = vmatpush.bf16.msra.mxu1 %v5822_v22  ;;  %1756 = vmatpush.bf16.msra.mxu3 %v5824_v31 }
 0x1e2   :  { %v4985_v6 = vpop.eup %4984 }
 0x1e3   :  { %v1564_v4 = vmul.f32 %v4985_v6, %v1563_v20  ;;  %1731 = vmatpush.bf16.msra.mxu1 %v5833_v43  ;;  %1757 = vmatpush.bf16.msra.mxu3 %v7894_v36  ;;  %v7907_v20 = vld [vmem:[#allocation96_spill] sm:$0xff]  ;;  %v7908_v6 = vld [vmem:[#allocation93_spill] sm:$0xff] }
 0x1e5   :  { %v6040_v15 = vadd.f32 %v1565_v38, %v1564_v4  ;;  %v7909_v4 = vld [vmem:[#allocation101_spill] sm:$0xff] }
 0x1e6   :  { %v7910_v38 = vld [vmem:[#allocation97_spill] sm:$0xff] }
 0x1e7   :  { %1567 = vst [vmem:[#allocation3] sm:$0x3] %v6040_v15  ;;  %v6047_v40 = vpack.c.bf16 %v6040_v15, %v6040_v15  ;;  %1732 = vmatpush.bf16.msra.mxu1 %v5843_v44  ;;  %1758 = vmatpush.bf16.msra.mxu3 %v5845_v45 }
 0x1e9   :  { %1591 = vmatmul.bf16.vlgmr.msra.gmra.mxu2 %v6047_v40  ;;  %1617 = vmatmul.bf16.vlgmr.msrb.gmra.mxu0 %v6047_v40 }
 0x1ea   :  { %1687 = vmatpush.bf16.msra.mxu2 %v7895_v2  ;;  %1713 = vmatpush.bf16.msrb.mxu0 %v7896_v35 }
 0x1eb   :  { %1733 = vmatpush.bf16.msra.mxu1 %v5853_v14  ;;  %1759 = vmatpush.bf16.msra.mxu3 %v5855_v28 }
 0x1ee   :  { %1688 = vmatpush.bf16.msra.mxu2 %v7897_v32  ;;  %1714 = vmatpush.bf16.msrb.mxu0 %v7898_v18 }
 0x1ef   :  { %1778 = vmatpush.bf16.msrb.mxu1 %v5857_v58  ;;  %1920 = vmatpush.bf16.msrb.mxu3 %v5363_v50  ;;  %v6201_v58 = vld [vmem:[%s7410_s3] ss:$0 sm:$0xff] }
 0x1f0   :  { %1734 = vmatmul.bf16.vlgmr.msra.gmra.mxu1 %v5982_v63  ;;  %1760 = vmatmul.bf16.vlgmr.msra.gmra.mxu3 %v5982_v63 }
 0x1f2   :  { %1689 = vmatpush.bf16.msra.mxu2 %v7899_v37  ;;  %1715 = vmatpush.bf16.msrb.mxu0 %v7900_v3 }
 0x1f3   :  { %1779 = vmatpush.bf16.msrb.mxu1 %v5866_v47  ;;  %1921 = vmatpush.bf16.msrb.mxu3 %v5381_v0 }
 0x1f6   :  { %1690 = vmatpush.bf16.msra.mxu2 %v7901_v26  ;;  %1716 = vmatpush.bf16.msrb.mxu0 %v7902_v21 }
 0x1f7   :  { %1780 = vmatpush.bf16.msrb.mxu1 %v5876_v10  ;;  %1922 = vmatpush.bf16.msrb.mxu3 %v5394_v13 }
 0x1f9   :  { %1643 = vmatmul.bf16.vlgmr.msrb.gmra.mxu2 %v6047_v40  ;;  %1669 = vmatmul.bf16.vlgmr.msra.gmra.mxu0 %v6047_v40 }
 0x1fa   :  { %1691 = vmatpush.bf16.msra.mxu2 %v7903_v12  ;;  %1717 = vmatpush.bf16.msrb.mxu0 %v7904_v54  ;;  %v7986_v54 = vld [vmem:[#allocation51_spill] sm:$0xff] }
 0x1fb   :  { %1781 = vmatpush.bf16.msrb.mxu1 %v5885_v5  ;;  %1923 = vmatpush.bf16.msrb.mxu3 %v5417_v30  ;;  %v7911_v30 = vld [vmem:[#allocation102_spill] sm:$0xff] }
 0x1fe   :  { %1692 = vmatpush.bf16.msra.mxu2 %v7905_v8  ;;  %1718 = vmatpush.bf16.msrb.mxu0 %v7906_v57  ;;  %v7912_v8 = vld [vmem:[#allocation98_spill] sm:$0xff] }
 0x1ff   :  { %1782 = vmatpush.bf16.msrb.mxu1 %v5892_v33  ;;  %1924 = vmatpush.bf16.msrb.mxu3 %v5429_v42  ;;  %v7963_v42 = vld [vmem:[#allocation69_spill] sm:$0xff] }
 0x200   :  { %v7966_v33 = vld [vmem:[#allocation13_spill] sm:$0xff] }
 0x202   :  { %1693 = vmatpush.bf16.msra.mxu2 %v7907_v20  ;;  %1719 = vmatpush.bf16.msrb.mxu0 %v7908_v6  ;;  %v7913_v6 = vld [vmem:[#allocation106_spill] sm:$0xff] }
 0x203   :  { %1783 = vmatpush.bf16.msrb.mxu1 %v5899_v56  ;;  %1925 = vmatpush.bf16.msrb.mxu3 %v5444_v1  ;;  %v7914_v56 = vld [vmem:[#allocation103_spill] sm:$0xff]  ;;  %v7921_v1 = vld [vmem:[#allocation52_spill] sm:$0xff]  ;;  %v7958_v20 = vld [vmem:[#allocation142_spill] sm:$0xff] }
 0x206   :  { %1694 = vmatpush.bf16.msra.mxu2 %v7909_v4  ;;  %1720 = vmatpush.bf16.msrb.mxu0 %v7910_v38  ;;  %v7915_v4 = vld [vmem:[#allocation46_spill] sm:$0xff]  ;;  %v7916_v38 = vld [vmem:[#allocation17_spill] sm:$0xff] }
 0x207   :  { %1784 = vmatpush.bf16.msrb.mxu1 %v5905_v52  ;;  %1926 = vmatpush.bf16.msrb.mxu3 %v5458_v27  ;;  %v7919_v52 = vld [vmem:[#allocation107_spill] sm:$0xff]  ;;  %v7920_v27 = vld [vmem:[#allocation21_spill] sm:$0xff] }
 0x209   :  { %1695 = vmatmul.bf16.vlgmr.msra.gmra.mxu2 %v6047_v40  ;;  %1721 = vmatmul.bf16.vlgmr.msrb.gmra.mxu0 %v6047_v40 }
 0x20a   :  { %1739 = vmatpush.bf16.msrb.mxu2 %v7911_v30  ;;  %1765 = vmatpush.bf16.msra.mxu0 %v7912_v8  ;;  %v7917_v30 = vld [vmem:[#allocation48_spill] sm:$0xff]  ;;  %v7918_v8 = vld [vmem:[#allocation110_spill] sm:$0xff] }
 0x20b   :  { %1785 = vmatpush.bf16.msrb.mxu1 %v5911_v23  ;;  %1927 = vmatpush.bf16.msrb.mxu3 %v7915_v4  ;;  %v7924_v23 = vld [vmem:[#allocation25_spill] sm:$0xff]  ;;  %v7925_v4 = vld [vmem:[#allocation56_spill] sm:$0xff] }
 0x20e   :  { %1740 = vmatpush.bf16.msrb.mxu2 %v7913_v6  ;;  %1766 = vmatpush.bf16.msra.mxu0 %v7914_v56  ;;  %v7922_v6 = vld [vmem:[#allocation114_spill] sm:$0xff]  ;;  %v7923_v56 = vld [vmem:[#allocation111_spill] sm:$0xff] }
 0x20f   :  { %1946 = vmatpush.bf16.msra.mxu1 %v7916_v38  ;;  %1972 = vmatpush.bf16.msra.mxu3 %v7917_v30  ;;  %v7926_v38 = vld [vmem:[#allocation118_spill] sm:$0xff]  ;;  %v7927_v30 = vld [vmem:[#allocation115_spill] sm:$0xff] }
 0x210   :  { %1786 = vmatmul.bf16.vlgmr.msrb.gmra.mxu1 %v5982_v63  ;;  %v7930_v63 = vld [vmem:[#allocation124_spill] sm:$0xff] }
 0x212   :  { %1741 = vmatpush.bf16.msrb.mxu2 %v7918_v8  ;;  %1767 = vmatpush.bf16.msra.mxu0 %v7919_v52  ;;  %v7928_v8 = vld [vmem:[#allocation29_spill] sm:$0xff]  ;;  %v7929_v52 = vld [vmem:[#allocation60_spill] sm:$0xff] }
 0x213   :  { %1947 = vmatpush.bf16.msra.mxu1 %v7920_v27  ;;  %1973 = vmatpush.bf16.msra.mxu3 %v7921_v1  ;;  %v7931_v27 = vld [vmem:[#allocation119_spill] sm:$0xff]  ;;  %v7932_v1 = vld [vmem:[#allocation33_spill] sm:$0xff] }
 0x216   :  { %1742 = vmatpush.bf16.msrb.mxu2 %v7922_v6  ;;  %1768 = vmatpush.bf16.msra.mxu0 %v7923_v56  ;;  %v7933_v6 = vld [vmem:[#allocation64_spill] sm:$0xff]  ;;  %v7934_v56 = vld [vmem:[#allocation126_spill] sm:$0xff] }
 0x217   :  { %1948 = vmatpush.bf16.msra.mxu1 %v7924_v23  ;;  %1974 = vmatpush.bf16.msra.mxu3 %v7925_v4  ;;  %v7935_v23 = vld [vmem:[#allocation125_spill] sm:$0xff] }
 0x218   :  { %v7936_v4 = vld [vmem:[#allocation37_spill] sm:$0xff] }
 0x21a   :  { %1743 = vmatpush.bf16.msrb.mxu2 %v7926_v38  ;;  %1769 = vmatpush.bf16.msra.mxu0 %v7927_v30  ;;  %v7937_v38 = vld [vmem:[#allocation68_spill] sm:$0xff] }
 0x21b   :  { %1949 = vmatpush.bf16.msra.mxu1 %v7928_v8  ;;  %1975 = vmatpush.bf16.msra.mxu3 %v7929_v52  ;;  %v7938_v30 = vld [vmem:[#allocation128_spill] sm:$0xff]  ;;  %v7939_v8 = vld [vmem:[#allocation127_spill] sm:$0xff]  ;;  %v7940_v52 = vld [vmem:[#allocation129_spill] sm:$0xff] }
 0x21e   :  { %1744 = vmatpush.bf16.msrb.mxu2 %v7930_v63  ;;  %1770 = vmatpush.bf16.msra.mxu0 %v7931_v27  ;;  %v7941_v63 = vld [vmem:[#allocation14_spill] sm:$0xff] }
 0x21f   :  { %1950 = vmatpush.bf16.msra.mxu1 %v7932_v1  ;;  %1976 = vmatpush.bf16.msra.mxu3 %v7933_v6  ;;  %v7942_v27 = vld [vmem:[#allocation42_spill] sm:$0xff]  ;;  %v7943_v1 = vld [vmem:[#allocation73_spill] sm:$0xff] }
 0x222   :  { %1745 = vmatpush.bf16.msrb.mxu2 %v7934_v56  ;;  %1771 = vmatpush.bf16.msra.mxu0 %v7935_v23  ;;  %v7944_v23 = vld [vmem:[#allocation130_spill] sm:$0xff] }
 0x223   :  { %1951 = vmatpush.bf16.msra.mxu1 %v7936_v4  ;;  %1977 = vmatpush.bf16.msra.mxu3 %v7937_v38  ;;  %v7945_v4 = vld [vmem:[#allocation18_spill] sm:$0xff]  ;;  %v7946_v38 = vld [vmem:[#allocation47_spill] sm:$0xff] }
 0x224   :  { %v7953_v56 = vld [vmem:[#allocation26_spill] sm:$0xff] }
 0x226   :  { %1746 = vmatpush.bf16.msrb.mxu2 %v7938_v30  ;;  %1772 = vmatpush.bf16.msra.mxu0 %v7939_v8  ;;  %v7947_v30 = vld [vmem:[#allocation78_spill] sm:$0xff]  ;;  %v7948_v8 = vld [vmem:[#allocation49_spill] sm:$0xff] }
 0x227   :  { %1952 = vmatpush.bf16.msra.mxu1 %v7942_v27  ;;  %1978 = vmatpush.bf16.msra.mxu3 %v7943_v1  ;;  %v7951_v27 = vld [vmem:[#allocation53_spill] sm:$0xff]  ;;  %v7952_v1 = vld [vmem:[#allocation135_spill] sm:$0xff] }
 0x229   :  { %1747 = vmatmul.bf16.vlgmr.msrb.gmra.mxu2 %v6047_v40  ;;  %1773 = vmatmul.bf16.vlgmr.msra.gmra.mxu0 %v6047_v40 }
 0x22a   :  { %1791 = vmatpush.bf16.msra.mxu2 %v7940_v52  ;;  %1933 = vmatpush.bf16.msrb.mxu0 %v7941_v63  ;;  %v7949_v52 = vld [vmem:[#allocation132_spill] sm:$0xff]  ;;  %v7950_v63 = vld [vmem:[#allocation22_spill] sm:$0xff] }
 0x22b   :  { %1953 = vmatpush.bf16.msra.mxu1 %v7946_v38  ;;  %1979 = vmatpush.bf16.msra.mxu3 %v7947_v30  ;;  %v1579_v6 = vpop.f32.mrf.mxu1  ;;  %v7956_v38 = vld [vmem:[#allocation30_spill] sm:$0xff]  ;;  %v7957_v30 = vld [vmem:[#allocation61_spill] sm:$0xff] }
 0x22e   :  { %1792 = vmatpush.bf16.msra.mxu2 %v7944_v23  ;;  %1934 = vmatpush.bf16.msrb.mxu0 %v7945_v4  ;;  %v7954_v23 = vld [vmem:[#allocation57_spill] sm:$0xff]  ;;  %v7955_v4 = vld [vmem:[#allocation138_spill] sm:$0xff] }
 0x22f   :  { %1998 = vmatpush.bf16.msrb.mxu1 %v7948_v8 }
 0x231   :  { %v1605_v8 = vpop.f32.mrf.mxu3 }
 0x232   :  { %1793 = vmatpush.bf16.msra.mxu2 %v7949_v52  ;;  %1935 = vmatpush.bf16.msrb.mxu0 %v7950_v63  ;;  %v7959_v52 = vld [vmem:[#allocation34_spill] sm:$0xff] }
 0x233   :  { %1999 = vmatpush.bf16.msrb.mxu1 %v7951_v27  ;;  %v1581_v63 = vpop.f32.mrf.mxu1  ;;  %v7960_v27 = vld [vmem:[#allocation65_spill] sm:$0xff] }
 0x234   :  { %v7968_v63 = vld [vmem:[#allocation74_spill] sm:$0xff] }
 0x236   :  { %1794 = vmatpush.bf16.msra.mxu2 %v7952_v1  ;;  %1936 = vmatpush.bf16.msrb.mxu0 %v7953_v56  ;;  %v7961_v1 = vld [vmem:[#allocation144_spill] sm:$0xff]  ;;  %v7962_v56 = vld [vmem:[#allocation38_spill] sm:$0xff] }
 0x237   :  { %2000 = vmatpush.bf16.msrb.mxu1 %v7954_v23 }
 0x239   :  { %v1607_v23 = vpop.f32.mrf.mxu3 }
 0x23a   :  { %1795 = vmatpush.bf16.msra.mxu2 %v7955_v4  ;;  %1937 = vmatpush.bf16.msrb.mxu0 %v7956_v38  ;;  %v7964_v4 = vld [vmem:[#allocation146_spill] sm:$0xff]  ;;  %v7965_v38 = vld [vmem:[#allocation43_spill] sm:$0xff] }
 0x23b   :  { %2001 = vmatpush.bf16.msrb.mxu1 %v7957_v30  ;;  %v6150_v30 = vpop.f32.mrf.mxu1 }
 0x23e   :  { %1796 = vmatpush.bf16.msra.mxu2 %v7958_v20  ;;  %1938 = vmatpush.bf16.msrb.mxu0 %v7959_v52  ;;  %v7967_v20 = vld [vmem:[#allocation44_spill] sm:$0xff] }
 0x23f   :  { %2002 = vmatpush.bf16.msrb.mxu1 %v7960_v27  ;;  %v7973_v27 = vld [vmem:[#allocation54_spill] sm:$0xff] }
 0x241   :  { %v6159_v23 = vpop.f32.mrf.mxu3 }
 0x242   :  { %1797 = vmatpush.bf16.msra.mxu2 %v7961_v1  ;;  %1939 = vmatpush.bf16.msrb.mxu0 %v7962_v56  ;;  %v7969_v1 = vld [vmem:[#allocation15_spill] sm:$0xff]  ;;  %v7970_v56 = vld [vmem:[#allocation50_spill] sm:$0xff] }
 0x243   :  { %2003 = vmatpush.bf16.msrb.mxu1 %v7963_v42  ;;  %v7971_v42 = vld [vmem:[#allocation79_spill] sm:$0xff] }
 0x246   :  { %1798 = vmatpush.bf16.msra.mxu2 %v7964_v4  ;;  %1940 = vmatpush.bf16.msrb.mxu0 %v7965_v38  ;;  %v1633_v4 = vpop.f32.mrf.mxu1  ;;  %v7972_v38 = vld [vmem:[#allocation19_spill] sm:$0xff] }
 0x247   :  { %2004 = vmatpush.bf16.msrb.mxu1 %v7968_v63 }
 0x249   :  { %1799 = vmatmul.bf16.vlgmr.msra.gmra.mxu2 %v6047_v40  ;;  %v1659_v63 = vpop.f32.mrf.mxu3  ;;  %v7976_v40 = vld [vmem:[#allocation27_spill] sm:$0xff] }
 0x24a   :  { %1959 = vmatpush.bf16.msrb.mxu2 %v7966_v33  ;;  %1985 = vmatpush.bf16.msra.mxu0 %v7967_v20  ;;  %v7974_v33 = vld [vmem:[#allocation23_spill] sm:$0xff]  ;;  %v7975_v20 = vld [vmem:[#allocation58_spill] sm:$0xff]  ;;  %v7984_v63 = vld [vmem:[#allocation40_spill] sm:$0xff] }
 0x24b   :  { %2005 = vmatpush.bf16.msrb.mxu1 %v7971_v42  ;;  %v7979_v42 = vld [vmem:[#allocation66_spill] sm:$0xff] }
 0x24e   :  { %1960 = vmatpush.bf16.msrb.mxu2 %v7969_v1  ;;  %1986 = vmatpush.bf16.msra.mxu0 %v7970_v56  ;;  %v6165_v52 = vpop.f32.mrf.mxu1  ;;  %v7977_v1 = vld [vmem:[#allocation62_spill] sm:$0xff]  ;;  %v7978_v56 = vld [vmem:[#allocation31_spill] sm:$0xff] }
 0x251   :  { %v1709_v4 = vpop.f32.mrf.mxu3 }
 0x252   :  { %1961 = vmatpush.bf16.msrb.mxu2 %v7972_v38  ;;  %1987 = vmatpush.bf16.msra.mxu0 %v7973_v27  ;;  %v7980_v38 = vld [vmem:[#allocation35_spill] sm:$0xff]  ;;  %v7981_v27 = vld [vmem:[#allocation70_spill] sm:$0xff] }
 0x256   :  { %1962 = vmatpush.bf16.msrb.mxu2 %v7974_v33  ;;  %1988 = vmatpush.bf16.msra.mxu0 %v7975_v20  ;;  %v1685_v57 = vpop.f32.mrf.mxu1  ;;  %v7982_v33 = vld [vmem:[#allocation39_spill] sm:$0xff] }
 0x257   :  { %v7983_v20 = vld [vmem:[#allocation75_spill] sm:$0xff] }
 0x259   :  { %v1711_v5 = vpop.f32.mrf.mxu3 }
 0x25a   :  { %1963 = vmatpush.bf16.msrb.mxu2 %v7976_v40  ;;  %1989 = vmatpush.bf16.msra.mxu0 %v7977_v1  ;;  %v7985_v40 = vld [vmem:[#allocation45_spill] sm:$0xff] }
 0x25e   :  { %1964 = vmatpush.bf16.msrb.mxu2 %v7978_v56  ;;  %1990 = vmatpush.bf16.msra.mxu0 %v7979_v42  ;;  %v7987_v42 = vld [vmem:[#allocation55_spill] sm:$0xff] }
 0x262   :  { %1965 = vmatpush.bf16.msrb.mxu2 %v7980_v38  ;;  %1991 = vmatpush.bf16.msra.mxu0 %v7981_v27  ;;  %v7988_v27 = vld [vmem:[#allocation59_spill] sm:$0xff] }
 0x266   :  { %1966 = vmatpush.bf16.msrb.mxu2 %v7982_v33  ;;  %1992 = vmatpush.bf16.msra.mxu0 %v7983_v20  ;;  %v1618_v1 = vpop.f32.mrf.mxu0  ;;  %v6180_v33 = vld [vmem:[#allocation2 + $0xc] sm:$0x3f] }
 0x267   :  { %v1619_v56 = vadd.f32 %v1618_v1, %v1605_v8 }
 0x269   :  { %v1810_v12 = vrot.slane %v1619_v56, 6  ;;  %v7990_v56 = vld [vmem:[#allocation67_spill] sm:$0xff] }
 0x26a   :  { %2011 = vmatpush.bf16.msra.mxu2 %v7984_v63 }
 0x26c   :  { %v1592_v57 = vpop.f32.mrf.mxu2 }
 0x26d   :  { %v1593_v38 = vadd.f32 %v1592_v57, %v1579_v6  ;;  %v6184_v63 = vpop.f32.mrf.mxu1 }
 0x26e   :  { %2012 = vmatpush.bf16.msra.mxu2 %v7985_v40  ;;  %v1620_v13 = vpop.f32.mrf.mxu0  ;;  %v7989_v40 = vld [vmem:[#allocation63_spill] sm:$0xff] }
 0x26f   :  { %v1811_v20 = vsel %vm211_vm1, %v1593_v38, %v1810_v12  ;;  %v7991_v12 = vld [vmem:[#allocation71_spill] sm:$0xff] }
 0x270   :  { %v1813_v5 = vadd.f32 %v1811_v20, %v6180_v33 }
 0x272   :  { %2013 = vmatpush.bf16.msra.mxu2 %v7986_v54  ;;  %1817 = vst [vmem:[#allocation1] ss:$4 sm:$0xff] %v1813_v5 }
 0x273   :  { %v6187_v8 = vpop.f32.mrf.mxu3 }
 0x274   :  { %v1594_v1 = vpop.f32.mrf.mxu2 }
 0x275   :  { %v1737_v13 = vpop.f32.mrf.mxu1 }
 0x276   :  { %2014 = vmatpush.bf16.msra.mxu2 %v7987_v42  ;;  %v6189_v42 = vpop.f32.mrf.mxu0 }
 0x279   :  { %v1818_v6 = vld.sshfl [vmem:[#allocation1] sm:$0xff pattern:$0x73625140]  ;;  %v1819_v57 = vld.sshfl [vmem:[#allocation1 + $0x8] sm:$0xff pattern:$0x73625140] }
 0x27a   :  { %2015 = vmatpush.bf16.msra.mxu2 %v7988_v27  ;;  %v4765_v27 = vmul.f32 -1.442695, %v1818_v6  ;;  %v4766_v54 = vmul.f32 -1.442695, %v1819_v57 }
 0x27b   :  { %v1763_v38 = vpop.f32.mrf.mxu3 }
 0x27c   :  { %v1644_v20 = vpop.f32.mrf.mxu2  ;;  %4986 = vpow2.f32 %v4765_v27 }
 0x27d   :  { %4988 = vpow2.f32 %v4766_v54 }
 0x27e   :  { %2016 = vmatpush.bf16.msra.mxu2 %v7989_v40  ;;  %v1672_v5 = vpop.f32.mrf.mxu0 }
 0x282   :  { %2017 = vmatpush.bf16.msra.mxu2 %v7990_v56  ;;  %v4987_v40 = vpop.eup %4986 }
 0x283   :  { %v4989_v1 = vpop.eup %4988  ;;  %v1834_v10 = vadd.f32 1.0, %v4987_v40  ;;  %v1645_v40 = vadd.f32 %v1644_v20, %v6150_v30 }
 0x284   :  { %v1835_v21 = vadd.f32 1.0, %v4989_v1  ;;  %v1646_v26 = vpop.f32.mrf.mxu2 }
 0x285   :  { %4990 = vrcp.f32 %v1834_v10  ;;  %v1849_v38 = vand.u32 2147483648, %v1834_v10  ;;  %v1847_v26 = vand.u32 2147483647, %v1834_v10  ;;  %vm1843_vm10 = vweird.f32 %v1834_v10 }
 0x286   :  { %2018 = vmatpush.bf16.msra.mxu2 %v7991_v12  ;;  %4992 = vrcp.f32 %v1835_v21  ;;  %v1722_v56 = vpop.f32.mrf.mxu0  ;;  %vm1858_vm14 = vweird.f32 %v1835_v21 }
 0x287   :  { %v6193_v13 = vadd.f32 %v1722_v56, %v1709_v4  ;;  %v1850_v4 = vor.u32 1.1754944e-38, %v1849_v38  ;;  %vm1848_vm12 = vcmp.eq.f32.partialorder %v1847_v26, 8.507059e+37  ;;  %v1862_v38 = vand.u32 2147483647, %v1835_v21 }
 0x289   :  { %vm1863_vm2 = vcmp.eq.f32.partialorder %v1862_v38, 8.507059e+37 }
 0x28b   :  { %v4991_v0 = vpop.eup %4990 }
 0x28c   :  { %v4993_v6 = vpop.eup %4992  ;;  %v1839_v57 = vmul.f32 %v4991_v0, %v1834_v10  ;;  %v1696_v47 = vpop.f32.mrf.mxu2  ;;  %vm1844_vm9 = vweird.f32 %v4991_v0 }
 0x28d   :  { %v1854_v12 = vmul.f32 %v4993_v6, %v1835_v21  ;;  %v6195_v3 = vpop.f32.mrf.mxu1  ;;  %vm1845_vm11 = vmor %vm1843_vm10, %vm1844_vm9  ;;  %vm1859_vm13 = vweird.f32 %v4993_v6 }
 0x28e   :  { %v1840_v27 = vsub.f32 1.0, %v1839_v57  ;;  %v1724_v54 = vpop.f32.mrf.mxu0  ;;  %v1898_v57 = vadd.f32 %v6201_v58, %v1645_v40  ;;  %vm1860_vm15 = vmor %vm1858_vm14, %vm1859_vm13 }
 0x28f   :  { %v1855_v5 = vsub.f32 1.0, %v1854_v12 }
 0x290   :  { %v1841_v1 = vmul.f32 %v4991_v0, %v1840_v27  ;;  %v1901_v27 = vrot.slane %v6180_v33, 4 }
 0x291   :  { %v1856_v37 = vmul.f32 %v4993_v6, %v1855_v5  ;;  %v1864_v5 = vand.u32 2147483648, %v1835_v21 }
 0x292   :  { %v1842_v50 = vadd.f32 %v4991_v0, %v1841_v1 }
 0x293   :  { %v1857_v30 = vadd.f32 %v4993_v6, %v1856_v37  ;;  %v1865_v1 = vor.u32 1.1754944e-38, %v1864_v5 }
 0x294   :  { %v1846_v56 = vsel %vm1845_vm11, %v4991_v0, %v1842_v50  ;;  %v1698_v12 = vpop.f32.mrf.mxu2 }
 0x295   :  { %v1851_v54 = vsel %vm1848_vm12, %v1850_v4, %v1846_v56  ;;  %v1789_v20 = vpop.f32.mrf.mxu1  ;;  %v1861_v0 = vsel %vm1860_vm15, %v4993_v6, %v1857_v30  ;;  %v1697_v4 = vadd.f32 %v1696_v47, %v6165_v52 }
 0x296   :  { %v1899_v10 = vmul.f32 %v1898_v57, %v1851_v54  ;;  %v1866_v26 = vsel %vm1863_vm2, %v1865_v1, %v1861_v0  ;;  %v1671_v54 = vadd.f32 %v6189_v42, %v6159_v23 }
 0x297   :  { %v1909_v28 = vsub.f32 1.0, %v1866_v26  ;;  %v1911_v56 = vmul.f32 %v1866_v26, %v5977_v7  ;;  %v1805_v57 = vadd.f32 %v1697_v4, %v5974_v53  ;;  %v7993_v26 = vld [vmem:[#allocation116_spill] sm:$0xff] }
 0x298   :  { %v1903_v50 = vadd.f32 %v1901_v27, %v1899_v10  ;;  %v1804_v52 = vadd.f32 %v1671_v54, %v5985_v9 }
 0x29a   :  { %4994 = vtanh.f32 %v1903_v50  ;;  %v7992_v50 = vld [vmem:[#allocation113_spill] sm:$0xff] }
 0x2a0   :  { %v4995_v40 = vpop.eup %4994 }
 0x2a1   :  { %v1910_v37 = vmul.f32 %v4995_v40, %v1909_v28  ;;  %v7994_v40 = vld [vmem:[#allocation117_spill] sm:$0xff] }
 0x2a3   :  { %v6207_v12 = vadd.f32 %v1911_v56, %v1910_v37 }
 0x2a5   :  { %v6213_v6 = vpack.c.bf16 %v6207_v12, %v6207_v12 }
 0x2a6   :  { %v1774_v33 = vpop.f32.mrf.mxu0 }
 0x2a7   :  { %v1775_v21 = vadd.f32 %v1774_v33, %v6187_v8  ;;  %1928 = vmatmul.bf16.vlgmr.msrb.gmra.mxu3 %v6213_v6  ;;  %1954 = vmatmul.bf16.vlgmr.msra.gmra.mxu1 %v6213_v6 }
 0x2a8   :  { %2024 = vmatpush.bf16.msrb.mxu3 %v7881_v39  ;;  %2050 = vmatpush.bf16.msra.mxu1 %v7882_v11 }
 0x2a9   :  { %v1815_v30 = vadd.f32 %v1805_v57, %v1775_v21  ;;  %v7995_v57 = vld [vmem:[#allocation120_spill] sm:$0xff]  ;;  %v7996_v21 = vld [vmem:[#allocation121_spill] sm:$0xff] }
 0x2ab   :  { %v4768_v28 = vmul.f32 -1.442695, %v1815_v30 }
 0x2ac   :  { %v1748_v47 = vpop.f32.mrf.mxu2  ;;  %2025 = vmatpush.bf16.msrb.mxu3 %v7883_v25  ;;  %2051 = vmatpush.bf16.msra.mxu1 %v7884_v49 }
 0x2ad   :  { %4996 = vpow2.f32 %v4768_v28  ;;  %v1749_v7 = vadd.f32 %v1748_v47, %v6184_v63  ;;  %v7997_v28 = vld [vmem:[#allocation122_spill] sm:$0xff]  ;;  %v7998_v47 = vld [vmem:[#allocation123_spill] sm:$0xff] }
 0x2ae   :  { %v1776_v8 = vpop.f32.mrf.mxu0 }
 0x2af   :  { %v1814_v20 = vadd.f32 %v1804_v52, %v1749_v7 }
 0x2b0   :  { %2026 = vmatpush.bf16.msrb.mxu3 %v7885_v24  ;;  %2052 = vmatpush.bf16.msra.mxu1 %v7886_v51 }
 0x2b1   :  { %v4767_v42 = vmul.f32 -1.442695, %v1814_v20 }
 0x2b3   :  { %v4997_v23 = vpop.eup %4996  ;;  %4998 = vpow2.f32 %v4767_v42 }
 0x2b4   :  { %v1837_v27 = vadd.f32 1.0, %v4997_v23  ;;  %v1750_v5 = vpop.f32.mrf.mxu2  ;;  %2027 = vmatpush.bf16.msrb.mxu3 %v7887_v41  ;;  %2053 = vmatpush.bf16.msra.mxu1 %v7888_v29 }
 0x2b6   :  { %5000 = vrcp.f32 %v1837_v27  ;;  %vm1888_vm8 = vweird.f32 %v1837_v27 }
 0x2b7   :  { %1980 = vmatmul.bf16.vlgmr.msra.gmra.mxu3 %v6213_v6  ;;  %2006 = vmatmul.bf16.vlgmr.msrb.gmra.mxu1 %v6213_v6 }
 0x2b8   :  { %2028 = vmatpush.bf16.msrb.mxu3 %v7889_v34  ;;  %2054 = vmatpush.bf16.msra.mxu1 %v7890_v60 }
 0x2b9   :  { %v4999_v63 = vpop.eup %4998 }
 0x2ba   :  { %v1836_v10 = vadd.f32 1.0, %v4999_v63 }
 0x2bc   :  { %5002 = vrcp.f32 %v1836_v10  ;;  %v5001_v38 = vpop.eup %5000  ;;  %2029 = vmatpush.bf16.msrb.mxu3 %v7891_v17  ;;  %2055 = vmatpush.bf16.msra.mxu1 %v7992_v50  ;;  %v1879_v33 = vand.u32 2147483648, %v1836_v10  ;;  %v1877_v30 = vand.u32 2147483647, %v1836_v10  ;;  %vm1873_vm4 = vweird.f32 %v1836_v10 }
 0x2bd   :  { %v1884_v0 = vmul.f32 %v5001_v38, %v1837_v27  ;;  %vm1889_vm7 = vweird.f32 %v5001_v38 }
 0x2be   :  { %v1880_v42 = vor.u32 1.1754944e-38, %v1879_v33  ;;  %vm1878_vm6 = vcmp.eq.f32.partialorder %v1877_v30, 8.507059e+37  ;;  %vm1890_vm9 = vmor %vm1888_vm8, %vm1889_vm7 }
 0x2bf   :  { %v1885_v37 = vsub.f32 1.0, %v1884_v0 }
 0x2c0   :  { %2030 = vmatpush.bf16.msrb.mxu3 %v7993_v26  ;;  %2056 = vmatpush.bf16.msra.mxu1 %v7994_v40 }
 0x2c1   :  { %v1886_v52 = vmul.f32 %v5001_v38, %v1885_v37  ;;  %v1892_v37 = vand.u32 2147483647, %v1837_v27 }
 0x2c2   :  { %v5003_v1 = vpop.eup %5002 }
 0x2c3   :  { %v1869_v4 = vmul.f32 %v5003_v1, %v1836_v10  ;;  %vm1874_vm3 = vweird.f32 %v5003_v1  ;;  %v1887_v0 = vadd.f32 %v5001_v38, %v1886_v52  ;;  %v1894_v10 = vand.u32 2147483648, %v1837_v27 }
 0x2c4   :  { %2031 = vmatpush.bf16.msrb.mxu3 %v7995_v57  ;;  %2057 = vmatpush.bf16.msra.mxu1 %v7996_v21  ;;  %vm1875_vm5 = vmor %vm1873_vm4, %vm1874_vm3  ;;  %vm1893_vm10 = vcmp.eq.f32.partialorder %v1892_v37, 8.507059e+37  ;;  %v8010_v37 = vld [vmem:[#allocation87_spill] sm:$0xff] }
 0x2c5   :  { %v1870_v56 = vsub.f32 1.0, %v1869_v4  ;;  %v1895_v33 = vor.u32 1.1754944e-38, %v1894_v10  ;;  %v8008_v10 = vld [vmem:[#allocation145_spill] sm:$0xff] }
 0x2c7   :  { %v1871_v54 = vmul.f32 %v5003_v1, %v1870_v56  ;;  %2032 = vmatmul.bf16.vlgmr.msrb.gmra.mxu3 %v6213_v6  ;;  %2058 = vmatmul.bf16.vlgmr.msra.gmra.mxu1 %v6213_v6 }
 0x2c8   :  { %2076 = vmatpush.bf16.msra.mxu3 %v7997_v28  ;;  %2102 = vmatpush.bf16.msrb.mxu1 %v7998_v47 }
 0x2c9   :  { %v1872_v8 = vadd.f32 %v5003_v1, %v1871_v54 }
 0x2cb   :  { %v1876_v23 = vsel %vm1875_vm5, %v5003_v1, %v1872_v8  ;;  %v8000_v8 = vld [vmem:[#allocation141_spill] sm:$0xff] }
 0x2cc   :  { %v1800_v7 = vpop.f32.mrf.mxu2  ;;  %v1881_v5 = vsel %vm1878_vm6, %v1880_v42, %v1876_v23  ;;  %2077 = vmatpush.bf16.msra.mxu3 %v5783_v16  ;;  %2103 = vmatpush.bf16.msrb.mxu1 %v5785_v55  ;;  %v8002_v42 = vld [vmem:[#allocation83_spill] sm:$0xff]  ;;  %v8003_v23 = vld [vmem:[#allocation82_spill] sm:$0xff] }
 0x2cd   :  { %v1801_v20 = vadd.f32 %v1800_v7, %v6195_v3  ;;  %v1806_v3 = vadd.f32 %v6193_v13, %v6022_v62 }
 0x2cf   :  { %v1904_v63 = vadd.f32 %v6019_v61, %v1801_v20  ;;  %v1891_v61 = vsel %vm1890_vm9, %v5001_v38, %v1887_v0  ;;  %v8001_v20 = vld [vmem:[#allocation16_spill] sm:$0xff]  ;;  %v8006_v0 = vld [vmem:[#allocation85_spill] sm:$0xff] }
 0x2d0   :  { %2078 = vmatpush.bf16.msra.mxu3 %v5797_v59  ;;  %2104 = vmatpush.bf16.msrb.mxu1 %v5799_v48  ;;  %v1896_v54 = vsel %vm1893_vm10, %v1895_v33, %v1891_v61  ;;  %v8012_v61 = vld [vmem:[#allocation147_spill] sm:$0xff]  ;;  %v8014_v33 = vld [vmem:[#allocation92_spill] sm:$0xff] }
 0x2d1   :  { %v1905_v4 = vmul.f32 %v1904_v63, %v1881_v5  ;;  %v1913_v13 = vsub.f32 1.0, %v1896_v54  ;;  %v1915_v52 = vmul.f32 %v1896_v54, %v6040_v15  ;;  %v7999_v15 = vld [vmem:[#allocation140_spill] sm:$0xff]  ;;  %v8004_v5 = vld [vmem:[#allocation143_spill] sm:$0xff] }
 0x2d2   :  { %v8005_v63 = vld [vmem:[#allocation20_spill] sm:$0xff] }
 0x2d3   :  { %v1906_v56 = vadd.f32 %v1905_v4, %v1806_v3  ;;  %v8007_v3 = vld [vmem:[#allocation84_spill] sm:$0xff] }
 0x2d4   :  { %v1802_v1 = vpop.f32.mrf.mxu2  ;;  %2079 = vmatpush.bf16.msra.mxu3 %v5810_v19  ;;  %2105 = vmatpush.bf16.msrb.mxu1 %v5812_v46  ;;  %v8009_v4 = vld [vmem:[#allocation24_spill] sm:$0xff] }
 0x2d5   :  { %5004 = vtanh.f32 %v1906_v56  ;;  %v8011_v56 = vld [vmem:[#allocation86_spill] sm:$0xff]  ;;  %v8013_v1 = vld [vmem:[#allocation28_spill] sm:$0xff] }
 0x2d6   :  { %v8015_v54 = vld [vmem:[#allocation88_spill] sm:$0xff] }
 0x2d8   :  { %2080 = vmatpush.bf16.msra.mxu3 %v5822_v22  ;;  %2106 = vmatpush.bf16.msrb.mxu1 %v5824_v31 }
 0x2db   :  { %v5005_v30 = vpop.eup %5004 }
 0x2dc   :  { %v1914_v27 = vmul.f32 %v5005_v30, %v1913_v13  ;;  %2081 = vmatpush.bf16.msra.mxu3 %v5833_v43  ;;  %2107 = vmatpush.bf16.msrb.mxu1 %v7894_v36  ;;  %v8016_v13 = vld [vmem:[#allocation148_spill] sm:$0xff] }
 0x2dd   :  { %v8017_v30 = vld [vmem:[#allocation32_spill] sm:$0xff] }
 0x2de   :  { %v6256_v7 = vadd.f32 %v1915_v52, %v1914_v27  ;;  %v8018_v27 = vld [vmem:[#allocation96_spill] sm:$0xff]  ;;  %v8019_v52 = vld [vmem:[#allocation93_spill] sm:$0xff] }
 0x2e0   :  { %1917 = vst [vmem:[#allocation3 + $0x2] sm:$0x3] %v6256_v7  ;;  %v6263_v38 = vpack.c.bf16 %v6256_v7, %v6256_v7  ;;  %2082 = vmatpush.bf16.msra.mxu3 %v5843_v44  ;;  %2108 = vmatpush.bf16.msrb.mxu1 %v5845_v45 }
 0x2e2   :  { %1941 = vmatmul.bf16.vlgmr.msrb.gmra.mxu0 %v6263_v38  ;;  %1967 = vmatmul.bf16.vlgmr.msrb.gmra.mxu2 %v6263_v38 }
 0x2e3   :  { %2037 = vmatpush.bf16.msrb.mxu0 %v7895_v2  ;;  %2063 = vmatpush.bf16.msrb.mxu2 %v7896_v35 }
 0x2e4   :  { %2083 = vmatpush.bf16.msra.mxu3 %v5853_v14  ;;  %2109 = vmatpush.bf16.msrb.mxu1 %v7999_v15 }
 0x2e7   :  { %2038 = vmatpush.bf16.msrb.mxu0 %v7897_v32  ;;  %2064 = vmatpush.bf16.msrb.mxu2 %v7898_v18 }
 0x2e8   :  { %2128 = vmatpush.bf16.msrb.mxu3 %v8000_v8  ;;  %2270 = vmatpush.bf16.msra.mxu1 %v8001_v20  ;;  %v8101_v20 = vld [vmem:[#allocation45_spill] sm:$0xff] }
 0x2e9   :  { %2084 = vmatmul.bf16.vlgmr.msra.gmra.mxu3 %v6213_v6  ;;  %2110 = vmatmul.bf16.vlgmr.msrb.gmra.mxu1 %v6213_v6 }
 0x2eb   :  { %2039 = vmatpush.bf16.msrb.mxu0 %v8002_v42  ;;  %2065 = vmatpush.bf16.msrb.mxu2 %v8003_v23 }
 0x2ec   :  { %2129 = vmatpush.bf16.msrb.mxu3 %v8004_v5  ;;  %2271 = vmatpush.bf16.msra.mxu1 %v8005_v63  ;;  %v8022_v63 = vld [vmem:[#allocation101_spill] sm:$0xff] }
 0x2ed   :  { %v8079_v5 = vld [vmem:[#allocation69_spill] sm:$0xff] }
 0x2ef   :  { %2040 = vmatpush.bf16.msrb.mxu0 %v8006_v0  ;;  %2066 = vmatpush.bf16.msrb.mxu2 %v8007_v3  ;;  %v8105_v3 = vld [vmem:[#allocation63_spill] sm:$0xff] }
 0x2f0   :  { %2130 = vmatpush.bf16.msrb.mxu3 %v8008_v10  ;;  %2272 = vmatpush.bf16.msra.mxu1 %v8009_v4  ;;  %v8020_v4 = vld [vmem:[#allocation149_spill] sm:$0xff]  ;;  %v8021_v10 = vld [vmem:[#allocation36_spill] sm:$0xff]  ;;  %v8106_v0 = vld [vmem:[#allocation67_spill] sm:$0xff] }
 0x2f2   :  { %1993 = vmatmul.bf16.vlgmr.msra.gmra.mxu0 %v6263_v38  ;;  %2019 = vmatmul.bf16.vlgmr.msra.gmra.mxu2 %v6263_v38 }
 0x2f3   :  { %2041 = vmatpush.bf16.msrb.mxu0 %v8010_v37  ;;  %2067 = vmatpush.bf16.msrb.mxu2 %v8011_v56  ;;  %v8082_v56 = vld [vmem:[#allocation13_spill] sm:$0xff]  ;;  %v8096_v37 = vld [vmem:[#allocation35_spill] sm:$0xff] }
 0x2f4   :  { %2131 = vmatpush.bf16.msrb.mxu3 %v8012_v61  ;;  %2273 = vmatpush.bf16.msra.mxu1 %v8013_v1  ;;  %v8023_v61 = vld [vmem:[#allocation97_spill] sm:$0xff]  ;;  %v8024_v1 = vld [vmem:[#allocation102_spill] sm:$0xff] }
 0x2f7   :  { %2042 = vmatpush.bf16.msrb.mxu0 %v8014_v33  ;;  %2068 = vmatpush.bf16.msrb.mxu2 %v8015_v54  ;;  %v8025_v33 = vld [vmem:[#allocation98_spill] sm:$0xff] }
 0x2f8   :  { %2132 = vmatpush.bf16.msrb.mxu3 %v8016_v13  ;;  %2274 = vmatpush.bf16.msra.mxu1 %v8017_v30  ;;  %v8026_v54 = vld [vmem:[#allocation150_spill] sm:$0xff]  ;;  %v8027_v13 = vld [vmem:[#allocation41_spill] sm:$0xff] }
 0x2f9   :  { %v8028_v30 = vld [vmem:[#allocation106_spill] sm:$0xff] }
 0x2fb   :  { %2043 = vmatpush.bf16.msrb.mxu0 %v8018_v27  ;;  %2069 = vmatpush.bf16.msrb.mxu2 %v8019_v52  ;;  %v8037_v52 = vld [vmem:[#allocation52_spill] sm:$0xff]  ;;  %v8074_v27 = vld [vmem:[#allocation142_spill] sm:$0xff] }
 0x2fc   :  { %2133 = vmatpush.bf16.msrb.mxu3 %v8020_v4  ;;  %2275 = vmatpush.bf16.msra.mxu1 %v8021_v10  ;;  %v8029_v4 = vld [vmem:[#allocation103_spill] sm:$0xff] }
 0x2fd   :  { %v8030_v10 = vld [vmem:[#allocation151_spill] sm:$0xff] }
 0x2ff   :  { %2044 = vmatpush.bf16.msrb.mxu0 %v8022_v63  ;;  %2070 = vmatpush.bf16.msrb.mxu2 %v8023_v61  ;;  %v8031_v63 = vld [vmem:[#allocation46_spill] sm:$0xff]  ;;  %v8032_v61 = vld [vmem:[#allocation17_spill] sm:$0xff] }
 0x300   :  { %2134 = vmatpush.bf16.msrb.mxu3 %v8026_v54  ;;  %2276 = vmatpush.bf16.msra.mxu1 %v8027_v13  ;;  %v8035_v54 = vld [vmem:[#allocation107_spill] sm:$0xff]  ;;  %v8036_v13 = vld [vmem:[#allocation21_spill] sm:$0xff] }
 0x302   :  { %2045 = vmatmul.bf16.vlgmr.msrb.gmra.mxu0 %v6263_v38  ;;  %2071 = vmatmul.bf16.vlgmr.msrb.gmra.mxu2 %v6263_v38 }
 0x303   :  { %2089 = vmatpush.bf16.msra.mxu0 %v8024_v1  ;;  %2115 = vmatpush.bf16.msra.mxu2 %v8025_v33  ;;  %v8033_v1 = vld [vmem:[#allocation48_spill] sm:$0xff]  ;;  %v8034_v33 = vld [vmem:[#allocation110_spill] sm:$0xff] }
 0x304   :  { %2135 = vmatpush.bf16.msrb.mxu3 %v8030_v10  ;;  %2277 = vmatpush.bf16.msra.mxu1 %v8031_v63  ;;  %v8040_v10 = vld [vmem:[#allocation25_spill] sm:$0xff]  ;;  %v8041_v63 = vld [vmem:[#allocation56_spill] sm:$0xff] }
 0x307   :  { %2090 = vmatpush.bf16.msra.mxu0 %v8028_v30  ;;  %2116 = vmatpush.bf16.msra.mxu2 %v8029_v4  ;;  %v8038_v30 = vld [vmem:[#allocation114_spill] sm:$0xff]  ;;  %v8039_v4 = vld [vmem:[#allocation111_spill] sm:$0xff] }
 0x308   :  { %2296 = vmatpush.bf16.msra.mxu3 %v8032_v61  ;;  %2322 = vmatpush.bf16.msrb.mxu1 %v8033_v1  ;;  %v8042_v61 = vld [vmem:[#allocation118_spill] sm:$0xff]  ;;  %v8043_v1 = vld [vmem:[#allocation115_spill] sm:$0xff] }
 0x309   :  { %2136 = vmatmul.bf16.vlgmr.msrb.gmra.mxu3 %v6213_v6  ;;  %v8046_v6 = vld [vmem:[#allocation124_spill] sm:$0xff] }
 0x30b   :  { %2091 = vmatpush.bf16.msra.mxu0 %v8034_v33  ;;  %2117 = vmatpush.bf16.msra.mxu2 %v8035_v54  ;;  %v8044_v33 = vld [vmem:[#allocation29_spill] sm:$0xff]  ;;  %v8045_v54 = vld [vmem:[#allocation60_spill] sm:$0xff] }
 0x30c   :  { %2297 = vmatpush.bf16.msra.mxu3 %v8036_v13  ;;  %2323 = vmatpush.bf16.msrb.mxu1 %v8037_v52  ;;  %v8047_v13 = vld [vmem:[#allocation119_spill] sm:$0xff]  ;;  %v8048_v52 = vld [vmem:[#allocation33_spill] sm:$0xff] }
 0x30f   :  { %2092 = vmatpush.bf16.msra.mxu0 %v8038_v30  ;;  %2118 = vmatpush.bf16.msra.mxu2 %v8039_v4  ;;  %v8049_v30 = vld [vmem:[#allocation64_spill] sm:$0xff]  ;;  %v8050_v4 = vld [vmem:[#allocation126_spill] sm:$0xff] }
 0x310   :  { %2298 = vmatpush.bf16.msra.mxu3 %v8040_v10  ;;  %2324 = vmatpush.bf16.msrb.mxu1 %v8041_v63  ;;  %v8051_v10 = vld [vmem:[#allocation125_spill] sm:$0xff] }
 0x311   :  { %v8052_v63 = vld [vmem:[#allocation37_spill] sm:$0xff] }
 0x313   :  { %2093 = vmatpush.bf16.msra.mxu0 %v8042_v61  ;;  %2119 = vmatpush.bf16.msra.mxu2 %v8043_v1  ;;  %v8053_v61 = vld [vmem:[#allocation68_spill] sm:$0xff] }
 0x314   :  { %2299 = vmatpush.bf16.msra.mxu3 %v8044_v33  ;;  %2325 = vmatpush.bf16.msrb.mxu1 %v8045_v54  ;;  %v8054_v1 = vld [vmem:[#allocation128_spill] sm:$0xff]  ;;  %v8055_v33 = vld [vmem:[#allocation127_spill] sm:$0xff]  ;;  %v8056_v54 = vld [vmem:[#allocation129_spill] sm:$0xff] }
 0x317   :  { %2094 = vmatpush.bf16.msra.mxu0 %v8046_v6  ;;  %2120 = vmatpush.bf16.msra.mxu2 %v8047_v13  ;;  %v8057_v6 = vld [vmem:[#allocation14_spill] sm:$0xff] }
 0x318   :  { %2300 = vmatpush.bf16.msra.mxu3 %v8048_v52  ;;  %2326 = vmatpush.bf16.msrb.mxu1 %v8049_v30  ;;  %v8058_v13 = vld [vmem:[#allocation42_spill] sm:$0xff]  ;;  %v8059_v52 = vld [vmem:[#allocation73_spill] sm:$0xff] }
 0x319   :  { %v8060_v30 = vld [vmem:[#allocation130_spill] sm:$0xff] }
 0x31b   :  { %2095 = vmatpush.bf16.msra.mxu0 %v8050_v4  ;;  %2121 = vmatpush.bf16.msra.mxu2 %v8051_v10  ;;  %v8069_v10 = vld [vmem:[#allocation26_spill] sm:$0xff] }
 0x31c   :  { %2301 = vmatpush.bf16.msra.mxu3 %v8052_v63  ;;  %2327 = vmatpush.bf16.msrb.mxu1 %v8053_v61  ;;  %v8061_v63 = vld [vmem:[#allocation18_spill] sm:$0xff]  ;;  %v8062_v61 = vld [vmem:[#allocation47_spill] sm:$0xff] }
 0x31f   :  { %2096 = vmatpush.bf16.msra.mxu0 %v8054_v1  ;;  %2122 = vmatpush.bf16.msra.mxu2 %v8055_v33  ;;  %v8063_v1 = vld [vmem:[#allocation78_spill] sm:$0xff]  ;;  %v8064_v33 = vld [vmem:[#allocation49_spill] sm:$0xff] }
 0x320   :  { %2302 = vmatpush.bf16.msra.mxu3 %v8058_v13  ;;  %2328 = vmatpush.bf16.msrb.mxu1 %v8059_v52  ;;  %v8067_v13 = vld [vmem:[#allocation53_spill] sm:$0xff]  ;;  %v8068_v52 = vld [vmem:[#allocation135_spill] sm:$0xff] }
 0x322   :  { %2097 = vmatmul.bf16.vlgmr.msra.gmra.mxu0 %v6263_v38  ;;  %2123 = vmatmul.bf16.vlgmr.msra.gmra.mxu2 %v6263_v38 }
 0x323   :  { %2141 = vmatpush.bf16.msrb.mxu0 %v8056_v54  ;;  %2283 = vmatpush.bf16.msrb.mxu2 %v8057_v6  ;;  %v8065_v54 = vld [vmem:[#allocation132_spill] sm:$0xff]  ;;  %v8066_v6 = vld [vmem:[#allocation22_spill] sm:$0xff] }
 0x324   :  { %2303 = vmatpush.bf16.msra.mxu3 %v8062_v61  ;;  %2329 = vmatpush.bf16.msrb.mxu1 %v8063_v1  ;;  %v1955_v4 = vpop.f32.mrf.mxu1  ;;  %v8072_v61 = vld [vmem:[#allocation30_spill] sm:$0xff]  ;;  %v8073_v1 = vld [vmem:[#allocation61_spill] sm:$0xff] }
 0x327   :  { %2142 = vmatpush.bf16.msrb.mxu0 %v8060_v30  ;;  %2284 = vmatpush.bf16.msrb.mxu2 %v8061_v63  ;;  %v8070_v30 = vld [vmem:[#allocation57_spill] sm:$0xff]  ;;  %v8071_v63 = vld [vmem:[#allocation138_spill] sm:$0xff] }
 0x328   :  { %2348 = vmatpush.bf16.msrb.mxu3 %v8064_v33 }
 0x32a   :  { %v1929_v33 = vpop.f32.mrf.mxu3 }
 0x32b   :  { %2143 = vmatpush.bf16.msrb.mxu0 %v8065_v54  ;;  %2285 = vmatpush.bf16.msrb.mxu2 %v8066_v6  ;;  %v8075_v54 = vld [vmem:[#allocation34_spill] sm:$0xff] }
 0x32c   :  { %2349 = vmatpush.bf16.msrb.mxu3 %v8067_v13  ;;  %v1957_v6 = vpop.f32.mrf.mxu1  ;;  %v8076_v13 = vld [vmem:[#allocation65_spill] sm:$0xff] }
 0x32d   :  { %v8084_v6 = vld [vmem:[#allocation74_spill] sm:$0xff] }
 0x32f   :  { %2144 = vmatpush.bf16.msrb.mxu0 %v8068_v52  ;;  %2286 = vmatpush.bf16.msrb.mxu2 %v8069_v10  ;;  %v8077_v52 = vld [vmem:[#allocation144_spill] sm:$0xff]  ;;  %v8078_v10 = vld [vmem:[#allocation38_spill] sm:$0xff] }
 0x330   :  { %2350 = vmatpush.bf16.msrb.mxu3 %v8070_v30 }
 0x332   :  { %v1931_v30 = vpop.f32.mrf.mxu3 }
 0x333   :  { %2145 = vmatpush.bf16.msrb.mxu0 %v8071_v63  ;;  %2287 = vmatpush.bf16.msrb.mxu2 %v8072_v61  ;;  %v8080_v63 = vld [vmem:[#allocation146_spill] sm:$0xff]  ;;  %v8081_v61 = vld [vmem:[#allocation43_spill] sm:$0xff] }
 0x334   :  { %2351 = vmatpush.bf16.msrb.mxu3 %v8073_v1  ;;  %v6366_v1 = vpop.f32.mrf.mxu1 }
 0x337   :  { %2146 = vmatpush.bf16.msrb.mxu0 %v8074_v27  ;;  %2288 = vmatpush.bf16.msrb.mxu2 %v8075_v54  ;;  %v8083_v27 = vld [vmem:[#allocation44_spill] sm:$0xff] }
 0x338   :  { %2352 = vmatpush.bf16.msrb.mxu3 %v8076_v13  ;;  %v8085_v13 = vld [vmem:[#allocation15_spill] sm:$0xff] }
 0x33a   :  { %v6375_v30 = vpop.f32.mrf.mxu3 }
 0x33b   :  { %2147 = vmatpush.bf16.msrb.mxu0 %v8077_v52  ;;  %2289 = vmatpush.bf16.msrb.mxu2 %v8078_v10  ;;  %v8086_v10 = vld [vmem:[#allocation50_spill] sm:$0xff] }
 0x33c   :  { %2353 = vmatpush.bf16.msrb.mxu3 %v8079_v5  ;;  %v8087_v5 = vld [vmem:[#allocation79_spill] sm:$0xff]  ;;  %v8089_v52 = vld [vmem:[#allocation54_spill] sm:$0xff] }
 0x33f   :  { %2148 = vmatpush.bf16.msrb.mxu0 %v8080_v63  ;;  %2290 = vmatpush.bf16.msrb.mxu2 %v8081_v61  ;;  %v2009_v63 = vpop.f32.mrf.mxu1  ;;  %v8088_v61 = vld [vmem:[#allocation19_spill] sm:$0xff] }
 0x340   :  { %2354 = vmatpush.bf16.msrb.mxu3 %v8084_v6 }
 0x342   :  { %2149 = vmatmul.bf16.vlgmr.msrb.gmra.mxu0 %v6263_v38  ;;  %v1983_v6 = vpop.f32.mrf.mxu3  ;;  %v8092_v38 = vld [vmem:[#allocation27_spill] sm:$0xff] }
 0x343   :  { %2309 = vmatpush.bf16.msra.mxu0 %v8082_v56  ;;  %2335 = vmatpush.bf16.msra.mxu2 %v8083_v27  ;;  %v8090_v56 = vld [vmem:[#allocation23_spill] sm:$0xff]  ;;  %v8091_v27 = vld [vmem:[#allocation58_spill] sm:$0xff] }
 0x344   :  { %2355 = vmatpush.bf16.msrb.mxu3 %v8087_v5  ;;  %v8095_v5 = vld [vmem:[#allocation66_spill] sm:$0xff]  ;;  %v8099_v6 = vld [vmem:[#allocation75_spill] sm:$0xff] }
 0x347   :  { %2310 = vmatpush.bf16.msra.mxu0 %v8085_v13  ;;  %2336 = vmatpush.bf16.msra.mxu2 %v8086_v10  ;;  %v6381_v54 = vpop.f32.mrf.mxu1  ;;  %v8093_v13 = vld [vmem:[#allocation62_spill] sm:$0xff]  ;;  %v8094_v10 = vld [vmem:[#allocation31_spill] sm:$0xff] }
 0x34a   :  { %v6387_v63 = vpop.f32.mrf.mxu3 }
 0x34b   :  { %2311 = vmatpush.bf16.msra.mxu0 %v8088_v61  ;;  %2337 = vmatpush.bf16.msra.mxu2 %v8089_v52  ;;  %v8097_v52 = vld [vmem:[#allocation70_spill] sm:$0xff] }
 0x34f   :  { %2312 = vmatpush.bf16.msra.mxu0 %v8090_v56  ;;  %2338 = vmatpush.bf16.msra.mxu2 %v8091_v27  ;;  %v2061_v61 = vpop.f32.mrf.mxu1  ;;  %v8098_v56 = vld [vmem:[#allocation39_spill] sm:$0xff]  ;;  %v8100_v27 = vld [vmem:[#allocation40_spill] sm:$0xff] }
 0x353   :  { %2313 = vmatpush.bf16.msra.mxu0 %v8092_v38  ;;  %2339 = vmatpush.bf16.msra.mxu2 %v8093_v13  ;;  %v2035_v38 = vpop.f32.mrf.mxu3 }
 0x357   :  { %2314 = vmatpush.bf16.msra.mxu0 %v8094_v10  ;;  %2340 = vmatpush.bf16.msra.mxu2 %v8095_v5  ;;  %v8102_v10 = vld [vmem:[#allocation51_spill] sm:$0xff] }
 0x358   :  { %v8103_v5 = vld [vmem:[#allocation55_spill] sm:$0xff] }
 0x35b   :  { %2315 = vmatpush.bf16.msra.mxu0 %v8096_v37  ;;  %2341 = vmatpush.bf16.msra.mxu2 %v8097_v52  ;;  %v8104_v37 = vld [vmem:[#allocation59_spill] sm:$0xff] }
 0x35f   :  { %2316 = vmatpush.bf16.msra.mxu0 %v8098_v56  ;;  %2342 = vmatpush.bf16.msra.mxu2 %v8099_v6  ;;  %v1942_v13 = vpop.f32.mrf.mxu0  ;;  %v2157_v6 = vld [vmem:[#allocation2 + $0x12] sm:$0x3f] }
 0x360   :  { %v1943_v52 = vadd.f32 %v1942_v13, %v1929_v33 }
 0x363   :  { %2361 = vmatpush.bf16.msrb.mxu0 %v8100_v27 }
 0x365   :  { %v1968_v8 = vpop.f32.mrf.mxu2 }
 0x366   :  { %v1969_v61 = vadd.f32 %v1968_v8, %v1955_v4  ;;  %v6398_v56 = vpop.f32.mrf.mxu1  ;;  %v8107_v8 = vld [vmem:[#allocation71_spill] sm:$0xff] }
 0x367   :  { %2362 = vmatpush.bf16.msrb.mxu0 %v8101_v20  ;;  %v1944_v15 = vpop.f32.mrf.mxu0 }
 0x368   :  { %v2160_v14 = vrot.slane %v1969_v61, 6 }
 0x36a   :  { %v2161_v27 = vsel %vm211_vm1, %v1943_v52, %v2160_v14 }
 0x36b   :  { %2363 = vmatpush.bf16.msrb.mxu0 %v8102_v10  ;;  %v2163_v38 = vadd.f32 %v2161_v27, %v2157_v6 }
 0x36c   :  { %v6402_v10 = vpop.f32.mrf.mxu3 }
 0x36d   :  { %2167 = vst [vmem:[#allocation1] ss:$4 sm:$0xff] %v2163_v38  ;;  %v1970_v20 = vpop.f32.mrf.mxu2 }
 0x36e   :  { %v2113_v15 = vpop.f32.mrf.mxu1 }
 0x36f   :  { %2364 = vmatpush.bf16.msrb.mxu0 %v8103_v5  ;;  %v1994_v5 = vpop.f32.mrf.mxu0 }
 0x373   :  { %2365 = vmatpush.bf16.msrb.mxu0 %v8104_v37 }
 0x374   :  { %v2168_v4 = vld.sshfl [vmem:[#allocation1] sm:$0xff pattern:$0x73625140]  ;;  %v2169_v33 = vld.sshfl [vmem:[#allocation1 + $0x8] sm:$0xff pattern:$0x73625140]  ;;  %v2087_v37 = vpop.f32.mrf.mxu3 }
 0x375   :  { %v4769_v13 = vmul.f32 -1.442695, %v2168_v4  ;;  %v4770_v61 = vmul.f32 -1.442695, %v2169_v33  ;;  %v1995_v37 = vadd.f32 %v1994_v5, %v6375_v30 }
 0x377   :  { %2366 = vmatpush.bf16.msrb.mxu0 %v8105_v3  ;;  %5006 = vpow2.f32 %v4769_v13  ;;  %v1996_v14 = vpop.f32.mrf.mxu0  ;;  %v2020_v3 = vpop.f32.mrf.mxu2 }
 0x378   :  { %5008 = vpow2.f32 %v4770_v61 }
 0x37b   :  { %2367 = vmatpush.bf16.msrb.mxu0 %v8106_v0 }
 0x37d   :  { %v5007_v27 = vpop.eup %5006 }
 0x37e   :  { %v5009_v52 = vpop.eup %5008  ;;  %v2184_v38 = vadd.f32 1.0, %v5007_v27 }
 0x37f   :  { %2368 = vmatpush.bf16.msrb.mxu0 %v8107_v8  ;;  %v2185_v20 = vadd.f32 1.0, %v5009_v52  ;;  %v2046_v45 = vpop.f32.mrf.mxu0  ;;  %v2022_v23 = vpop.f32.mrf.mxu2 }
 0x380   :  { %5010 = vrcp.f32 %v2184_v38  ;;  %v2199_v33 = vand.u32 2147483648, %v2184_v38  ;;  %v2197_v14 = vand.u32 2147483647, %v2184_v38  ;;  %vm2193_vm12 = vweird.f32 %v2184_v38 }
 0x381   :  { %5012 = vrcp.f32 %v2185_v20  ;;  %v2248_v23 = vadd.f32 %v6201_v58, %v1995_v37  ;;  %v2214_v5 = vand.u32 2147483648, %v2185_v20  ;;  %vm2208_vm2 = vweird.f32 %v2185_v20 }
 0x382   :  { %v2200_v43 = vor.u32 1.1754944e-38, %v2199_v33  ;;  %vm2198_vm14 = vcmp.eq.f32.partialorder %v2197_v14, 8.507059e+37 }
 0x383   :  { %v2215_v31 = vor.u32 1.1754944e-38, %v2214_v5 }
 0x386   :  { %v5011_v0 = vpop.eup %5010 }
 0x387   :  { %v5013_v15 = vpop.eup %5012  ;;  %v2189_v44 = vmul.f32 %v5011_v0, %v2184_v38  ;;  %v2048_v42 = vpop.f32.mrf.mxu0  ;;  %vm2194_vm11 = vweird.f32 %v5011_v0 }
 0x388   :  { %v2204_v8 = vmul.f32 %v5013_v15, %v2185_v20  ;;  %vm2195_vm13 = vmor %vm2193_vm12, %vm2194_vm11  ;;  %vm2209_vm15 = vweird.f32 %v5013_v15 }
 0x389   :  { %v2190_v4 = vsub.f32 1.0, %v2189_v44  ;;  %vm2210_vm3 = vmor %vm2208_vm2, %vm2209_vm15 }
 0x38a   :  { %v2205_v13 = vsub.f32 1.0, %v2204_v8  ;;  %v6410_v8 = vpop.f32.mrf.mxu2 }
 0x38b   :  { %v2191_v61 = vmul.f32 %v5011_v0, %v2190_v4  ;;  %v2251_v4 = vrot.slane %v2157_v6, 4 }
 0x38c   :  { %v2206_v27 = vmul.f32 %v5013_v15, %v2205_v13  ;;  %v6407_v52 = vpop.f32.mrf.mxu3  ;;  %v2212_v13 = vand.u32 2147483647, %v2185_v20 }
 0x38d   :  { %v2192_v36 = vadd.f32 %v5011_v0, %v2191_v61 }
 0x38e   :  { %v2207_v44 = vadd.f32 %v5013_v15, %v2206_v27  ;;  %vm2213_vm4 = vcmp.eq.f32.partialorder %v2212_v13, 8.507059e+37 }
 0x38f   :  { %v2196_v18 = vsel %vm2195_vm13, %v5011_v0, %v2192_v36 }
 0x390   :  { %v2201_v42 = vsel %vm2198_vm14, %v2200_v43, %v2196_v18  ;;  %v2211_v61 = vsel %vm2210_vm3, %v5013_v15, %v2207_v44  ;;  %v2021_v43 = vadd.f32 %v2020_v3, %v6366_v1  ;;  %v2047_v15 = vadd.f32 %v2046_v45, %v6387_v63 }
 0x391   :  { %v2249_v30 = vmul.f32 %v2248_v23, %v2201_v42  ;;  %v2216_v36 = vsel %vm2213_vm4, %v2215_v31, %v2211_v61 }
 0x392   :  { %v2074_v0 = vpop.f32.mrf.mxu2  ;;  %v2259_v58 = vsub.f32 1.0, %v2216_v36  ;;  %v2261_v37 = vmul.f32 %v2216_v36, %v6207_v12  ;;  %v2154_v6 = vadd.f32 %v2021_v43, %v5985_v9  ;;  %v2155_v12 = vadd.f32 %v2047_v15, %v5974_v53 }
 0x393   :  { %v2253_v32 = vadd.f32 %v2251_v4, %v2249_v30 }
 0x394   :  { %v2139_v38 = vpop.f32.mrf.mxu3 }
 0x395   :  { %5014 = vtanh.f32 %v2253_v32 }
 0x39b   :  { %v5015_v18 = vpop.eup %5014 }
 0x39c   :  { %v2260_v33 = vmul.f32 %v5015_v18, %v2259_v58 }
 0x39e   :  { %v6416_v27 = vadd.f32 %v2261_v37, %v2260_v33  ;;  %v2073_v37 = vadd.f32 %v6410_v8, %v6381_v54 }
 0x39f   :  { %v2098_v14 = vpop.f32.mrf.mxu0 }
 0x3a0   :  { %v2099_v20 = vadd.f32 %v2098_v14, %v6402_v10  ;;  %v6421_v31 = vpack.c.bf16 %v6416_v27, %v6416_v27 }
 0x3a2   :  { %v2164_v32 = vadd.f32 %v2154_v6, %v2099_v20  ;;  %2278 = vmatmul.bf16.vlgmr.msra.gmra.mxu1 %v6421_v31  ;;  %2304 = vmatmul.bf16.vlgmr.msra.gmra.mxu3 %v6421_v31 }
 0x3a3   :  { %2374 = vmatpush.bf16.msra.mxu1 %v7881_v39  ;;  %2400 = vmatpush.bf16.msra.mxu3 %v7882_v11 }
 0x3a4   :  { %v4771_v3 = vmul.f32 -1.442695, %v2164_v32 }
 0x3a5   :  { %v2124_v1 = vpop.f32.mrf.mxu2 }
 0x3a6   :  { %5016 = vpow2.f32 %v4771_v3  ;;  %v2125_v10 = vadd.f32 %v2124_v1, %v6398_v56  ;;  %v6449_v3 = vld [vmem:[%s7413_s6] ss:$0 sm:$0xff] }
 0x3a7   :  { %v2100_v45 = vpop.f32.mrf.mxu0  ;;  %2375 = vmatpush.bf16.msra.mxu1 %v7883_v25  ;;  %2401 = vmatpush.bf16.msra.mxu3 %v7884_v49 }
 0x3a8   :  { %v2165_v63 = vadd.f32 %v2155_v12, %v2125_v10 }
 0x3aa   :  { %v4772_v23 = vmul.f32 -1.442695, %v2165_v63 }
 0x3ab   :  { %2376 = vmatpush.bf16.msra.mxu1 %v7885_v24  ;;  %2402 = vmatpush.bf16.msra.mxu3 %v7886_v51 }
 0x3ac   :  { %v5017_v42 = vpop.eup %5016  ;;  %5018 = vpow2.f32 %v4772_v23 }
 0x3ad   :  { %v2186_v44 = vadd.f32 1.0, %v5017_v42  ;;  %v2126_v5 = vpop.f32.mrf.mxu2 }
 0x3af   :  { %5020 = vrcp.f32 %v2186_v44  ;;  %2377 = vmatpush.bf16.msra.mxu1 %v7887_v41  ;;  %2403 = vmatpush.bf16.msra.mxu3 %v7888_v29  ;;  %v2229_v38 = vand.u32 2147483648, %v2186_v44  ;;  %v2227_v0 = vand.u32 2147483647, %v2186_v44  ;;  %vm2223_vm6 = vweird.f32 %v2186_v44 }
 0x3b1   :  { %v2230_v6 = vor.u32 1.1754944e-38, %v2229_v38  ;;  %vm2228_vm8 = vcmp.eq.f32.partialorder %v2227_v0, 8.507059e+37  ;;  %v8110_v0 = vld [vmem:[#allocation77_spill] sm:$0xff] }
 0x3b2   :  { %v5019_v56 = vpop.eup %5018  ;;  %2330 = vmatmul.bf16.vlgmr.msrb.gmra.mxu1 %v6421_v31  ;;  %2356 = vmatmul.bf16.vlgmr.msrb.gmra.mxu3 %v6421_v31 }
 0x3b3   :  { %v2187_v30 = vadd.f32 1.0, %v5019_v56  ;;  %2378 = vmatpush.bf16.msra.mxu1 %v7889_v34  ;;  %2404 = vmatpush.bf16.msra.mxu3 %v7890_v60 }
 0x3b5   :  { %v5021_v4 = vpop.eup %5020  ;;  %5022 = vrcp.f32 %v2187_v30  ;;  %v2244_v8 = vand.u32 2147483648, %v2187_v30  ;;  %vm2238_vm10 = vweird.f32 %v2187_v30  ;;  %v2242_v45 = vand.u32 2147483647, %v2187_v30 }
 0x3b6   :  { %v2219_v13 = vmul.f32 %v5021_v4, %v2186_v44  ;;  %vm2224_vm5 = vweird.f32 %v5021_v4 }
 0x3b7   :  { %2379 = vmatpush.bf16.msra.mxu1 %v7891_v17  ;;  %2405 = vmatpush.bf16.msra.mxu3 %v7992_v50  ;;  %vm2225_vm7 = vmor %vm2223_vm6, %vm2224_vm5  ;;  %v2245_v44 = vor.u32 1.1754944e-38, %v2244_v8  ;;  %vm2243_vm12 = vcmp.eq.f32.partialorder %v2242_v45, 8.507059e+37  ;;  %v8124_v8 = vld [vmem:[#allocation86_spill] sm:$0xff]  ;;  %v8127_v45 = vld [vmem:[#allocation92_spill] sm:$0xff] }
 0x3b8   :  { %v2220_v61 = vsub.f32 1.0, %v2219_v13 }
 0x3ba   :  { %v2221_v36 = vmul.f32 %v5021_v4, %v2220_v61 }
 0x3bb   :  { %v5023_v43 = vpop.eup %5022  ;;  %2380 = vmatpush.bf16.msra.mxu1 %v7993_v26  ;;  %2406 = vmatpush.bf16.msra.mxu3 %v7994_v40 }
 0x3bc   :  { %v2234_v58 = vmul.f32 %v5023_v43, %v2187_v30  ;;  %v2222_v33 = vadd.f32 %v5021_v4, %v2221_v36  ;;  %vm2239_vm9 = vweird.f32 %v5023_v43  ;;  %v8109_v36 = vld [vmem:[#allocation81_spill] sm:$0xff] }
 0x3bd   :  { %vm2240_vm11 = vmor %vm2238_vm10, %vm2239_vm9 }
 0x3be   :  { %v2235_v20 = vsub.f32 1.0, %v2234_v58  ;;  %v2226_v15 = vsel %vm2225_vm7, %v5021_v4, %v2222_v33  ;;  %v8112_v58 = vld [vmem:[#allocation134_spill] sm:$0xff] }
 0x3bf   :  { %v2150_v18 = vpop.f32.mrf.mxu0  ;;  %v2231_v32 = vsel %vm2228_vm8, %v2230_v6, %v2226_v15  ;;  %2381 = vmatpush.bf16.msra.mxu1 %v7995_v57  ;;  %2407 = vmatpush.bf16.msra.mxu3 %v7996_v21  ;;  %v8114_v33 = vld [vmem:[#allocation82_spill] sm:$0xff]  ;;  %v8117_v6 = vld [vmem:[#allocation85_spill] sm:$0xff]  ;;  %v8119_v15 = vld [vmem:[#allocation139_spill] sm:$0xff] }
 0x3c0   :  { %v2151_v14 = vadd.f32 %v2150_v18, %v6407_v52  ;;  %v2236_v54 = vmul.f32 %v5023_v43, %v2235_v20  ;;  %v2156_v52 = vadd.f32 %v2073_v37, %v6022_v62  ;;  %v8113_v18 = vld [vmem:[#allocation83_spill] sm:$0xff]  ;;  %v8115_v37 = vld [vmem:[#allocation136_spill] sm:$0xff] }
 0x3c1   :  { %v8118_v20 = vld [vmem:[#allocation84_spill] sm:$0xff] }
 0x3c2   :  { %v2254_v1 = vadd.f32 %v6449_v3, %v2151_v14  ;;  %v2237_v10 = vadd.f32 %v5023_v43, %v2236_v54  ;;  %2382 = vmatmul.bf16.vlgmr.msra.gmra.mxu1 %v6421_v31  ;;  %2408 = vmatmul.bf16.vlgmr.msra.gmra.mxu3 %v6421_v31  ;;  %v8116_v14 = vld [vmem:[#allocation137_spill] sm:$0xff]  ;;  %v8122_v54 = vld [vmem:[#allocation16_spill] sm:$0xff] }
 0x3c3   :  { %2426 = vmatpush.bf16.msrb.mxu1 %v7997_v28  ;;  %2452 = vmatpush.bf16.msrb.mxu3 %v7998_v47 }
 0x3c4   :  { %v2255_v12 = vmul.f32 %v2254_v1, %v2231_v32  ;;  %v2241_v23 = vsel %vm2240_vm11, %v5023_v43, %v2237_v10  ;;  %v8111_v43 = vld [vmem:[#allocation133_spill] sm:$0xff]  ;;  %v8120_v32 = vld [vmem:[#allocation140_spill] sm:$0xff] }
 0x3c5   :  { %v2246_v5 = vsel %vm2243_vm12, %v2245_v44, %v2241_v23  ;;  %v8121_v1 = vld [vmem:[#allocation141_spill] sm:$0xff]  ;;  %v8126_v10 = vld [vmem:[#allocation20_spill] sm:$0xff] }
 0x3c6   :  { %v2256_v63 = vadd.f32 %v2255_v12, %v2156_v52  ;;  %v2263_v56 = vsub.f32 1.0, %v2246_v5  ;;  %v2265_v13 = vmul.f32 %v2246_v5, %v6256_v7  ;;  %v8108_v7 = vld [vmem:[#allocation131_spill] sm:$0xff]  ;;  %v8129_v23 = vld [vmem:[#allocation145_spill] sm:$0xff]  ;;  %v8131_v44 = vld [vmem:[#allocation96_spill] sm:$0xff] }
 0x3c7   :  { %v2152_v42 = vpop.f32.mrf.mxu0  ;;  %2427 = vmatpush.bf16.msrb.mxu1 %v5783_v16  ;;  %2453 = vmatpush.bf16.msrb.mxu3 %v5785_v55  ;;  %v8123_v52 = vld [vmem:[#allocation87_spill] sm:$0xff]  ;;  %v8132_v5 = vld [vmem:[#allocation93_spill] sm:$0xff] }
 0x3c8   :  { %5024 = vtanh.f32 %v2256_v63  ;;  %v8125_v12 = vld [vmem:[#allocation143_spill] sm:$0xff]  ;;  %v8128_v63 = vld [vmem:[#allocation88_spill] sm:$0xff] }
 0x3c9   :  { %v8130_v42 = vld [vmem:[#allocation24_spill] sm:$0xff] }
 0x3cb   :  { %2428 = vmatpush.bf16.msrb.mxu1 %v5797_v59  ;;  %2454 = vmatpush.bf16.msrb.mxu3 %v5799_v48 }
 0x3ce   :  { %v5025_v30 = vpop.eup %5024 }
 0x3cf   :  { %v2264_v4 = vmul.f32 %v5025_v30, %v2263_v56  ;;  %2429 = vmatpush.bf16.msrb.mxu1 %v5810_v19  ;;  %2455 = vmatpush.bf16.msrb.mxu3 %v5812_v46  ;;  %v8133_v56 = vld [vmem:[#allocation147_spill] sm:$0xff]  ;;  %v8134_v30 = vld [vmem:[#allocation28_spill] sm:$0xff] }
 0x3d1   :  { %v6464_v61 = vadd.f32 %v2265_v13, %v2264_v4  ;;  %v8135_v4 = vld [vmem:[#allocation101_spill] sm:$0xff] }
 0x3d2   :  { %v8136_v13 = vld [vmem:[#allocation97_spill] sm:$0xff] }
 0x3d3   :  { %2267 = vst [vmem:[#allocation3 + $0x4] sm:$0x3] %v6464_v61  ;;  %v6471_v38 = vpack.c.bf16 %v6464_v61, %v6464_v61  ;;  %2430 = vmatpush.bf16.msrb.mxu1 %v5822_v22  ;;  %2456 = vmatpush.bf16.msrb.mxu3 %v8108_v7 }
 0x3d5   :  { %2291 = vmatmul.bf16.vlgmr.msrb.gmra.mxu2 %v6471_v38  ;;  %2317 = vmatmul.bf16.vlgmr.msra.gmra.mxu0 %v6471_v38 }
 0x3d6   :  { %2387 = vmatpush.bf16.msrb.mxu2 %v7895_v2  ;;  %2413 = vmatpush.bf16.msra.mxu0 %v7896_v35 }
 0x3d7   :  { %2431 = vmatpush.bf16.msrb.mxu1 %v8111_v43  ;;  %2457 = vmatpush.bf16.msrb.mxu3 %v8112_v58 }
 0x3da   :  { %2388 = vmatpush.bf16.msrb.mxu2 %v8109_v36  ;;  %2414 = vmatpush.bf16.msra.mxu0 %v8110_v0 }
 0x3db   :  { %2432 = vmatpush.bf16.msrb.mxu1 %v8115_v37  ;;  %2458 = vmatpush.bf16.msrb.mxu3 %v8116_v14 }
 0x3de   :  { %2389 = vmatpush.bf16.msrb.mxu2 %v8113_v18  ;;  %2415 = vmatpush.bf16.msra.mxu0 %v8114_v33 }
 0x3df   :  { %2433 = vmatpush.bf16.msrb.mxu1 %v8119_v15  ;;  %2459 = vmatpush.bf16.msrb.mxu3 %v8120_v32 }
 0x3e2   :  { %2390 = vmatpush.bf16.msrb.mxu2 %v8117_v6  ;;  %2416 = vmatpush.bf16.msra.mxu0 %v8118_v20 }
 0x3e3   :  { %2478 = vmatpush.bf16.msra.mxu1 %v8121_v1  ;;  %2620 = vmatpush.bf16.msra.mxu3 %v8122_v54 }
 0x3e4   :  { %2434 = vmatmul.bf16.vlgmr.msrb.gmra.mxu1 %v6421_v31  ;;  %2460 = vmatmul.bf16.vlgmr.msrb.gmra.mxu3 %v6421_v31 }
 0x3e5   :  { %2343 = vmatmul.bf16.vlgmr.msra.gmra.mxu2 %v6471_v38  ;;  %2369 = vmatmul.bf16.vlgmr.msrb.gmra.mxu0 %v6471_v38 }
 0x3e6   :  { %2391 = vmatpush.bf16.msrb.mxu2 %v8123_v52  ;;  %2417 = vmatpush.bf16.msra.mxu0 %v8124_v8  ;;  %v8137_v8 = vld [vmem:[#allocation102_spill] sm:$0xff]  ;;  %v8140_v52 = vld [vmem:[#allocation32_spill] sm:$0xff] }
 0x3e7   :  { %2479 = vmatpush.bf16.msra.mxu1 %v8125_v12  ;;  %2621 = vmatpush.bf16.msra.mxu3 %v8126_v10  ;;  %v8219_v10 = vld [vmem:[#allocation51_spill] sm:$0xff] }
 0x3e8   :  { %v8220_v12 = vld [vmem:[#allocation55_spill] sm:$0xff] }
 0x3ea   :  { %2392 = vmatpush.bf16.msrb.mxu2 %v8127_v45  ;;  %2418 = vmatpush.bf16.msra.mxu0 %v8128_v63  ;;  %v8138_v45 = vld [vmem:[#allocation98_spill] sm:$0xff]  ;;  %v8139_v63 = vld [vmem:[#allocation148_spill] sm:$0xff] }
 0x3eb   :  { %2480 = vmatpush.bf16.msra.mxu1 %v8129_v23  ;;  %2622 = vmatpush.bf16.msra.mxu3 %v8130_v42  ;;  %v8151_v42 = vld [vmem:[#allocation151_spill] sm:$0xff] }
 0x3ee   :  { %2393 = vmatpush.bf16.msrb.mxu2 %v8131_v44  ;;  %2419 = vmatpush.bf16.msra.mxu0 %v8132_v5  ;;  %v8141_v5 = vld [vmem:[#allocation106_spill] sm:$0xff]  ;;  %v8142_v44 = vld [vmem:[#allocation103_spill] sm:$0xff] }
 0x3ef   :  { %2481 = vmatpush.bf16.msra.mxu1 %v8133_v56  ;;  %2623 = vmatpush.bf16.msra.mxu3 %v8134_v30  ;;  %v8143_v30 = vld [vmem:[#allocation149_spill] sm:$0xff]  ;;  %v8150_v56 = vld [vmem:[#allocation111_spill] sm:$0xff] }
 0x3f2   :  { %2394 = vmatpush.bf16.msrb.mxu2 %v8135_v4  ;;  %2420 = vmatpush.bf16.msra.mxu0 %v8136_v13  ;;  %v8144_v4 = vld [vmem:[#allocation36_spill] sm:$0xff]  ;;  %v8145_v13 = vld [vmem:[#allocation110_spill] sm:$0xff] }
 0x3f3   :  { %2482 = vmatpush.bf16.msra.mxu1 %v8139_v63  ;;  %2624 = vmatpush.bf16.msra.mxu3 %v8140_v52  ;;  %v8148_v63 = vld [vmem:[#allocation41_spill] sm:$0xff]  ;;  %v8149_v52 = vld [vmem:[#allocation114_spill] sm:$0xff] }
 0x3f5   :  { %2395 = vmatmul.bf16.vlgmr.msrb.gmra.mxu2 %v6471_v38  ;;  %2421 = vmatmul.bf16.vlgmr.msra.gmra.mxu0 %v6471_v38 }
 0x3f6   :  { %2439 = vmatpush.bf16.msra.mxu2 %v8137_v8  ;;  %2465 = vmatpush.bf16.msrb.mxu0 %v8138_v45  ;;  %v8146_v8 = vld [vmem:[#allocation107_spill] sm:$0xff]  ;;  %v8147_v45 = vld [vmem:[#allocation150_spill] sm:$0xff] }
 0x3f7   :  { %2483 = vmatpush.bf16.msra.mxu1 %v8143_v30  ;;  %2625 = vmatpush.bf16.msra.mxu3 %v8144_v4  ;;  %v8154_v30 = vld [vmem:[#allocation48_spill] sm:$0xff]  ;;  %v8155_v4 = vld [vmem:[#allocation118_spill] sm:$0xff] }
 0x3fa   :  { %2440 = vmatpush.bf16.msra.mxu2 %v8141_v5  ;;  %2466 = vmatpush.bf16.msrb.mxu0 %v8142_v44  ;;  %v8152_v5 = vld [vmem:[#allocation46_spill] sm:$0xff]  ;;  %v8153_v44 = vld [vmem:[#allocation17_spill] sm:$0xff] }
 0x3fb   :  { %2484 = vmatpush.bf16.msra.mxu1 %v8147_v45  ;;  %2626 = vmatpush.bf16.msra.mxu3 %v8148_v63  ;;  %v8158_v63 = vld [vmem:[#allocation52_spill] sm:$0xff]  ;;  %v8195_v45 = vld [vmem:[#allocation146_spill] sm:$0xff] }
 0x3fe   :  { %2441 = vmatpush.bf16.msra.mxu2 %v8145_v13  ;;  %2467 = vmatpush.bf16.msrb.mxu0 %v8146_v8  ;;  %v8156_v13 = vld [vmem:[#allocation115_spill] sm:$0xff]  ;;  %v8157_v8 = vld [vmem:[#allocation21_spill] sm:$0xff] }
 0x3ff   :  { %2485 = vmatpush.bf16.msra.mxu1 %v8151_v42  ;;  %2627 = vmatpush.bf16.msra.mxu3 %v8152_v5  ;;  %v8161_v42 = vld [vmem:[#allocation25_spill] sm:$0xff]  ;;  %v8162_v5 = vld [vmem:[#allocation56_spill] sm:$0xff] }
 0x402   :  { %2442 = vmatpush.bf16.msra.mxu2 %v8149_v52  ;;  %2468 = vmatpush.bf16.msrb.mxu0 %v8150_v56  ;;  %v8159_v52 = vld [vmem:[#allocation124_spill] sm:$0xff]  ;;  %v8160_v56 = vld [vmem:[#allocation119_spill] sm:$0xff] }
 0x403   :  { %2646 = vmatpush.bf16.msrb.mxu1 %v8153_v44  ;;  %2672 = vmatpush.bf16.msrb.mxu3 %v8154_v30  ;;  %v8163_v44 = vld [vmem:[#allocation126_spill] sm:$0xff]  ;;  %v8164_v30 = vld [vmem:[#allocation125_spill] sm:$0xff] }
 0x404   :  { %2486 = vmatmul.bf16.vlgmr.msra.gmra.mxu1 %v6421_v31  ;;  %v8167_v31 = vld [vmem:[#allocation128_spill] sm:$0xff] }
 0x406   :  { %2443 = vmatpush.bf16.msra.mxu2 %v8155_v4  ;;  %2469 = vmatpush.bf16.msrb.mxu0 %v8156_v13  ;;  %v8165_v4 = vld [vmem:[#allocation29_spill] sm:$0xff]  ;;  %v8166_v13 = vld [vmem:[#allocation60_spill] sm:$0xff] }
 0x407   :  { %2647 = vmatpush.bf16.msrb.mxu1 %v8157_v8  ;;  %2673 = vmatpush.bf16.msrb.mxu3 %v8158_v63  ;;  %v8168_v8 = vld [vmem:[#allocation127_spill] sm:$0xff]  ;;  %v8169_v63 = vld [vmem:[#allocation129_spill] sm:$0xff] }
 0x40a   :  { %2444 = vmatpush.bf16.msra.mxu2 %v8159_v52  ;;  %2470 = vmatpush.bf16.msrb.mxu0 %v8160_v56  ;;  %v8170_v52 = vld [vmem:[#allocation14_spill] sm:$0xff]  ;;  %v8171_v56 = vld [vmem:[#allocation33_spill] sm:$0xff] }
 0x40b   :  { %2648 = vmatpush.bf16.msrb.mxu1 %v8161_v42  ;;  %2674 = vmatpush.bf16.msrb.mxu3 %v8162_v5  ;;  %v8172_v42 = vld [vmem:[#allocation64_spill] sm:$0xff]  ;;  %v8183_v5 = vld [vmem:[#allocation47_spill] sm:$0xff] }
 0x40e   :  { %2445 = vmatpush.bf16.msra.mxu2 %v8163_v44  ;;  %2471 = vmatpush.bf16.msrb.mxu0 %v8164_v30  ;;  %v8173_v30 = vld [vmem:[#allocation130_spill] sm:$0xff] }
 0x40f   :  { %2649 = vmatpush.bf16.msrb.mxu1 %v8165_v4  ;;  %2675 = vmatpush.bf16.msrb.mxu3 %v8166_v13  ;;  %v8174_v44 = vld [vmem:[#allocation18_spill] sm:$0xff]  ;;  %v8175_v13 = vld [vmem:[#allocation37_spill] sm:$0xff] }
 0x410   :  { %v8182_v4 = vld [vmem:[#allocation26_spill] sm:$0xff] }
 0x412   :  { %2446 = vmatpush.bf16.msra.mxu2 %v8167_v31  ;;  %2472 = vmatpush.bf16.msrb.mxu0 %v8168_v8  ;;  %v8176_v31 = vld [vmem:[#allocation68_spill] sm:$0xff] }
 0x413   :  { %2650 = vmatpush.bf16.msrb.mxu1 %v8171_v56  ;;  %2676 = vmatpush.bf16.msrb.mxu3 %v8172_v42  ;;  %v8177_v8 = vld [vmem:[#allocation132_spill] sm:$0xff]  ;;  %v8180_v56 = vld [vmem:[#allocation73_spill] sm:$0xff]  ;;  %v8181_v42 = vld [vmem:[#allocation135_spill] sm:$0xff] }
 0x415   :  { %2447 = vmatmul.bf16.vlgmr.msra.gmra.mxu2 %v6471_v38  ;;  %2473 = vmatmul.bf16.vlgmr.msrb.gmra.mxu0 %v6471_v38 }
 0x416   :  { %2491 = vmatpush.bf16.msrb.mxu2 %v8169_v63  ;;  %2633 = vmatpush.bf16.msra.mxu0 %v8170_v52  ;;  %v8178_v63 = vld [vmem:[#allocation22_spill] sm:$0xff] }
 0x417   :  { %2651 = vmatpush.bf16.msrb.mxu1 %v8175_v13  ;;  %2677 = vmatpush.bf16.msrb.mxu3 %v8176_v31  ;;  %v8179_v52 = vld [vmem:[#allocation42_spill] sm:$0xff] }
 0x418   :  { %v8186_v13 = vld [vmem:[#allocation138_spill] sm:$0xff] }
 0x419   :  { %v8187_v31 = vld [vmem:[#allocation30_spill] sm:$0xff] }
 0x41a   :  { %2492 = vmatpush.bf16.msrb.mxu2 %v8173_v30  ;;  %2634 = vmatpush.bf16.msra.mxu0 %v8174_v44  ;;  %v8184_v30 = vld [vmem:[#allocation78_spill] sm:$0xff]  ;;  %v8185_v44 = vld [vmem:[#allocation49_spill] sm:$0xff] }
 0x41b   :  { %2652 = vmatpush.bf16.msrb.mxu1 %v8179_v52  ;;  %2678 = vmatpush.bf16.msrb.mxu3 %v8180_v56  ;;  %v8190_v52 = vld [vmem:[#allocation34_spill] sm:$0xff] }
 0x41e   :  { %2493 = vmatpush.bf16.msrb.mxu2 %v8177_v8  ;;  %2635 = vmatpush.bf16.msra.mxu0 %v8178_v63  ;;  %v8188_v8 = vld [vmem:[#allocation53_spill] sm:$0xff]  ;;  %v8189_v63 = vld [vmem:[#allocation142_spill] sm:$0xff] }
 0x41f   :  { %2653 = vmatpush.bf16.msrb.mxu1 %v8183_v5  ;;  %2679 = vmatpush.bf16.msrb.mxu3 %v8184_v30  ;;  %v2279_v56 = vpop.f32.mrf.mxu1  ;;  %v8193_v5 = vld [vmem:[#allocation38_spill] sm:$0xff]  ;;  %v8194_v30 = vld [vmem:[#allocation61_spill] sm:$0xff] }
 0x422   :  { %2494 = vmatpush.bf16.msrb.mxu2 %v8181_v42  ;;  %2636 = vmatpush.bf16.msra.mxu0 %v8182_v4  ;;  %v8191_v42 = vld [vmem:[#allocation57_spill] sm:$0xff]  ;;  %v8192_v4 = vld [vmem:[#allocation144_spill] sm:$0xff] }
 0x423   :  { %2698 = vmatpush.bf16.msra.mxu1 %v8185_v44 }
 0x425   :  { %v2305_v44 = vpop.f32.mrf.mxu3 }
 0x426   :  { %2495 = vmatpush.bf16.msrb.mxu2 %v8186_v13  ;;  %2637 = vmatpush.bf16.msra.mxu0 %v8187_v31  ;;  %v8196_v13 = vld [vmem:[#allocation43_spill] sm:$0xff] }
 0x427   :  { %2699 = vmatpush.bf16.msra.mxu1 %v8188_v8  ;;  %v2281_v31 = vpop.f32.mrf.mxu1  ;;  %v8197_v8 = vld [vmem:[#allocation13_spill] sm:$0xff] }
 0x428   :  { %v8204_v31 = vld [vmem:[#allocation54_spill] sm:$0xff] }
 0x42a   :  { %2496 = vmatpush.bf16.msrb.mxu2 %v8189_v63  ;;  %2638 = vmatpush.bf16.msra.mxu0 %v8190_v52  ;;  %v8198_v63 = vld [vmem:[#allocation44_spill] sm:$0xff]  ;;  %v8199_v52 = vld [vmem:[#allocation65_spill] sm:$0xff] }
 0x42b   :  { %2700 = vmatpush.bf16.msra.mxu1 %v8191_v42  ;;  %v8200_v42 = vld [vmem:[#allocation15_spill] sm:$0xff] }
 0x42e   :  { %2497 = vmatpush.bf16.msrb.mxu2 %v8192_v4  ;;  %2639 = vmatpush.bf16.msra.mxu0 %v8193_v5  ;;  %v8201_v4 = vld [vmem:[#allocation50_spill] sm:$0xff]  ;;  %v8202_v5 = vld [vmem:[#allocation69_spill] sm:$0xff] }
 0x42f   :  { %2701 = vmatpush.bf16.msra.mxu1 %v8194_v30  ;;  %v2307_v30 = vpop.f32.mrf.mxu3  ;;  %v6583_v23 = vpop.f32.mrf.mxu1 }
 0x430   :  { %v8210_v30 = vld [vmem:[#allocation62_spill] sm:$0xff] }
 0x432   :  { %2498 = vmatpush.bf16.msrb.mxu2 %v8195_v45  ;;  %2640 = vmatpush.bf16.msra.mxu0 %v8196_v13  ;;  %v8203_v45 = vld [vmem:[#allocation19_spill] sm:$0xff]  ;;  %v8207_v13 = vld [vmem:[#allocation58_spill] sm:$0xff] }
 0x433   :  { %2702 = vmatpush.bf16.msra.mxu1 %v8199_v52  ;;  %v8209_v52 = vld [vmem:[#allocation27_spill] sm:$0xff] }
 0x435   :  { %2499 = vmatmul.bf16.vlgmr.msrb.gmra.mxu2 %v6471_v38  ;;  %v8208_v38 = vld [vmem:[#allocation79_spill] sm:$0xff] }
 0x436   :  { %2659 = vmatpush.bf16.msra.mxu2 %v8197_v8  ;;  %2685 = vmatpush.bf16.msrb.mxu0 %v8198_v63  ;;  %v8205_v8 = vld [vmem:[#allocation74_spill] sm:$0xff]  ;;  %v8206_v63 = vld [vmem:[#allocation23_spill] sm:$0xff] }
 0x437   :  { %2703 = vmatpush.bf16.msra.mxu1 %v8202_v5  ;;  %v8211_v5 = vld [vmem:[#allocation31_spill] sm:$0xff] }
 0x43a   :  { %2660 = vmatpush.bf16.msra.mxu2 %v8200_v42  ;;  %2686 = vmatpush.bf16.msrb.mxu0 %v8201_v4  ;;  %v6591_v42 = vpop.f32.mrf.mxu3  ;;  %v2333_v4 = vpop.f32.mrf.mxu1 }
 0x43b   :  { %2704 = vmatpush.bf16.msra.mxu1 %v8205_v8  ;;  %v8213_v8 = vld [vmem:[#allocation35_spill] sm:$0xff]  ;;  %v8217_v4 = vld [vmem:[#allocation40_spill] sm:$0xff] }
 0x43e   :  { %2661 = vmatpush.bf16.msra.mxu2 %v8203_v45  ;;  %2687 = vmatpush.bf16.msrb.mxu0 %v8204_v31  ;;  %v8212_v45 = vld [vmem:[#allocation66_spill] sm:$0xff] }
 0x43f   :  { %2705 = vmatpush.bf16.msra.mxu1 %v8208_v38  ;;  %v8216_v38 = vld [vmem:[#allocation75_spill] sm:$0xff] }
 0x442   :  { %2662 = vmatpush.bf16.msra.mxu2 %v8206_v63  ;;  %2688 = vmatpush.bf16.msrb.mxu0 %v8207_v13  ;;  %v2359_v31 = vpop.f32.mrf.mxu3  ;;  %v6597_v20 = vpop.f32.mrf.mxu1  ;;  %v8214_v63 = vld [vmem:[#allocation70_spill] sm:$0xff]  ;;  %v8215_v13 = vld [vmem:[#allocation39_spill] sm:$0xff] }
 0x446   :  { %2663 = vmatpush.bf16.msra.mxu2 %v8209_v52  ;;  %2689 = vmatpush.bf16.msrb.mxu0 %v8210_v30  ;;  %v8218_v30 = vld [vmem:[#allocation45_spill] sm:$0xff] }
 0x44a   :  { %2664 = vmatpush.bf16.msra.mxu2 %v8211_v5  ;;  %2690 = vmatpush.bf16.msrb.mxu0 %v8212_v45  ;;  %v2409_v52 = vpop.f32.mrf.mxu3  ;;  %v2385_v6 = vpop.f32.mrf.mxu1 }
 0x44e   :  { %2665 = vmatpush.bf16.msra.mxu2 %v8213_v8  ;;  %2691 = vmatpush.bf16.msrb.mxu0 %v8214_v63 }
 0x452   :  { %2666 = vmatpush.bf16.msra.mxu2 %v8215_v13  ;;  %2692 = vmatpush.bf16.msrb.mxu0 %v8216_v38  ;;  %v2318_v5 = vpop.f32.mrf.mxu0  ;;  %v2411_v31 = vpop.f32.mrf.mxu3  ;;  %v8221_v13 = vld [vmem:[#allocation59_spill] sm:$0xff]  ;;  %v6608_v38 = vld [vmem:[#allocation2 + $0x18] sm:$0x3f] }
 0x453   :  { %v2319_v45 = vadd.f32 %v2318_v5, %v2305_v44  ;;  %v8223_v44 = vld [vmem:[#allocation67_spill] sm:$0xff] }
 0x455   :  { %v2510_v33 = vrot.slane %v2319_v45, 6 }
 0x456   :  { %2711 = vmatpush.bf16.msrb.mxu2 %v8217_v4 }
 0x458   :  { %v2292_v8 = vpop.f32.mrf.mxu2 }
 0x459   :  { %v2293_v63 = vadd.f32 %v2292_v8, %v2279_v56 }
 0x45a   :  { %2712 = vmatpush.bf16.msrb.mxu2 %v8218_v30  ;;  %v2320_v18 = vpop.f32.mrf.mxu0  ;;  %v8222_v30 = vld [vmem:[#allocation63_spill] sm:$0xff] }
 0x45b   :  { %v2511_v4 = vsel %vm211_vm1, %v2293_v63, %v2510_v33 }
 0x45c   :  { %v2513_v6 = vadd.f32 %v2511_v4, %v6608_v38 }
 0x45e   :  { %2713 = vmatpush.bf16.msrb.mxu2 %v8219_v10  ;;  %2517 = vst [vmem:[#allocation1] ss:$4 sm:$0xff] %v2513_v6 }
 0x460   :  { %v2294_v10 = vpop.f32.mrf.mxu2 }
 0x461   :  { %v6616_v5 = vpop.f32.mrf.mxu1 }
 0x462   :  { %2714 = vmatpush.bf16.msrb.mxu2 %v8220_v12  ;;  %v6613_v31 = vpop.f32.mrf.mxu0 }
 0x465   :  { %v2518_v8 = vld.sshfl [vmem:[#allocation1] sm:$0xff pattern:$0x73625140]  ;;  %v2519_v18 = vld.sshfl [vmem:[#allocation1 + $0x8] sm:$0xff pattern:$0x73625140] }
 0x466   :  { %2715 = vmatpush.bf16.msrb.mxu2 %v8221_v13  ;;  %v4773_v45 = vmul.f32 -1.442695, %v2518_v8  ;;  %v4774_v56 = vmul.f32 -1.442695, %v2519_v18  ;;  %v8224_v13 = vld [vmem:[#allocation71_spill] sm:$0xff] }
 0x468   :  { %v2344_v12 = vpop.f32.mrf.mxu2  ;;  %5026 = vpow2.f32 %v4773_v45 }
 0x469   :  { %5028 = vpow2.f32 %v4774_v56  ;;  %v2437_v63 = vpop.f32.mrf.mxu1 }
 0x46a   :  { %2716 = vmatpush.bf16.msrb.mxu2 %v8222_v30  ;;  %v2372_v33 = vpop.f32.mrf.mxu0 }
 0x46e   :  { %2717 = vmatpush.bf16.msrb.mxu2 %v8223_v44  ;;  %v5027_v4 = vpop.eup %5026  ;;  %v2461_v44 = vpop.f32.mrf.mxu3 }
 0x46f   :  { %v5029_v6 = vpop.eup %5028  ;;  %v2534_v10 = vadd.f32 1.0, %v5027_v4  ;;  %v2345_v4 = vadd.f32 %v2344_v12, %v6583_v23 }
 0x470   :  { %v2535_v30 = vadd.f32 1.0, %v5029_v6  ;;  %v2346_v54 = vpop.f32.mrf.mxu2 }
 0x471   :  { %5030 = vrcp.f32 %v2534_v10  ;;  %v2549_v63 = vand.u32 2147483648, %v2534_v10  ;;  %v2547_v54 = vand.u32 2147483647, %v2534_v10  ;;  %vm2543_vm14 = vweird.f32 %v2534_v10 }
 0x472   :  { %2718 = vmatpush.bf16.msrb.mxu2 %v8224_v13  ;;  %5032 = vrcp.f32 %v2535_v30  ;;  %v2422_v1 = vpop.f32.mrf.mxu0  ;;  %vm2558_vm4 = vweird.f32 %v2535_v30 }
 0x473   :  { %v6619_v32 = vadd.f32 %v2422_v1, %v2409_v52  ;;  %v2550_v1 = vor.u32 1.1754944e-38, %v2549_v63  ;;  %vm2548_vm2 = vcmp.eq.f32.partialorder %v2547_v54, 8.507059e+37 }
 0x476   :  { %v2463_v45 = vpop.f32.mrf.mxu3 }
 0x477   :  { %v5031_v8 = vpop.eup %5030  ;;  %v6625_v45 = vld [vmem:[%s7410_s3] ss:$0 sm:$0xff] }
 0x478   :  { %v5033_v18 = vpop.eup %5032  ;;  %v2539_v15 = vmul.f32 %v5031_v8, %v2534_v10  ;;  %v2396_v13 = vpop.f32.mrf.mxu2  ;;  %vm2544_vm13 = vweird.f32 %v5031_v8  ;;  %8225 = vst [vmem:[#allocation89_spill] sm:$0xff] %v6625_v45  ;;  %v2564_v10 = vand.u32 2147483648, %v2535_v30 }
 0x479   :  { %v2554_v0 = vmul.f32 %v5033_v18, %v2535_v30  ;;  %vm2545_vm15 = vmor %vm2543_vm14, %vm2544_vm13  ;;  %vm2559_vm3 = vweird.f32 %v5033_v18 }
 0x47a   :  { %v2540_v56 = vsub.f32 1.0, %v2539_v15  ;;  %v2424_v33 = vpop.f32.mrf.mxu0  ;;  %v2598_v15 = vadd.f32 %v6625_v45, %v2345_v4  ;;  %vm2560_vm5 = vmor %vm2558_vm4, %vm2559_vm3 }
 0x47b   :  { %v2555_v36 = vsub.f32 1.0, %v2554_v0 }
 0x47c   :  { %v2541_v6 = vmul.f32 %v5031_v8, %v2540_v56 }
 0x47d   :  { %v2556_v14 = vmul.f32 %v5033_v18, %v2555_v36  ;;  %v2601_v36 = vrot.slane %v6608_v38, 4 }
 0x47e   :  { %v2542_v37 = vadd.f32 %v5031_v8, %v2541_v6  ;;  %v2565_v6 = vor.u32 1.1754944e-38, %v2564_v10 }
 0x47f   :  { %v2557_v12 = vadd.f32 %v5033_v18, %v2556_v14  ;;  %v2397_v14 = vadd.f32 %v2396_v13, %v6597_v20 }
 0x480   :  { %v2546_v52 = vsel %vm2545_vm15, %v5031_v8, %v2542_v37  ;;  %v2398_v0 = vpop.f32.mrf.mxu2  ;;  %v2562_v37 = vand.u32 2147483647, %v2535_v30 }
 0x481   :  { %v2551_v33 = vsel %vm2548_vm2, %v2550_v1, %v2546_v52  ;;  %v6628_v23 = vpop.f32.mrf.mxu1  ;;  %v2561_v63 = vsel %vm2560_vm5, %v5033_v18, %v2557_v12  ;;  %v2505_v30 = vadd.f32 %v2397_v14, %v5974_v53  ;;  %v2371_v12 = vadd.f32 %v6613_v31, %v6591_v42 }
 0x482   :  { %v2599_v56 = vmul.f32 %v2598_v15, %v2551_v33  ;;  %vm2563_vm6 = vcmp.eq.f32.partialorder %v2562_v37, 8.507059e+37 }
 0x483   :  { %v2566_v54 = vsel %vm2563_vm6, %v2565_v6, %v2561_v63  ;;  %v2504_v13 = vadd.f32 %v2371_v12, %v5985_v9 }
 0x484   :  { %v2603_v8 = vadd.f32 %v2601_v36, %v2599_v56  ;;  %v2609_v0 = vsub.f32 1.0, %v2566_v54  ;;  %v2611_v45 = vmul.f32 %v2566_v54, %v6416_v27 }
 0x486   :  { %5034 = vtanh.f32 %v2603_v8 }
 0x489   :  { %v2489_v4 = vpop.f32.mrf.mxu1 }
 0x48c   :  { %v5035_v1 = vpop.eup %5034 }
 0x48d   :  { %v2610_v52 = vmul.f32 %v5035_v1, %v2609_v0 }
 0x48f   :  { %v6633_v38 = vadd.f32 %v2611_v45, %v2610_v52 }
 0x491   :  { %v6638_v18 = vpack.c.bf16 %v6633_v38, %v6633_v38 }
 0x492   :  { %v2474_v15 = vpop.f32.mrf.mxu0 }
 0x493   :  { %v2475_v33 = vadd.f32 %v2474_v15, %v2461_v44  ;;  %2628 = vmatmul.bf16.vlgmr.msra.gmra.mxu3 %v6638_v18  ;;  %2654 = vmatmul.bf16.vlgmr.msrb.gmra.mxu1 %v6638_v18 }
 0x494   :  { %2724 = vmatpush.bf16.msra.mxu3 %v7881_v39  ;;  %2750 = vmatpush.bf16.msrb.mxu1 %v7882_v11 }
 0x495   :  { %v2515_v36 = vadd.f32 %v2505_v30, %v2475_v33 }
 0x497   :  { %v4776_v20 = vmul.f32 -1.442695, %v2515_v36 }
 0x498   :  { %v2448_v27 = vpop.f32.mrf.mxu2  ;;  %2725 = vmatpush.bf16.msra.mxu3 %v7883_v25  ;;  %2751 = vmatpush.bf16.msrb.mxu1 %v7884_v49 }
 0x499   :  { %5036 = vpow2.f32 %v4776_v20  ;;  %v2449_v44 = vadd.f32 %v2448_v27, %v6616_v5 }
 0x49a   :  { %v2476_v45 = vpop.f32.mrf.mxu0 }
 0x49b   :  { %v2514_v10 = vadd.f32 %v2504_v13, %v2449_v44 }
 0x49c   :  { %2726 = vmatpush.bf16.msra.mxu3 %v7885_v24  ;;  %2752 = vmatpush.bf16.msrb.mxu1 %v7886_v51 }
 0x49d   :  { %v4775_v42 = vmul.f32 -1.442695, %v2514_v10 }
 0x49f   :  { %v5037_v31 = vpop.eup %5036  ;;  %5038 = vpow2.f32 %v4775_v42 }
 0x4a0   :  { %v2537_v56 = vadd.f32 1.0, %v5037_v31  ;;  %v2450_v37 = vpop.f32.mrf.mxu2  ;;  %2727 = vmatpush.bf16.msra.mxu3 %v7887_v41  ;;  %2753 = vmatpush.bf16.msrb.mxu1 %v7888_v29 }
 0x4a2   :  { %5040 = vrcp.f32 %v2537_v56  ;;  %v2594_v10 = vand.u32 2147483648, %v2537_v56  ;;  %vm2588_vm12 = vweird.f32 %v2537_v56  ;;  %v2592_v31 = vand.u32 2147483647, %v2537_v56 }
 0x4a3   :  { %2680 = vmatmul.bf16.vlgmr.msrb.gmra.mxu3 %v6638_v18  ;;  %2706 = vmatmul.bf16.vlgmr.msra.gmra.mxu1 %v6638_v18 }
 0x4a4   :  { %2728 = vmatpush.bf16.msra.mxu3 %v7889_v34  ;;  %2754 = vmatpush.bf16.msrb.mxu1 %v7890_v60  ;;  %vm2593_vm14 = vcmp.eq.f32.partialorder %v2592_v31, 8.507059e+37  ;;  %v8243_v31 = vld [vmem:[#allocation86_spill] sm:$0xff] }
 0x4a5   :  { %v5039_v5 = vpop.eup %5038 }
 0x4a6   :  { %v2536_v8 = vadd.f32 1.0, %v5039_v5 }
 0x4a8   :  { %5042 = vrcp.f32 %v2536_v8  ;;  %v5041_v63 = vpop.eup %5040  ;;  %2729 = vmatpush.bf16.msra.mxu3 %v7891_v17  ;;  %2755 = vmatpush.bf16.msrb.mxu1 %v7992_v50  ;;  %v2579_v14 = vand.u32 2147483648, %v2536_v8  ;;  %v2577_v15 = vand.u32 2147483647, %v2536_v8  ;;  %vm2573_vm8 = vweird.f32 %v2536_v8 }
 0x4a9   :  { %v2584_v6 = vmul.f32 %v5041_v63, %v2537_v56  ;;  %vm2589_vm11 = vweird.f32 %v5041_v63 }
 0x4aa   :  { %v2580_v20 = vor.u32 1.1754944e-38, %v2579_v14  ;;  %vm2578_vm10 = vcmp.eq.f32.partialorder %v2577_v15, 8.507059e+37  ;;  %vm2590_vm13 = vmor %vm2588_vm12, %vm2589_vm11  ;;  %v8228_v14 = vld [vmem:[#allocation81_spill] sm:$0xff]  ;;  %v8230_v15 = vld [vmem:[#allocation139_spill] sm:$0xff] }
 0x4ab   :  { %v2585_v0 = vsub.f32 1.0, %v2584_v6 }
 0x4ac   :  { %2730 = vmatpush.bf16.msra.mxu3 %v7993_v26  ;;  %2756 = vmatpush.bf16.msrb.mxu1 %v7994_v40 }
 0x4ad   :  { %v2586_v30 = vmul.f32 %v5041_v63, %v2585_v0 }
 0x4ae   :  { %v5043_v54 = vpop.eup %5042 }
 0x4af   :  { %v2569_v4 = vmul.f32 %v5043_v54, %v2536_v8  ;;  %vm2574_vm7 = vweird.f32 %v5043_v54  ;;  %v2587_v45 = vadd.f32 %v5041_v63, %v2586_v30  ;;  %v2595_v8 = vor.u32 1.1754944e-38, %v2594_v10  ;;  %v8231_v30 = vld [vmem:[#allocation140_spill] sm:$0xff] }
 0x4b0   :  { %2731 = vmatpush.bf16.msra.mxu3 %v7995_v57  ;;  %2757 = vmatpush.bf16.msrb.mxu1 %v7996_v21  ;;  %vm2575_vm9 = vmor %vm2573_vm8, %vm2574_vm7  ;;  %v8241_v10 = vld [vmem:[#allocation24_spill] sm:$0xff] }
 0x4b1   :  { %v2570_v1 = vsub.f32 1.0, %v2569_v4 }
 0x4b3   :  { %v2571_v52 = vmul.f32 %v5043_v54, %v2570_v1  ;;  %2732 = vmatmul.bf16.vlgmr.msra.gmra.mxu3 %v6638_v18  ;;  %2758 = vmatmul.bf16.vlgmr.msrb.gmra.mxu1 %v6638_v18  ;;  %v8227_v1 = vld [vmem:[#allocation137_spill] sm:$0xff] }
 0x4b4   :  { %2776 = vmatpush.bf16.msrb.mxu3 %v7997_v28  ;;  %2802 = vmatpush.bf16.msra.mxu1 %v7998_v47 }
 0x4b5   :  { %v2572_v12 = vadd.f32 %v5043_v54, %v2571_v52  ;;  %v8229_v52 = vld [vmem:[#allocation77_spill] sm:$0xff] }
 0x4b7   :  { %v2576_v27 = vsel %vm2575_vm9, %v5043_v54, %v2572_v12  ;;  %v8233_v12 = vld [vmem:[#allocation16_spill] sm:$0xff] }
 0x4b8   :  { %v2500_v33 = vpop.f32.mrf.mxu2  ;;  %v2581_v13 = vsel %vm2578_vm10, %v2580_v20, %v2576_v27  ;;  %2777 = vmatpush.bf16.msrb.mxu3 %v5783_v16  ;;  %2803 = vmatpush.bf16.msra.mxu1 %v5785_v55  ;;  %v8235_v20 = vld [vmem:[#allocation82_spill] sm:$0xff]  ;;  %v8236_v27 = vld [vmem:[#allocation143_spill] sm:$0xff] }
 0x4b9   :  { %v2501_v36 = vadd.f32 %v2500_v33, %v6628_v23  ;;  %v2506_v23 = vadd.f32 %v6619_v32, %v6022_v62  ;;  %v8232_v33 = vld [vmem:[#allocation141_spill] sm:$0xff] }
 0x4bb   :  { %v2604_v44 = vadd.f32 %v6449_v3, %v2501_v36  ;;  %v2591_v3 = vsel %vm2590_vm13, %v5041_v63, %v2587_v45  ;;  %v8234_v36 = vld [vmem:[#allocation83_spill] sm:$0xff]  ;;  %v8239_v45 = vld [vmem:[#allocation84_spill] sm:$0xff] }
 0x4bc   :  { %2778 = vmatpush.bf16.msrb.mxu3 %v5797_v59  ;;  %2804 = vmatpush.bf16.msra.mxu1 %v5799_v48  ;;  %v2596_v6 = vsel %vm2593_vm14, %v2595_v8, %v2591_v3  ;;  %v8245_v3 = vld [vmem:[#allocation28_spill] sm:$0xff] }
 0x4bd   :  { %v2605_v42 = vmul.f32 %v2604_v44, %v2581_v13  ;;  %v2613_v32 = vsub.f32 1.0, %v2596_v6  ;;  %v2615_v4 = vmul.f32 %v2596_v6, %v6464_v61  ;;  %v8226_v61 = vld [vmem:[#allocation136_spill] sm:$0xff]  ;;  %v8238_v44 = vld [vmem:[#allocation85_spill] sm:$0xff] }
 0x4be   :  { %v8237_v13 = vld [vmem:[#allocation20_spill] sm:$0xff] }
 0x4bf   :  { %v2606_v37 = vadd.f32 %v2605_v42, %v2506_v23  ;;  %v8240_v23 = vld [vmem:[#allocation145_spill] sm:$0xff]  ;;  %v8242_v42 = vld [vmem:[#allocation87_spill] sm:$0xff]  ;;  %v8247_v8 = vld [vmem:[#allocation88_spill] sm:$0xff] }
 0x4c0   :  { %v2502_v5 = vpop.f32.mrf.mxu2  ;;  %2779 = vmatpush.bf16.msrb.mxu3 %v5810_v19  ;;  %2805 = vmatpush.bf16.msra.mxu1 %v5812_v46  ;;  %v8248_v6 = vld [vmem:[#allocation148_spill] sm:$0xff] }
 0x4c1   :  { %5044 = vtanh.f32 %v2606_v37  ;;  %v8244_v37 = vld [vmem:[#allocation147_spill] sm:$0xff]  ;;  %v8246_v5 = vld [vmem:[#allocation92_spill] sm:$0xff] }
 0x4c4   :  { %2780 = vmatpush.bf16.msrb.mxu3 %v5822_v22  ;;  %2806 = vmatpush.bf16.msra.mxu1 %v8108_v7 }
 0x4c7   :  { %v5045_v54 = vpop.eup %5044 }
 0x4c8   :  { %v2614_v56 = vmul.f32 %v5045_v54, %v2613_v32  ;;  %2781 = vmatpush.bf16.msrb.mxu3 %v8111_v43  ;;  %2807 = vmatpush.bf16.msra.mxu1 %v8112_v58  ;;  %v8249_v32 = vld [vmem:[#allocation32_spill] sm:$0xff] }
 0x4c9   :  { %v8250_v54 = vld [vmem:[#allocation96_spill] sm:$0xff] }
 0x4ca   :  { %v6681_v0 = vadd.f32 %v2615_v4, %v2614_v56  ;;  %v8251_v56 = vld [vmem:[#allocation93_spill] sm:$0xff] }
 0x4cb   :  { %v8252_v4 = vld [vmem:[#allocation149_spill] sm:$0xff] }
 0x4cc   :  { %2617 = vst [vmem:[#allocation3 + $0x6] sm:$0x3] %v6681_v0  ;;  %v6688_v63 = vpack.c.bf16 %v6681_v0, %v6681_v0  ;;  %2782 = vmatpush.bf16.msrb.mxu3 %v8226_v61  ;;  %2808 = vmatpush.bf16.msra.mxu1 %v8227_v1 }
 0x4ce   :  { %2641 = vmatmul.bf16.vlgmr.msra.gmra.mxu0 %v6688_v63  ;;  %2667 = vmatmul.bf16.vlgmr.msra.gmra.mxu2 %v6688_v63 }
 0x4cf   :  { %2737 = vmatpush.bf16.msra.mxu0 %v7895_v2  ;;  %2763 = vmatpush.bf16.msra.mxu2 %v7896_v35 }
 0x4d0   :  { %2783 = vmatpush.bf16.msrb.mxu3 %v8230_v15  ;;  %2809 = vmatpush.bf16.msra.mxu1 %v8231_v30  ;;  %v8337_v15 = vld [vmem:[#allocation63_spill] sm:$0xff] }
 0x4d3   :  { %2738 = vmatpush.bf16.msra.mxu0 %v8228_v14  ;;  %2764 = vmatpush.bf16.msra.mxu2 %v8229_v52  ;;  %v8340_v52 = vld [vmem:[#allocation89_spill] sm:$0xff] }
 0x4d4   :  { %2828 = vmatpush.bf16.msra.mxu3 %v8232_v33  ;;  %2970 = vmatpush.bf16.msrb.mxu1 %v8233_v12 }
 0x4d5   :  { %2784 = vmatmul.bf16.vlgmr.msrb.gmra.mxu3 %v6638_v18  ;;  %2810 = vmatmul.bf16.vlgmr.msra.gmra.mxu1 %v6638_v18 }
 0x4d7   :  { %2739 = vmatpush.bf16.msra.mxu0 %v8234_v36  ;;  %2765 = vmatpush.bf16.msra.mxu2 %v8235_v20 }
 0x4d8   :  { %2829 = vmatpush.bf16.msra.mxu3 %v8236_v27  ;;  %2971 = vmatpush.bf16.msrb.mxu1 %v8237_v13  ;;  %v8311_v13 = vld [vmem:[#allocation69_spill] sm:$0xff] }
 0x4d9   :  { %v8314_v27 = vld [vmem:[#allocation13_spill] sm:$0xff] }
 0x4db   :  { %2740 = vmatpush.bf16.msra.mxu0 %v8238_v44  ;;  %2766 = vmatpush.bf16.msra.mxu2 %v8239_v45  ;;  %v8338_v45 = vld [vmem:[#allocation67_spill] sm:$0xff] }
 0x4dc   :  { %2830 = vmatpush.bf16.msra.mxu3 %v8240_v23  ;;  %2972 = vmatpush.bf16.msrb.mxu1 %v8241_v10  ;;  %v8253_v10 = vld [vmem:[#allocation36_spill] sm:$0xff]  ;;  %v8254_v23 = vld [vmem:[#allocation101_spill] sm:$0xff] }
 0x4de   :  { %2693 = vmatmul.bf16.vlgmr.msrb.gmra.mxu0 %v6688_v63  ;;  %2719 = vmatmul.bf16.vlgmr.msrb.gmra.mxu2 %v6688_v63 }
 0x4df   :  { %2741 = vmatpush.bf16.msra.mxu0 %v8242_v42  ;;  %2767 = vmatpush.bf16.msra.mxu2 %v8243_v31  ;;  %v8328_v31 = vld [vmem:[#allocation35_spill] sm:$0xff]  ;;  %v8333_v42 = vld [vmem:[#allocation45_spill] sm:$0xff] }
 0x4e0   :  { %2831 = vmatpush.bf16.msra.mxu3 %v8244_v37  ;;  %2973 = vmatpush.bf16.msrb.mxu1 %v8245_v3  ;;  %v8255_v37 = vld [vmem:[#allocation97_spill] sm:$0xff]  ;;  %v8256_v3 = vld [vmem:[#allocation102_spill] sm:$0xff] }
 0x4e3   :  { %2742 = vmatpush.bf16.msra.mxu0 %v8246_v5  ;;  %2768 = vmatpush.bf16.msra.mxu2 %v8247_v8  ;;  %v8257_v5 = vld [vmem:[#allocation98_spill] sm:$0xff] }
 0x4e4   :  { %2832 = vmatpush.bf16.msra.mxu3 %v8248_v6  ;;  %2974 = vmatpush.bf16.msrb.mxu1 %v8249_v32  ;;  %v8258_v8 = vld [vmem:[#allocation150_spill] sm:$0xff]  ;;  %v8259_v6 = vld [vmem:[#allocation41_spill] sm:$0xff] }
 0x4e5   :  { %v8260_v32 = vld [vmem:[#allocation106_spill] sm:$0xff] }
 0x4e7   :  { %2743 = vmatpush.bf16.msra.mxu0 %v8250_v54  ;;  %2769 = vmatpush.bf16.msra.mxu2 %v8251_v56  ;;  %v8269_v56 = vld [vmem:[#allocation52_spill] sm:$0xff]  ;;  %v8306_v54 = vld [vmem:[#allocation142_spill] sm:$0xff] }
 0x4e8   :  { %2833 = vmatpush.bf16.msra.mxu3 %v8252_v4  ;;  %2975 = vmatpush.bf16.msrb.mxu1 %v8253_v10  ;;  %v8261_v4 = vld [vmem:[#allocation103_spill] sm:$0xff] }
 0x4e9   :  { %v8262_v10 = vld [vmem:[#allocation151_spill] sm:$0xff] }
 0x4eb   :  { %2744 = vmatpush.bf16.msra.mxu0 %v8254_v23  ;;  %2770 = vmatpush.bf16.msra.mxu2 %v8255_v37  ;;  %v8263_v23 = vld [vmem:[#allocation46_spill] sm:$0xff]  ;;  %v8264_v37 = vld [vmem:[#allocation17_spill] sm:$0xff] }
 0x4ec   :  { %2834 = vmatpush.bf16.msra.mxu3 %v8258_v8  ;;  %2976 = vmatpush.bf16.msrb.mxu1 %v8259_v6  ;;  %v8267_v8 = vld [vmem:[#allocation107_spill] sm:$0xff]  ;;  %v8268_v6 = vld [vmem:[#allocation21_spill] sm:$0xff] }
 0x4ee   :  { %2745 = vmatmul.bf16.vlgmr.msra.gmra.mxu0 %v6688_v63  ;;  %2771 = vmatmul.bf16.vlgmr.msra.gmra.mxu2 %v6688_v63 }
 0x4ef   :  { %2789 = vmatpush.bf16.msrb.mxu0 %v8256_v3  ;;  %2815 = vmatpush.bf16.msrb.mxu2 %v8257_v5  ;;  %v8265_v3 = vld [vmem:[#allocation48_spill] sm:$0xff]  ;;  %v8266_v5 = vld [vmem:[#allocation110_spill] sm:$0xff] }
 0x4f0   :  { %2835 = vmatpush.bf16.msra.mxu3 %v8262_v10  ;;  %2977 = vmatpush.bf16.msrb.mxu1 %v8263_v23  ;;  %v8272_v10 = vld [vmem:[#allocation25_spill] sm:$0xff]  ;;  %v8273_v23 = vld [vmem:[#allocation56_spill] sm:$0xff] }
 0x4f3   :  { %2790 = vmatpush.bf16.msrb.mxu0 %v8260_v32  ;;  %2816 = vmatpush.bf16.msrb.mxu2 %v8261_v4  ;;  %v8270_v32 = vld [vmem:[#allocation114_spill] sm:$0xff]  ;;  %v8271_v4 = vld [vmem:[#allocation111_spill] sm:$0xff] }
 0x4f4   :  { %2996 = vmatpush.bf16.msrb.mxu3 %v8264_v37  ;;  %3022 = vmatpush.bf16.msra.mxu1 %v8265_v3  ;;  %v8274_v37 = vld [vmem:[#allocation118_spill] sm:$0xff]  ;;  %v8275_v3 = vld [vmem:[#allocation115_spill] sm:$0xff] }
 0x4f5   :  { %2836 = vmatmul.bf16.vlgmr.msra.gmra.mxu3 %v6638_v18  ;;  %v8278_v18 = vld [vmem:[#allocation124_spill] sm:$0xff] }
 0x4f7   :  { %2791 = vmatpush.bf16.msrb.mxu0 %v8266_v5  ;;  %2817 = vmatpush.bf16.msrb.mxu2 %v8267_v8  ;;  %v8276_v5 = vld [vmem:[#allocation29_spill] sm:$0xff]  ;;  %v8277_v8 = vld [vmem:[#allocation60_spill] sm:$0xff] }
 0x4f8   :  { %2997 = vmatpush.bf16.msrb.mxu3 %v8268_v6  ;;  %3023 = vmatpush.bf16.msra.mxu1 %v8269_v56  ;;  %v8279_v6 = vld [vmem:[#allocation119_spill] sm:$0xff]  ;;  %v8280_v56 = vld [vmem:[#allocation33_spill] sm:$0xff] }
 0x4fb   :  { %2792 = vmatpush.bf16.msrb.mxu0 %v8270_v32  ;;  %2818 = vmatpush.bf16.msrb.mxu2 %v8271_v4  ;;  %v8281_v32 = vld [vmem:[#allocation64_spill] sm:$0xff]  ;;  %v8282_v4 = vld [vmem:[#allocation126_spill] sm:$0xff] }
 0x4fc   :  { %2998 = vmatpush.bf16.msrb.mxu3 %v8272_v10  ;;  %3024 = vmatpush.bf16.msra.mxu1 %v8273_v23  ;;  %v8283_v10 = vld [vmem:[#allocation125_spill] sm:$0xff] }
 0x4fd   :  { %v8284_v23 = vld [vmem:[#allocation37_spill] sm:$0xff] }
 0x4ff   :  { %2793 = vmatpush.bf16.msrb.mxu0 %v8274_v37  ;;  %2819 = vmatpush.bf16.msrb.mxu2 %v8275_v3  ;;  %v8285_v37 = vld [vmem:[#allocation68_spill] sm:$0xff] }
 0x500   :  { %2999 = vmatpush.bf16.msrb.mxu3 %v8276_v5  ;;  %3025 = vmatpush.bf16.msra.mxu1 %v8277_v8  ;;  %v8286_v3 = vld [vmem:[#allocation128_spill] sm:$0xff]  ;;  %v8287_v5 = vld [vmem:[#allocation127_spill] sm:$0xff]  ;;  %v8288_v8 = vld [vmem:[#allocation129_spill] sm:$0xff] }
 0x503   :  { %2794 = vmatpush.bf16.msrb.mxu0 %v8278_v18  ;;  %2820 = vmatpush.bf16.msrb.mxu2 %v8279_v6  ;;  %v8289_v18 = vld [vmem:[#allocation14_spill] sm:$0xff] }
 0x504   :  { %3000 = vmatpush.bf16.msrb.mxu3 %v8280_v56  ;;  %3026 = vmatpush.bf16.msra.mxu1 %v8281_v32  ;;  %v8290_v6 = vld [vmem:[#allocation42_spill] sm:$0xff]  ;;  %v8291_v56 = vld [vmem:[#allocation73_spill] sm:$0xff] }
 0x505   :  { %v8292_v32 = vld [vmem:[#allocation130_spill] sm:$0xff] }
 0x507   :  { %2795 = vmatpush.bf16.msrb.mxu0 %v8282_v4  ;;  %2821 = vmatpush.bf16.msrb.mxu2 %v8283_v10  ;;  %v8301_v10 = vld [vmem:[#allocation26_spill] sm:$0xff] }
 0x508   :  { %3001 = vmatpush.bf16.msrb.mxu3 %v8284_v23  ;;  %3027 = vmatpush.bf16.msra.mxu1 %v8285_v37  ;;  %v8293_v23 = vld [vmem:[#allocation18_spill] sm:$0xff]  ;;  %v8294_v37 = vld [vmem:[#allocation47_spill] sm:$0xff] }
 0x50b   :  { %2796 = vmatpush.bf16.msrb.mxu0 %v8286_v3  ;;  %2822 = vmatpush.bf16.msrb.mxu2 %v8287_v5  ;;  %v8295_v3 = vld [vmem:[#allocation78_spill] sm:$0xff]  ;;  %v8296_v5 = vld [vmem:[#allocation49_spill] sm:$0xff] }
 0x50c   :  { %3002 = vmatpush.bf16.msrb.mxu3 %v8290_v6  ;;  %3028 = vmatpush.bf16.msra.mxu1 %v8291_v56  ;;  %v8299_v6 = vld [vmem:[#allocation53_spill] sm:$0xff]  ;;  %v8300_v56 = vld [vmem:[#allocation135_spill] sm:$0xff] }
 0x50e   :  { %2797 = vmatmul.bf16.vlgmr.msrb.gmra.mxu0 %v6688_v63  ;;  %2823 = vmatmul.bf16.vlgmr.msrb.gmra.mxu2 %v6688_v63 }
 0x50f   :  { %2841 = vmatpush.bf16.msra.mxu0 %v8288_v8  ;;  %2983 = vmatpush.bf16.msra.mxu2 %v8289_v18  ;;  %v8297_v8 = vld [vmem:[#allocation132_spill] sm:$0xff]  ;;  %v8298_v18 = vld [vmem:[#allocation22_spill] sm:$0xff] }
 0x510   :  { %3003 = vmatpush.bf16.msrb.mxu3 %v8294_v37  ;;  %3029 = vmatpush.bf16.msra.mxu1 %v8295_v3  ;;  %v2655_v4 = vpop.f32.mrf.mxu1  ;;  %v8304_v37 = vld [vmem:[#allocation30_spill] sm:$0xff]  ;;  %v8305_v3 = vld [vmem:[#allocation61_spill] sm:$0xff] }
 0x513   :  { %2842 = vmatpush.bf16.msra.mxu0 %v8292_v32  ;;  %2984 = vmatpush.bf16.msra.mxu2 %v8293_v23  ;;  %v8302_v32 = vld [vmem:[#allocation57_spill] sm:$0xff]  ;;  %v8303_v23 = vld [vmem:[#allocation138_spill] sm:$0xff] }
 0x514   :  { %3048 = vmatpush.bf16.msra.mxu3 %v8296_v5 }
 0x516   :  { %v2629_v5 = vpop.f32.mrf.mxu3 }
 0x517   :  { %2843 = vmatpush.bf16.msra.mxu0 %v8297_v8  ;;  %2985 = vmatpush.bf16.msra.mxu2 %v8298_v18  ;;  %v8307_v8 = vld [vmem:[#allocation34_spill] sm:$0xff] }
 0x518   :  { %3049 = vmatpush.bf16.msra.mxu3 %v8299_v6  ;;  %v2657_v18 = vpop.f32.mrf.mxu1  ;;  %v8308_v6 = vld [vmem:[#allocation65_spill] sm:$0xff] }
 0x519   :  { %v8316_v18 = vld [vmem:[#allocation74_spill] sm:$0xff] }
 0x51b   :  { %2844 = vmatpush.bf16.msra.mxu0 %v8300_v56  ;;  %2986 = vmatpush.bf16.msra.mxu2 %v8301_v10  ;;  %v8309_v56 = vld [vmem:[#allocation144_spill] sm:$0xff]  ;;  %v8310_v10 = vld [vmem:[#allocation38_spill] sm:$0xff] }
 0x51c   :  { %3050 = vmatpush.bf16.msra.mxu3 %v8302_v32 }
 0x51e   :  { %v2631_v32 = vpop.f32.mrf.mxu3 }
 0x51f   :  { %2845 = vmatpush.bf16.msra.mxu0 %v8303_v23  ;;  %2987 = vmatpush.bf16.msra.mxu2 %v8304_v37  ;;  %v8312_v23 = vld [vmem:[#allocation146_spill] sm:$0xff]  ;;  %v8313_v37 = vld [vmem:[#allocation43_spill] sm:$0xff] }
 0x520   :  { %3051 = vmatpush.bf16.msra.mxu3 %v8305_v3  ;;  %v6791_v3 = vpop.f32.mrf.mxu1 }
 0x523   :  { %2846 = vmatpush.bf16.msra.mxu0 %v8306_v54  ;;  %2988 = vmatpush.bf16.msra.mxu2 %v8307_v8  ;;  %v8315_v54 = vld [vmem:[#allocation44_spill] sm:$0xff] }
 0x524   :  { %3052 = vmatpush.bf16.msra.mxu3 %v8308_v6  ;;  %v8317_v6 = vld [vmem:[#allocation15_spill] sm:$0xff] }
 0x526   :  { %v6800_v32 = vpop.f32.mrf.mxu3 }
 0x527   :  { %2847 = vmatpush.bf16.msra.mxu0 %v8309_v56  ;;  %2989 = vmatpush.bf16.msra.mxu2 %v8310_v10  ;;  %v8318_v10 = vld [vmem:[#allocation50_spill] sm:$0xff] }
 0x528   :  { %3053 = vmatpush.bf16.msra.mxu3 %v8311_v13  ;;  %v8319_v13 = vld [vmem:[#allocation79_spill] sm:$0xff]  ;;  %v8321_v56 = vld [vmem:[#allocation54_spill] sm:$0xff] }
 0x52b   :  { %2848 = vmatpush.bf16.msra.mxu0 %v8312_v23  ;;  %2990 = vmatpush.bf16.msra.mxu2 %v8313_v37  ;;  %v2709_v23 = vpop.f32.mrf.mxu1  ;;  %v8320_v37 = vld [vmem:[#allocation19_spill] sm:$0xff] }
 0x52c   :  { %3054 = vmatpush.bf16.msra.mxu3 %v8316_v18 }
 0x52e   :  { %2849 = vmatmul.bf16.vlgmr.msra.gmra.mxu0 %v6688_v63  ;;  %v2683_v18 = vpop.f32.mrf.mxu3  ;;  %v8324_v63 = vld [vmem:[#allocation27_spill] sm:$0xff] }
 0x52f   :  { %3009 = vmatpush.bf16.msrb.mxu0 %v8314_v27  ;;  %3035 = vmatpush.bf16.msrb.mxu2 %v8315_v54  ;;  %v8322_v27 = vld [vmem:[#allocation23_spill] sm:$0xff]  ;;  %v8323_v54 = vld [vmem:[#allocation58_spill] sm:$0xff] }
 0x530   :  { %3055 = vmatpush.bf16.msra.mxu3 %v8319_v13  ;;  %v8327_v13 = vld [vmem:[#allocation66_spill] sm:$0xff]  ;;  %v8331_v18 = vld [vmem:[#allocation75_spill] sm:$0xff] }
 0x533   :  { %3010 = vmatpush.bf16.msrb.mxu0 %v8317_v6  ;;  %3036 = vmatpush.bf16.msrb.mxu2 %v8318_v10  ;;  %v6806_v8 = vpop.f32.mrf.mxu1  ;;  %v8325_v6 = vld [vmem:[#allocation62_spill] sm:$0xff]  ;;  %v8326_v10 = vld [vmem:[#allocation31_spill] sm:$0xff] }
 0x536   :  { %v6812_v23 = vpop.f32.mrf.mxu3 }
 0x537   :  { %3011 = vmatpush.bf16.msrb.mxu0 %v8320_v37  ;;  %3037 = vmatpush.bf16.msrb.mxu2 %v8321_v56  ;;  %v8329_v56 = vld [vmem:[#allocation70_spill] sm:$0xff] }
 0x53b   :  { %3012 = vmatpush.bf16.msrb.mxu0 %v8322_v27  ;;  %3038 = vmatpush.bf16.msrb.mxu2 %v8323_v54  ;;  %v2761_v37 = vpop.f32.mrf.mxu1  ;;  %v8330_v27 = vld [vmem:[#allocation39_spill] sm:$0xff]  ;;  %v8332_v54 = vld [vmem:[#allocation40_spill] sm:$0xff] }
 0x53f   :  { %3013 = vmatpush.bf16.msrb.mxu0 %v8324_v63  ;;  %3039 = vmatpush.bf16.msrb.mxu2 %v8325_v6  ;;  %v2735_v63 = vpop.f32.mrf.mxu3 }
 0x543   :  { %3014 = vmatpush.bf16.msrb.mxu0 %v8326_v10  ;;  %3040 = vmatpush.bf16.msrb.mxu2 %v8327_v13  ;;  %v8334_v10 = vld [vmem:[#allocation51_spill] sm:$0xff] }
 0x544   :  { %v8335_v13 = vld [vmem:[#allocation55_spill] sm:$0xff] }
 0x547   :  { %3015 = vmatpush.bf16.msrb.mxu0 %v8328_v31  ;;  %3041 = vmatpush.bf16.msrb.mxu2 %v8329_v56  ;;  %v8336_v31 = vld [vmem:[#allocation59_spill] sm:$0xff] }
 0x54b   :  { %3016 = vmatpush.bf16.msrb.mxu0 %v8330_v27  ;;  %3042 = vmatpush.bf16.msrb.mxu2 %v8331_v18  ;;  %v2642_v6 = vpop.f32.mrf.mxu0  ;;  %v2857_v18 = vld [vmem:[#allocation2 + $0x1e] sm:$0x3f] }
 0x54c   :  { %v2643_v56 = vadd.f32 %v2642_v6, %v2629_v5 }
 0x54f   :  { %3061 = vmatpush.bf16.msra.mxu0 %v8332_v54 }
 0x551   :  { %v2668_v12 = vpop.f32.mrf.mxu2 }
 0x552   :  { %v2669_v37 = vadd.f32 %v2668_v12, %v2655_v4  ;;  %v6823_v27 = vpop.f32.mrf.mxu1  ;;  %v8339_v12 = vld [vmem:[#allocation71_spill] sm:$0xff] }
 0x553   :  { %3062 = vmatpush.bf16.msra.mxu0 %v8333_v42  ;;  %v2644_v33 = vpop.f32.mrf.mxu0 }
 0x554   :  { %v2860_v30 = vrot.slane %v2669_v37, 6 }
 0x556   :  { %v2861_v54 = vsel %vm211_vm1, %v2643_v56, %v2860_v30 }
 0x557   :  { %3063 = vmatpush.bf16.msra.mxu0 %v8334_v10  ;;  %v2863_v63 = vadd.f32 %v2861_v54, %v2857_v18 }
 0x558   :  { %v6827_v10 = vpop.f32.mrf.mxu3 }
 0x559   :  { %2867 = vst [vmem:[#allocation1] ss:$4 sm:$0xff] %v2863_v63  ;;  %v2670_v42 = vpop.f32.mrf.mxu2 }
 0x55a   :  { %v2813_v33 = vpop.f32.mrf.mxu1 }
 0x55b   :  { %3064 = vmatpush.bf16.msra.mxu0 %v8335_v13  ;;  %v2694_v13 = vpop.f32.mrf.mxu0 }
 0x55f   :  { %3065 = vmatpush.bf16.msra.mxu0 %v8336_v31 }
 0x560   :  { %v2868_v5 = vld.sshfl [vmem:[#allocation1] sm:$0xff pattern:$0x73625140]  ;;  %v2869_v6 = vld.sshfl [vmem:[#allocation1 + $0x8] sm:$0xff pattern:$0x73625140]  ;;  %v2787_v31 = vpop.f32.mrf.mxu3 }
 0x561   :  { %v4777_v4 = vmul.f32 -1.442695, %v2868_v5  ;;  %v4778_v37 = vmul.f32 -1.442695, %v2869_v6  ;;  %v2695_v31 = vadd.f32 %v2694_v13, %v6800_v32 }
 0x563   :  { %3066 = vmatpush.bf16.msra.mxu0 %v8337_v15  ;;  %5046 = vpow2.f32 %v4777_v4  ;;  %v2696_v30 = vpop.f32.mrf.mxu0  ;;  %v2720_v15 = vpop.f32.mrf.mxu2 }
 0x564   :  { %5048 = vpow2.f32 %v4778_v37 }
 0x567   :  { %3067 = vmatpush.bf16.msra.mxu0 %v8338_v45 }
 0x569   :  { %v5047_v54 = vpop.eup %5046 }
 0x56a   :  { %v5049_v56 = vpop.eup %5048  ;;  %v2884_v63 = vadd.f32 1.0, %v5047_v54 }
 0x56b   :  { %3068 = vmatpush.bf16.msra.mxu0 %v8339_v12  ;;  %v2885_v42 = vadd.f32 1.0, %v5049_v56  ;;  %v2746_v44 = vpop.f32.mrf.mxu0  ;;  %v2722_v61 = vpop.f32.mrf.mxu2 }
 0x56c   :  { %5050 = vrcp.f32 %v2884_v63  ;;  %v2899_v6 = vand.u32 2147483648, %v2884_v63  ;;  %v2897_v30 = vand.u32 2147483647, %v2884_v63  ;;  %vm2893_vm2 = vweird.f32 %v2884_v63 }
 0x56d   :  { %5052 = vrcp.f32 %v2885_v42  ;;  %v2948_v61 = vadd.f32 %v8340_v52, %v2695_v31  ;;  %v2914_v13 = vand.u32 2147483648, %v2885_v42  ;;  %vm2908_vm6 = vweird.f32 %v2885_v42 }
 0x56e   :  { %v2900_v58 = vor.u32 1.1754944e-38, %v2899_v6  ;;  %vm2898_vm4 = vcmp.eq.f32.partialorder %v2897_v30, 8.507059e+37 }
 0x56f   :  { %v2915_v7 = vor.u32 1.1754944e-38, %v2914_v13 }
 0x572   :  { %v5051_v45 = vpop.eup %5050 }
 0x573   :  { %v5053_v33 = vpop.eup %5052  ;;  %v2889_v1 = vmul.f32 %v5051_v45, %v2884_v63  ;;  %v2748_v20 = vpop.f32.mrf.mxu0  ;;  %vm2894_vm15 = vweird.f32 %v5051_v45 }
 0x574   :  { %v2904_v12 = vmul.f32 %v5053_v33, %v2885_v42  ;;  %vm2895_vm3 = vmor %vm2893_vm2, %vm2894_vm15  ;;  %vm2909_vm5 = vweird.f32 %v5053_v33 }
 0x575   :  { %v2890_v5 = vsub.f32 1.0, %v2889_v1  ;;  %vm2910_vm7 = vmor %vm2908_vm6, %vm2909_vm5 }
 0x576   :  { %v2905_v4 = vsub.f32 1.0, %v2904_v12  ;;  %v6835_v12 = vpop.f32.mrf.mxu2 }
 0x577   :  { %v2891_v37 = vmul.f32 %v5051_v45, %v2890_v5  ;;  %v2951_v5 = vrot.slane %v2857_v18, 4 }
 0x578   :  { %v2906_v54 = vmul.f32 %v5053_v33, %v2905_v4  ;;  %v6832_v56 = vpop.f32.mrf.mxu3  ;;  %v2912_v4 = vand.u32 2147483647, %v2885_v42 }
 0x579   :  { %v2892_v36 = vadd.f32 %v5051_v45, %v2891_v37 }
 0x57a   :  { %v2907_v1 = vadd.f32 %v5053_v33, %v2906_v54  ;;  %vm2913_vm8 = vcmp.eq.f32.partialorder %v2912_v4, 8.507059e+37 }
 0x57b   :  { %v2896_v43 = vsel %vm2895_vm3, %v5051_v45, %v2892_v36 }
 0x57c   :  { %v2901_v20 = vsel %vm2898_vm4, %v2900_v58, %v2896_v43  ;;  %v2911_v37 = vsel %vm2910_vm7, %v5053_v33, %v2907_v1  ;;  %v2721_v43 = vadd.f32 %v2720_v15, %v6791_v3  ;;  %v2747_v33 = vadd.f32 %v2746_v44, %v6812_v23 }
 0x57d   :  { %v2949_v32 = vmul.f32 %v2948_v61, %v2901_v20  ;;  %v2916_v36 = vsel %vm2913_vm8, %v2915_v7, %v2911_v37 }
 0x57e   :  { %v2774_v45 = vpop.f32.mrf.mxu2  ;;  %v2959_v58 = vsub.f32 1.0, %v2916_v36  ;;  %v2961_v31 = vmul.f32 %v2916_v36, %v6633_v38  ;;  %v2854_v18 = vadd.f32 %v2721_v43, %v5985_v9  ;;  %v2855_v38 = vadd.f32 %v2747_v33, %v5974_v53 }
 0x57f   :  { %v2953_v14 = vadd.f32 %v2951_v5, %v2949_v32 }
 0x580   :  { %v2839_v63 = vpop.f32.mrf.mxu3 }
 0x581   :  { %5054 = vtanh.f32 %v2953_v14 }
 0x587   :  { %v5055_v52 = vpop.eup %5054 }
 0x588   :  { %v2960_v6 = vmul.f32 %v5055_v52, %v2959_v58 }
 0x58a   :  { %v6841_v54 = vadd.f32 %v2961_v31, %v2960_v6  ;;  %v2773_v31 = vadd.f32 %v6835_v12, %v6806_v8 }
 0x58b   :  { %v2798_v30 = vpop.f32.mrf.mxu0 }
 0x58c   :  { %v2799_v42 = vadd.f32 %v2798_v30, %v6827_v10  ;;  %v6846_v7 = vpack.c.bf16 %v6841_v54, %v6841_v54 }
 0x58e   :  { %v2864_v14 = vadd.f32 %v2854_v18, %v2799_v42  ;;  %2978 = vmatmul.bf16.vlgmr.msrb.gmra.mxu1 %v6846_v7  ;;  %3004 = vmatmul.bf16.vlgmr.msrb.gmra.mxu3 %v6846_v7 }
 0x58f   :  { %3074 = vmatpush.bf16.msrb.mxu1 %v7881_v39  ;;  %3100 = vmatpush.bf16.msrb.mxu3 %v7882_v11 }
 0x590   :  { %v4779_v15 = vmul.f32 -1.442695, %v2864_v14 }
 0x591   :  { %v2824_v3 = vpop.f32.mrf.mxu2 }
 0x592   :  { %5056 = vpow2.f32 %v4779_v15  ;;  %v2825_v10 = vadd.f32 %v2824_v3, %v6823_v27  ;;  %v6874_v15 = vld [vmem:[%s7413_s6] ss:$0 sm:$0xff] }
 0x593   :  { %v2800_v44 = vpop.f32.mrf.mxu0  ;;  %3075 = vmatpush.bf16.msrb.mxu1 %v7883_v25  ;;  %3101 = vmatpush.bf16.msrb.mxu3 %v7884_v49 }
 0x594   :  { %v2865_v23 = vadd.f32 %v2855_v38, %v2825_v10 }
 0x596   :  { %v4780_v61 = vmul.f32 -1.442695, %v2865_v23 }
 0x597   :  { %3076 = vmatpush.bf16.msrb.mxu1 %v7885_v24  ;;  %3102 = vmatpush.bf16.msrb.mxu3 %v7886_v51 }
 0x598   :  { %v5057_v20 = vpop.eup %5056  ;;  %5058 = vpow2.f32 %v4780_v61 }
 0x599   :  { %v2886_v1 = vadd.f32 1.0, %v5057_v20  ;;  %v2826_v13 = vpop.f32.mrf.mxu2 }
 0x59b   :  { %5060 = vrcp.f32 %v2886_v1  ;;  %3077 = vmatpush.bf16.msrb.mxu1 %v7887_v41  ;;  %3103 = vmatpush.bf16.msrb.mxu3 %v7888_v29  ;;  %v2929_v63 = vand.u32 2147483648, %v2886_v1  ;;  %v2927_v45 = vand.u32 2147483647, %v2886_v1  ;;  %vm2923_vm10 = vweird.f32 %v2886_v1 }
 0x59d   :  { %v2930_v18 = vor.u32 1.1754944e-38, %v2929_v63  ;;  %vm2928_vm12 = vcmp.eq.f32.partialorder %v2927_v45, 8.507059e+37  ;;  %v8343_v45 = vld [vmem:[#allocation77_spill] sm:$0xff] }
 0x59e   :  { %v5059_v27 = vpop.eup %5058  ;;  %3030 = vmatmul.bf16.vlgmr.msra.gmra.mxu1 %v6846_v7  ;;  %3056 = vmatmul.bf16.vlgmr.msra.gmra.mxu3 %v6846_v7 }
 0x59f   :  { %v2887_v32 = vadd.f32 1.0, %v5059_v27  ;;  %3078 = vmatpush.bf16.msrb.mxu1 %v7889_v34  ;;  %3104 = vmatpush.bf16.msrb.mxu3 %v7890_v60 }
 0x5a1   :  { %v5061_v5 = vpop.eup %5060  ;;  %5062 = vrcp.f32 %v2887_v32  ;;  %v2944_v12 = vand.u32 2147483648, %v2887_v32  ;;  %vm2938_vm14 = vweird.f32 %v2887_v32  ;;  %v2942_v44 = vand.u32 2147483647, %v2887_v32 }
 0x5a2   :  { %v2919_v4 = vmul.f32 %v5061_v5, %v2886_v1  ;;  %vm2924_vm9 = vweird.f32 %v5061_v5 }
 0x5a3   :  { %3079 = vmatpush.bf16.msrb.mxu1 %v7891_v17  ;;  %3105 = vmatpush.bf16.msrb.mxu3 %v7992_v50  ;;  %vm2925_vm11 = vmor %vm2923_vm10, %vm2924_vm9  ;;  %v2945_v1 = vor.u32 1.1754944e-38, %v2944_v12  ;;  %vm2943_vm2 = vcmp.eq.f32.partialorder %v2942_v44, 8.507059e+37  ;;  %v8357_v12 = vld [vmem:[#allocation86_spill] sm:$0xff]  ;;  %v8360_v44 = vld [vmem:[#allocation92_spill] sm:$0xff] }
 0x5a4   :  { %v2920_v37 = vsub.f32 1.0, %v2919_v4 }
 0x5a6   :  { %v2921_v36 = vmul.f32 %v5061_v5, %v2920_v37 }
 0x5a7   :  { %v5063_v43 = vpop.eup %5062  ;;  %3080 = vmatpush.bf16.msrb.mxu1 %v7993_v26  ;;  %3106 = vmatpush.bf16.msrb.mxu3 %v7994_v40 }
 0x5a8   :  { %v2934_v58 = vmul.f32 %v5063_v43, %v2887_v32  ;;  %v2922_v6 = vadd.f32 %v5061_v5, %v2921_v36  ;;  %vm2939_vm13 = vweird.f32 %v5063_v43  ;;  %v8342_v36 = vld [vmem:[#allocation81_spill] sm:$0xff] }
 0x5a9   :  { %vm2940_vm15 = vmor %vm2938_vm14, %vm2939_vm13 }
 0x5aa   :  { %v2935_v42 = vsub.f32 1.0, %v2934_v58  ;;  %v2926_v33 = vsel %vm2925_vm11, %v5061_v5, %v2922_v6  ;;  %v8345_v58 = vld [vmem:[#allocation134_spill] sm:$0xff] }
 0x5ab   :  { %v2850_v52 = vpop.f32.mrf.mxu0  ;;  %v2931_v14 = vsel %vm2928_vm12, %v2930_v18, %v2926_v33  ;;  %3081 = vmatpush.bf16.msrb.mxu1 %v7995_v57  ;;  %3107 = vmatpush.bf16.msrb.mxu3 %v7996_v21  ;;  %v8347_v6 = vld [vmem:[#allocation82_spill] sm:$0xff]  ;;  %v8350_v18 = vld [vmem:[#allocation85_spill] sm:$0xff]  ;;  %v8352_v33 = vld [vmem:[#allocation139_spill] sm:$0xff] }
 0x5ac   :  { %v2851_v30 = vadd.f32 %v2850_v52, %v6832_v56  ;;  %v2936_v8 = vmul.f32 %v5063_v43, %v2935_v42  ;;  %v2856_v56 = vadd.f32 %v2773_v31, %v6022_v62  ;;  %v8346_v52 = vld [vmem:[#allocation83_spill] sm:$0xff]  ;;  %v8348_v31 = vld [vmem:[#allocation136_spill] sm:$0xff] }
 0x5ad   :  { %v8351_v42 = vld [vmem:[#allocation84_spill] sm:$0xff] }
 0x5ae   :  { %v2954_v3 = vadd.f32 %v6874_v15, %v2851_v30  ;;  %v2937_v10 = vadd.f32 %v5063_v43, %v2936_v8  ;;  %3082 = vmatmul.bf16.vlgmr.msrb.gmra.mxu1 %v6846_v7  ;;  %3108 = vmatmul.bf16.vlgmr.msrb.gmra.mxu3 %v6846_v7  ;;  %v8349_v30 = vld [vmem:[#allocation137_spill] sm:$0xff]  ;;  %v8355_v8 = vld [vmem:[#allocation16_spill] sm:$0xff] }
 0x5af   :  { %3126 = vmatpush.bf16.msra.mxu1 %v7997_v28  ;;  %3152 = vmatpush.bf16.msra.mxu3 %v7998_v47 }
 0x5b0   :  { %v2955_v38 = vmul.f32 %v2954_v3, %v2931_v14  ;;  %v2941_v61 = vsel %vm2940_vm15, %v5063_v43, %v2937_v10  ;;  %v8344_v43 = vld [vmem:[#allocation133_spill] sm:$0xff]  ;;  %v8353_v14 = vld [vmem:[#allocation140_spill] sm:$0xff] }
 0x5b1   :  { %v2946_v13 = vsel %vm2943_vm2, %v2945_v1, %v2941_v61  ;;  %v8354_v3 = vld [vmem:[#allocation141_spill] sm:$0xff]  ;;  %v8359_v10 = vld [vmem:[#allocation20_spill] sm:$0xff] }
 0x5b2   :  { %v2956_v23 = vadd.f32 %v2955_v38, %v2856_v56  ;;  %v2963_v27 = vsub.f32 1.0, %v2946_v13  ;;  %v2965_v4 = vmul.f32 %v2946_v13, %v6681_v0  ;;  %v8341_v0 = vld [vmem:[#allocation131_spill] sm:$0xff]  ;;  %v8362_v61 = vld [vmem:[#allocation145_spill] sm:$0xff]  ;;  %v8364_v1 = vld [vmem:[#allocation96_spill] sm:$0xff] }
 0x5b3   :  { %v2852_v20 = vpop.f32.mrf.mxu0  ;;  %3127 = vmatpush.bf16.msra.mxu1 %v5783_v16  ;;  %3153 = vmatpush.bf16.msra.mxu3 %v5785_v55  ;;  %v8356_v56 = vld [vmem:[#allocation87_spill] sm:$0xff]  ;;  %v8365_v13 = vld [vmem:[#allocation93_spill] sm:$0xff] }
 0x5b4   :  { %5064 = vtanh.f32 %v2956_v23  ;;  %v8358_v38 = vld [vmem:[#allocation143_spill] sm:$0xff]  ;;  %v8361_v23 = vld [vmem:[#allocation88_spill] sm:$0xff] }
 0x5b5   :  { %v8363_v20 = vld [vmem:[#allocation24_spill] sm:$0xff] }
 0x5b7   :  { %3128 = vmatpush.bf16.msra.mxu1 %v5797_v59  ;;  %3154 = vmatpush.bf16.msra.mxu3 %v5799_v48 }
 0x5ba   :  { %v5065_v32 = vpop.eup %5064 }
 0x5bb   :  { %v2964_v5 = vmul.f32 %v5065_v32, %v2963_v27  ;;  %3129 = vmatpush.bf16.msra.mxu1 %v5810_v19  ;;  %3155 = vmatpush.bf16.msra.mxu3 %v5812_v46  ;;  %v8366_v27 = vld [vmem:[#allocation147_spill] sm:$0xff]  ;;  %v8367_v32 = vld [vmem:[#allocation28_spill] sm:$0xff] }
 0x5bd   :  { %v6889_v37 = vadd.f32 %v2965_v4, %v2964_v5  ;;  %v8368_v5 = vld [vmem:[#allocation101_spill] sm:$0xff] }
 0x5be   :  { %v8369_v4 = vld [vmem:[#allocation97_spill] sm:$0xff] }
 0x5bf   :  { %2967 = vst [vmem:[#allocation3 + $0x8] sm:$0x3] %v6889_v37  ;;  %v6896_v63 = vpack.c.bf16 %v6889_v37, %v6889_v37  ;;  %3130 = vmatpush.bf16.msra.mxu1 %v5822_v22  ;;  %3156 = vmatpush.bf16.msra.mxu3 %v8341_v0 }
 0x5c1   :  { %2991 = vmatmul.bf16.vlgmr.msra.gmra.mxu2 %v6896_v63  ;;  %3017 = vmatmul.bf16.vlgmr.msrb.gmra.mxu0 %v6896_v63 }
 0x5c2   :  { %3087 = vmatpush.bf16.msra.mxu2 %v7895_v2  ;;  %3113 = vmatpush.bf16.msrb.mxu0 %v7896_v35 }
 0x5c3   :  { %3131 = vmatpush.bf16.msra.mxu1 %v8344_v43  ;;  %3157 = vmatpush.bf16.msra.mxu3 %v8345_v58 }
 0x5c6   :  { %3088 = vmatpush.bf16.msra.mxu2 %v8342_v36  ;;  %3114 = vmatpush.bf16.msrb.mxu0 %v8343_v45 }
 0x5c7   :  { %3132 = vmatpush.bf16.msra.mxu1 %v8348_v31  ;;  %3158 = vmatpush.bf16.msra.mxu3 %v8349_v30 }
 0x5ca   :  { %3089 = vmatpush.bf16.msra.mxu2 %v8346_v52  ;;  %3115 = vmatpush.bf16.msrb.mxu0 %v8347_v6 }
 0x5cb   :  { %3133 = vmatpush.bf16.msra.mxu1 %v8352_v33  ;;  %3159 = vmatpush.bf16.msra.mxu3 %v8353_v14 }
 0x5ce   :  { %3090 = vmatpush.bf16.msra.mxu2 %v8350_v18  ;;  %3116 = vmatpush.bf16.msrb.mxu0 %v8351_v42 }
 0x5cf   :  { %3178 = vmatpush.bf16.msrb.mxu1 %v8354_v3  ;;  %3320 = vmatpush.bf16.msrb.mxu3 %v8355_v8  ;;  %v8370_v8 = vld [vmem:[#allocation102_spill] sm:$0xff] }
 0x5d0   :  { %3134 = vmatmul.bf16.vlgmr.msra.gmra.mxu1 %v6846_v7  ;;  %3160 = vmatmul.bf16.vlgmr.msra.gmra.mxu3 %v6846_v7 }
 0x5d1   :  { %3043 = vmatmul.bf16.vlgmr.msrb.gmra.mxu2 %v6896_v63  ;;  %3069 = vmatmul.bf16.vlgmr.msra.gmra.mxu0 %v6896_v63 }
 0x5d2   :  { %3091 = vmatpush.bf16.msra.mxu2 %v8356_v56  ;;  %3117 = vmatpush.bf16.msrb.mxu0 %v8357_v12  ;;  %v8428_v12 = vld [vmem:[#allocation146_spill] sm:$0xff]  ;;  %v8430_v56 = vld [vmem:[#allocation13_spill] sm:$0xff] }
 0x5d3   :  { %3179 = vmatpush.bf16.msrb.mxu1 %v8358_v38  ;;  %3321 = vmatpush.bf16.msrb.mxu3 %v8359_v10  ;;  %v8371_v10 = vld [vmem:[#allocation98_spill] sm:$0xff]  ;;  %v8453_v38 = vld [vmem:[#allocation55_spill] sm:$0xff] }
 0x5d6   :  { %3092 = vmatpush.bf16.msra.mxu2 %v8360_v44  ;;  %3118 = vmatpush.bf16.msrb.mxu0 %v8361_v23  ;;  %v8372_v23 = vld [vmem:[#allocation148_spill] sm:$0xff] }
 0x5d7   :  { %3180 = vmatpush.bf16.msrb.mxu1 %v8362_v61  ;;  %3322 = vmatpush.bf16.msrb.mxu3 %v8363_v20  ;;  %v8373_v44 = vld [vmem:[#allocation32_spill] sm:$0xff]  ;;  %v8374_v20 = vld [vmem:[#allocation106_spill] sm:$0xff] }
 0x5da   :  { %3093 = vmatpush.bf16.msra.mxu2 %v8364_v1  ;;  %3119 = vmatpush.bf16.msrb.mxu0 %v8365_v13  ;;  %v8375_v13 = vld [vmem:[#allocation103_spill] sm:$0xff]  ;;  %v8381_v1 = vld [vmem:[#allocation41_spill] sm:$0xff] }
 0x5db   :  { %3181 = vmatpush.bf16.msrb.mxu1 %v8366_v27  ;;  %3323 = vmatpush.bf16.msrb.mxu3 %v8367_v32  ;;  %v8376_v32 = vld [vmem:[#allocation149_spill] sm:$0xff]  ;;  %v8384_v27 = vld [vmem:[#allocation151_spill] sm:$0xff] }
 0x5de   :  { %3094 = vmatpush.bf16.msra.mxu2 %v8368_v5  ;;  %3120 = vmatpush.bf16.msrb.mxu0 %v8369_v4  ;;  %v8377_v5 = vld [vmem:[#allocation36_spill] sm:$0xff]  ;;  %v8378_v4 = vld [vmem:[#allocation110_spill] sm:$0xff] }
 0x5df   :  { %3182 = vmatpush.bf16.msrb.mxu1 %v8372_v23  ;;  %3324 = vmatpush.bf16.msrb.mxu3 %v8373_v44  ;;  %v8382_v44 = vld [vmem:[#allocation114_spill] sm:$0xff]  ;;  %v8383_v23 = vld [vmem:[#allocation111_spill] sm:$0xff] }
 0x5e1   :  { %3095 = vmatmul.bf16.vlgmr.msra.gmra.mxu2 %v6896_v63  ;;  %3121 = vmatmul.bf16.vlgmr.msrb.gmra.mxu0 %v6896_v63 }
 0x5e2   :  { %3139 = vmatpush.bf16.msrb.mxu2 %v8370_v8  ;;  %3165 = vmatpush.bf16.msra.mxu0 %v8371_v10  ;;  %v8379_v8 = vld [vmem:[#allocation107_spill] sm:$0xff]  ;;  %v8380_v10 = vld [vmem:[#allocation150_spill] sm:$0xff] }
 0x5e3   :  { %3183 = vmatpush.bf16.msrb.mxu1 %v8376_v32  ;;  %3325 = vmatpush.bf16.msrb.mxu3 %v8377_v5  ;;  %v8387_v32 = vld [vmem:[#allocation48_spill] sm:$0xff]  ;;  %v8388_v5 = vld [vmem:[#allocation118_spill] sm:$0xff] }
 0x5e6   :  { %3140 = vmatpush.bf16.msrb.mxu2 %v8374_v20  ;;  %3166 = vmatpush.bf16.msra.mxu0 %v8375_v13  ;;  %v8385_v20 = vld [vmem:[#allocation46_spill] sm:$0xff]  ;;  %v8386_v13 = vld [vmem:[#allocation17_spill] sm:$0xff] }
 0x5e7   :  { %3184 = vmatpush.bf16.msrb.mxu1 %v8380_v10  ;;  %3326 = vmatpush.bf16.msrb.mxu3 %v8381_v1  ;;  %v8391_v1 = vld [vmem:[#allocation52_spill] sm:$0xff] }
 0x5ea   :  { %3141 = vmatpush.bf16.msrb.mxu2 %v8378_v4  ;;  %3167 = vmatpush.bf16.msra.mxu0 %v8379_v8  ;;  %v8389_v4 = vld [vmem:[#allocation115_spill] sm:$0xff]  ;;  %v8390_v8 = vld [vmem:[#allocation21_spill] sm:$0xff] }
 0x5eb   :  { %3185 = vmatpush.bf16.msrb.mxu1 %v8384_v27  ;;  %3327 = vmatpush.bf16.msrb.mxu3 %v8385_v20  ;;  %v8394_v27 = vld [vmem:[#allocation25_spill] sm:$0xff]  ;;  %v8395_v20 = vld [vmem:[#allocation56_spill] sm:$0xff] }
 0x5ee   :  { %3142 = vmatpush.bf16.msrb.mxu2 %v8382_v44  ;;  %3168 = vmatpush.bf16.msra.mxu0 %v8383_v23  ;;  %v8392_v44 = vld [vmem:[#allocation124_spill] sm:$0xff]  ;;  %v8393_v23 = vld [vmem:[#allocation119_spill] sm:$0xff] }
 0x5ef   :  { %3346 = vmatpush.bf16.msra.mxu1 %v8386_v13  ;;  %3372 = vmatpush.bf16.msra.mxu3 %v8387_v32  ;;  %v8396_v13 = vld [vmem:[#allocation126_spill] sm:$0xff]  ;;  %v8397_v32 = vld [vmem:[#allocation125_spill] sm:$0xff] }
 0x5f0   :  { %3186 = vmatmul.bf16.vlgmr.msrb.gmra.mxu1 %v6846_v7  ;;  %v8400_v7 = vld [vmem:[#allocation128_spill] sm:$0xff] }
 0x5f2   :  { %3143 = vmatpush.bf16.msrb.mxu2 %v8388_v5  ;;  %3169 = vmatpush.bf16.msra.mxu0 %v8389_v4  ;;  %v8398_v5 = vld [vmem:[#allocation29_spill] sm:$0xff]  ;;  %v8399_v4 = vld [vmem:[#allocation60_spill] sm:$0xff] }
 0x5f3   :  { %3347 = vmatpush.bf16.msra.mxu1 %v8390_v8  ;;  %3373 = vmatpush.bf16.msra.mxu3 %v8391_v1  ;;  %v8401_v8 = vld [vmem:[#allocation127_spill] sm:$0xff]  ;;  %v8402_v1 = vld [vmem:[#allocation129_spill] sm:$0xff] }
 0x5f6   :  { %3144 = vmatpush.bf16.msrb.mxu2 %v8392_v44  ;;  %3170 = vmatpush.bf16.msra.mxu0 %v8393_v23  ;;  %v8403_v44 = vld [vmem:[#allocation14_spill] sm:$0xff]  ;;  %v8404_v23 = vld [vmem:[#allocation33_spill] sm:$0xff] }
 0x5f7   :  { %3348 = vmatpush.bf16.msra.mxu1 %v8394_v27  ;;  %3374 = vmatpush.bf16.msra.mxu3 %v8395_v20  ;;  %v8405_v27 = vld [vmem:[#allocation64_spill] sm:$0xff]  ;;  %v8406_v20 = vld [vmem:[#allocation130_spill] sm:$0xff] }
 0x5fa   :  { %3145 = vmatpush.bf16.msrb.mxu2 %v8396_v13  ;;  %3171 = vmatpush.bf16.msra.mxu0 %v8397_v32  ;;  %v8415_v32 = vld [vmem:[#allocation26_spill] sm:$0xff]  ;;  %v8416_v13 = vld [vmem:[#allocation47_spill] sm:$0xff] }
 0x5fb   :  { %3349 = vmatpush.bf16.msra.mxu1 %v8398_v5  ;;  %3375 = vmatpush.bf16.msra.mxu3 %v8399_v4  ;;  %v8407_v5 = vld [vmem:[#allocation18_spill] sm:$0xff]  ;;  %v8408_v4 = vld [vmem:[#allocation37_spill] sm:$0xff] }
 0x5fe   :  { %3146 = vmatpush.bf16.msrb.mxu2 %v8400_v7  ;;  %3172 = vmatpush.bf16.msra.mxu0 %v8401_v8  ;;  %v8409_v7 = vld [vmem:[#allocation68_spill] sm:$0xff] }
 0x5ff   :  { %3350 = vmatpush.bf16.msra.mxu1 %v8404_v23  ;;  %3376 = vmatpush.bf16.msra.mxu3 %v8405_v27  ;;  %v8410_v8 = vld [vmem:[#allocation132_spill] sm:$0xff]  ;;  %v8413_v23 = vld [vmem:[#allocation73_spill] sm:$0xff]  ;;  %v8414_v27 = vld [vmem:[#allocation135_spill] sm:$0xff] }
 0x601   :  { %3147 = vmatmul.bf16.vlgmr.msrb.gmra.mxu2 %v6896_v63  ;;  %3173 = vmatmul.bf16.vlgmr.msra.gmra.mxu0 %v6896_v63 }
 0x602   :  { %3191 = vmatpush.bf16.msra.mxu2 %v8402_v1  ;;  %3333 = vmatpush.bf16.msrb.mxu0 %v8403_v44  ;;  %v8411_v1 = vld [vmem:[#allocation22_spill] sm:$0xff] }
 0x603   :  { %3351 = vmatpush.bf16.msra.mxu1 %v8408_v4  ;;  %3377 = vmatpush.bf16.msra.mxu3 %v8409_v7  ;;  %v8412_v44 = vld [vmem:[#allocation42_spill] sm:$0xff] }
 0x604   :  { %v8419_v4 = vld [vmem:[#allocation138_spill] sm:$0xff] }
 0x605   :  { %v8420_v7 = vld [vmem:[#allocation30_spill] sm:$0xff] }
 0x606   :  { %3192 = vmatpush.bf16.msra.mxu2 %v8406_v20  ;;  %3334 = vmatpush.bf16.msrb.mxu0 %v8407_v5  ;;  %v8417_v20 = vld [vmem:[#allocation78_spill] sm:$0xff]  ;;  %v8418_v5 = vld [vmem:[#allocation49_spill] sm:$0xff] }
 0x607   :  { %3352 = vmatpush.bf16.msra.mxu1 %v8412_v44  ;;  %3378 = vmatpush.bf16.msra.mxu3 %v8413_v23  ;;  %v8423_v44 = vld [vmem:[#allocation34_spill] sm:$0xff] }
 0x60a   :  { %3193 = vmatpush.bf16.msra.mxu2 %v8410_v8  ;;  %3335 = vmatpush.bf16.msrb.mxu0 %v8411_v1  ;;  %v8421_v8 = vld [vmem:[#allocation53_spill] sm:$0xff]  ;;  %v8422_v1 = vld [vmem:[#allocation142_spill] sm:$0xff] }
 0x60b   :  { %3353 = vmatpush.bf16.msra.mxu1 %v8416_v13  ;;  %3379 = vmatpush.bf16.msra.mxu3 %v8417_v20  ;;  %v2979_v23 = vpop.f32.mrf.mxu1  ;;  %v8426_v13 = vld [vmem:[#allocation38_spill] sm:$0xff]  ;;  %v8427_v20 = vld [vmem:[#allocation61_spill] sm:$0xff] }
 0x60e   :  { %3194 = vmatpush.bf16.msra.mxu2 %v8414_v27  ;;  %3336 = vmatpush.bf16.msrb.mxu0 %v8415_v32  ;;  %v8424_v27 = vld [vmem:[#allocation57_spill] sm:$0xff]  ;;  %v8425_v32 = vld [vmem:[#allocation144_spill] sm:$0xff] }
 0x60f   :  { %3398 = vmatpush.bf16.msrb.mxu1 %v8418_v5 }
 0x611   :  { %v3005_v10 = vpop.f32.mrf.mxu3 }
 0x612   :  { %3195 = vmatpush.bf16.msra.mxu2 %v8419_v4  ;;  %3337 = vmatpush.bf16.msrb.mxu0 %v8420_v7  ;;  %v8429_v4 = vld [vmem:[#allocation43_spill] sm:$0xff] }
 0x613   :  { %3399 = vmatpush.bf16.msrb.mxu1 %v8421_v8  ;;  %v2981_v7 = vpop.f32.mrf.mxu1  ;;  %v8452_v8 = vld [vmem:[#allocation51_spill] sm:$0xff] }
 0x614   :  { %v8440_v7 = vld [vmem:[#allocation58_spill] sm:$0xff] }
 0x616   :  { %3196 = vmatpush.bf16.msra.mxu2 %v8422_v1  ;;  %3338 = vmatpush.bf16.msrb.mxu0 %v8423_v44  ;;  %v8431_v1 = vld [vmem:[#allocation44_spill] sm:$0xff]  ;;  %v8432_v44 = vld [vmem:[#allocation65_spill] sm:$0xff] }
 0x617   :  { %3400 = vmatpush.bf16.msrb.mxu1 %v8424_v27  ;;  %v8433_v27 = vld [vmem:[#allocation15_spill] sm:$0xff] }
 0x61a   :  { %3197 = vmatpush.bf16.msra.mxu2 %v8425_v32  ;;  %3339 = vmatpush.bf16.msrb.mxu0 %v8426_v13  ;;  %v8434_v32 = vld [vmem:[#allocation50_spill] sm:$0xff]  ;;  %v8435_v13 = vld [vmem:[#allocation69_spill] sm:$0xff] }
 0x61b   :  { %3401 = vmatpush.bf16.msrb.mxu1 %v8427_v20  ;;  %v3007_v20 = vpop.f32.mrf.mxu3  ;;  %v7008_v61 = vpop.f32.mrf.mxu1 }
 0x61c   :  { %v8443_v20 = vld [vmem:[#allocation62_spill] sm:$0xff] }
 0x61e   :  { %3198 = vmatpush.bf16.msra.mxu2 %v8428_v12  ;;  %3340 = vmatpush.bf16.msrb.mxu0 %v8429_v4  ;;  %v8436_v12 = vld [vmem:[#allocation19_spill] sm:$0xff]  ;;  %v8437_v4 = vld [vmem:[#allocation54_spill] sm:$0xff] }
 0x61f   :  { %3402 = vmatpush.bf16.msrb.mxu1 %v8432_v44  ;;  %v8442_v44 = vld [vmem:[#allocation27_spill] sm:$0xff] }
 0x621   :  { %3199 = vmatmul.bf16.vlgmr.msra.gmra.mxu2 %v6896_v63  ;;  %v8441_v63 = vld [vmem:[#allocation79_spill] sm:$0xff] }
 0x622   :  { %3359 = vmatpush.bf16.msrb.mxu2 %v8430_v56  ;;  %3385 = vmatpush.bf16.msra.mxu0 %v8431_v1  ;;  %v8438_v56 = vld [vmem:[#allocation74_spill] sm:$0xff]  ;;  %v8439_v1 = vld [vmem:[#allocation23_spill] sm:$0xff] }
 0x623   :  { %3403 = vmatpush.bf16.msrb.mxu1 %v8435_v13  ;;  %v8444_v13 = vld [vmem:[#allocation31_spill] sm:$0xff] }
 0x626   :  { %3360 = vmatpush.bf16.msrb.mxu2 %v8433_v27  ;;  %3386 = vmatpush.bf16.msra.mxu0 %v8434_v32  ;;  %v7016_v27 = vpop.f32.mrf.mxu3  ;;  %v3033_v32 = vpop.f32.mrf.mxu1 }
 0x627   :  { %3404 = vmatpush.bf16.msrb.mxu1 %v8438_v56  ;;  %v8446_v56 = vld [vmem:[#allocation35_spill] sm:$0xff]  ;;  %v8450_v32 = vld [vmem:[#allocation40_spill] sm:$0xff] }
 0x62a   :  { %3361 = vmatpush.bf16.msrb.mxu2 %v8436_v12  ;;  %3387 = vmatpush.bf16.msra.mxu0 %v8437_v4  ;;  %v8445_v12 = vld [vmem:[#allocation66_spill] sm:$0xff] }
 0x62b   :  { %3405 = vmatpush.bf16.msrb.mxu1 %v8441_v63  ;;  %v8449_v63 = vld [vmem:[#allocation75_spill] sm:$0xff] }
 0x62e   :  { %3362 = vmatpush.bf16.msrb.mxu2 %v8439_v1  ;;  %3388 = vmatpush.bf16.msra.mxu0 %v8440_v7  ;;  %v3059_v4 = vpop.f32.mrf.mxu3  ;;  %v7022_v42 = vpop.f32.mrf.mxu1  ;;  %v8447_v1 = vld [vmem:[#allocation70_spill] sm:$0xff]  ;;  %v8448_v7 = vld [vmem:[#allocation39_spill] sm:$0xff] }
 0x632   :  { %3363 = vmatpush.bf16.msrb.mxu2 %v8442_v44  ;;  %3389 = vmatpush.bf16.msra.mxu0 %v8443_v20  ;;  %v8451_v20 = vld [vmem:[#allocation45_spill] sm:$0xff] }
 0x636   :  { %3364 = vmatpush.bf16.msrb.mxu2 %v8444_v13  ;;  %3390 = vmatpush.bf16.msra.mxu0 %v8445_v12  ;;  %v3109_v44 = vpop.f32.mrf.mxu3  ;;  %v3085_v18 = vpop.f32.mrf.mxu1 }
 0x63a   :  { %3365 = vmatpush.bf16.msrb.mxu2 %v8446_v56  ;;  %3391 = vmatpush.bf16.msra.mxu0 %v8447_v1 }
 0x63e   :  { %3366 = vmatpush.bf16.msrb.mxu2 %v8448_v7  ;;  %3392 = vmatpush.bf16.msra.mxu0 %v8449_v63  ;;  %v3018_v13 = vpop.f32.mrf.mxu0  ;;  %v3111_v12 = vpop.f32.mrf.mxu3  ;;  %v8454_v7 = vld [vmem:[#allocation59_spill] sm:$0xff] }
 0x63f   :  { %v3019_v4 = vadd.f32 %v3018_v13, %v3005_v10  ;;  %v7033_v63 = vld [vmem:[#allocation2 + $0x24] sm:$0x3f] }
 0x640   :  { %v8456_v10 = vld [vmem:[#allocation67_spill] sm:$0xff] }
 0x641   :  { %v3210_v6 = vrot.slane %v3019_v4, 6 }
 0x642   :  { %3411 = vmatpush.bf16.msra.mxu2 %v8450_v32 }
 0x644   :  { %v2992_v56 = vpop.f32.mrf.mxu2 }
 0x645   :  { %v2993_v1 = vadd.f32 %v2992_v56, %v2979_v23 }
 0x646   :  { %3412 = vmatpush.bf16.msra.mxu2 %v8451_v20  ;;  %v3020_v52 = vpop.f32.mrf.mxu0  ;;  %v8455_v20 = vld [vmem:[#allocation63_spill] sm:$0xff] }
 0x647   :  { %v3211_v32 = vsel %vm211_vm1, %v2993_v1, %v3210_v6 }
 0x648   :  { %v3213_v18 = vadd.f32 %v3211_v32, %v7033_v63 }
 0x64a   :  { %3413 = vmatpush.bf16.msra.mxu2 %v8452_v8  ;;  %3217 = vst [vmem:[#allocation1] ss:$4 sm:$0xff] %v3213_v18 }
 0x64c   :  { %v2994_v8 = vpop.f32.mrf.mxu2 }
 0x64d   :  { %v7041_v13 = vpop.f32.mrf.mxu1 }
 0x64e   :  { %3414 = vmatpush.bf16.msra.mxu2 %v8453_v38  ;;  %v7038_v12 = vpop.f32.mrf.mxu0 }
 0x651   :  { %v3218_v23 = vld.sshfl [vmem:[#allocation1] sm:$0xff pattern:$0x73625140]  ;;  %v3219_v52 = vld.sshfl [vmem:[#allocation1 + $0x8] sm:$0xff pattern:$0x73625140] }
 0x652   :  { %3415 = vmatpush.bf16.msra.mxu2 %v8454_v7  ;;  %v4781_v4 = vmul.f32 -1.442695, %v3218_v23  ;;  %v4782_v56 = vmul.f32 -1.442695, %v3219_v52  ;;  %v8457_v7 = vld [vmem:[#allocation71_spill] sm:$0xff] }
 0x654   :  { %v3044_v38 = vpop.f32.mrf.mxu2  ;;  %5066 = vpow2.f32 %v4781_v4 }
 0x655   :  { %5068 = vpow2.f32 %v4782_v56  ;;  %v3137_v32 = vpop.f32.mrf.mxu1 }
 0x656   :  { %3416 = vmatpush.bf16.msra.mxu2 %v8455_v20  ;;  %v3072_v6 = vpop.f32.mrf.mxu0 }
 0x65a   :  { %3417 = vmatpush.bf16.msra.mxu2 %v8456_v10  ;;  %v5067_v1 = vpop.eup %5066  ;;  %v3161_v10 = vpop.f32.mrf.mxu3 }
 0x65b   :  { %v5069_v18 = vpop.eup %5068  ;;  %v3234_v8 = vadd.f32 1.0, %v5067_v1  ;;  %v3045_v1 = vadd.f32 %v3044_v38, %v7008_v61 }
 0x65c   :  { %v3235_v20 = vadd.f32 1.0, %v5069_v18  ;;  %v3046_v5 = vpop.f32.mrf.mxu2 }
 0x65d   :  { %5070 = vrcp.f32 %v3234_v8  ;;  %v3249_v32 = vand.u32 2147483648, %v3234_v8  ;;  %v3247_v5 = vand.u32 2147483647, %v3234_v8  ;;  %vm3243_vm4 = vweird.f32 %v3234_v8 }
 0x65e   :  { %3418 = vmatpush.bf16.msra.mxu2 %v8457_v7  ;;  %5072 = vrcp.f32 %v3235_v20  ;;  %v3122_v3 = vpop.f32.mrf.mxu0  ;;  %vm3258_vm8 = vweird.f32 %v3235_v20 }
 0x65f   :  { %v7044_v14 = vadd.f32 %v3122_v3, %v3109_v44  ;;  %v3250_v3 = vor.u32 1.1754944e-38, %v3249_v32  ;;  %vm3248_vm6 = vcmp.eq.f32.partialorder %v3247_v5, 8.507059e+37 }
 0x662   :  { %v3163_v4 = vpop.f32.mrf.mxu3 }
 0x663   :  { %v5071_v23 = vpop.eup %5070  ;;  %v7050_v4 = vld [vmem:[%s7410_s3] ss:$0 sm:$0xff] }
 0x664   :  { %v5073_v52 = vpop.eup %5072  ;;  %v3239_v33 = vmul.f32 %v5071_v23, %v3234_v8  ;;  %v3096_v7 = vpop.f32.mrf.mxu2  ;;  %vm3244_vm3 = vweird.f32 %v5071_v23  ;;  %8458 = vst [vmem:[#allocation90_spill] sm:$0xff] %v7050_v4  ;;  %v3301_v8 = vrot.slane %v7033_v63, 4 }
 0x665   :  { %v3254_v45 = vmul.f32 %v5073_v52, %v3235_v20  ;;  %vm3245_vm5 = vmor %vm3243_vm4, %vm3244_vm3  ;;  %vm3259_vm7 = vweird.f32 %v5073_v52 }
 0x666   :  { %v3240_v56 = vsub.f32 1.0, %v3239_v33  ;;  %v3124_v6 = vpop.f32.mrf.mxu0  ;;  %v3298_v33 = vadd.f32 %v7050_v4, %v3045_v1  ;;  %vm3260_vm9 = vmor %vm3258_vm8, %vm3259_vm7 }
 0x667   :  { %v3255_v36 = vsub.f32 1.0, %v3254_v45 }
 0x668   :  { %v3241_v18 = vmul.f32 %v5071_v23, %v3240_v56 }
 0x669   :  { %v3256_v30 = vmul.f32 %v5073_v52, %v3255_v36  ;;  %v3264_v36 = vand.u32 2147483648, %v3235_v20 }
 0x66a   :  { %v3242_v31 = vadd.f32 %v5071_v23, %v3241_v18 }
 0x66b   :  { %v3257_v38 = vadd.f32 %v5073_v52, %v3256_v30  ;;  %v3265_v18 = vor.u32 1.1754944e-38, %v3264_v36  ;;  %v3097_v30 = vadd.f32 %v3096_v7, %v7022_v42 }
 0x66c   :  { %v3246_v44 = vsel %vm3245_vm5, %v5071_v23, %v3242_v31  ;;  %v3098_v45 = vpop.f32.mrf.mxu2  ;;  %v3262_v31 = vand.u32 2147483647, %v3235_v20 }
 0x66d   :  { %v3251_v6 = vsel %vm3248_vm6, %v3250_v3, %v3246_v44  ;;  %v7053_v61 = vpop.f32.mrf.mxu1  ;;  %v3261_v32 = vsel %vm3260_vm9, %v5073_v52, %v3257_v38  ;;  %v3205_v20 = vadd.f32 %v3097_v30, %v5974_v53  ;;  %v3071_v38 = vadd.f32 %v7038_v12, %v7016_v27 }
 0x66e   :  { %v3299_v56 = vmul.f32 %v3298_v33, %v3251_v6  ;;  %vm3263_vm10 = vcmp.eq.f32.partialorder %v3262_v31, 8.507059e+37 }
 0x66f   :  { %v3266_v5 = vsel %vm3263_vm10, %v3265_v18, %v3261_v32  ;;  %v3204_v7 = vadd.f32 %v3071_v38, %v5985_v9 }
 0x670   :  { %v3303_v23 = vadd.f32 %v3301_v8, %v3299_v56  ;;  %v3309_v45 = vsub.f32 1.0, %v3266_v5  ;;  %v3311_v4 = vmul.f32 %v3266_v5, %v6841_v54 }
 0x672   :  { %5074 = vtanh.f32 %v3303_v23 }
 0x675   :  { %v3189_v1 = vpop.f32.mrf.mxu1 }
 0x678   :  { %v5075_v3 = vpop.eup %5074 }
 0x679   :  { %v3310_v44 = vmul.f32 %v5075_v3, %v3309_v45 }
 0x67b   :  { %v7058_v33 = vadd.f32 %v3311_v4, %v3310_v44 }
 0x67d   :  { %v7063_v52 = vpack.c.bf16 %v7058_v33, %v7058_v33 }
 0x67e   :  { %v3174_v63 = vpop.f32.mrf.mxu0 }
 0x67f   :  { %v3175_v6 = vadd.f32 %v3174_v63, %v3161_v10  ;;  %3328 = vmatmul.bf16.vlgmr.msrb.gmra.mxu3 %v7063_v52  ;;  %3354 = vmatmul.bf16.vlgmr.msra.gmra.mxu1 %v7063_v52 }
 0x680   :  { %3424 = vmatpush.bf16.msrb.mxu3 %v7881_v39  ;;  %3450 = vmatpush.bf16.msra.mxu1 %v7882_v11 }
 0x681   :  { %v3215_v36 = vadd.f32 %v3205_v20, %v3175_v6 }
 0x683   :  { %v4784_v42 = vmul.f32 -1.442695, %v3215_v36 }
 0x684   :  { %v3148_v54 = vpop.f32.mrf.mxu2  ;;  %3425 = vmatpush.bf16.msrb.mxu3 %v7883_v25  ;;  %3451 = vmatpush.bf16.msra.mxu1 %v7884_v49 }
 0x685   :  { %5076 = vpow2.f32 %v4784_v42  ;;  %v3149_v10 = vadd.f32 %v3148_v54, %v7041_v13 }
 0x686   :  { %v3176_v4 = vpop.f32.mrf.mxu0 }
 0x687   :  { %v3214_v56 = vadd.f32 %v3204_v7, %v3149_v10 }
 0x688   :  { %3426 = vmatpush.bf16.msrb.mxu3 %v7885_v24  ;;  %3452 = vmatpush.bf16.msra.mxu1 %v7886_v51 }
 0x689   :  { %v4783_v27 = vmul.f32 -1.442695, %v3214_v56 }
 0x68b   :  { %v5077_v12 = vpop.eup %5076  ;;  %5078 = vpow2.f32 %v4783_v27 }
 0x68c   :  { %v3237_v8 = vadd.f32 1.0, %v5077_v12  ;;  %v3150_v31 = vpop.f32.mrf.mxu2  ;;  %3427 = vmatpush.bf16.msrb.mxu3 %v7887_v41  ;;  %3453 = vmatpush.bf16.msra.mxu1 %v7888_v29 }
 0x68e   :  { %5080 = vrcp.f32 %v3237_v8  ;;  %v3294_v56 = vand.u32 2147483648, %v3237_v8  ;;  %vm3288_vm2 = vweird.f32 %v3237_v8  ;;  %v3292_v12 = vand.u32 2147483647, %v3237_v8 }
 0x68f   :  { %3380 = vmatmul.bf16.vlgmr.msra.gmra.mxu3 %v7063_v52  ;;  %3406 = vmatmul.bf16.vlgmr.msrb.gmra.mxu1 %v7063_v52 }
 0x690   :  { %3428 = vmatpush.bf16.msrb.mxu3 %v7889_v34  ;;  %3454 = vmatpush.bf16.msra.mxu1 %v7890_v60  ;;  %vm3293_vm4 = vcmp.eq.f32.partialorder %v3292_v12, 8.507059e+37  ;;  %v8477_v12 = vld [vmem:[#allocation86_spill] sm:$0xff] }
 0x691   :  { %v5079_v13 = vpop.eup %5078 }
 0x692   :  { %v3236_v23 = vadd.f32 1.0, %v5079_v13 }
 0x694   :  { %5082 = vrcp.f32 %v3236_v23  ;;  %v5081_v32 = vpop.eup %5080  ;;  %3429 = vmatpush.bf16.msrb.mxu3 %v7891_v17  ;;  %3455 = vmatpush.bf16.msra.mxu1 %v7992_v50  ;;  %v3279_v30 = vand.u32 2147483648, %v3236_v23  ;;  %v3277_v63 = vand.u32 2147483647, %v3236_v23  ;;  %vm3273_vm12 = vweird.f32 %v3236_v23 }
 0x695   :  { %v3284_v18 = vmul.f32 %v5081_v32, %v3237_v8  ;;  %vm3289_vm15 = vweird.f32 %v5081_v32 }
 0x696   :  { %v3280_v42 = vor.u32 1.1754944e-38, %v3279_v30  ;;  %vm3278_vm14 = vcmp.eq.f32.partialorder %v3277_v63, 8.507059e+37  ;;  %vm3290_vm3 = vmor %vm3288_vm2, %vm3289_vm15  ;;  %v8462_v30 = vld [vmem:[#allocation81_spill] sm:$0xff]  ;;  %v8464_v63 = vld [vmem:[#allocation139_spill] sm:$0xff] }
 0x697   :  { %v3285_v45 = vsub.f32 1.0, %v3284_v18 }
 0x698   :  { %3430 = vmatpush.bf16.msrb.mxu3 %v7993_v26  ;;  %3456 = vmatpush.bf16.msra.mxu1 %v7994_v40 }
 0x699   :  { %v3286_v20 = vmul.f32 %v5081_v32, %v3285_v45 }
 0x69a   :  { %v5083_v5 = vpop.eup %5082 }
 0x69b   :  { %v3269_v1 = vmul.f32 %v5083_v5, %v3236_v23  ;;  %vm3274_vm11 = vweird.f32 %v5083_v5  ;;  %v3287_v4 = vadd.f32 %v5081_v32, %v3286_v20  ;;  %v3295_v23 = vor.u32 1.1754944e-38, %v3294_v56  ;;  %v8465_v20 = vld [vmem:[#allocation140_spill] sm:$0xff]  ;;  %v8475_v56 = vld [vmem:[#allocation57_spill] sm:$0xff] }
 0x69c   :  { %3431 = vmatpush.bf16.msrb.mxu3 %v7995_v57  ;;  %3457 = vmatpush.bf16.msra.mxu1 %v7996_v21  ;;  %vm3275_vm13 = vmor %vm3273_vm12, %vm3274_vm11 }
 0x69d   :  { %v3270_v3 = vsub.f32 1.0, %v3269_v1 }
 0x69f   :  { %v3271_v44 = vmul.f32 %v5083_v5, %v3270_v3  ;;  %3432 = vmatmul.bf16.vlgmr.msrb.gmra.mxu3 %v7063_v52  ;;  %3458 = vmatmul.bf16.vlgmr.msra.gmra.mxu1 %v7063_v52  ;;  %v8461_v3 = vld [vmem:[#allocation137_spill] sm:$0xff] }
 0x6a0   :  { %3476 = vmatpush.bf16.msra.mxu3 %v7997_v28  ;;  %3502 = vmatpush.bf16.msrb.mxu1 %v7998_v47 }
 0x6a1   :  { %v3272_v38 = vadd.f32 %v5083_v5, %v3271_v44  ;;  %v8463_v44 = vld [vmem:[#allocation77_spill] sm:$0xff] }
 0x6a3   :  { %v3276_v54 = vsel %vm3275_vm13, %v5083_v5, %v3272_v38  ;;  %v8467_v38 = vld [vmem:[#allocation49_spill] sm:$0xff] }
 0x6a4   :  { %v3200_v6 = vpop.f32.mrf.mxu2  ;;  %v3281_v7 = vsel %vm3278_vm14, %v3280_v42, %v3276_v54  ;;  %3477 = vmatpush.bf16.msra.mxu3 %v5783_v16  ;;  %3503 = vmatpush.bf16.msrb.mxu1 %v5785_v55  ;;  %v8469_v42 = vld [vmem:[#allocation82_spill] sm:$0xff]  ;;  %v8470_v54 = vld [vmem:[#allocation143_spill] sm:$0xff] }
 0x6a5   :  { %v3201_v36 = vadd.f32 %v3200_v6, %v7053_v61  ;;  %v3206_v61 = vadd.f32 %v7044_v14, %v6022_v62  ;;  %v8466_v6 = vld [vmem:[#allocation141_spill] sm:$0xff]  ;;  %v8493_v62 = vld [vmem:[#allocation74_spill] sm:$0xff] }
 0x6a7   :  { %v3304_v10 = vadd.f32 %v6874_v15, %v3201_v36  ;;  %v3291_v15 = vsel %vm3290_vm3, %v5081_v32, %v3287_v4  ;;  %v8468_v36 = vld [vmem:[#allocation83_spill] sm:$0xff]  ;;  %v8473_v4 = vld [vmem:[#allocation84_spill] sm:$0xff] }
 0x6a8   :  { %3478 = vmatpush.bf16.msra.mxu3 %v5797_v59  ;;  %3504 = vmatpush.bf16.msrb.mxu1 %v5799_v48  ;;  %v3296_v18 = vsel %vm3293_vm4, %v3295_v23, %v3291_v15  ;;  %v8479_v15 = vld [vmem:[#allocation61_spill] sm:$0xff]  ;;  %v8481_v23 = vld [vmem:[#allocation88_spill] sm:$0xff] }
 0x6a9   :  { %v3305_v27 = vmul.f32 %v3304_v10, %v3281_v7  ;;  %v3313_v14 = vsub.f32 1.0, %v3296_v18  ;;  %v3315_v1 = vmul.f32 %v3296_v18, %v6889_v37  ;;  %v8460_v37 = vld [vmem:[#allocation136_spill] sm:$0xff]  ;;  %v8471_v7 = vld [vmem:[#allocation53_spill] sm:$0xff] }
 0x6aa   :  { %v8472_v10 = vld [vmem:[#allocation85_spill] sm:$0xff]  ;;  %v8482_v18 = vld [vmem:[#allocation148_spill] sm:$0xff] }
 0x6ab   :  { %v3306_v31 = vadd.f32 %v3305_v27, %v3206_v61  ;;  %v8474_v61 = vld [vmem:[#allocation145_spill] sm:$0xff]  ;;  %v8476_v27 = vld [vmem:[#allocation87_spill] sm:$0xff] }
 0x6ac   :  { %v3202_v13 = vpop.f32.mrf.mxu2  ;;  %3479 = vmatpush.bf16.msra.mxu3 %v5810_v19  ;;  %3505 = vmatpush.bf16.msrb.mxu1 %v5812_v46 }
 0x6ad   :  { %5084 = vtanh.f32 %v3306_v31  ;;  %v8478_v31 = vld [vmem:[#allocation147_spill] sm:$0xff]  ;;  %v8480_v13 = vld [vmem:[#allocation92_spill] sm:$0xff] }
 0x6b0   :  { %3480 = vmatpush.bf16.msra.mxu3 %v5822_v22  ;;  %3506 = vmatpush.bf16.msrb.mxu1 %v8341_v0 }
 0x6b3   :  { %v5085_v5 = vpop.eup %5084 }
 0x6b4   :  { %v3314_v8 = vmul.f32 %v5085_v5, %v3313_v14  ;;  %3481 = vmatpush.bf16.msra.mxu3 %v8344_v43  ;;  %3507 = vmatpush.bf16.msrb.mxu1 %v8345_v58  ;;  %v8483_v14 = vld [vmem:[#allocation65_spill] sm:$0xff]  ;;  %v8484_v5 = vld [vmem:[#allocation96_spill] sm:$0xff] }
 0x6b6   :  { %v7106_v45 = vadd.f32 %v3315_v1, %v3314_v8  ;;  %v8485_v8 = vld [vmem:[#allocation93_spill] sm:$0xff] }
 0x6b7   :  { %v8486_v1 = vld [vmem:[#allocation149_spill] sm:$0xff] }
 0x6b8   :  { %8459 = vst [vmem:[#allocation91_spill] sm:$0xff] %v7106_v45  ;;  %v7113_v32 = vpack.c.bf16 %v7106_v45, %v7106_v45  ;;  %3482 = vmatpush.bf16.msra.mxu3 %v8460_v37  ;;  %3508 = vmatpush.bf16.msrb.mxu1 %v8461_v3  ;;  %v8495_v3 = vld [vmem:[#allocation103_spill] sm:$0xff] }
 0x6b9   :  { %3317 = vst [vmem:[#allocation3 + $0xa] sm:$0x3] %v7106_v45  ;;  %v8491_v45 = vld [vmem:[#allocation98_spill] sm:$0xff] }
 0x6ba   :  { %3341 = vmatmul.bf16.vlgmr.msrb.gmra.mxu0 %v7113_v32  ;;  %3367 = vmatmul.bf16.vlgmr.msrb.gmra.mxu2 %v7113_v32 }
 0x6bb   :  { %3437 = vmatpush.bf16.msrb.mxu0 %v7895_v2  ;;  %3463 = vmatpush.bf16.msrb.mxu2 %v7896_v35 }
 0x6bc   :  { %3483 = vmatpush.bf16.msra.mxu3 %v8464_v63  ;;  %3509 = vmatpush.bf16.msrb.mxu1 %v8465_v20  ;;  %v8492_v20 = vld [vmem:[#allocation150_spill] sm:$0xff] }
 0x6bf   :  { %3438 = vmatpush.bf16.msrb.mxu0 %v8462_v30  ;;  %3464 = vmatpush.bf16.msrb.mxu2 %v8463_v44 }
 0x6c0   :  { %3528 = vmatpush.bf16.msrb.mxu3 %v8466_v6  ;;  %3670 = vmatpush.bf16.msra.mxu1 %v8467_v38  ;;  %v8487_v38 = vld [vmem:[#allocation69_spill] sm:$0xff] }
 0x6c1   :  { %3484 = vmatmul.bf16.vlgmr.msra.gmra.mxu3 %v7063_v52  ;;  %3510 = vmatmul.bf16.vlgmr.msrb.gmra.mxu1 %v7063_v52 }
 0x6c3   :  { %3439 = vmatpush.bf16.msrb.mxu0 %v8468_v36  ;;  %3465 = vmatpush.bf16.msrb.mxu2 %v8469_v42 }
 0x6c4   :  { %3529 = vmatpush.bf16.msrb.mxu3 %v8470_v54  ;;  %3671 = vmatpush.bf16.msra.mxu1 %v8471_v7  ;;  %v8488_v7 = vld [vmem:[#allocation101_spill] sm:$0xff] }
 0x6c7   :  { %3440 = vmatpush.bf16.msrb.mxu0 %v8472_v10  ;;  %3466 = vmatpush.bf16.msrb.mxu2 %v8473_v4 }
 0x6c8   :  { %3530 = vmatpush.bf16.msrb.mxu3 %v8474_v61  ;;  %3672 = vmatpush.bf16.msra.mxu1 %v8475_v56  ;;  %v8489_v56 = vld [vmem:[#allocation97_spill] sm:$0xff] }
 0x6ca   :  { %3393 = vmatmul.bf16.vlgmr.msra.gmra.mxu0 %v7113_v32  ;;  %3419 = vmatmul.bf16.vlgmr.msra.gmra.mxu2 %v7113_v32 }
 0x6cb   :  { %3441 = vmatpush.bf16.msrb.mxu0 %v8476_v27  ;;  %3467 = vmatpush.bf16.msrb.mxu2 %v8477_v12 }
 0x6cc   :  { %3531 = vmatpush.bf16.msrb.mxu3 %v8478_v31  ;;  %3673 = vmatpush.bf16.msra.mxu1 %v8479_v15  ;;  %v8490_v15 = vld [vmem:[#allocation102_spill] sm:$0xff] }
 0x6cf   :  { %3442 = vmatpush.bf16.msrb.mxu0 %v8480_v13  ;;  %3468 = vmatpush.bf16.msrb.mxu2 %v8481_v23 }
 0x6d0   :  { %3532 = vmatpush.bf16.msrb.mxu3 %v8482_v18  ;;  %3674 = vmatpush.bf16.msra.mxu1 %v8483_v14  ;;  %v8494_v14 = vld [vmem:[#allocation106_spill] sm:$0xff] }
 0x6d3   :  { %3443 = vmatpush.bf16.msrb.mxu0 %v8484_v5  ;;  %3469 = vmatpush.bf16.msrb.mxu2 %v8485_v8 }
 0x6d4   :  { %3533 = vmatpush.bf16.msrb.mxu3 %v8486_v1  ;;  %3675 = vmatpush.bf16.msra.mxu1 %v8487_v38  ;;  %v8496_v38 = vld [vmem:[#allocation151_spill] sm:$0xff] }
 0x6d5   :  { %v8497_v1 = vld [vmem:[#allocation79_spill] sm:$0xff] }
 0x6d7   :  { %3444 = vmatpush.bf16.msrb.mxu0 %v8488_v7  ;;  %3470 = vmatpush.bf16.msrb.mxu2 %v8489_v56 }
 0x6d8   :  { %3534 = vmatpush.bf16.msrb.mxu3 %v8492_v20  ;;  %3676 = vmatpush.bf16.msra.mxu1 %v8493_v62  ;;  %v8499_v20 = vld [vmem:[#allocation107_spill] sm:$0xff]  ;;  %v8500_v62 = vld [vmem:[#allocation114_spill] sm:$0xff] }
 0x6da   :  { %3445 = vmatmul.bf16.vlgmr.msrb.gmra.mxu0 %v7113_v32  ;;  %3471 = vmatmul.bf16.vlgmr.msrb.gmra.mxu2 %v7113_v32 }
 0x6db   :  { %3489 = vmatpush.bf16.msra.mxu0 %v8490_v15  ;;  %3515 = vmatpush.bf16.msra.mxu2 %v8491_v45  ;;  %v8498_v45 = vld [vmem:[#allocation110_spill] sm:$0xff] }
 0x6dc   :  { %3535 = vmatpush.bf16.msrb.mxu3 %v8496_v38  ;;  %3677 = vmatpush.bf16.msra.mxu1 %v8497_v1  ;;  %v8511_v1 = vld [vmem:[#allocation40_spill] sm:$0xff] }
 0x6df   :  { %3490 = vmatpush.bf16.msra.mxu0 %v8494_v14  ;;  %3516 = vmatpush.bf16.msra.mxu2 %v8495_v3  ;;  %v8501_v3 = vld [vmem:[#allocation111_spill] sm:$0xff] }
 0x6e0   :  { %3696 = vmatpush.bf16.msra.mxu3 %v7881_v39  ;;  %3722 = vmatpush.bf16.msrb.mxu1 %v7882_v11  ;;  %v8502_v39 = vld [vmem:[#allocation118_spill] sm:$0xff]  ;;  %v8503_v11 = vld [vmem:[#allocation115_spill] sm:$0xff] }
 0x6e1   :  { %3536 = vmatmul.bf16.vlgmr.msrb.gmra.mxu3 %v7063_v52  ;;  %v8504_v52 = vld [vmem:[#allocation124_spill] sm:$0xff] }
 0x6e3   :  { %3491 = vmatpush.bf16.msra.mxu0 %v8498_v45  ;;  %3517 = vmatpush.bf16.msra.mxu2 %v8499_v20 }
 0x6e4   :  { %3697 = vmatpush.bf16.msra.mxu3 %v7883_v25  ;;  %3723 = vmatpush.bf16.msrb.mxu1 %v7884_v49  ;;  %v8505_v25 = vld [vmem:[#allocation119_spill] sm:$0xff]  ;;  %v8506_v49 = vld [vmem:[#allocation126_spill] sm:$0xff] }
 0x6e7   :  { %3492 = vmatpush.bf16.msra.mxu0 %v8500_v62  ;;  %3518 = vmatpush.bf16.msra.mxu2 %v8501_v3 }
 0x6e8   :  { %3698 = vmatpush.bf16.msra.mxu3 %v7885_v24  ;;  %3724 = vmatpush.bf16.msrb.mxu1 %v7886_v51  ;;  %v8507_v24 = vld [vmem:[#allocation125_spill] sm:$0xff]  ;;  %v8508_v51 = vld [vmem:[#allocation128_spill] sm:$0xff] }
 0x6eb   :  { %3493 = vmatpush.bf16.msra.mxu0 %v8502_v39  ;;  %3519 = vmatpush.bf16.msra.mxu2 %v8503_v11 }
 0x6ec   :  { %3699 = vmatpush.bf16.msra.mxu3 %v7887_v41  ;;  %3725 = vmatpush.bf16.msrb.mxu1 %v7888_v29  ;;  %v8509_v41 = vld [vmem:[#allocation127_spill] sm:$0xff]  ;;  %v8510_v29 = vld [vmem:[#allocation129_spill] sm:$0xff] }
 0x6ef   :  { %3494 = vmatpush.bf16.msra.mxu0 %v8504_v52  ;;  %3520 = vmatpush.bf16.msra.mxu2 %v8505_v25 }
 0x6f0   :  { %3700 = vmatpush.bf16.msra.mxu3 %v7889_v34  ;;  %3726 = vmatpush.bf16.msrb.mxu1 %v7890_v60  ;;  %v8512_v34 = vld [vmem:[#allocation130_spill] sm:$0xff]  ;;  %v8513_v60 = vld [vmem:[#allocation45_spill] sm:$0xff] }
 0x6f3   :  { %3495 = vmatpush.bf16.msra.mxu0 %v8506_v49  ;;  %3521 = vmatpush.bf16.msra.mxu2 %v8507_v24  ;;  %v8524_v24 = vld [vmem:[#allocation146_spill] sm:$0xff] }
 0x6f4   :  { %3701 = vmatpush.bf16.msra.mxu3 %v7891_v17  ;;  %3727 = vmatpush.bf16.msrb.mxu1 %v7992_v50  ;;  %v8514_v17 = vld [vmem:[#allocation132_spill] sm:$0xff]  ;;  %v8515_v50 = vld [vmem:[#allocation51_spill] sm:$0xff] }
 0x6f7   :  { %3496 = vmatpush.bf16.msra.mxu0 %v8508_v51  ;;  %3522 = vmatpush.bf16.msra.mxu2 %v8509_v41  ;;  %v8521_v41 = vld [vmem:[#allocation63_spill] sm:$0xff] }
 0x6f8   :  { %3702 = vmatpush.bf16.msra.mxu3 %v7993_v26  ;;  %3728 = vmatpush.bf16.msrb.mxu1 %v7994_v40  ;;  %v8516_v26 = vld [vmem:[#allocation135_spill] sm:$0xff] }
 0x6f9   :  { %v8517_v40 = vld [vmem:[#allocation55_spill] sm:$0xff] }
 0x6fa   :  { %3497 = vmatmul.bf16.vlgmr.msra.gmra.mxu0 %v7113_v32  ;;  %3523 = vmatmul.bf16.vlgmr.msra.gmra.mxu2 %v7113_v32 }
 0x6fb   :  { %3541 = vmatpush.bf16.msrb.mxu0 %v8510_v29  ;;  %3683 = vmatpush.bf16.msrb.mxu2 %v8511_v1 }
 0x6fc   :  { %3703 = vmatpush.bf16.msra.mxu3 %v7995_v57  ;;  %3729 = vmatpush.bf16.msrb.mxu1 %v7996_v21  ;;  %v3355_v1 = vpop.f32.mrf.mxu1  ;;  %v8519_v57 = vld [vmem:[#allocation59_spill] sm:$0xff] }
 0x6ff   :  { %3542 = vmatpush.bf16.msrb.mxu0 %v8512_v34  ;;  %3684 = vmatpush.bf16.msrb.mxu2 %v8513_v60  ;;  %v8518_v60 = vld [vmem:[#allocation138_spill] sm:$0xff] }
 0x700   :  { %3748 = vmatpush.bf16.msrb.mxu3 %v7997_v28  ;;  %v8520_v28 = vld [vmem:[#allocation142_spill] sm:$0xff] }
 0x702   :  { %v3329_v21 = vpop.f32.mrf.mxu3 }
 0x703   :  { %3543 = vmatpush.bf16.msrb.mxu0 %v8514_v17  ;;  %3685 = vmatpush.bf16.msrb.mxu2 %v8515_v50 }
 0x704   :  { %3749 = vmatpush.bf16.msrb.mxu3 %v5783_v16  ;;  %v3357_v50 = vpop.f32.mrf.mxu1  ;;  %v8522_v16 = vld [vmem:[#allocation144_spill] sm:$0xff] }
 0x707   :  { %3544 = vmatpush.bf16.msrb.mxu0 %v8516_v26  ;;  %3686 = vmatpush.bf16.msrb.mxu2 %v8517_v40  ;;  %v8523_v40 = vld [vmem:[#allocation67_spill] sm:$0xff] }
 0x708   :  { %3750 = vmatpush.bf16.msrb.mxu3 %v5797_v59 }
 0x70a   :  { %v3331_v59 = vpop.f32.mrf.mxu3 }
 0x70b   :  { %3545 = vmatpush.bf16.msrb.mxu0 %v8518_v60  ;;  %3687 = vmatpush.bf16.msrb.mxu2 %v8519_v57  ;;  %v8525_v57 = vld [vmem:[#allocation71_spill] sm:$0xff] }
 0x70c   :  { %3751 = vmatpush.bf16.msrb.mxu3 %v5810_v19  ;;  %v7216_v19 = vpop.f32.mrf.mxu1 }
 0x70f   :  { %3546 = vmatpush.bf16.msrb.mxu0 %v8520_v28  ;;  %3688 = vmatpush.bf16.msrb.mxu2 %v8521_v41 }
 0x710   :  { %3752 = vmatpush.bf16.msrb.mxu3 %v5822_v22 }
 0x712   :  { %v7225_v22 = vpop.f32.mrf.mxu3 }
 0x713   :  { %3547 = vmatpush.bf16.msrb.mxu0 %v8522_v16  ;;  %3689 = vmatpush.bf16.msrb.mxu2 %v8523_v40 }
 0x714   :  { %3753 = vmatpush.bf16.msrb.mxu3 %v8344_v43  ;;  %v3409_v43 = vpop.f32.mrf.mxu1 }
 0x717   :  { %3548 = vmatpush.bf16.msrb.mxu0 %v8524_v24  ;;  %3690 = vmatpush.bf16.msrb.mxu2 %v8525_v57 }
 0x718   :  { %3754 = vmatpush.bf16.msrb.mxu3 %v8460_v37 }
 0x71a   :  { %3549 = vmatmul.bf16.vlgmr.msrb.gmra.mxu0 %v7113_v32 }
 0x71b   :  { %3709 = vmatpush.bf16.msra.mxu0 %v7895_v2  ;;  %3735 = vmatpush.bf16.msra.mxu2 %v7896_v35  ;;  %v3383_v2 = vpop.f32.mrf.mxu3 }
 0x71c   :  { %3755 = vmatpush.bf16.msrb.mxu3 %v8464_v63  ;;  %v7231_v35 = vpop.f32.mrf.mxu1 }
 0x71f   :  { %3710 = vmatpush.bf16.msra.mxu0 %v8462_v30  ;;  %3736 = vmatpush.bf16.msra.mxu2 %v8463_v44 }
 0x723   :  { %3711 = vmatpush.bf16.msra.mxu0 %v8468_v36  ;;  %3737 = vmatpush.bf16.msra.mxu2 %v8469_v42  ;;  %v7237_v32 = vpop.f32.mrf.mxu3 }
 0x724   :  { %v3461_v37 = vpop.f32.mrf.mxu1 }
 0x727   :  { %3712 = vmatpush.bf16.msra.mxu0 %v8472_v10  ;;  %3738 = vmatpush.bf16.msra.mxu2 %v8473_v4 }
 0x72b   :  { %3713 = vmatpush.bf16.msra.mxu0 %v8476_v27  ;;  %3739 = vmatpush.bf16.msra.mxu2 %v8477_v12  ;;  %v3435_v30 = vpop.f32.mrf.mxu3  ;;  %v3557_v12 = vld [vmem:[#allocation2 + $0x2a] sm:$0x3f] }
 0x72f   :  { %3714 = vmatpush.bf16.msra.mxu0 %v8480_v13  ;;  %3740 = vmatpush.bf16.msra.mxu2 %v8481_v23 }
 0x733   :  { %3715 = vmatpush.bf16.msra.mxu0 %v8484_v5  ;;  %3741 = vmatpush.bf16.msra.mxu2 %v8485_v8 }
 0x737   :  { %3716 = vmatpush.bf16.msra.mxu0 %v8488_v7  ;;  %3742 = vmatpush.bf16.msra.mxu2 %v8489_v56  ;;  %v3342_v44 = vpop.f32.mrf.mxu0 }
 0x738   :  { %v3343_v10 = vadd.f32 %v3342_v44, %v3329_v21 }
 0x73b   :  { %3761 = vmatpush.bf16.msrb.mxu0 %v8490_v15 }
 0x73d   :  { %v3368_v63 = vpop.f32.mrf.mxu2 }
 0x73e   :  { %v3369_v36 = vadd.f32 %v3368_v63, %v3355_v1  ;;  %v7248_v27 = vpop.f32.mrf.mxu1 }
 0x73f   :  { %3762 = vmatpush.bf16.msrb.mxu0 %v8494_v14  ;;  %v3344_v42 = vpop.f32.mrf.mxu0 }
 0x740   :  { %v3560_v4 = vrot.slane %v3369_v36, 6 }
 0x742   :  { %v3561_v13 = vsel %vm211_vm1, %v3343_v10, %v3560_v4 }
 0x743   :  { %3763 = vmatpush.bf16.msrb.mxu0 %v8498_v45  ;;  %v3563_v23 = vadd.f32 %v3561_v13, %v3557_v12 }
 0x744   :  { %v7252_v45 = vpop.f32.mrf.mxu3 }
 0x745   :  { %3567 = vst [vmem:[#allocation1] ss:$4 sm:$0xff] %v3563_v23  ;;  %v3370_v5 = vpop.f32.mrf.mxu2 }
 0x746   :  { %v3513_v7 = vpop.f32.mrf.mxu1 }
 0x747   :  { %3764 = vmatpush.bf16.msrb.mxu0 %v8500_v62  ;;  %v3394_v8 = vpop.f32.mrf.mxu0 }
 0x748   :  { %v3395_v36 = vadd.f32 %v3394_v8, %v7225_v22 }
 0x74b   :  { %3765 = vmatpush.bf16.msrb.mxu0 %v8502_v39 }
 0x74c   :  { %v3568_v56 = vld.sshfl [vmem:[#allocation1] sm:$0xff pattern:$0x73625140]  ;;  %v3569_v15 = vld.sshfl [vmem:[#allocation1 + $0x8] sm:$0xff pattern:$0x73625140]  ;;  %v3487_v39 = vpop.f32.mrf.mxu3 }
 0x74d   :  { %v4785_v14 = vmul.f32 -1.442695, %v3568_v56  ;;  %v4786_v62 = vmul.f32 -1.442695, %v3569_v15  ;;  %v3420_v40 = vpop.f32.mrf.mxu2  ;;  %v8526_v56 = vld [vmem:[#allocation90_spill] sm:$0xff] }
 0x74e   :  { %v3648_v15 = vadd.f32 %v8526_v56, %v3395_v36 }
 0x74f   :  { %3766 = vmatpush.bf16.msrb.mxu0 %v8504_v52  ;;  %5086 = vpow2.f32 %v4785_v14  ;;  %v3396_v41 = vpop.f32.mrf.mxu0 }
 0x750   :  { %5088 = vpow2.f32 %v4786_v62  ;;  %v3651_v41 = vrot.slane %v3557_v12, 4 }
 0x753   :  { %3767 = vmatpush.bf16.msrb.mxu0 %v8506_v49 }
 0x755   :  { %v5087_v1 = vpop.eup %5086  ;;  %v3422_v2 = vpop.f32.mrf.mxu2 }
 0x756   :  { %v5089_v52 = vpop.eup %5088  ;;  %v3584_v21 = vadd.f32 1.0, %v5087_v1 }
 0x757   :  { %3768 = vmatpush.bf16.msrb.mxu0 %v8508_v51  ;;  %v3585_v50 = vadd.f32 1.0, %v5089_v52  ;;  %v3446_v59 = vpop.f32.mrf.mxu0 }
 0x758   :  { %5090 = vrcp.f32 %v3584_v21  ;;  %v3599_v44 = vand.u32 2147483648, %v3584_v21  ;;  %v3597_v10 = vand.u32 2147483647, %v3584_v21  ;;  %vm3593_vm5 = vweird.f32 %v3584_v21 }
 0x759   :  { %5092 = vrcp.f32 %v3585_v50  ;;  %v3614_v22 = vand.u32 2147483648, %v3585_v50  ;;  %vm3608_vm9 = vweird.f32 %v3585_v50  ;;  %v3612_v1 = vand.u32 2147483647, %v3585_v50 }
 0x75a   :  { %v3600_v5 = vor.u32 1.1754944e-38, %v3599_v44  ;;  %vm3598_vm7 = vcmp.eq.f32.partialorder %v3597_v10, 8.507059e+37 }
 0x75b   :  { %vm3613_vm11 = vcmp.eq.f32.partialorder %v3612_v1, 8.507059e+37 }
 0x75d   :  { %v7260_v39 = vpop.f32.mrf.mxu2 }
 0x75e   :  { %v5091_v49 = vpop.eup %5090 }
 0x75f   :  { %v5093_v57 = vpop.eup %5092  ;;  %v3589_v43 = vmul.f32 %v5091_v49, %v3584_v21  ;;  %v3448_v37 = vpop.f32.mrf.mxu0  ;;  %vm3594_vm1 = vweird.f32 %v5091_v49 }
 0x760   :  { %v3604_v51 = vmul.f32 %v5093_v57, %v3585_v50  ;;  %vm3595_vm6 = vmor %vm3593_vm5, %vm3594_vm1  ;;  %vm3609_vm8 = vweird.f32 %v5093_v57  ;;  %v3421_v37 = vadd.f32 %v3420_v40, %v7216_v19 }
 0x761   :  { %v3590_v30 = vsub.f32 1.0, %v3589_v43  ;;  %vm3610_vm10 = vmor %vm3608_vm9, %vm3609_vm8 }
 0x762   :  { %v3605_v63 = vsub.f32 1.0, %v3604_v51  ;;  %v3615_v51 = vor.u32 1.1754944e-38, %v3614_v22  ;;  %v3554_v12 = vadd.f32 %v3421_v37, %v5985_v9 }
 0x763   :  { %v3591_v42 = vmul.f32 %v5091_v49, %v3590_v30 }
 0x764   :  { %v3606_v4 = vmul.f32 %v5093_v57, %v3605_v63  ;;  %v7257_v13 = vpop.f32.mrf.mxu3 }
 0x765   :  { %v3592_v23 = vadd.f32 %v5091_v49, %v3591_v42  ;;  %v3474_v2 = vpop.f32.mrf.mxu2 }
 0x766   :  { %v3607_v62 = vadd.f32 %v5093_v57, %v3606_v4  ;;  %v8530_v2 = vld [vmem:[#allocation80_spill] sm:$0xff] }
 0x767   :  { %v3596_v7 = vsel %vm3595_vm6, %v5091_v49, %v3592_v23 }
 0x768   :  { %v3601_v14 = vsel %vm3598_vm7, %v3600_v5, %v3596_v7  ;;  %v3611_v43 = vsel %vm3610_vm10, %v5093_v57, %v3607_v62  ;;  %v3447_v57 = vadd.f32 %v3446_v59, %v7237_v32 }
 0x769   :  { %v3649_v8 = vmul.f32 %v3648_v15, %v3601_v14  ;;  %v3616_v49 = vsel %vm3613_vm11, %v3615_v51, %v3611_v43  ;;  %v8529_v43 = vld [vmem:[#allocation150_spill] sm:$0xff] }
 0x76a   :  { %v3659_v30 = vsub.f32 1.0, %v3616_v49  ;;  %v3661_v36 = vmul.f32 %v3616_v49, %v7058_v33  ;;  %v3555_v19 = vadd.f32 %v3447_v57, %v5974_v53  ;;  %v7295_v51 = vld [vmem:[%s7413_s6] ss:$0 sm:$0xff] }
 0x76b   :  { %v3653_v52 = vadd.f32 %v3651_v41, %v3649_v8 }
 0x76c   :  { %v3539_v21 = vpop.f32.mrf.mxu3 }
 0x76d   :  { %5094 = vtanh.f32 %v3653_v52 }
 0x773   :  { %v5095_v44 = vpop.eup %5094 }
 0x774   :  { %v3660_v63 = vmul.f32 %v5095_v44, %v3659_v30 }
 0x776   :  { %v3662_v10 = vadd.f32 %v3661_v36, %v3660_v63 }
 0x777   :  { %v3498_v42 = vpop.f32.mrf.mxu0 }
 0x778   :  { %v3499_v50 = vadd.f32 %v3498_v42, %v7252_v45  ;;  %v7267_v23 = vpack.c.bf16 %v3662_v10, %v3662_v10  ;;  %v8531_v42 = vld [vmem:[#allocation140_spill] sm:$0xff]  ;;  %v3930_v10 = vld [vmem:[#allocation7 + $0x180] sm:$0xff] }
 0x77a   :  { %v3564_v4 = vadd.f32 %v3554_v12, %v3499_v50  ;;  %3678 = vmatmul.bf16.vlgmr.msra.gmra.mxu1 %v7267_v23  ;;  %3704 = vmatmul.bf16.vlgmr.msra.gmra.mxu3 %v7267_v23  ;;  %v3910_v12 = vld [vmem:[#allocation7 + $0xe0] sm:$0xff]  ;;  %v3911_v50 = vld [vmem:[#allocation7 + $0xe8] sm:$0xff] }
 0x77b   :  { %3774 = vmatpush.bf16.msra.mxu1 %v7998_v47  ;;  %3800 = vmatpush.bf16.msra.mxu3 %v8466_v6 }
 0x77c   :  { %v4787_v5 = vmul.f32 -1.442695, %v3564_v4 }
 0x77d   :  { %v3524_v7 = vpop.f32.mrf.mxu2 }
 0x77e   :  { %5096 = vpow2.f32 %v4787_v5  ;;  %v3525_v33 = vadd.f32 %v3524_v7, %v7248_v27  ;;  %v3908_v7 = vld [vmem:[#allocation7 + $0xd0] sm:$0xff] }
 0x77f   :  { %v3500_v45 = vpop.f32.mrf.mxu0  ;;  %3775 = vmatpush.bf16.msra.mxu1 %v5785_v55  ;;  %3801 = vmatpush.bf16.msra.mxu3 %v8470_v54 }
 0x780   :  { %v3565_v32 = vadd.f32 %v3555_v19, %v3525_v33  ;;  %v3909_v19 = vld [vmem:[#allocation7 + $0xd8] sm:$0xff]  ;;  %v3907_v45 = vld [vmem:[#allocation7 + $0xc8] sm:$0xff] }
 0x782   :  { %v4788_v40 = vmul.f32 -1.442695, %v3565_v32 }
 0x783   :  { %3776 = vmatpush.bf16.msra.mxu1 %v5799_v48  ;;  %3802 = vmatpush.bf16.msra.mxu3 %v8474_v61  ;;  %v8527_v61 = vld [vmem:[#allocation149_spill] sm:$0xff] }
 0x784   :  { %v5097_v59 = vpop.eup %5096  ;;  %5098 = vpow2.f32 %v4788_v40  ;;  %v3904_v40 = vld [vmem:[#allocation7 + $0xb0] sm:$0xff] }
 0x785   :  { %v3586_v56 = vadd.f32 1.0, %v5097_v59  ;;  %v3526_v15 = vpop.f32.mrf.mxu2  ;;  %v3905_v59 = vld [vmem:[#allocation7 + $0xb8] sm:$0xff] }
 0x786   :  { %v3902_v15 = vld [vmem:[#allocation7 + $0xa0] sm:$0xff] }
 0x787   :  { %5100 = vrcp.f32 %v3586_v56  ;;  %3777 = vmatpush.bf16.msra.mxu1 %v5812_v46  ;;  %3803 = vmatpush.bf16.msra.mxu3 %v8478_v31  ;;  %v3629_v54 = vand.u32 2147483648, %v3586_v56  ;;  %v3627_v31 = vand.u32 2147483647, %v3586_v56  ;;  %vm3623_vm13 = vweird.f32 %v3586_v56 }
 0x789   :  { %v3630_v41 = vor.u32 1.1754944e-38, %v3629_v54  ;;  %vm3628_vm15 = vcmp.eq.f32.partialorder %v3627_v31, 8.507059e+37  ;;  %v3900_v54 = vld [vmem:[#allocation7 + $0x90] sm:$0xff]  ;;  %v3899_v31 = vld [vmem:[#allocation7 + $0x88] sm:$0xff] }
 0x78a   :  { %v5099_v27 = vpop.eup %5098  ;;  %3730 = vmatmul.bf16.vlgmr.msrb.gmra.mxu1 %v7267_v23  ;;  %3756 = vmatmul.bf16.vlgmr.msrb.gmra.mxu3 %v7267_v23 }
 0x78b   :  { %v3587_v47 = vadd.f32 1.0, %v5099_v27  ;;  %3778 = vmatpush.bf16.msra.mxu1 %v8341_v0  ;;  %3804 = vmatpush.bf16.msra.mxu3 %v8482_v18  ;;  %v3473_v0 = vadd.f32 %v7260_v39, %v7231_v35  ;;  %v3913_v39 = vld [vmem:[#allocation7 + $0xf8] sm:$0xff]  ;;  %v3903_v27 = vld [vmem:[#allocation7 + $0xa8] sm:$0xff] }
 0x78d   :  { %v5101_v6 = vpop.eup %5100  ;;  %5102 = vrcp.f32 %v3587_v47  ;;  %v3556_v37 = vadd.f32 %v3473_v0, %v8530_v2  ;;  %v3644_v30 = vand.u32 2147483648, %v3587_v47  ;;  %vm3638_vm3 = vweird.f32 %v3587_v47  ;;  %v3894_v0 = vld [vmem:[#allocation7 + $0x60] sm:$0xff] }
 0x78e   :  { %v3619_v55 = vmul.f32 %v5101_v6, %v3586_v56  ;;  %vm3624_vm12 = vweird.f32 %v5101_v6  ;;  %v3642_v36 = vand.u32 2147483647, %v3587_v47 }
 0x78f   :  { %3779 = vmatpush.bf16.msra.mxu1 %v8345_v58  ;;  %3805 = vmatpush.bf16.msra.mxu3 %v8527_v61  ;;  %vm3625_vm14 = vmor %vm3623_vm13, %vm3624_vm12  ;;  %v8528_v58 = vld [vmem:[#allocation137_spill] sm:$0xff]  ;;  %v3645_v33 = vor.u32 1.1754944e-38, %v3644_v30  ;;  %v8538_v30 = vld [vmem:[#allocation127_spill] sm:$0xff] }
 0x790   :  { %v3620_v48 = vsub.f32 1.0, %v3619_v55  ;;  %vm3643_vm1 = vcmp.eq.f32.partialorder %v3642_v36, 8.507059e+37  ;;  %v8534_v55 = vld [vmem:[#allocation91_spill] sm:$0xff]  ;;  %v3937_v36 = vld [vmem:[#allocation7 + $0x1b8] sm:$0xff] }
 0x792   :  { %v3621_v46 = vmul.f32 %v5101_v6, %v3620_v48 }
 0x793   :  { %v5103_v14 = vpop.eup %5102  ;;  %3780 = vmatpush.bf16.msra.mxu1 %v8528_v58  ;;  %3806 = vmatpush.bf16.msra.mxu3 %v8529_v43  ;;  %v3890_v58 = vld [vmem:[#allocation7 + $0x40] sm:$0xff]  ;;  %v3891_v43 = vld [vmem:[#allocation7 + $0x48] sm:$0xff] }
 0x794   :  { %v3634_v62 = vmul.f32 %v5103_v14, %v3587_v47  ;;  %v3622_v8 = vadd.f32 %v5101_v6, %v3621_v46  ;;  %vm3639_vm2 = vweird.f32 %v5103_v14  ;;  %v3898_v46 = vld [vmem:[#allocation7 + $0x80] sm:$0xff] }
 0x795   :  { %vm7301_vm4 = vmor %vm3638_vm3, %vm3639_vm2 }
 0x796   :  { %v3635_v1 = vsub.f32 1.0, %v3634_v62  ;;  %v3626_v52 = vsel %vm3625_vm14, %v5101_v6, %v3622_v8  ;;  %v3896_v62 = vld [vmem:[#allocation7 + $0x70] sm:$0xff]  ;;  %v8535_v8 = vld [vmem:[#allocation98_spill] sm:$0xff] }
 0x797   :  { %v3550_v22 = vpop.f32.mrf.mxu0  ;;  %v3631_v21 = vsel %vm3628_vm15, %v3630_v41, %v3626_v52  ;;  %3781 = vmatpush.bf16.msra.mxu1 %v8531_v42  ;;  %3807 = vmatpush.bf16.msra.mxu3 %v8496_v38  ;;  %v3906_v38 = vld [vmem:[#allocation7 + $0xc0] sm:$0xff]  ;;  %v3892_v41 = vld [vmem:[#allocation7 + $0x50] sm:$0xff]  ;;  %v3935_v42 = vld [vmem:[#allocation7 + $0x1a8] sm:$0xff] }
 0x798   :  { %v3551_v18 = vadd.f32 %v3550_v22, %v7257_v13  ;;  %v3636_v35 = vmul.f32 %v5103_v14, %v3635_v1  ;;  %v3912_v13 = vld [vmem:[#allocation7 + $0xf0] sm:$0xff]  ;;  %v3897_v22 = vld [vmem:[#allocation7 + $0x78] sm:$0xff]  ;;  %v8536_v52 = vld [vmem:[#allocation103_spill] sm:$0xff] }
 0x799   :  { %v3893_v1 = vld [vmem:[#allocation7 + $0x58] sm:$0xff] }
 0x79a   :  { %v3654_v49 = vadd.f32 %v7295_v51, %v3551_v18  ;;  %v3637_v63 = vadd.f32 %v5103_v14, %v3636_v35  ;;  %3782 = vmatmul.bf16.vlgmr.msra.gmra.mxu1 %v7267_v23  ;;  %3808 = vmatmul.bf16.vlgmr.msra.gmra.mxu3 %v7267_v23  ;;  %v3901_v23 = vld [vmem:[#allocation7 + $0x98] sm:$0xff]  ;;  %v3895_v18 = vld [vmem:[#allocation7 + $0x68] sm:$0xff] }
 0x79b   :  { %3946 = vmatpush.msrb.mxu1 %v3912_v13  ;;  %3992 = vmatpush.msrb.mxu3 %v3913_v39  ;;  %v3887_v35 = vld [vmem:[#allocation7 + $0x28] sm:$0xff]  ;;  %v3884_v13 = vld [vmem:[#allocation7 + $0x10] sm:$0xff]  ;;  %v3885_v39 = vld [vmem:[#allocation7 + $0x18] sm:$0xff] }
 0x79c   :  { %v3655_v44 = vmul.f32 %v3654_v49, %v3631_v21  ;;  %v3641_v4 = vsel %vm7301_vm4, %v5103_v14, %v3637_v63  ;;  %v3888_v21 = vld [vmem:[#allocation7 + $0x30] sm:$0xff]  ;;  %v3889_v49 = vld [vmem:[#allocation7 + $0x38] sm:$0xff] }
 0x79d   :  { %3947 = vmatpush.msrb.mxu1 %v3910_v12  ;;  %3993 = vmatpush.msrb.mxu3 %v3911_v50  ;;  %v3646_v32 = vsel %vm3643_vm1, %v3645_v33, %v3641_v4  ;;  %v3941_v63 = vld [vmem:[#allocation7 + $0x1d8] sm:$0xff]  ;;  %v3932_v12 = vld [vmem:[#allocation7 + $0x190] sm:$0xff] }
 0x79e   :  { %v3656_v57 = vadd.f32 %v3655_v44, %v3556_v37  ;;  %v3663_v56 = vsub.f32 1.0, %v3646_v32  ;;  %v3665_v48 = vmul.f32 %v3646_v32, %v8534_v55  ;;  %v3883_v37 = vld [vmem:[#allocation7 + $0x8] sm:$0xff]  ;;  %v3940_v44 = vld [vmem:[#allocation7 + $0x1d0] sm:$0xff]  ;;  %v3933_v50 = vld [vmem:[#allocation7 + $0x198] sm:$0xff] }
 0x79f   :  { %v3552_v5 = vpop.f32.mrf.mxu0  ;;  %3948 = vmatpush.msrb.mxu1 %v3908_v7  ;;  %3994 = vmatpush.msrb.mxu3 %v3909_v19  ;;  %v3928_v4 = vld [vmem:[#allocation7 + $0x170] sm:$0xff]  ;;  %v3926_v7 = vld [vmem:[#allocation7 + $0x160] sm:$0xff]  ;;  %v3927_v19 = vld [vmem:[#allocation7 + $0x168] sm:$0xff] }
 0x7a0   :  { %5104 = vtanh.f32 %v3656_v57  ;;  %v3931_v57 = vld [vmem:[#allocation7 + $0x188] sm:$0xff]  ;;  %v3929_v5 = vld [vmem:[#allocation7 + $0x178] sm:$0xff]  ;;  %v3924_v33 = vld [vmem:[#allocation7 + $0x150] sm:$0xff] }
 0x7a1   :  { %3949 = vmatpush.msrb.mxu1 %v3906_v38  ;;  %3995 = vmatpush.msrb.mxu3 %v3907_v45  ;;  %v3925_v38 = vld [vmem:[#allocation7 + $0x158] sm:$0xff]  ;;  %v3922_v45 = vld [vmem:[#allocation7 + $0x140] sm:$0xff]  ;;  %v3923_v32 = vld [vmem:[#allocation7 + $0x148] sm:$0xff] }
 0x7a2   :  { %v3915_v55 = vld [vmem:[#allocation7 + $0x108] sm:$0xff] }
 0x7a3   :  { %3950 = vmatpush.msrb.mxu1 %v3904_v40  ;;  %3996 = vmatpush.msrb.mxu3 %v3905_v59  ;;  %v3920_v40 = vld [vmem:[#allocation7 + $0x130] sm:$0xff]  ;;  %v3921_v59 = vld [vmem:[#allocation7 + $0x138] sm:$0xff] }
 0x7a5   :  { %3951 = vmatpush.msrb.mxu1 %v3902_v15  ;;  %3997 = vmatpush.msrb.mxu3 %v3903_v27  ;;  %v3919_v15 = vld [vmem:[#allocation7 + $0x128] sm:$0xff]  ;;  %v3916_v27 = vld [vmem:[#allocation7 + $0x110] sm:$0xff] }
 0x7a6   :  { %v5105_v47 = vpop.eup %5104 }
 0x7a7   :  { %v3664_v6 = vmul.f32 %v5105_v47, %v3663_v56  ;;  %3952 = vmatpush.msrb.mxu1 %v3900_v54  ;;  %3998 = vmatpush.msrb.mxu3 %v3901_v23  ;;  %v3918_v56 = vld [vmem:[#allocation7 + $0x120] sm:$0xff]  ;;  %v3917_v47 = vld [vmem:[#allocation7 + $0x118] sm:$0xff] }
 0x7a9   :  { %v7310_v61 = vadd.f32 %v3665_v48, %v3664_v6  ;;  %3953 = vmatpush.msrb.mxu1 %v3898_v46  ;;  %3999 = vmatpush.msrb.mxu3 %v3899_v31  ;;  %v3914_v6 = vld [vmem:[#allocation7 + $0x100] sm:$0xff] }
 0x7ab   :  { %3667 = vst [vmem:[#allocation3 + $0xc] sm:$0x3] %v7310_v61  ;;  %v7315_v14 = vpack.c.bf16 %v7310_v61, %v7310_v61  ;;  %3954 = vmatpush.msrb.mxu1 %v3896_v62  ;;  %4000 = vmatpush.msrb.mxu3 %v3897_v22 }
 0x7ad   :  { %3691 = vmatmul.bf16.vlgmr.msrb.gmra.mxu2 %v7315_v14  ;;  %3717 = vmatmul.bf16.vlgmr.msra.gmra.mxu0 %v7315_v14 }
 0x7ae   :  { %3787 = vmatpush.bf16.msrb.mxu2 %v8535_v8  ;;  %3813 = vmatpush.bf16.msra.mxu0 %v8510_v29  ;;  %v3886_v29 = vld [vmem:[#allocation7 + $0x20] sm:$0xff] }
 0x7af   :  { %3955 = vmatpush.msrb.mxu1 %v3894_v0  ;;  %4001 = vmatpush.msrb.mxu3 %v3895_v18 }
 0x7b1   :  { %3956 = vmatpush.msrb.mxu1 %v3892_v41  ;;  %4002 = vmatpush.msrb.mxu3 %v3893_v1 }
 0x7b2   :  { %3788 = vmatpush.bf16.msrb.mxu2 %v8536_v52  ;;  %3814 = vmatpush.bf16.msra.mxu0 %v8512_v34  ;;  %v3882_v34 = vld [vmem:[#allocation7] sm:$0xff] }
 0x7b3   :  { %3957 = vmatpush.msrb.mxu1 %v3890_v58  ;;  %4003 = vmatpush.msrb.mxu3 %v3891_v43 }
 0x7b5   :  { %3958 = vmatpush.msrb.mxu1 %v3888_v21  ;;  %4004 = vmatpush.msrb.mxu3 %v3889_v49 }
 0x7b6   :  { %3789 = vmatpush.bf16.msrb.mxu2 %v8499_v20  ;;  %3815 = vmatpush.bf16.msra.mxu0 %v8514_v17  ;;  %v7331_v20 = vld [vmem:[#allocation3] sm:$0xff] }
 0x7b7   :  { %3959 = vmatpush.msrb.mxu1 %v3886_v29  ;;  %4005 = vmatpush.msrb.mxu3 %v3887_v35  ;;  %v3944_v17 = vld [vmem:[#allocation7 + $0x1f0] sm:$0xff]  ;;  %v3880_v48 = vmul.f32 %v7331_v20, %v7331_v20 }
 0x7b9   :  { %3960 = vmatpush.msrb.mxu1 %v3884_v13  ;;  %4006 = vmatpush.msrb.mxu3 %v3885_v39 }
 0x7ba   :  { %3790 = vmatpush.bf16.msrb.mxu2 %v8501_v3  ;;  %3816 = vmatpush.bf16.msra.mxu0 %v8516_v26  ;;  %v8537_v3 = vld [vmem:[#allocation125_spill] sm:$0xff]  ;;  %v3945_v26 = vld [vmem:[#allocation7 + $0x1f8] sm:$0xff] }
 0x7bb   :  { %3961 = vmatpush.msrb.mxu1 %v3882_v34  ;;  %4007 = vmatpush.msrb.mxu3 %v3883_v37 }
 0x7bc   :  { %3962 = vmatmul.f32.vlgmr.msrb.gmra.mxu1 %v7331_v20  ;;  %4008 = vmatmul.f32.vlgmr.msrb.gmra.mxu3 %v7331_v20 }
 0x7bd   :  { %3743 = vmatmul.bf16.vlgmr.msra.gmra.mxu2 %v7315_v14  ;;  %3769 = vmatmul.bf16.vlgmr.msrb.gmra.mxu0 %v7315_v14 }
 0x7be   :  { %3791 = vmatpush.bf16.msrb.mxu2 %v8503_v11  ;;  %3817 = vmatpush.bf16.msra.mxu0 %v8518_v60  ;;  %v3942_v11 = vld [vmem:[#allocation7 + $0x1e0] sm:$0xff]  ;;  %v3943_v60 = vld [vmem:[#allocation7 + $0x1e8] sm:$0xff] }
 0x7c2   :  { %3792 = vmatpush.bf16.msrb.mxu2 %v8505_v25  ;;  %3818 = vmatpush.bf16.msra.mxu0 %v8520_v28  ;;  %v3938_v25 = vld [vmem:[#allocation7 + $0x1c0] sm:$0xff]  ;;  %v3939_v28 = vld [vmem:[#allocation7 + $0x1c8] sm:$0xff] }
 0x7c6   :  { %3793 = vmatpush.bf16.msrb.mxu2 %v8537_v3  ;;  %3819 = vmatpush.bf16.msra.mxu0 %v8522_v16  ;;  %v3936_v16 = vld [vmem:[#allocation7 + $0x1b0] sm:$0xff] }
 0x7ca   :  { %3794 = vmatpush.bf16.msrb.mxu2 %v8538_v30  ;;  %3820 = vmatpush.bf16.msra.mxu0 %v8524_v24  ;;  %v3934_v24 = vld [vmem:[#allocation7 + $0x1a0] sm:$0xff] }
 0x7cd   :  { %3795 = vmatmul.bf16.vlgmr.msrb.gmra.mxu2 %v7315_v14  ;;  %3821 = vmatmul.bf16.vlgmr.msra.gmra.mxu0 %v7315_v14 }
 0x7ce   :  { %3969 = vmatpush.msra.mxu2 %v3944_v17  ;;  %4015 = vmatpush.msrb.mxu0 %v3945_v26 }
 0x7d0   :  { %3970 = vmatpush.msra.mxu2 %v3942_v11  ;;  %4016 = vmatpush.msrb.mxu0 %v3943_v60 }
 0x7d2   :  { %3971 = vmatpush.msra.mxu2 %v3940_v44  ;;  %4017 = vmatpush.msrb.mxu0 %v3941_v63 }
 0x7d4   :  { %3972 = vmatpush.msra.mxu2 %v3938_v25  ;;  %4018 = vmatpush.msrb.mxu0 %v3939_v28 }
 0x7d6   :  { %3973 = vmatpush.msra.mxu2 %v3936_v16  ;;  %4019 = vmatpush.msrb.mxu0 %v3937_v36 }
 0x7d8   :  { %3974 = vmatpush.msra.mxu2 %v3934_v24  ;;  %4020 = vmatpush.msrb.mxu0 %v3935_v42 }
 0x7da   :  { %3975 = vmatpush.msra.mxu2 %v3932_v12  ;;  %4021 = vmatpush.msrb.mxu0 %v3933_v50 }
 0x7dc   :  { %3976 = vmatpush.msra.mxu2 %v3930_v10  ;;  %4022 = vmatpush.msrb.mxu0 %v3931_v57 }
 0x7de   :  { %3977 = vmatpush.msra.mxu2 %v3928_v4  ;;  %4023 = vmatpush.msrb.mxu0 %v3929_v5 }
 0x7e0   :  { %3978 = vmatpush.msra.mxu2 %v3926_v7  ;;  %4024 = vmatpush.msrb.mxu0 %v3927_v19 }
 0x7e2   :  { %3979 = vmatpush.msra.mxu2 %v3924_v33  ;;  %4025 = vmatpush.msrb.mxu0 %v3925_v38 }
 0x7e4   :  { %3980 = vmatpush.msra.mxu2 %v3922_v45  ;;  %4026 = vmatpush.msrb.mxu0 %v3923_v32 }
 0x7e6   :  { %3981 = vmatpush.msra.mxu2 %v3920_v40  ;;  %4027 = vmatpush.msrb.mxu0 %v3921_v59 }
 0x7e8   :  { %3982 = vmatpush.msra.mxu2 %v3918_v56  ;;  %4028 = vmatpush.msrb.mxu0 %v3919_v15 }
 0x7ea   :  { %3983 = vmatpush.msra.mxu2 %v3916_v27  ;;  %4029 = vmatpush.msrb.mxu0 %v3917_v47 }
 0x7ec   :  { %3984 = vmatpush.msra.mxu2 %v3914_v6  ;;  %4030 = vmatpush.msrb.mxu0 %v3915_v55  ;;  %v4082_v6 = vld [vmem:[%s7415_s8 + $0x70] sm:$0xff] }
 0x7ed   :  { %3985 = vmatmul.f32.vlgmr.msra.gmra.mxu2 %v3880_v48  ;;  %4031 = vmatmul.f32.vlgmr.msrb.gmra.mxu0 %v3880_v48 }
 0x7f7   :  { %v3679_v54 = vpop.f32.mrf.mxu1 }
 0x7fd   :  { %v3705_v23 = vpop.f32.mrf.mxu3 }
 0x7ff   :  { %v3681_v46 = vpop.f32.mrf.mxu1 }
 0x805   :  { %v3707_v31 = vpop.f32.mrf.mxu3 }
 0x806   :  { %v4079_v31 = vld [vmem:[%s7415_s8 + $0x58] sm:$0xff] }
 0x807   :  { %v3731_v14 = vpop.f32.mrf.mxu1 }
 0x80d   :  { %v3757_v62 = vpop.f32.mrf.mxu3 }
 0x80f   :  { %v3733_v22 = vpop.f32.mrf.mxu1 }
 0x815   :  { %v3759_v8 = vpop.f32.mrf.mxu3 }
 0x817   :  { %v3783_v0 = vpop.f32.mrf.mxu1 }
 0x81d   :  { %v3809_v18 = vpop.f32.mrf.mxu3 }
 0x81f   :  { %v3785_v41 = vpop.f32.mrf.mxu1 }
 0x825   :  { %v3811_v52 = vpop.f32.mrf.mxu3 }
 0x82a   :  { %v3718_v1 = vpop.f32.mrf.mxu0 }
 0x82b   :  { %v3719_v60 = vadd.f32 %v3718_v1, %v3705_v23 }
 0x82d   :  { %v3827_v28 = vadd.f32 %v3719_v60, %v5974_v53  ;;  %v4083_v53 = vld [vmem:[%s7415_s8 + $0x78] sm:$0xff] }
 0x82e   :  { %4088 = vmatpush.msra.mxu1 %v4083_v53  ;;  %v4071_v60 = vld [vmem:[%s7415_s8 + $0x18] sm:$0xff] }
 0x830   :  { %v3692_v58 = vpop.f32.mrf.mxu2  ;;  %4089 = vmatpush.msra.mxu1 %v4082_v6 }
 0x831   :  { %v3693_v21 = vadd.f32 %v3692_v58, %v3679_v54 }
 0x832   :  { %v3720_v43 = vpop.f32.mrf.mxu0 }
 0x833   :  { %v3826_v35 = vadd.f32 %v3693_v21, %v5985_v9  ;;  %v4077_v43 = vld [vmem:[%s7415_s8 + $0x48] sm:$0xff] }
 0x838   :  { %v3694_v49 = vpop.f32.mrf.mxu2 }
 0x839   :  { %v3963_v54 = vpop.f32.mrf.mxu1 }
 0x83a   :  { %v3770_v29 = vpop.f32.mrf.mxu0 }
 0x83b   :  { %v3771_v13 = vadd.f32 %v3770_v29, %v3757_v62 }
 0x83d   :  { %v3829_v39 = vadd.f32 %v3826_v35, %v3771_v13  ;;  %v4076_v35 = vld [vmem:[%s7415_s8 + $0x40] sm:$0xff] }
 0x83f   :  { %v4789_v34 = vmul.f32 -1.442695, %v3829_v39 }
 0x840   :  { %v3744_v37 = vpop.f32.mrf.mxu2 }
 0x841   :  { %5106 = vpow2.f32 %v4789_v34  ;;  %v3745_v4 = vadd.f32 %v3744_v37, %v3731_v14 }
 0x842   :  { %v3772_v3 = vpop.f32.mrf.mxu0 }
 0x843   :  { %v3828_v32 = vadd.f32 %v3745_v4, %v8530_v2  ;;  %v4080_v2 = vld [vmem:[%s7415_s8 + $0x60] sm:$0xff]  ;;  %v4075_v3 = vld [vmem:[%s7415_s8 + $0x38] sm:$0xff] }
 0x847   :  { %v5107_v17 = vpop.eup %5106 }
 0x848   :  { %v3837_v26 = vadd.f32 1.0, %v5107_v17  ;;  %v3746_v30 = vpop.f32.mrf.mxu2 }
 0x849   :  { %v4073_v30 = vld [vmem:[%s7415_s8 + $0x28] sm:$0xff] }
 0x84a   :  { %5108 = vrcp.f32 %v3837_v26  ;;  %v3822_v11 = vpop.f32.mrf.mxu0  ;;  %v3850_v24 = vand.u32 2147483648, %v3837_v26  ;;  %v3848_v10 = vand.u32 2147483647, %v3837_v26  ;;  %vm3844_vm6 = vweird.f32 %v3837_v26 }
 0x84b   :  { %v3823_v12 = vadd.f32 %v3822_v11, %v3809_v18  ;;  %v4009_v18 = vpop.f32.mrf.mxu3 }
 0x84c   :  { %v3851_v7 = vor.u32 1.1754944e-38, %v3850_v24  ;;  %vm3849_vm8 = vcmp.eq.f32.partialorder %v3848_v10, 8.507059e+37  ;;  %v4068_v24 = vld [vmem:[%s7415_s8] sm:$0xff] }
 0x84d   :  { %v3869_v33 = vadd.f32 %v7295_v51, %v3823_v12  ;;  %v4081_v51 = vld [vmem:[%s7415_s8 + $0x68] sm:$0xff] }
 0x84e   :  { %4090 = vmatpush.msra.mxu1 %v4081_v51 }
 0x850   :  { %v5109_v44 = vpop.eup %5108  ;;  %v3796_v25 = vpop.f32.mrf.mxu2  ;;  %4091 = vmatpush.msra.mxu1 %v4080_v2 }
 0x851   :  { %v3840_v63 = vmul.f32 %v5109_v44, %v3837_v26  ;;  %v3797_v16 = vadd.f32 %v3796_v25, %v3783_v0  ;;  %vm3845_vm5 = vweird.f32 %v5109_v44  ;;  %v4078_v0 = vld [vmem:[%s7415_s8 + $0x50] sm:$0xff] }
 0x852   :  { %v3824_v9 = vpop.f32.mrf.mxu0  ;;  %vm3846_vm7 = vmor %vm3844_vm6, %vm3845_vm5  ;;  %4092 = vmatpush.msra.mxu1 %v4079_v31  ;;  %v4074_v26 = vld [vmem:[%s7415_s8 + $0x30] sm:$0xff] }
 0x853   :  { %v3841_v36 = vsub.f32 1.0, %v3840_v63  ;;  %v3830_v42 = vadd.f32 %v3827_v28, %v3797_v16  ;;  %v4070_v63 = vld [vmem:[%s7415_s8 + $0x10] sm:$0xff] }
 0x854   :  { %4093 = vmatpush.msra.mxu1 %v4078_v0 }
 0x855   :  { %v3842_v50 = vmul.f32 %v5109_v44, %v3841_v36  ;;  %v4790_v57 = vmul.f32 -1.442695, %v3830_v42  ;;  %v4069_v36 = vld [vmem:[%s7415_s8 + $0x8] sm:$0xff] }
 0x856   :  { %4094 = vmatpush.msra.mxu1 %v4077_v43 }
 0x857   :  { %v3843_v5 = vadd.f32 %v5109_v44, %v3842_v50  ;;  %5110 = vpow2.f32 %v4790_v57 }
 0x858   :  { %v3798_v38 = vpop.f32.mrf.mxu2  ;;  %4095 = vmatpush.msra.mxu1 %v4076_v35 }
 0x859   :  { %v3847_v19 = vsel %vm3846_vm7, %v5109_v44, %v3843_v5  ;;  %v4959_v5 = vld [vmem:[%s7416_s9] ss:$0 sm:$0xff] }
 0x85a   :  { %v3852_v45 = vsel %vm3849_vm8, %v3851_v7, %v3847_v19  ;;  %4096 = vmatpush.msra.mxu1 %v4075_v3 }
 0x85b   :  { %v3870_v40 = vmul.f32 %v3869_v33, %v3852_v45 }
 0x85c   :  { %4097 = vmatpush.msra.mxu1 %v4074_v26 }
 0x85d   :  { %v3871_v59 = vadd.f32 %v3870_v40, %v3828_v32  ;;  %v5111_v56 = vpop.eup %5110 }
 0x85e   :  { %v3838_v15 = vadd.f32 1.0, %v5111_v56  ;;  %4098 = vmatpush.msra.mxu1 %v4073_v30 }
 0x860   :  { %5112 = vrcp.f32 %v3838_v15  ;;  %v3865_v48 = vand.u32 2147483648, %v3838_v15  ;;  %v3863_v46 = vand.u32 2147483647, %v3838_v15  ;;  %vm3859_vm10 = vweird.f32 %v3838_v15 }
 0x861   :  { %5114 = vtanh.f32 %v3871_v59 }
 0x862   :  { %v3866_v41 = vor.u32 1.1754944e-38, %v3865_v48  ;;  %vm3864_vm12 = vcmp.eq.f32.partialorder %v3863_v46, 8.507059e+37 }
 0x866   :  { %v5113_v27 = vpop.eup %5112 }
 0x867   :  { %v3855_v47 = vmul.f32 %v5113_v27, %v3838_v15  ;;  %vm3860_vm9 = vweird.f32 %v5113_v27  ;;  %v5115_v13 = vpop.eup %5114 }
 0x868   :  { %vm3861_vm11 = vmor %vm3859_vm10, %vm3860_vm9 }
 0x869   :  { %v3856_v55 = vsub.f32 1.0, %v3855_v47 }
 0x86a   :  { %v4032_v14 = vpop.f32.mrf.mxu0 }
 0x86b   :  { %v3857_v23 = vmul.f32 %v5113_v27, %v3856_v55  ;;  %v4033_v52 = vadd.f32 %v4032_v14, %v4009_v18 }
 0x86d   :  { %v3858_v22 = vadd.f32 %v5113_v27, %v3857_v23 }
 0x86f   :  { %v3862_v1 = vsel %vm3861_vm11, %v5113_v27, %v3858_v22 }
 0x870   :  { %v3986_v62 = vpop.f32.mrf.mxu2  ;;  %v3867_v21 = vsel %vm3864_vm12, %v3866_v41, %v3862_v1 }
 0x871   :  { %v3987_v8 = vadd.f32 %v3986_v62, %v3963_v54  ;;  %v3873_v49 = vsub.f32 1.0, %v3867_v21  ;;  %v3875_v34 = vmul.f32 %v3867_v21, %v7310_v61  ;;  %v4072_v61 = vld [vmem:[%s7415_s8 + $0x20] sm:$0xff]  ;;  %s5211_s8 = smov [#allocation9]  }
 0x872   :  { %4099 = vmatpush.msra.mxu1 %v4072_v61  ;;  %s4117_s9 = sshll.u32 %s5211_s8, 4  ;;  %s4118_s9 = int_to_ptr.vmem [resolvable:$true] %s4117_s9 }
 0x873   :  { %v4038_v58 = vmul.f32 %v3987_v8, %v3987_v8  ;;  %v3874_v39 = vmul.f32 %v5115_v13, %v3873_v49  ;;  %v4042_v50 = vsub.f32 %v7331_v20, %v3987_v8 }
 0x874   :  { %4100 = vmatpush.msra.mxu1 %v4071_v60 }
 0x875   :  { %v4040_v29 = vsub.f32 %v4033_v52, %v4038_v58  ;;  %v3876_v17 = vadd.f32 %v3875_v34, %v3874_v39 }
 0x876   :  { %4101 = vmatpush.msra.mxu1 %v4070_v63 }
 0x877   :  { %v4044_v37 = vadd.f32 1e-05, %v4040_v29  ;;  %3877 = vst [vmem:[#allocation3 + $0xe] sm:$0x3] %v3876_v17 }
 0x878   :  { %4102 = vmatpush.msra.mxu1 %v4069_v36 }
 0x879   :  { %5116 = vrsqrt.f32 %v4044_v37  ;;  %vm4052_vm14 = vweird.f32 %v4044_v37 }
 0x87a   :  { %4103 = vmatpush.msra.mxu1 %v4068_v24 }
 0x87e   :  { %v3879_v28 = vld [vmem:[#allocation3 + $0x8] sm:$0xff] }
 0x87f   :  { %v5117_v11 = vpop.eup %5116  ;;  %3965 = vmatmul.f32.gmra.mxu1 %v3879_v28  ;;  %4011 = vmatmul.f32.gmra.mxu3 %v3879_v28  ;;  %v3881_v16 = vmul.f32 %v3879_v28, %v3879_v28 }
 0x880   :  { %v4047_v44 = vmul.f32 %v5117_v11, %v4044_v37  ;;  %vm4053_vm13 = vweird.f32 %v5117_v11 }
 0x881   :  { %3988 = vmatmul.f32.gmra.mxu2 %v3881_v16  ;;  %4034 = vmatmul.f32.gmra.mxu0 %v3881_v16  ;;  %vm4054_vm15 = vmor %vm4052_vm14, %vm4053_vm13 }
 0x882   :  { %v4048_v25 = vmul.f32 %v5117_v11, %v4047_v44 }
 0x884   :  { %v4049_v9 = vmul.f32 0.5, %v4048_v25 }
 0x886   :  { %v4050_v42 = vsub.f32 1.5, %v4049_v9 }
 0x888   :  { %v4051_v12 = vmul.f32 %v5117_v11, %v4050_v42 }
 0x88a   :  { %v4055_v10 = vsel %vm4054_vm15, %v5117_v11, %v4051_v12 }
 0x88b   :  { %v4066_v57 = vmul.f32 %v4055_v10, %v4042_v50 }
 0x88d   :  { %4104 = vmatmul.f32.vlgmr.msra.gmra.mxu1 %v4066_v57 }
 0x8fc   :  { %v3966_v4 = vpop.f32.mrf.mxu1 }
 0x8fe   :  { %v4035_v33 = vpop.f32.mrf.mxu0 }
 0x902   :  { %v4012_v7 = vpop.f32.mrf.mxu3 }
 0x903   :  { %v4036_v45 = vadd.f32 %v4035_v33, %v4012_v7 }
 0x904   :  { %v3989_v53 = vpop.f32.mrf.mxu2 }
 0x905   :  { %v3990_v19 = vadd.f32 %v3989_v53, %v3966_v4 }
 0x907   :  { %v4039_v32 = vmul.f32 %v3990_v19, %v3990_v19  ;;  %v4043_v55 = vsub.f32 %v3879_v28, %v3990_v19 }
 0x909   :  { %v4041_v59 = vsub.f32 %v4036_v45, %v4039_v32 }
 0x90a   :  { %v4105_v38 = vpop.f32.mrf.mxu1 }
 0x90b   :  { %v4106_v40 = vadd.f32 %v4959_v5, %v4105_v38  ;;  %v4045_v20 = vadd.f32 1e-05, %v4041_v59 }
 0x90d   :  { %4111 = vst.msk [vmem:[#allocation9] sm:$0xff] %vm160_vm0, %v4106_v40  ;;  %5118 = vrsqrt.f32 %v4045_v20  ;;  %vm4062_vm3 = vweird.f32 %v4045_v20 }
 0x913   :  { %v5119_v56 = vpop.eup %5118 }
 0x914   :  { %v4057_v15 = vmul.f32 %v5119_v56, %v4045_v20  ;;  %vm4063_vm2 = vweird.f32 %v5119_v56 }
 0x915   :  { %vm4064_vm4 = vmor %vm4062_vm3, %vm4063_vm2 }
 0x916   :  { %v4058_v27 = vmul.f32 %v5119_v56, %v4057_v15 }
 0x918   :  { %v4059_v47 = vmul.f32 0.5, %v4058_v27 }
 0x91a   :  { %v4060_v6 = vsub.f32 1.5, %v4059_v47 }
 0x91c   :  { %v4061_v51 = vmul.f32 %v5119_v56, %v4060_v6 }
 0x91e   :  { %v4065_v2 = vsel %vm4064_vm4, %v5119_v56, %v4061_v51 }
 0x91f   :  { %v4067_v48 = vmul.f32 %v4065_v2, %v4043_v55 }
 0x921   :  { %4107 = vmatmul.f32.gmra.mxu1 %v4067_v48 }
 0x99e   :  { %v4108_v54 = vpop.f32.mrf.mxu1 }
 0x99f   :  { %v4109_v23 = vadd.f32 %v4959_v5, %v4108_v54 }
 0x9a1   :  { %4112 = vst.msk [vmem:[#allocation9 + $0x8] sm:$0xff] %vm160_vm0, %v4109_v23 }
 0x9a2   :  { %4125 = dma.vmem_to_hbm [thread:$0]  %s4118_s9, 256, %s4120_s1, [#allocation6], %s5212_s12, %s5212_s12, %s5213_s2  }
 0x9a3   :  { %5202 = dma.done.wait [#allocation6], 256  }
 0x9a4   :  { %5203 = vsyncadd [#allocation6], 4294967040 }
 0x9a5   :  { %4130 = vsyncpa [#allocation5], 1 }
 0x9a6   :  { %4131 = vsyncpa [#allocation8], 1 }
 0x9a7   :  { %4132 = vsyncpa [#allocation6], 1 }

</bundles_post_ra>
